<compile_context>
chip_gen: v7x
topology: tpu7x:2x2x1
jax: 0.10.0
libtpu: 0.0.40
codegen_flags: <defaults>
</compile_context>

<pallas_src>
import math

import jax
import jax.numpy as jnp
from jax.experimental import pallas as pl
from jax.experimental.pallas import tpu as pltpu

# ---------------------------------------------------------------------------
# torchvision vgg19().features layer-index table (non-BN variant).
# ---------------------------------------------------------------------------
VGG19_LAYERS = {
    'conv1_1': 0, 'relu1_1': 1, 'conv1_2': 2, 'relu1_2': 3, 'pool1': 4,
    'conv2_1': 5, 'relu2_1': 6, 'conv2_2': 7, 'relu2_2': 8, 'pool2': 9,
    'conv3_1': 10, 'relu3_1': 11, 'conv3_2': 12, 'relu3_2': 13,
    'conv3_3': 14, 'relu3_3': 15, 'conv3_4': 16, 'relu3_4': 17, 'pool3': 18,
    'conv4_1': 19, 'relu4_1': 20, 'conv4_2': 21, 'relu4_2': 22,
    'conv4_3': 23, 'relu4_3': 24, 'conv4_4': 25, 'relu4_4': 26, 'pool4': 27,
    'conv5_1': 28, 'relu5_1': 29, 'conv5_2': 30, 'relu5_2': 31,
    'conv5_3': 32, 'relu5_3': 33, 'conv5_4': 34, 'relu5_4': 35, 'pool5': 36,
}

IMAGENET_MEAN = (0.485, 0.456, 0.406)
IMAGENET_STD = (0.229, 0.224, 0.225)


def vgg19_cfg(widths):
    c1, c2, c3, c4, c5 = widths
    return [c1, c1, 'M', c2, c2, 'M', c3, c3, c3, c3, 'M',
            c4, c4, c4, c4, 'M', c5, c5, c5, c5, 'M']


def _round_up(x, m):
    return (x + m - 1) // m * m


# ---------------------------------------------------------------------------
# Generation-aware VMEM budgets.
# ---------------------------------------------------------------------------
def _vmem_limits():
    """Return (scoped_vmem_limit_bytes, conv_block_budget_bytes)."""
    try:
        cap = int(getattr(pltpu.get_tpu_info(), "vmem_capacity_bytes", 0))
    except Exception:
        cap = 0
    if cap <= 0:
        # Conservative fallback (safe on v7x's 64 MiB/TC).
        limit = 40 * 1024 * 1024
    else:
        # ~60% of physical VMEM, capped: v7x (64 MiB) -> ~38 MiB,
        # v5e/v6e (128 MiB) -> ~77 MiB.
        limit = min(int(cap * 0.6), 80 * 1024 * 1024)
        limit = max(limit, 32 * 1024 * 1024)
    budget = max(limit - 16 * 1024 * 1024, 12 * 1024 * 1024)
    return limit, budget


VMEM_LIMIT_BYTES, CONV_VMEM_BUDGET = _vmem_limits()
POOL_VMEM_BUDGET = 8 * 1024 * 1024


def _pick_strip_height(h, w, wp, cin, tn, budget=CONV_VMEM_BUDGET):
    """Largest even divisor of h whose estimated per-step VMEM fits the budget."""
    const = (2 * 2 * wp * cin * 2        # halo block, double-buffered, bf16
             + 2 * 9 * cin * tn * 2      # weight slab, double-buffered, bf16
             + 2 * tn * 4)               # bias
    per_row = (2 * wp * cin * 2          # main strip block (double-buffered)
               + 2 * w * tn * 2          # output block (double-buffered)
               + wp * cin * 2            # flattened strip value
               + wp * 9 * cin * 2        # im2col patch (bf16)
               + wp * tn * 4)            # f32 matmul result
    budget_th = max(2, (budget - const) // per_row)
    th = 2
    for cand in range(2, min(h, budget_th) + 1, 2):
        if h % cand == 0:
            th = cand
    return th


def _pick_pool_rows(ho, wo, c, budget=POOL_VMEM_BUDGET):
    per_row = 2 * (2 * wo * 2 * c * 2) + 2 * (wo * c * 2)   # in + out, dbuf, bf16
    cap = max(1, budget // per_row)
    tr = 1
    for cand in range(1, min(ho, cap) + 1):
        if ho % cand == 0:
            tr = cand
    return tr


# ---------------------------------------------------------------------------
# Fused Conv3x3 (pad=1, stride=1) + bias + ReLU kernel.
# ---------------------------------------------------------------------------
def _conv3x3_relu_kernel(xa_ref, xb_ref, w_ref, b_ref, o_ref):
    """One (row-strip, Cout-tile) block of a 3x3 conv.

    xa_ref : (1, TH, Wp, Cin)   bf16  main rows of the padded input strip
    xb_ref : (1, 2,  Wp, Cin)   bf16  2-row halo directly below the strip
    w_ref  : (9*Cin, TN)        bf16  im2col weight slab, rows ordered (kh, kw, cin)
    b_ref  : (1, TN)            f32
    o_ref  : (1, TH, W, TN)     bf16
    """
    th = o_ref.shape[1]
    w_out = o_ref.shape[2]
    tn = o_ref.shape[3]
    wp = xa_ref.shape[2]
    cin = xa_ref.shape[3]
    nrows = th * wp

    # Flatten the strip to (rows, Cin).  Wp is a multiple of 16 (bf16 sublane
    # tile) so the reshape is layout preserving.  A few trailing zero guard
    # rows keep every tap slice in bounds; they only feed the discarded
    # (width-padding) output columns.
    xa = xa_ref[0].reshape(nrows, cin)
    xb = xb_ref[0].reshape(2 * wp, cin)
    guard = jnp.zeros((8, cin), dtype=xa.dtype)
    xflat = jnp.concatenate([xa, xb, guard], axis=0)

    # Full im2col patch: each (kh, kw) tap is a contiguous row-range slice of
    # the flattened strip (no windowed relayouts).  One MXU matmul, K = 9*Cin:
    # no f32 accumulator round-trips, full K-dim MXU utilization.
    patch = jnp.concatenate(
        [xflat[kh * wp + kw: kh * wp + kw + nrows]
         for kh in range(3) for kw in range(3)],
        axis=1)                                           # (rows, 9*Cin) bf16

    res = jnp.dot(patch, w_ref[...], preferred_element_type=jnp.float32)
    res = jnp.maximum(res + b_ref[...], 0.0)              # bias + ReLU (f32)
    res = res.reshape(th, wp, tn)
    # Valid output starts at flattened column 0 -> aligned store.
    o_ref[0] = res[:, :w_out, :].astype(o_ref.dtype)


def conv3x3_relu_pallas(x_nhwc, w_flat, b2d):
    """x_nhwc: (N, H, W, Cin) bf16; w_flat: (9*Cin, Cout) bf16; b2d: (1, Cout) f32."""
    n, h, w, cin = x_nhwc.shape
    cout = w_flat.shape[1]
    assert h % 2 == 0 and w_flat.shape[0] == 9 * cin

    # Cout tile: split wide layers so conv3/4/5 keep >=2 grid steps (megacore
    # work sharing + pipelining even at N=1, spatial 14x14).
    tn = cout if cout < 256 else cout // 2
    assert cout % tn == 0 and (tn == cout or tn % 128 == 0)

    wp = _round_up(w + 2, 16)                 # bf16 sublane tile is 16
    th = _pick_strip_height(h, w, wp, cin, tn)
    # Halo index_map below encodes its offset as (i+1)*(th//2) (blocks of 2
    # rows): only valid when th is even and divides h.
    assert th % 2 == 0 and h % th == 0, (h, th)

    # Single pad per layer: +1 row top/bottom, +1 col left, zeros up to Wp right.
    x_pad = jnp.pad(x_nhwc, ((0, 0), (1, 1), (1, wp - w - 1), (0, 0)))

    flops = 2 * n * h * w * 9 * cin * cout
    bytes_accessed = (x_pad.size * x_pad.dtype.itemsize
                      + w_flat.size * w_flat.dtype.itemsize
                      + b2d.size * b2d.dtype.itemsize
                      + n * h * w * cout * 2)

    return pl.pallas_call(
        _conv3x3_relu_kernel,
        out_shape=jax.ShapeDtypeStruct((n, h, w, cout), jnp.bfloat16),
        grid_spec=pltpu.PrefetchScalarGridSpec(
            num_scalar_prefetch=0,
            grid=(n, h // th, cout // tn),
            in_specs=[
                # main TH rows of the padded strip (constant across the Cout axis,
                # which is innermost -> no re-fetch between consecutive steps)
                pl.BlockSpec((1, th, wp, cin), lambda b, i, j: (b, i, 0, 0)),
                # 2-row halo just below the strip (second view of the same array)
                pl.BlockSpec((1, 2, wp, cin),
                             lambda b, i, j: (b, (i + 1) * (th // 2), 0, 0)),
                pl.BlockSpec((9 * cin, tn), lambda b, i, j: (0, j)),
                pl.BlockSpec((1, tn), lambda b, i, j: (0, j)),
            ],
            out_specs=pl.BlockSpec((1, th, w, tn), lambda b, i, j: (b, i, 0, j)),
        ),
        compiler_params=pltpu.CompilerParams(
            dimension_semantics=("parallel", "parallel", "parallel"),
            vmem_limit_bytes=VMEM_LIMIT_BYTES,
        ),
        cost_estimate=pl.CostEstimate(
            flops=flops, transcendentals=0, bytes_accessed=bytes_accessed),
    )(x_pad, x_pad, w_flat, b2d)


# ---------------------------------------------------------------------------
# 2x2 max pool (stride 2) kernel, TR output rows per grid step.
# ---------------------------------------------------------------------------
def _maxpool2x2_kernel(x_ref, o_ref):
    # x_ref: (1, 2*TR, Wo, 2*C) — horizontal pixel pair folded into channels
    # o_ref: (1, TR, Wo, C)
    tr = o_ref.shape[1]
    c = o_ref.shape[3]
    x = x_ref[0]
    x = x.reshape(tr, 2, x.shape[1], x.shape[2])
    r = jnp.maximum(x[:, 0], x[:, 1])                 # vertical max   (TR, Wo, 2C)
    o_ref[0] = jnp.maximum(r[:, :, :c], r[:, :, c:])  # horizontal max (TR, Wo, C)


def maxpool2x2_pallas(x_nhwc):
    n, h, w, c = x_nhwc.shape
    assert h % 2 == 0 and w % 2 == 0
    ho, wo = h // 2, w // 2
    tr = _pick_pool_rows(ho, wo, c)
    # Free XLA reshape: fold each horizontal pixel pair into the channel axis
    # so the kernel needs only contiguous (lane) slices — no strided loads.
    x_folded = x_nhwc.reshape(n, h, wo, 2 * c)
    return pl.pallas_call(
        _maxpool2x2_kernel,
        out_shape=jax.ShapeDtypeStruct((n, ho, wo, c), x_nhwc.dtype),
        grid_spec=pltpu.PrefetchScalarGridSpec(
            num_scalar_prefetch=0,
            grid=(n, ho // tr),
            in_specs=[pl.BlockSpec((1, 2 * tr, wo, 2 * c),
                                   lambda b, i: (b, i, 0, 0))],
            out_specs=pl.BlockSpec((1, tr, wo, c), lambda b, i: (b, i, 0, 0)),
        ),
        compiler_params=pltpu.CompilerParams(
            dimension_semantics=("parallel", "parallel"),
            vmem_limit_bytes=VMEM_LIMIT_BYTES,
        ),
    )(x_folded)


# ---------------------------------------------------------------------------
# Model shell mirroring the PyTorch module.
# ---------------------------------------------------------------------------
class FeatureExtractor:
    """Pallas/JAX analogue of the PyTorch FeatureExtractor: runs the wrapped
    layer, stashes its output in `self.feature`, and returns it."""

    def __init__(self, layer):
        self.layer = layer
        self.feature = None

    def __call__(self, x):
        x = self.layer(x)
        self.feature = x
        return x


def _prep_conv_params(w_oihw, b):
    """(Cout, Cin, 3, 3) f32, (Cout,) f32 -> bf16 (9*Cin, Cout), f32 (1, Cout)."""
    cout, cin, kh, kw = w_oihw.shape
    w_hwio = jnp.transpose(w_oihw, (2, 3, 1, 0))            # (3, 3, Cin, Cout)
    w_flat = w_hwio.reshape(kh * kw * cin, cout).astype(jnp.bfloat16)
    return w_flat, b.reshape(1, cout).astype(jnp.float32)


def _make_conv_layer(w_flat, b2d):
    def layer(x_nhwc):
        return conv3x3_relu_pallas(x_nhwc, w_flat, b2d)
    return layer


def _identity(x):
    return x


class VGG19:
    """Pallas re-implementation of the VGG19 content/style feature extractor.

    ReLU is fused into the conv kernel, so the standalone "relu" slots are
    identities; the default content/style layers are all relu layers and
    therefore see exactly the post-ReLU activations.
    """

    def __init__(self, conv_params, widths,
                 content_layers=('relu4_2',),
                 style_layers=('relu1_1', 'relu2_1', 'relu3_1', 'relu4_1'),
                 bn=False):
        if bn:
            # TODO(synk): vgg19_bn variant not implemented (inference BN would
            # be folded into the conv weights/bias before kernel launch).
            raise NotImplementedError("bn=True is not supported")
        self.content_layers_idx = [VGG19_LAYERS[i] for i in content_layers]
        self.style_layers_idx = [VGG19_LAYERS[i] for i in style_layers]

        layers = []
        params = iter(conv_params)
        for v in vgg19_cfg(widths):
            if v == 'M':
                layers.append(maxpool2x2_pallas)
            else:
                w, b = next(params)
                layers.append(_make_conv_layer(*_prep_conv_params(w, b)))
                layers.append(_identity)   # ReLU slot (fused into the conv kernel)
        self.model = layers

        for i in set(self.content_layers_idx) | set(self.style_layers_idx):
            self.model[i] = FeatureExtractor(self.model[i])

        self._mean = jnp.asarray(IMAGENET_MEAN, jnp.float32).reshape(1, 3, 1, 1)
        self._std = jnp.asarray(IMAGENET_STD, jnp.float32).reshape(1, 3, 1, 1)

    def _transform(self, x_nchw):
        # torchvision ToImage/ToDtype(scale)/Normalize for a float [0,1] image.
        return (x_nchw - self._mean) / self._std

    def __call__(self, x, mask=None):
        x = self._transform(x)
        if mask is not None:
            x = x * mask
        # NCHW -> NHWC bf16 once; the whole conv stack runs in NHWC / bf16.
        x = jnp.transpose(x, (0, 2, 3, 1)).astype(jnp.bfloat16)
        for layer in self.model:
            x = layer(x)

        def to_nchw(t):
            return jnp.transpose(t.astype(jnp.float32), (0, 3, 1, 2))

        content_features = [to_nchw(self.model[i].feature)
                            for i in self.content_layers_idx]
        style_features = [to_nchw(self.model[i].feature)
                          for i in self.style_layers_idx]
        return to_nchw(x), content_features, style_features


# ---------------------------------------------------------------------------
# Parameter init + pure-XLA reference (for the correctness check).
# ---------------------------------------------------------------------------
def init_vgg19_params(key, widths, in_channels=3):
    # TODO(synk): pretrained IMAGENET1K_V1 weights cannot be loaded here
    # (no file / network access); deterministic random He-init stands in.
    params = []
    cin = in_channels
    for v in vgg19_cfg(widths):
        if v == 'M':
            continue
        key, kw_key, kb_key = jax.random.split(key, 3)
        scale = math.sqrt(2.0 / (9 * cin))
        w = jax.random.normal(kw_key, (v, cin, 3, 3), jnp.float32) * scale
        b = jax.random.normal(kb_key, (v,), jnp.float32) * 0.05
        params.append((w, b))
        cin = v
    return params


def reference_forward(conv_params, widths, x_nchw, content_idx, style_idx):
    """Pure-XLA bf16 reference mirroring the Pallas pipeline."""
    mean = jnp.asarray(IMAGENET_MEAN, jnp.float32).reshape(1, 3, 1, 1)
    std = jnp.asarray(IMAGENET_STD, jnp.float32).reshape(1, 3, 1, 1)
    x = (x_nchw - mean) / std
    x = jnp.transpose(x, (0, 2, 3, 1)).astype(jnp.bfloat16)

    feats = {}
    idx = 0
    params = iter(conv_params)
    for v in vgg19_cfg(widths):
        if v == 'M':
            n, h, w, c = x.shape
            x = x.reshape(n, h // 2, 2, w // 2, 2, c).max(axis=(2, 4))
            feats[idx] = x
            idx += 1
        else:
            wgt, b = next(params)
            w_hwio = jnp.transpose(wgt, (2, 3, 1, 0)).astype(jnp.bfloat16)
            y = jax.lax.conv_general_dilated(
                x, w_hwio, window_strides=(1, 1), padding='SAME',
                dimension_numbers=('NHWC', 'HWIO', 'NHWC'),
                preferred_element_type=jnp.float32)
            x = jnp.maximum(y + b.reshape(1, 1, 1, -1), 0.0).astype(jnp.bfloat16)
            feats[idx] = x        # conv slot (post-ReLU, matching fused kernel)
            idx += 1
            feats[idx] = x        # relu slot
            idx += 1

    def to_nchw(t):
        return jnp.transpose(t.astype(jnp.float32), (0, 3, 1, 2))

    return (to_nchw(x),
            [to_nchw(feats[i]) for i in content_idx],
            [to_nchw(feats[i]) for i in style_idx])


# ---------------------------------------------------------------------------
if __name__ == "__main__":
    key = jax.random.PRNGKey(0)
    k_params, k_x = jax.random.split(key)

    # Scaled-down VGG19 widths (real net: 64, 128, 256, 512, 512) so the toy
    # run stays small; topology and layer indices are the real VGG19 ones.
    widths = (8, 16, 32, 64, 64)
    params = init_vgg19_params(k_params, widths)

    model = VGG19(params, widths)

    n, h, w = 2, 32, 32
    x = jax.random.uniform(k_x, (n, 3, h, w), jnp.float32)   # float image in [0, 1]

    out, content_feats, style_feats = model(x)
    out = jax.block_until_ready(out)

    assert out.shape == (n, widths[4], h // 32, w // 32)
    assert len(content_feats) == 1 and len(style_feats) == 4
    assert model.model[VGG19_LAYERS['relu4_2']].feature is not None

    ref_out, ref_content, ref_style = reference_forward(
        params, widths, x, model.content_layers_idx, model.style_layers_idx)

    def rel_err(a, b):
        return float(jnp.linalg.norm(a - b) / (jnp.linalg.norm(b) + 1e-6))

    for got, want in zip([out] + content_feats + style_feats,
                         [ref_out] + ref_content + ref_style):
        assert got.shape == want.shape, (got.shape, want.shape)
        e = rel_err(got, want)
        assert e < 5e-2, f"relative error too large: {e}"

    print("KERNEL_OK")
</pallas_src>

<mosaic_0001>
module attributes {stable_mosaic.version = 11 : i64} {
  func.func @_conv3x3_relu_kernel(%arg0: i32, %arg1: i32, %arg2: i32, %arg3: memref<1x32x48x3xbf16, #tpu.memory_space<vmem>>, %arg4: memref<1x2x48x3xbf16, #tpu.memory_space<vmem>>, %arg5: memref<27x8xbf16, #tpu.memory_space<vmem>>, %arg6: memref<1x8xf32, #tpu.memory_space<vmem>>, %arg7: memref<1x32x32x8xbf16, #tpu.memory_space<vmem>>) attributes {dimension_semantics = [#tpu.dimension_semantics<parallel>, #tpu.dimension_semantics<parallel>, #tpu.dimension_semantics<parallel>], iteration_bounds = array<i64: 2, 1, 1>, scalar_prefetch = 0 : i64, scratch_operands = 0 : i64, tpu.core_type = #tpu.core_type<tc>, window_params = [{transform_indices = @transform_0, window_bounds = array<i64: 1, 32, 48, 3>}, {transform_indices = @transform_1, window_bounds = array<i64: 1, 2, 48, 3>}, {transform_indices = @transform_2, window_bounds = array<i64: 27, 8>}, {transform_indices = @transform_3, window_bounds = array<i64: 1, 8>}, {transform_indices = @transform_4, window_bounds = array<i64: 1, 32, 32, 8>}]} {
    %c0 = arith.constant 0 : index
    %c0_0 = arith.constant 0 : index
    %c0_1 = arith.constant 0 : index
    %c0_2 = arith.constant 0 : index
    %0 = vector.load %arg3[%c0, %c0_0, %c0_1, %c0_2] : memref<1x32x48x3xbf16, #tpu.memory_space<vmem>>, vector<1x32x48x3xbf16>
    %1 = vector.shape_cast %0 : vector<1x32x48x3xbf16> to vector<32x48x3xbf16>
    %2 = vector.shape_cast %1 : vector<32x48x3xbf16> to vector<1536x3xbf16>
    %c0_3 = arith.constant 0 : index
    %c0_4 = arith.constant 0 : index
    %c0_5 = arith.constant 0 : index
    %c0_6 = arith.constant 0 : index
    %3 = vector.load %arg4[%c0_3, %c0_4, %c0_5, %c0_6] : memref<1x2x48x3xbf16, #tpu.memory_space<vmem>>, vector<1x2x48x3xbf16>
    %4 = vector.shape_cast %3 : vector<1x2x48x3xbf16> to vector<2x48x3xbf16>
    %5 = vector.shape_cast %4 : vector<2x48x3xbf16> to vector<96x3xbf16>
    %cst = arith.constant 0.000000e+00 : bf16
    %6 = vector.broadcast %cst : bf16 to vector<8x3xbf16>
    %7 = tpu.concatenate %2, %5, %6 in 0 : vector<1536x3xbf16>, vector<96x3xbf16>, vector<8x3xbf16> -> vector<1640x3xbf16>
    %8 = vector.extract_strided_slice %7 {offsets = [0, 0], sizes = [1536, 3], strides = [1, 1]} : vector<1640x3xbf16> to vector<1536x3xbf16>
    %9 = vector.extract_strided_slice %7 {offsets = [1, 0], sizes = [1536, 3], strides = [1, 1]} : vector<1640x3xbf16> to vector<1536x3xbf16>
    %10 = vector.extract_strided_slice %7 {offsets = [2, 0], sizes = [1536, 3], strides = [1, 1]} : vector<1640x3xbf16> to vector<1536x3xbf16>
    %11 = vector.extract_strided_slice %7 {offsets = [48, 0], sizes = [1536, 3], strides = [1, 1]} : vector<1640x3xbf16> to vector<1536x3xbf16>
    %12 = vector.extract_strided_slice %7 {offsets = [49, 0], sizes = [1536, 3], strides = [1, 1]} : vector<1640x3xbf16> to vector<1536x3xbf16>
    %13 = vector.extract_strided_slice %7 {offsets = [50, 0], sizes = [1536, 3], strides = [1, 1]} : vector<1640x3xbf16> to vector<1536x3xbf16>
    %14 = vector.extract_strided_slice %7 {offsets = [96, 0], sizes = [1536, 3], strides = [1, 1]} : vector<1640x3xbf16> to vector<1536x3xbf16>
    %15 = vector.extract_strided_slice %7 {offsets = [97, 0], sizes = [1536, 3], strides = [1, 1]} : vector<1640x3xbf16> to vector<1536x3xbf16>
    %16 = vector.extract_strided_slice %7 {offsets = [98, 0], sizes = [1536, 3], strides = [1, 1]} : vector<1640x3xbf16> to vector<1536x3xbf16>
    %17 = tpu.concatenate %8, %9, %10, %11, %12, %13, %14, %15, %16 in 1 : vector<1536x3xbf16>, vector<1536x3xbf16>, vector<1536x3xbf16>, vector<1536x3xbf16>, vector<1536x3xbf16>, vector<1536x3xbf16>, vector<1536x3xbf16>, vector<1536x3xbf16>, vector<1536x3xbf16> -> vector<1536x27xbf16>
    %c0_7 = arith.constant 0 : index
    %c0_8 = arith.constant 0 : index
    %18 = vector.load %arg5[%c0_7, %c0_8] : memref<27x8xbf16, #tpu.memory_space<vmem>>, vector<27x8xbf16>
    %cst_9 = arith.constant dense<0.000000e+00> : vector<1536x8xf32>
    %19 = tpu.matmul %17, %18, %cst_9 {dimension_numbers = #tpu.dot_dimension_numbers<[1], [0], [0], [1], [0, 0, 1, 1], [], []>} : vector<1536x27xbf16>, vector<27x8xbf16>, vector<1536x8xf32> -> vector<1536x8xf32>
    %c0_10 = arith.constant 0 : index
    %c0_11 = arith.constant 0 : index
    %20 = vector.load %arg6[%c0_10, %c0_11] : memref<1x8xf32, #tpu.memory_space<vmem>>, vector<1x8xf32>
    %21 = vector.broadcast %20 : vector<1x8xf32> to vector<1536x8xf32>
    %22 = arith.addf %19, %21 : vector<1536x8xf32>
    %cst_12 = arith.constant 0.000000e+00 : f32
    %23 = vector.broadcast %cst_12 : f32 to vector<1536x8xf32>
    %24 = arith.maximumf %22, %23 : vector<1536x8xf32>
    %25 = vector.shape_cast %24 : vector<1536x8xf32> to vector<32x48x8xf32>
    %26 = vector.extract_strided_slice %25 {offsets = [0, 0, 0], sizes = [32, 32, 8], strides = [1, 1, 1]} : vector<32x48x8xf32> to vector<32x32x8xf32>
    %27 = arith.truncf %26 : vector<32x32x8xf32> to vector<32x32x8xbf16>
    %c0_13 = arith.constant 0 : index
    %c0_14 = arith.constant 0 : index
    %c0_15 = arith.constant 0 : index
    %c0_16 = arith.constant 0 : index
    %28 = vector.load %arg7[%c0_13, %c0_14, %c0_15, %c0_16] : memref<1x32x32x8xbf16, #tpu.memory_space<vmem>>, vector<1x32x32x8xbf16>
    %29 = vector.shape_cast %28 : vector<1x32x32x8xbf16> to vector<32x32x8xbf16>
    %30 = vector.shape_cast %27 : vector<32x32x8xbf16> to vector<1x32x32x8xbf16>
    tpu.vector_store %arg7[%c0_13, %c0_14, %c0_15, %c0_16], %30 {strides = array<i32>} : memref<1x32x32x8xbf16, #tpu.memory_space<vmem>>, vector<1x32x32x8xbf16>,
    return
  }
  func.func @transform_0(%arg0: i32, %arg1: i32, %arg2: i32) -> (i32, i32, i32, i32) {
    %c0_i32 = arith.constant 0 : i32
    %c0_i32_0 = arith.constant 0 : i32
    %c0_i32_1 = arith.constant 0 : i32
    return %arg0, %arg1, %c0_i32, %c0_i32_0 : i32, i32, i32, i32
  }
  func.func @transform_1(%arg0: i32, %arg1: i32, %arg2: i32) -> (i32, i32, i32, i32) {
    %c1_i32 = arith.constant 1 : i32
    %0 = arith.addi %arg1, %c1_i32 : i32
    %c16_i32 = arith.constant 16 : i32
    %1 = arith.muli %0, %c16_i32 : i32
    %c0_i32 = arith.constant 0 : i32
    %c0_i32_0 = arith.constant 0 : i32
    %c0_i32_1 = arith.constant 0 : i32
    return %arg0, %1, %c0_i32, %c0_i32_0 : i32, i32, i32, i32
  }
  func.func @transform_2(%arg0: i32, %arg1: i32, %arg2: i32) -> (i32, i32) {
    %c0_i32 = arith.constant 0 : i32
    %c0_i32_0 = arith.constant 0 : i32
    return %c0_i32, %arg2 : i32, i32
  }
  func.func @transform_3(%arg0: i32, %arg1: i32, %arg2: i32) -> (i32, i32) {
    %c0_i32 = arith.constant 0 : i32
    %c0_i32_0 = arith.constant 0 : i32
    return %c0_i32, %arg2 : i32, i32
  }
  func.func @transform_4(%arg0: i32, %arg1: i32, %arg2: i32) -> (i32, i32, i32, i32) {
    %c0_i32 = arith.constant 0 : i32
    %c0_i32_0 = arith.constant 0 : i32
    return %arg0, %arg1, %c0_i32, %arg2 : i32, i32, i32, i32
  }
}

</mosaic_0001>

<bundles_post_ra>
// kernel: tpu_custom_call.1
= control target key start
LH: loop header
LB: loop body
LE: loop exit
PB: predicated region body
PF: predicated region fallthrough
CT: control target
= control target key end

     0   :  { %s8309_s15 = smov 0   ;;  %s8311_s16 = smov 0   ;;  %s14089_s0 = inlined_call_operand.vmem [shape: bf16[2,34,48,3], index: 0, kind: input, shape index: {}]   ;;  %s14090_s1 = inlined_call_operand.vmem [shape: bf16[2,34,48,3], index: 1, kind: input, shape index: {}]   ;;  %s14091_s2 = inlined_call_operand.vmem [shape: bf16[27,8], index: 2, kind: input, shape index: {}]   ;;  %s14092_s3 = inlined_call_operand.vmem [shape: f32[1,8], index: 3, kind: input, shape index: {}]   ;;  %s14093_s4 = inlined_call_operand.vmem [shape: bf16[2,32,32,8], index: 4, kind: output, shape index: {}]  }
   0x1   :  { %s8313_s17 = smov 0  }
   0x2 LB: > { %s33_s18 = sadd.s32 1, %s8268_s16  ;;  %p7080_p0 = scmp.ge.s32.totalorder %s8272_s17, 1  ;;  %s8272_s17 = sphi %s8313_s17, %s14_s17   ;;  %s8268_s16 = sphi %s8311_s16, %s16122_s16   ;;  %s8264_s15 = sphi %s8309_s15, %s16121_s15  }
   0x3   : > { %p35_p1 = scmp.ge.s32.totalorder %s33_s18, 2  ;;  %p246_p2 = scmp.lt.s32.totalorder %s8272_s17, 3 }
   0x5   : > { %s16124_s18 = smov (%p35_p1, %s33_s18), 0  ;;  %p247_p3 = pnand %p7080_p0, %p246_p2 }
   0x7   : > { %250 = sbr.rel (%p247_p3) target bundleno = 1900 (0x76c), region = 36 }
   0xe   : > { %p315_p4 = scmp.lt.s32.totalorder %s8264_s15, 1  ;;  %vm1081_vm0 = vsmask.f32 7424  ;;  %s8274_s23 = smov 3   ;;  %vm2046_vm1 = vcmask 1046528   ;;  %vm5404_vm2 = vcmask 1044480  }
   0xf   : > { %s8275_s28 = smov 6   ;;  %s8276_s29 = smov 9   ;;  %vm5405_vm3 = vcmask 1045504   ;;  %vm3645_vm4 = vcmask 23552   ;;  %vm3838_vm5 = vcmask 48128   ;;  %vm4031_vm6 = vcmask 72704  }
  0x10   : > { %s16126_s15 = smov (!%p315_p4, %s8264_s15), 1  ;;  %s8277_s30 = smov 12   ;;  %vm4224_vm7 = vcmask 97280   ;;  %vm4417_vm8 = vcmask 121856   ;;  %vm4610_vm9 = vcmask 146432   ;;  %vm4803_vm10 = vcmask 171008  }
  0x11   : > { %s7845_s19 = smul.u32 816, %s16126_s15  ;;  %s8278_s5 = smov 15   ;;  %vm4996_vm11 = vcmask 195584   ;;  %vm5211_vm12 = vcmask 220160   ;;  %vm6788_vm13 = vcmask 60416  }
  0x12   : > { %s8279_s6 = smov 18   ;;  %s8281_s11 = smov 21  }
  0x13   : > { %s8335_s22 = scalar_lea.vmem %s14089_s0, %s7845_s19  ;;  %s7417_s24 = sadd.s32 768, %s7845_s19 }
  0x14   : > { %v7882_v0 = vld [vmem:[%s8335_s22 + $0x10] sm:$0xff]   ;;  %v7883_v1 = vld [vmem:[%s8335_s22 + $0x18] sm:$0xff]   ;;  %v7884_v5 = vld [vmem:[%s8335_s22] sm:$0xff]   ;;  %s8707_s27 = scalar_lea.vmem %s14090_s1, %s7417_s24  ;;  %s8282_s12 = smov 24  }
  0x15   : > { %v1098_v2 = vshll.u32 %v7882_v0, 16  ;;  %v1102_v3 = vshrl.u32 %v7882_v0, 16  ;;  %v1106_v4 = vshll.u32 %v7883_v1, 16  ;;  %v7885_v6 = vld [vmem:[%s8335_s22 + $0x8] sm:$0xff]   ;;  %v1110_v7 = vshrl.u32 %v7883_v1, 16  ;;  %v7886_v12 = vld [vmem:[%s8335_s22 + $0x20] sm:$0xff]  }
  0x16   : > { %v1083_v10 = vshrl.u32 %v7884_v5, 16  ;;  %v1085_v11 = vshll.u32 %v7884_v5, 16  ;;  %v7887_v13 = vld [vmem:[%s8335_s22 + $0x28] sm:$0xff]   ;;  %v1090_v14 = vshll.u32 %v7885_v6, 16  ;;  %v1094_v15 = vshrl.u32 %v7885_v6, 16  ;;  %v7888_v21 = vld [vmem:[%s8335_s22 + $0x30] sm:$0xff]  }
  0x17   : > { %v1100_v8 = vrot.slane %v1098_v2, 1  ;;  %v1108_v9 = vrot.slane %v1106_v4, 1  ;;  %v1114_v19 = vshll.u32 %v7886_v12, 16  ;;  %v1122_v22 = vshll.u32 %v7887_v13, 16  ;;  %v7889_v25 = vld [vmem:[%s8335_s22 + $0x38] sm:$0xff]   ;;  %v7890_v29 = vld [vmem:[%s8335_s22 + $0x40] sm:$0xff]  }
  0x18   : > { %v1087_v17 = vrot.slane %v1085_v11, 1  ;;  %v1092_v20 = vrot.slane %v1090_v14, 1  ;;  %v1126_v23 = vshrl.u32 %v7887_v13, 16  ;;  %v1118_v24 = vshrl.u32 %v7886_v12, 16  ;;  %v7891_v36 = vld [vmem:[%s8335_s22 + $0x48] sm:$0xff]   ;;  %v7892_v45 = vld [vmem:[%s8335_s22 + $0x50] sm:$0xff]  }
  0x19   : > { %v1104_v16 = vor.u32 %v1102_v3, %v1100_v8  ;;  %v1112_v18 = vor.u32 %v1110_v7, %v1108_v9  ;;  %v1116_v28 = vrot.slane %v1114_v19, 1  ;;  %v1124_v31 = vrot.slane %v1122_v22, 1  ;;  %v7893_v48 = vld [vmem:[%s8335_s22 + $0x58] sm:$0xff]   ;;  %v7894_v56 = vld [vmem:[%s8335_s22 + $0x60] sm:$0xff]   ;;  %v7895_v58 = vld [vmem:[%s8335_s22 + $0x68] sm:$0xff]   ;;  %s7418_s19 = sshll.u32 %s16126_s15, 9 }
  0x1a   : > { %v1088_v27 = vor.u32 %v1087_v17, %v1083_v10  ;;  %v1096_v30 = vor.u32 %v1094_v15, %v1092_v20  ;;  %v1130_v32 = vshll.u32 %v7888_v21, 16  ;;  %v1138_v35 = vshll.u32 %v7889_v25, 16  ;;  %v7896_v61 = vld [vmem:[%s8335_s22 + $0x70] sm:$0xff]   ;;  %v7897_v10 = vld [vmem:[%s8335_s22 + $0x78] sm:$0xff]   ;;  %v7898_v12 = vld [vmem:[%s8335_s22 + $0x80] sm:$0xff]   ;;  %s12781_s21 = scalar_lea.vmem %s14093_s4, %s7418_s19 }
  0x1b   : > { %v1109_v26 = vsel %vm1081_vm0, %v1104_v16, %v1108_v9  ;;  %v8350_v34 = vsel %vm1081_vm0, %v1112_v18, %v1116_v28  ;;  %v1128_v37 = vor.u32 %v1126_v23, %v1124_v31  ;;  %v1120_v39 = vor.u32 %v1118_v24, %v1116_v28  ;;  %v7899_v16 = vld [vmem:[%s8335_s22 + $0x88] sm:$0xff]   ;;  %v7901_v24 = vld [vmem:[%s8335_s22 + $0x98] sm:$0xff]  }
  0x1c   : > { %1858 = vrot.lane.b32.xlu1 %v1109_v26, %s8274_s23  ;;  %v1093_v33 = vsel %vm1081_vm0, %v1088_v27, %v1092_v20  ;;  %14491 = vst [vmem:[#allocation2_spill] sm:$0xff] %v8350_v34  ;;  %v1132_v38 = vrot.slane %v1130_v32, 1  ;;  %v1142_v40 = vshrl.u32 %v7889_v25, 16  ;;  %v1101_v41 = vsel %vm1081_vm0, %v1096_v30, %v1100_v8  ;;  %v7900_v20 = vld [vmem:[%s8335_s22 + $0x90] sm:$0xff]  }
  0x1d   : > { %1854 = vrot.lane.b32.xlu0 %v1093_v33, %s8274_s23  ;;  %v1140_v42 = vrot.slane %v1138_v35, 1  ;;  %v1146_v43 = vshll.u32 %v7890_v29, 16  ;;  %v1134_v44 = vshrl.u32 %v7888_v21, 16  ;;  %v1154_v46 = vshll.u32 %v7891_v36, 16  ;;  %v7902_v35 = vld [vmem:[%s8335_s22 + $0xa0] sm:$0xff]  }
  0x1e   : > { %v1158_v47 = vshrl.u32 %v7891_v36, 16  ;;  %v8360_v49 = vsel %vm1081_vm0, %v1128_v37, %v1132_v38  ;;  %v1162_v52 = vshll.u32 %v7892_v45, 16  ;;  %v1150_v55 = vshrl.u32 %v7890_v29, 16 }
  0x1f   : > { %14492 = vst [vmem:[#allocation3_spill] sm:$0xff] %v8360_v49  ;;  %v1144_v50 = vor.u32 %v1142_v40, %v1140_v42  ;;  %v1148_v51 = vrot.slane %v1146_v43, 1  ;;  %v1136_v53 = vor.u32 %v1134_v44, %v1132_v38  ;;  %v1156_v54 = vrot.slane %v1154_v46, 1 }
  0x20   : > { %1860 = vrot.lane.b32.xlu1 %v8350_v34, %s8274_s23  ;;  %v1170_v57 = vshll.u32 %v7893_v48, 16  ;;  %v8366_v59 = vsel %vm1081_vm0, %v1120_v39, %v1124_v31  ;;  %v1174_v60 = vshrl.u32 %v7893_v48, 16  ;;  %v1164_v62 = vrot.slane %v1162_v52, 1  ;;  %v9390_v34 = vld [vmem:[%s8335_s22 + $0xf8] sm:$0xff]  }
  0x21   : > { %1856 = vrot.lane.b32.xlu0 %v1101_v41, %s8274_s23  ;;  %14493 = vst [vmem:[#allocation4_spill] sm:$0xff] %v8366_v59  ;;  %v1178_v63 = vshll.u32 %v7894_v56, 16  ;;  %v8372_v0 = vsel %vm1081_vm0, %v1144_v50, %v1148_v51  ;;  %v1160_v1 = vor.u32 %v1158_v47, %v1156_v54  ;;  %v1186_v3 = vshll.u32 %v7895_v58, 16  ;;  %v7903_v41 = vld [vmem:[%s8335_s22 + $0xa8] sm:$0xff]   ;;  %v7904_v50 = vld [vmem:[%s8335_s22 + $0xb0] sm:$0xff]   ;;  %14678 = vst [vmem:[#allocation189_spill] sm:$0xff] %v9390_v34 }
  0x22   : > { %14494 = vst [vmem:[#allocation5_spill] sm:$0xff] %v8372_v0  ;;  %v1172_v2 = vrot.slane %v1170_v57, 1  ;;  %v8377_v4 = vsel %vm1081_vm0, %v1136_v53, %v1140_v42  ;;  %v1166_v5 = vshrl.u32 %v7892_v45, 16  ;;  %v1152_v6 = vor.u32 %v1150_v55, %v1148_v51 }
  0x23   : > { %14495 = vst [vmem:[#allocation6_spill] sm:$0xff] %v8377_v4  ;;  %v1180_v7 = vrot.slane %v1178_v63, 1  ;;  %v1190_v8 = vshrl.u32 %v7895_v58, 16  ;;  %v1194_v9 = vshll.u32 %v7896_v61, 16  ;;  %v1188_v11 = vrot.slane %v1186_v3, 1  ;;  %v7907_v63 = vld [vmem:[%s8335_s22 + $0xc8] sm:$0xff]  }
  0x24   : > { %1864 = vrot.lane.b32.xlu1 %v8360_v49, %s8274_s23  ;;  %v8384_v13 = vsel %vm1081_vm0, %v1160_v1, %v1164_v62  ;;  %v1176_v14 = vor.u32 %v1174_v60, %v1172_v2  ;;  %v1202_v15 = vshll.u32 %v7897_v10, 16  ;;  %v1168_v17 = vor.u32 %v1166_v5, %v1164_v62  ;;  %v9368_v49 = vld [vmem:[%s8335_s22 + $0xe8] sm:$0xff]  }
  0x25   : > { %1862 = vrot.lane.b32.xlu0 %v8366_v59, %s8274_s23  ;;  %14496 = vst [vmem:[#allocation7_spill] sm:$0xff] %v8384_v13  ;;  %v8390_v18 = vsel %vm1081_vm0, %v1152_v6, %v1156_v54  ;;  %v1182_v19 = vshrl.u32 %v7894_v56, 16  ;;  %v1196_v21 = vrot.slane %v1194_v9, 1  ;;  %v1206_v22 = vshrl.u32 %v7897_v10, 16  ;;  %v7905_v54 = vld [vmem:[%s8335_s22 + $0xb8] sm:$0xff]   ;;  %v7908_v10 = vld [vmem:[%s8335_s22 + $0xd0] sm:$0xff]  }
  0x26   : > { %14497 = vst [vmem:[#allocation8_spill] sm:$0xff] %v8390_v18  ;;  %v1210_v23 = vshll.u32 %v7898_v12, 16  ;;  %v8397_v25 = vsel %vm1081_vm0, %v1176_v14, %v1180_v7  ;;  %v1192_v26 = vor.u32 %v1190_v8, %v1188_v11  ;;  %v1204_v27 = vrot.slane %v1202_v15, 1  ;;  %14673 = vst [vmem:[#allocation184_spill] sm:$0xff] %v9368_v49 }
  0x27   : > { %14498 = vst [vmem:[#allocation9_spill] sm:$0xff] %v8397_v25  ;;  %v1218_v28 = vshll.u32 %v7899_v16, 16  ;;  %v8402_v29 = vsel %vm1081_vm0, %v1168_v17, %v1172_v2  ;;  %v1184_v30 = vor.u32 %v1182_v19, %v1180_v7  ;;  %v1198_v31 = vshrl.u32 %v7896_v61, 16  ;;  %v7906_v61 = vld [vmem:[%s8335_s22 + $0xc0] sm:$0xff]   ;;  %v7909_v19 = vld [vmem:[%s8335_s22 + $0xd8] sm:$0xff]  }
  0x28   : > { %1868 = vrot.lane.b32.xlu1 %v8372_v0, %s8274_s23  ;;  %14499 = vst [vmem:[#allocation10_spill] sm:$0xff] %v8402_v29  ;;  %v1222_v32 = vshrl.u32 %v7899_v16, 16  ;;  %v1226_v33 = vshll.u32 %v7900_v20, 16  ;;  %v1212_v36 = vrot.slane %v1210_v23, 1  ;;  %v1234_v37 = vshll.u32 %v7901_v24, 16  ;;  %v9346_v0 = vld [vmem:[%s8335_s22 + $0xd8] sm:$0xff]  }
  0x29   : > { %1866 = vrot.lane.b32.xlu0 %v8377_v4, %s8274_s23  ;;  %v8408_v38 = vsel %vm1081_vm0, %v1192_v26, %v1196_v21  ;;  %v1208_v39 = vor.u32 %v1206_v22, %v1204_v27  ;;  %v1220_v40 = vrot.slane %v1218_v28, 1  ;;  %v8414_v42 = vsel %vm1081_vm0, %v1184_v30, %v1188_v11  ;;  %v7910_v28 = vld [vmem:[%s8335_s22 + $0xe0] sm:$0xff]  }
  0x2a   : > { %14500 = vst [vmem:[#allocation11_spill] sm:$0xff] %v8408_v38  ;;  %14501 = vst [vmem:[#allocation12_spill] sm:$0xff] %v8414_v42  ;;  %v1200_v43 = vor.u32 %v1198_v31, %v1196_v21  ;;  %v1214_v44 = vshrl.u32 %v7898_v12, 16  ;;  %v1242_v45 = vshll.u32 %v7902_v35, 16  ;;  %v1228_v46 = vrot.slane %v1226_v33, 1  ;;  %v7911_v33 = vld [vmem:[%s8335_s22 + $0xe8] sm:$0xff]  }
  0x2b   : > { %v1236_v47 = vrot.slane %v1234_v37, 1  ;;  %v1238_v48 = vshrl.u32 %v7901_v24, 16  ;;  %v8420_v51 = vsel %vm1081_vm0, %v1208_v39, %v1212_v36  ;;  %v1224_v52 = vor.u32 %v1222_v32, %v1220_v40  ;;  %v7912_v39 = vld [vmem:[%s8335_s22 + $0xf0] sm:$0xff]  }
  0x2c   : > { %1872 = vrot.lane.b32.xlu1 %v8384_v13, %s8274_s23  ;;  %14502 = vst [vmem:[#allocation13_spill] sm:$0xff] %v8420_v51  ;;  %v1250_v53 = vshll.u32 %v7903_v41, 16  ;;  %v1230_v55 = vshrl.u32 %v7900_v20, 16  ;;  %v8426_v56 = vsel %vm1081_vm0, %v1200_v43, %v1204_v27  ;;  %v1216_v57 = vor.u32 %v1214_v44, %v1212_v36  ;;  %v7913_v44 = vld [vmem:[%s8335_s22 + $0xf8] sm:$0xff]   ;;  %v9324_v13 = vld [vmem:[%s8335_s22 + $0xc8] sm:$0xff]  }
  0x2d   : > { %1870 = vrot.lane.b32.xlu0 %v8390_v18, %s8274_s23  ;;  %14503 = vst [vmem:[#allocation14_spill] sm:$0xff] %v8426_v56  ;;  %v1244_v58 = vrot.slane %v1242_v45, 1  ;;  %v1254_v60 = vshrl.u32 %v7903_v41, 16  ;;  %v1258_v62 = vshll.u32 %v7904_v50, 16  ;;  %v8433_v1 = vsel %vm1081_vm0, %v1224_v52, %v1228_v46 }
  0x2e   : > { %14504 = vst [vmem:[#allocation15_spill] sm:$0xff] %v8433_v1  ;;  %v1240_v2 = vor.u32 %v1238_v48, %v1236_v47  ;;  %v1252_v3 = vrot.slane %v1250_v53, 1  ;;  %v1266_v5 = vshll.u32 %v7905_v54, 16  ;;  %v1232_v6 = vor.u32 %v1230_v55, %v1228_v46 }
  0x2f   : > { %v1246_v7 = vshrl.u32 %v7902_v35, 16  ;;  %v8438_v8 = vsel %vm1081_vm0, %v1216_v57, %v1220_v40  ;;  %v1274_v9 = vshll.u32 %v7906_v61, 16  ;;  %v1260_v11 = vrot.slane %v1258_v62, 1  ;;  %v7914_v57 = vld [vmem:[%s8335_s22 + $0x100] sm:$0xff]  }
  0x30   : > { %1876 = vrot.lane.b32.xlu1 %v8397_v25, %s8274_s23  ;;  %14505 = vst [vmem:[#allocation16_spill] sm:$0xff] %v8438_v8  ;;  %v1270_v12 = vshrl.u32 %v7905_v54, 16  ;;  %v1282_v14 = vshll.u32 %v7907_v63, 16  ;;  %v8444_v15 = vsel %vm1081_vm0, %v1240_v2, %v1244_v58  ;;  %v1256_v16 = vor.u32 %v1254_v60, %v1252_v3  ;;  %v7915_v2 = vld [vmem:[%s8335_s22 + $0x108] sm:$0xff]   ;;  %v9302_v25 = vld [vmem:[%s8335_s22 + $0xb8] sm:$0xff]  }
  0x31   : > { %1874 = vrot.lane.b32.xlu0 %v8402_v29, %s8274_s23  ;;  %14506 = vst [vmem:[#allocation17_spill] sm:$0xff] %v8444_v15  ;;  %v1268_v17 = vrot.slane %v1266_v5, 1  ;;  %v8450_v20 = vsel %vm1081_vm0, %v1232_v6, %v1236_v47  ;;  %v1248_v21 = vor.u32 %v1246_v7, %v1244_v58  ;;  %v1276_v22 = vrot.slane %v1274_v9, 1 }
  0x32   : > { %14507 = vst [vmem:[#allocation18_spill] sm:$0xff] %v8450_v20  ;;  %v1262_v23 = vshrl.u32 %v7904_v50, 16  ;;  %v1286_v24 = vshrl.u32 %v7907_v63, 16  ;;  %v1290_v26 = vshll.u32 %v7908_v10, 16  ;;  %v1284_v27 = vrot.slane %v1282_v14, 1 }
  0x33   : > { %v8456_v30 = vsel %vm1081_vm0, %v1256_v16, %v1260_v11  ;;  %v1272_v31 = vor.u32 %v1270_v12, %v1268_v17  ;;  %v1298_v32 = vshll.u32 %v7909_v19, 16  ;;  %v8462_v35 = vsel %vm1081_vm0, %v1248_v21, %v1252_v3  ;;  %v7916_v12 = vld [vmem:[%s8335_s22 + $0x110] sm:$0xff]  }
  0x34   : > { %1880 = vrot.lane.b32.xlu1 %v8408_v38, %s8274_s23  ;;  %14508 = vst [vmem:[#allocation19_spill] sm:$0xff] %v8456_v30  ;;  %14509 = vst [vmem:[#allocation20_spill] sm:$0xff] %v8462_v35  ;;  %v1264_v36 = vor.u32 %v1262_v23, %v1260_v11  ;;  %v1278_v37 = vshrl.u32 %v7906_v61, 16  ;;  %v1292_v40 = vrot.slane %v1290_v26, 1  ;;  %v1302_v41 = vshrl.u32 %v7909_v19, 16  ;;  %v7917_v19 = vld [vmem:[%s8335_s22 + $0x118] sm:$0xff]  }
  0x35   : > { %1878 = vrot.lane.b32.xlu0 %v8414_v42, %s8274_s23  ;;  %v1306_v43 = vshll.u32 %v7910_v28, 16  ;;  %v8469_v45 = vsel %vm1081_vm0, %v1272_v31, %v1276_v22  ;;  %v1288_v46 = vor.u32 %v1286_v24, %v1284_v27  ;;  %v1300_v47 = vrot.slane %v1298_v32, 1  ;;  %v7919_v31 = vld [vmem:[%s8335_s22 + $0x128] sm:$0xff]  }
  0x36   : > { %14510 = vst [vmem:[#allocation21_spill] sm:$0xff] %v8469_v45  ;;  %v1314_v48 = vshll.u32 %v7911_v33, 16  ;;  %v1294_v50 = vshrl.u32 %v7908_v10, 16  ;;  %v8474_v52 = vsel %vm1081_vm0, %v1264_v36, %v1268_v17  ;;  %v1280_v53 = vor.u32 %v1278_v37, %v1276_v22  ;;  %v9280_v38 = vld [vmem:[%s8335_s22 + $0xa8] sm:$0xff]  }
  0x37   : > { %14511 = vst [vmem:[#allocation22_spill] sm:$0xff] %v8474_v52  ;;  %v1318_v54 = vshrl.u32 %v7911_v33, 16  ;;  %v1322_v55 = vshll.u32 %v7912_v39, 16  ;;  %v1308_v58 = vrot.slane %v1306_v43, 1  ;;  %v1330_v60 = vshll.u32 %v7913_v44, 16 }
  0x38   : > { %1884 = vrot.lane.b32.xlu1 %v8420_v51, %s8274_s23  ;;  %v8480_v61 = vsel %vm1081_vm0, %v1288_v46, %v1292_v40  ;;  %v1304_v62 = vor.u32 %v1302_v41, %v1300_v47  ;;  %v1316_v63 = vrot.slane %v1314_v48, 1  ;;  %v8486_v3 = vsel %vm1081_vm0, %v1280_v53, %v1284_v27  ;;  %v7918_v27 = vld [vmem:[%s8335_s22 + $0x120] sm:$0xff]   ;;  %v9258_v51 = vld [vmem:[%s8335_s22 + $0x98] sm:$0xff]  }
  0x39   : > { %1882 = vrot.lane.b32.xlu0 %v8426_v56, %s8274_s23  ;;  %14512 = vst [vmem:[#allocation23_spill] sm:$0xff] %v8480_v61  ;;  %14513 = vst [vmem:[#allocation24_spill] sm:$0xff] %v8486_v3  ;;  %v1296_v5 = vor.u32 %v1294_v50, %v1292_v40  ;;  %v1310_v6 = vshrl.u32 %v7910_v28, 16  ;;  %v1338_v7 = vshll.u32 %v7914_v57, 16  ;;  %v1324_v9 = vrot.slane %v1322_v55, 1  ;;  %v7921_v55 = vld [vmem:[%s8335_s22 + $0x138] sm:$0xff]  }
  0x3a   : > { %v1332_v10 = vrot.slane %v1330_v60, 1  ;;  %v1334_v11 = vshrl.u32 %v7913_v44, 16  ;;  %v8492_v14 = vsel %vm1081_vm0, %v1304_v62, %v1308_v58  ;;  %v1320_v16 = vor.u32 %v1318_v54, %v1316_v63  ;;  %v7920_v44 = vld [vmem:[%s8335_s22 + $0x130] sm:$0xff]  }
  0x3b   : > { %14514 = vst [vmem:[#allocation25_spill] sm:$0xff] %v8492_v14  ;;  %v1346_v17 = vshll.u32 %v7915_v2, 16  ;;  %v1326_v21 = vshrl.u32 %v7912_v39, 16  ;;  %v8498_v22 = vsel %vm1081_vm0, %v1296_v5, %v1300_v47  ;;  %v1312_v23 = vor.u32 %v1310_v6, %v1308_v58  ;;  %v7922_v6 = vld [vmem:[%s8335_s22 + $0x140] sm:$0xff]  }
  0x3c   : > { %1888 = vrot.lane.b32.xlu1 %v8433_v1, %s8274_s23  ;;  %14515 = vst [vmem:[#allocation26_spill] sm:$0xff] %v8498_v22  ;;  %v1340_v24 = vrot.slane %v1338_v7, 1  ;;  %v1350_v26 = vshrl.u32 %v7915_v2, 16  ;;  %v1354_v28 = vshll.u32 %v7916_v12, 16  ;;  %v8505_v32 = vsel %vm1081_vm0, %v1320_v16, %v1324_v9  ;;  %v7923_v16 = vld [vmem:[%s8335_s22 + $0x148] sm:$0xff]  }
  0x3d   : > { %1886 = vrot.lane.b32.xlu0 %v8438_v8, %s8274_s23  ;;  %14516 = vst [vmem:[#allocation27_spill] sm:$0xff] %v8505_v32  ;;  %v1336_v33 = vor.u32 %v1334_v11, %v1332_v10  ;;  %v1348_v36 = vrot.slane %v1346_v17, 1  ;;  %v1362_v37 = vshll.u32 %v7917_v19, 16  ;;  %v1328_v39 = vor.u32 %v1326_v21, %v1324_v9  ;;  %v9236_v1 = vld [vmem:[%s8335_s22 + $0x88] sm:$0xff]  }
  0x3e   : > { %v1342_v40 = vshrl.u32 %v7914_v57, 16  ;;  %v8510_v41 = vsel %vm1081_vm0, %v1312_v23, %v1316_v63  ;;  %v1370_v43 = vshll.u32 %v7918_v27, 16  ;;  %v1356_v46 = vrot.slane %v1354_v28, 1 }
  0x3f   : > { %14517 = vst [vmem:[#allocation28_spill] sm:$0xff] %v8510_v41  ;;  %v1366_v47 = vshrl.u32 %v7917_v19, 16  ;;  %v1378_v48 = vshll.u32 %v7919_v31, 16  ;;  %v8516_v50 = vsel %vm1081_vm0, %v1336_v33, %v1340_v24  ;;  %v1352_v53 = vor.u32 %v1350_v26, %v1348_v36  ;;  %v7924_v19 = vld [vmem:[%s8335_s22 + $0x150] sm:$0xff]   ;;  %v7925_v26 = vld [vmem:[%s8335_s22 + $0x158] sm:$0xff]  }
  0x40   : > { %1892 = vrot.lane.b32.xlu1 %v8444_v15, %s8274_s23  ;;  %14518 = vst [vmem:[#allocation29_spill] sm:$0xff] %v8516_v50  ;;  %v1364_v54 = vrot.slane %v1362_v37, 1  ;;  %v8522_v57 = vsel %vm1081_vm0, %v1328_v39, %v1332_v10  ;;  %v1344_v58 = vor.u32 %v1342_v40, %v1340_v24  ;;  %v1372_v60 = vrot.slane %v1370_v43, 1  ;;  %v9214_v15 = vld [vmem:[%s8335_s22 + $0x78] sm:$0xff]  }
  0x41   : > { %1890 = vrot.lane.b32.xlu0 %v8450_v20, %s8274_s23  ;;  %14519 = vst [vmem:[#allocation30_spill] sm:$0xff] %v8522_v57  ;;  %v1358_v62 = vshrl.u32 %v7916_v12, 16  ;;  %v1382_v63 = vshrl.u32 %v7919_v31, 16  ;;  %v1386_v2 = vshll.u32 %v7920_v44, 16  ;;  %v1380_v5 = vrot.slane %v1378_v48, 1 }
  0x42   : > { %v8528_v7 = vsel %vm1081_vm0, %v1352_v53, %v1356_v46  ;;  %v1368_v9 = vor.u32 %v1366_v47, %v1364_v54  ;;  %v1394_v11 = vshll.u32 %v7921_v55, 16  ;;  %v8534_v10 = vsel %vm1081_vm0, %v1344_v58, %v1348_v36 }
  0x43   : > { %14520 = vst [vmem:[#allocation31_spill] sm:$0xff] %v8528_v7  ;;  %14521 = vst [vmem:[#allocation32_spill] sm:$0xff] %v8534_v10  ;;  %v1360_v12 = vor.u32 %v1358_v62, %v1356_v46  ;;  %v1374_v17 = vshrl.u32 %v7918_v27, 16  ;;  %v1388_v21 = vrot.slane %v1386_v2, 1  ;;  %v1398_v23 = vshrl.u32 %v7921_v55, 16  ;;  %v7926_v46 = vld [vmem:[%s8335_s22 + $0x160] sm:$0xff]  }
  0x44   : > { %1896 = vrot.lane.b32.xlu1 %v8456_v30, %s8274_s23  ;;  %v1402_v24 = vshll.u32 %v7922_v6, 16  ;;  %v8541_v28 = vsel %vm1081_vm0, %v1368_v9, %v1372_v60  ;;  %v1384_v31 = vor.u32 %v1382_v63, %v1380_v5  ;;  %v1396_v33 = vrot.slane %v1394_v11, 1 }
  0x45   : > { %1894 = vrot.lane.b32.xlu0 %v8462_v35, %s8274_s23  ;;  %14522 = vst [vmem:[#allocation33_spill] sm:$0xff] %v8541_v28  ;;  %v1410_v37 = vshll.u32 %v7923_v16, 16  ;;  %v1390_v27 = vshrl.u32 %v7920_v44, 16  ;;  %v8546_v36 = vsel %vm1081_vm0, %v1360_v12, %v1364_v54  ;;  %v1376_v39 = vor.u32 %v1374_v17, %v1372_v60  ;;  %v7927_v44 = vld [vmem:[%s8335_s22 + $0x168] sm:$0xff]  }
  0x46   : > { %14523 = vst [vmem:[#allocation34_spill] sm:$0xff] %v8546_v36  ;;  %v1414_v40 = vshrl.u32 %v7923_v16, 16  ;;  %v1418_v43 = vshll.u32 %v7924_v19, 16  ;;  %v1404_v47 = vrot.slane %v1402_v24, 1  ;;  %v1426_v48 = vshll.u32 %v7925_v26, 16  ;;  %v7928_v16 = vld [vmem:[%s8335_s22 + $0x170] sm:$0xff]  }
  0x47   : > { %v8552_v53 = vsel %vm1081_vm0, %v1384_v31, %v1388_v21  ;;  %v1400_v55 = vor.u32 %v1398_v23, %v1396_v33  ;;  %v1412_v58 = vrot.slane %v1410_v37, 1  ;;  %v8558_v54 = vsel %vm1081_vm0, %v1376_v39, %v1380_v5  ;;  %v7929_v24 = vld [vmem:[%s8335_s22 + $0x178] sm:$0xff]   ;;  %v7931_v39 = vld [vmem:[%s8335_s22 + $0x188] sm:$0xff]  }
  0x48   : > { %1900 = vrot.lane.b32.xlu1 %v8469_v45, %s8274_s23  ;;  %14524 = vst [vmem:[#allocation35_spill] sm:$0xff] %v8552_v53  ;;  %14525 = vst [vmem:[#allocation36_spill] sm:$0xff] %v8558_v54  ;;  %v1392_v60 = vor.u32 %v1390_v27, %v1388_v21  ;;  %v1406_v62 = vshrl.u32 %v7922_v6, 16  ;;  %v1434_v63 = vshll.u32 %v7926_v46, 16  ;;  %v1420_v2 = vrot.slane %v1418_v43, 1  ;;  %v7930_v27 = vld [vmem:[%s8335_s22 + $0x180] sm:$0xff]  }
  0x49   : > { %1898 = vrot.lane.b32.xlu0 %v8474_v52, %s8274_s23  ;;  %v1428_v9 = vrot.slane %v1426_v48, 1  ;;  %v1430_v11 = vshrl.u32 %v7925_v26, 16  ;;  %v8564_v12 = vsel %vm1081_vm0, %v1400_v55, %v1404_v47  ;;  %v1416_v17 = vor.u32 %v1414_v40, %v1412_v58 }
  0x4a   : > { %14526 = vst [vmem:[#allocation37_spill] sm:$0xff] %v8564_v12  ;;  %v1442_v23 = vshll.u32 %v7927_v44, 16  ;;  %v1422_v5 = vshrl.u32 %v7924_v19, 16  ;;  %v8570_v6 = vsel %vm1081_vm0, %v1392_v60, %v1396_v33  ;;  %v1408_v21 = vor.u32 %v1406_v62, %v1404_v47  ;;  %v7932_v60 = vld [vmem:[%s8335_s22 + $0x190] sm:$0xff]  }
  0x4b   : > { %14527 = vst [vmem:[#allocation38_spill] sm:$0xff] %v8570_v6  ;;  %v1436_v31 = vrot.slane %v1434_v63, 1  ;;  %v1446_v37 = vshrl.u32 %v7927_v44, 16  ;;  %v1450_v26 = vshll.u32 %v7928_v16, 16  ;;  %v8577_v40 = vsel %vm1081_vm0, %v1416_v17, %v1420_v2 }
  0x4c   : > { %1904 = vrot.lane.b32.xlu1 %v8480_v61, %s8274_s23  ;;  %14528 = vst [vmem:[#allocation39_spill] sm:$0xff] %v8577_v40  ;;  %v1432_v43 = vor.u32 %v1430_v11, %v1428_v9  ;;  %v1444_v48 = vrot.slane %v1442_v23, 1  ;;  %v1458_v19 = vshll.u32 %v7929_v24, 16  ;;  %v1424_v33 = vor.u32 %v1422_v5, %v1420_v2  ;;  %v7933_v2 = vld [vmem:[%s8335_s22 + $0x198] sm:$0xff]  }
  0x4d   : > { %1902 = vrot.lane.b32.xlu0 %v8486_v3, %s8274_s23  ;;  %v1438_v47 = vshrl.u32 %v7926_v46, 16  ;;  %v8582_v55 = vsel %vm1081_vm0, %v1408_v21, %v1412_v58  ;;  %v1466_v44 = vshll.u32 %v7930_v27, 16  ;;  %v1452_v62 = vrot.slane %v1450_v26, 1 }
  0x4e   : > { %14529 = vst [vmem:[#allocation40_spill] sm:$0xff] %v8582_v55  ;;  %v1462_v63 = vshrl.u32 %v7929_v24, 16  ;;  %v1474_v11 = vshll.u32 %v7931_v39, 16  ;;  %v8588_v17 = vsel %vm1081_vm0, %v1432_v43, %v1436_v31  ;;  %v1448_v23 = vor.u32 %v1446_v37, %v1444_v48  ;;  %v7934_v43 = vld [vmem:[%s8335_s22 + $0x1a0] sm:$0xff]  }
  0x4f   : > { %14530 = vst [vmem:[#allocation41_spill] sm:$0xff] %v8588_v17  ;;  %v8594_v46 = vsel %vm1081_vm0, %v1424_v33, %v1428_v9  ;;  %v1440_v58 = vor.u32 %v1438_v47, %v1436_v31  ;;  %v1468_v5 = vrot.slane %v1466_v44, 1  ;;  %v1454_v21 = vshrl.u32 %v7928_v16, 16 }
  0x50   : > { %1908 = vrot.lane.b32.xlu1 %v8492_v14, %s8274_s23  ;;  %14531 = vst [vmem:[#allocation42_spill] sm:$0xff] %v8594_v46  ;;  %v1478_v26 = vshrl.u32 %v7931_v39, 16  ;;  %v1482_v24 = vshll.u32 %v7932_v60, 16  ;;  %v1476_v37 = vrot.slane %v1474_v11, 1  ;;  %v1470_v31 = vshrl.u32 %v7930_v27, 16  ;;  %v7936_v39 = vld [vmem:[%s8335_s22 + $0x1b0] sm:$0xff]  }
  0x51   : > { %1906 = vrot.lane.b32.xlu0 %v8498_v22, %s8274_s23  ;;  %v8606_v9 = vsel %vm1081_vm0, %v1440_v58, %v1444_v48  ;;  %v1456_v16 = vor.u32 %v1454_v21, %v1452_v62  ;;  %v1494_v47 = vshrl.u32 %v7933_v2, 16  ;;  %v1498_v44 = vshll.u32 %v7934_v43, 16  ;;  %v7937_v11 = vld [vmem:[%s8335_s22 + $0x1b8] sm:$0xff]   ;;  %v8972_v14 = vld [vmem:[%s8335_s22 + $0x2e0] sm:$0xff]   ;;  %v8994_v22 = vld [vmem:[%s8335_s22 + $0x2f0] sm:$0xff]  }
  0x52   : > { %14533 = vst [vmem:[#allocation44_spill] sm:$0xff] %v8606_v9  ;;  %v1484_v33 = vrot.slane %v1482_v24, 1  ;;  %v1486_v27 = vshrl.u32 %v7932_v60, 16  ;;  %v1514_v21 = vshll.u32 %v7936_v39, 16  ;;  %v7939_v60 = vld [vmem:[%s8335_s22 + $0x1c8] sm:$0xff]   ;;  %v1834_v45 = vshll.u32 %v8994_v22, 16 }
  0x53   : > { %v2076_v35 = vrot.slane %v9214_v15, 1  ;;  %v2080_v20 = vrot.slane %v9236_v1, 1  ;;  %v2084_v8 = vrot.slane %v9258_v51, 1  ;;  %v2088_v56 = vrot.slane %v9280_v38, 1 }
  0x54   : > { %1912 = vrot.lane.b32.xlu1 %v8505_v32, %s8274_s23  ;;  %v2092_v42 = vrot.slane %v9302_v25, 1  ;;  %v2096_v29 = vrot.slane %v9324_v13, 1  ;;  %v2100_v18 = vrot.slane %v9346_v0, 1  ;;  %v2104_v4 = vrot.slane %v9368_v49, 1  ;;  %v9834_v49 = vld [vmem:[%s8335_s22 + $0x240] sm:$0xff]  }
  0x55   : > { %1910 = vrot.lane.b32.xlu0 %v8510_v41, %s8274_s23  ;;  %v2108_v59 = vrot.slane %v9390_v34, 1  ;;  %v9412_v34 = vld [vmem:[%s8335_s22 + $0x108] sm:$0xff]   ;;  %14799 = vst [vmem:[#allocation310_spill] sm:$0xff] %v9834_v49 }
  0x56   : > { %14684 = vst [vmem:[#allocation195_spill] sm:$0xff] %v9412_v34 }
  0x58   : > { %1916 = vrot.lane.b32.xlu1 %v8516_v50, %s8274_s23 }
  0x59   : > { %1914 = vrot.lane.b32.xlu0 %v8522_v57, %s8274_s23 }
  0x5c   : > { %1920 = vrot.lane.b32.xlu1 %v8528_v7, %s8274_s23 }
  0x5d   : > { %1918 = vrot.lane.b32.xlu0 %v8534_v10, %s8274_s23 }
  0x60   : > { %1924 = vrot.lane.b32.xlu1 %v8541_v28, %s8274_s23 }
  0x61   : > { %1922 = vrot.lane.b32.xlu0 %v8546_v36, %s8274_s23  ;;  %v8898_v36 = vld [vmem:[%s8335_s22 + $0x2b0] sm:$0xff]  }
  0x64   : > { %1928 = vrot.lane.b32.xlu1 %v8552_v53, %s8274_s23  ;;  %v7935_v53 = vld [vmem:[%s8335_s22 + $0x1a8] sm:$0xff]  }
  0x65   : > { %1926 = vrot.lane.b32.xlu0 %v8558_v54, %s8274_s23  ;;  %v1510_v58 = vshrl.u32 %v7935_v53, 16 }
  0x68   : > { %1932 = vrot.lane.b32.xlu1 %v8564_v12, %s8274_s23  ;;  %v1460_v12 = vrot.slane %v1458_v19, 1  ;;  %v8600_v19 = vsel %vm1081_vm0, %v1448_v23, %v1452_v62  ;;  %v1480_v23 = vor.u32 %v1478_v26, %v1476_v37  ;;  %v1472_v62 = vor.u32 %v1470_v31, %v1468_v5 }
  0x69   : > { %1930 = vrot.lane.b32.xlu0 %v8570_v6, %s8274_s23  ;;  %14532 = vst [vmem:[#allocation43_spill] sm:$0xff] %v8600_v19  ;;  %v1522_v26 = vshll.u32 %v7937_v11, 16  ;;  %v1516_v31 = vrot.slane %v1514_v21, 1  ;;  %v1542_v21 = vshrl.u32 %v7939_v60, 16  ;;  %v8849_v6 = vld [vmem:[%s8335_s22 + $0x298] sm:$0xff]  }
  0x6a   : > { %v8618_v48 = vsel %vm1081_vm0, %v1456_v16, %v1460_v12  ;;  %v1750_v7 = vshrl.u32 %v8849_v6, 16 }
  0x6b   : > { %14535 = vst [vmem:[#allocation46_spill] sm:$0xff] %v8618_v48 }
  0x6c   : > { %1936 = vrot.lane.b32.xlu1 %v8577_v40, %s8274_s23  ;;  %v1464_v40 = vor.u32 %v1462_v63, %v1460_v12  ;;  %v1488_v12 = vor.u32 %v1486_v27, %v1484_v33 }
  0x6d   : > { %1934 = vrot.lane.b32.xlu0 %v8582_v55, %s8274_s23  ;;  %v1490_v55 = vshll.u32 %v7933_v2, 16  ;;  %v7938_v2 = vld [vmem:[%s8335_s22 + $0x1c0] sm:$0xff]  }
  0x6e   : > { %v8613_v63 = vsel %vm1081_vm0, %v1464_v40, %v1468_v5  ;;  %v1500_v40 = vrot.slane %v1498_v44, 1  ;;  %v1502_v5 = vshrl.u32 %v7934_v43, 16  ;;  %v1530_v16 = vshll.u32 %v7938_v2, 16 }
  0x6f   : > { %14534 = vst [vmem:[#allocation45_spill] sm:$0xff] %v8613_v63  ;;  %v1524_v44 = vrot.slane %v1522_v26, 1  ;;  %v7942_v26 = vld [vmem:[%s8335_s22 + $0x1e0] sm:$0xff]  }
  0x70   : > { %1940 = vrot.lane.b32.xlu1 %v8588_v17, %s8274_s23  ;;  %v1492_v17 = vrot.slane %v1490_v55, 1  ;;  %v8624_v55 = vsel %vm1081_vm0, %v1480_v23, %v1484_v33  ;;  %v7940_v23 = vld [vmem:[%s8335_s22 + $0x1d0] sm:$0xff]   ;;  %v7941_v33 = vld [vmem:[%s8335_s22 + $0x1d8] sm:$0xff]   ;;  %v1504_v43 = vor.u32 %v1502_v5, %v1500_v40  ;;  %v1532_v27 = vrot.slane %v1530_v16, 1 }
  0x71   : > { %1938 = vrot.lane.b32.xlu0 %v8594_v46, %s8274_s23  ;;  %v1506_v46 = vshll.u32 %v7935_v53, 16  ;;  %14536 = vst [vmem:[#allocation47_spill] sm:$0xff] %v8624_v55  ;;  %v8630_v53 = vsel %vm1081_vm0, %v1472_v62, %v1476_v37  ;;  %v1518_v62 = vshrl.u32 %v7936_v39, 16  ;;  %v7944_v5 = vld [vmem:[%s8335_s22 + $0x1f0] sm:$0xff]  }
  0x72   : > { %v1496_v24 = vor.u32 %v1494_v47, %v1492_v17  ;;  %14537 = vst [vmem:[#allocation48_spill] sm:$0xff] %v8630_v53  ;;  %v1526_v47 = vshrl.u32 %v7937_v11, 16  ;;  %v8642_v37 = vsel %vm1081_vm0, %v1488_v12, %v1492_v17  ;;  %v1546_v11 = vshll.u32 %v7940_v23, 16 }
  0x73   : > { %14539 = vst [vmem:[#allocation50_spill] sm:$0xff] %v8642_v37  ;;  %v1520_v39 = vor.u32 %v1518_v62, %v1516_v31  ;;  %v7947_v62 = vld [vmem:[%s8335_s22 + $0x208] sm:$0xff]  }
  0x74   : > { %1944 = vrot.lane.b32.xlu1 %v8600_v19, %s8274_s23  ;;  %v1508_v19 = vrot.slane %v1506_v46, 1  ;;  %v8636_v46 = vsel %vm1081_vm0, %v1496_v24, %v1500_v40  ;;  %v7943_v24 = vld [vmem:[%s8335_s22 + $0x1e8] sm:$0xff]   ;;  %v1534_v40 = vshrl.u32 %v7938_v2, 16  ;;  %v1548_v12 = vrot.slane %v1546_v11, 1 }
  0x75   : > { %1942 = vrot.lane.b32.xlu0 %v8606_v9, %s8274_s23  ;;  %14538 = vst [vmem:[#allocation49_spill] sm:$0xff] %v8636_v46  ;;  %v1554_v9 = vshll.u32 %v7941_v33, 16  ;;  %v1570_v16 = vshll.u32 %v7943_v24, 16  ;;  %v8666_v2 = vsel %vm1081_vm0, %v1520_v39, %v1524_v44  ;;  %v8681_v39 = vld [vmem:[%s8335_s22 + $0x210] sm:$0xff]  }
  0x76   : > { %v8654_v17 = vsel %vm1081_vm0, %v1504_v43, %v1508_v19  ;;  %14543 = vst [vmem:[#allocation54_spill] sm:$0xff] %v8666_v2 }
  0x77   : > { %14541 = vst [vmem:[#allocation52_spill] sm:$0xff] %v8654_v17 }
  0x78   : > { %1948 = vrot.lane.b32.xlu1 %v8613_v63, %s8274_s23  ;;  %v1512_v63 = vor.u32 %v1510_v58, %v1508_v19  ;;  %v1550_v19 = vshrl.u32 %v7940_v23, 16 }
  0x79   : > { %1946 = vrot.lane.b32.xlu0 %v8618_v48, %s8274_s23  ;;  %v1538_v48 = vshll.u32 %v7939_v60, 16  ;;  %v1562_v60 = vshll.u32 %v7942_v26, 16 }
  0x7a   : > { %v8649_v58 = vsel %vm1081_vm0, %v1512_v63, %v1516_v31  ;;  %v1558_v63 = vshrl.u32 %v7941_v33, 16  ;;  %v1536_v31 = vor.u32 %v1534_v40, %v1532_v27  ;;  %v1574_v33 = vshrl.u32 %v7943_v24, 16 }
  0x7b   : > { %14540 = vst [vmem:[#allocation51_spill] sm:$0xff] %v8649_v58  ;;  %v1564_v43 = vrot.slane %v1562_v60, 1  ;;  %v1602_v40 = vshll.u32 %v7947_v62, 16 }
  0x7c   : > { %1952 = vrot.lane.b32.xlu1 %v8624_v55, %s8274_s23  ;;  %v1528_v55 = vor.u32 %v1526_v47, %v1524_v44  ;;  %v1552_v44 = vor.u32 %v1550_v19, %v1548_v12 }
  0x7d   : > { %1950 = vrot.lane.b32.xlu0 %v8630_v53, %s8274_s23  ;;  %v1540_v53 = vrot.slane %v1538_v48, 1 }
  0x7e   : > { %v8660_v48 = vsel %vm1081_vm0, %v1528_v55, %v1532_v27  ;;  %v1572_v55 = vrot.slane %v1570_v16, 1  ;;  %v1566_v27 = vshrl.u32 %v7942_v26, 16 }
  0x7f   : > { %14542 = vst [vmem:[#allocation53_spill] sm:$0xff] %v8660_v48  ;;  %v1544_v47 = vor.u32 %v1542_v21, %v1540_v53  ;;  %v1578_v21 = vshll.u32 %v7944_v5, 16  ;;  %v8678_v24 = vsel %vm1081_vm0, %v1536_v31, %v1540_v53  ;;  %v1582_v31 = vshrl.u32 %v7944_v5, 16 }
  0x80   : > { %1956 = vrot.lane.b32.xlu1 %v8636_v46, %s8274_s23  ;;  %v1556_v46 = vrot.slane %v1554_v9, 1  ;;  %14545 = vst [vmem:[#allocation56_spill] sm:$0xff] %v8678_v24 }
  0x81   : > { %1954 = vrot.lane.b32.xlu0 %v8642_v37, %s8274_s23  ;;  %v7945_v37 = vld [vmem:[%s8335_s22 + $0x1f8] sm:$0xff]   ;;  %v8672_v9 = vsel %vm1081_vm0, %v1544_v47, %v1548_v12  ;;  %v1580_v60 = vrot.slane %v1578_v21, 1  ;;  %v1568_v21 = vor.u32 %v1566_v27, %v1564_v43 }
  0x82   : > { %14544 = vst [vmem:[#allocation55_spill] sm:$0xff] %v8672_v9  ;;  %v1560_v11 = vor.u32 %v1558_v63, %v1556_v46  ;;  %v1586_v23 = vshll.u32 %v7945_v37, 16  ;;  %v1590_v16 = vshrl.u32 %v7945_v37, 16  ;;  %v7949_v63 = vld [vmem:[%s8335_s22 + $0x218] sm:$0xff]   ;;  %v8694_v19 = vsel %vm1081_vm0, %v1552_v44, %v1556_v46 }
  0x83   : > { %14548 = vst [vmem:[#allocation59_spill] sm:$0xff] %v8694_v19  ;;  %v1604_v37 = vrot.slane %v1602_v40, 1  ;;  %v8718_v27 = vsel %vm1081_vm0, %v1568_v21, %v1572_v55  ;;  %v1584_v40 = vor.u32 %v1582_v31, %v1580_v60 }
  0x84   : > { %1960 = vrot.lane.b32.xlu1 %v8649_v58, %s8274_s23  ;;  %v7946_v58 = vld [vmem:[%s8335_s22 + $0x200] sm:$0xff]   ;;  %v8687_v47 = vsel %vm1081_vm0, %v1560_v11, %v1564_v43  ;;  %v1588_v12 = vrot.slane %v1586_v23, 1  ;;  %v1618_v23 = vshll.u32 %v7949_v63, 16  ;;  %14552 = vst [vmem:[#allocation63_spill] sm:$0xff] %v8718_v27 }
  0x85   : > { %1958 = vrot.lane.b32.xlu0 %v8654_v17, %s8274_s23  ;;  %14546 = vst [vmem:[#allocation57_spill] sm:$0xff] %v8687_v47  ;;  %v1594_v26 = vshll.u32 %v7946_v58, 16  ;;  %v7950_v11 = vld [vmem:[%s8335_s22 + $0x220] sm:$0xff]   ;;  %v7953_v17 = vld [vmem:[%s8335_s22 + $0x238] sm:$0xff]  }
  0x86   : > { %v1592_v5 = vor.u32 %v1590_v16, %v1588_v12  ;;  %v1620_v16 = vrot.slane %v1618_v23, 1  ;;  %v7954_v23 = vld [vmem:[%s8335_s22 + $0x240] sm:$0xff]  }
  0x87   : > { %v1596_v43 = vrot.slane %v1594_v26, 1  ;;  %v1622_v26 = vshrl.u32 %v7949_v63, 16 }
  0x88   : > { %1964 = vrot.lane.b32.xlu1 %v8660_v48, %s8274_s23  ;;  %v1576_v48 = vor.u32 %v1574_v33, %v1572_v55 }
  0x89   : > { %1962 = vrot.lane.b32.xlu0 %v8666_v2, %s8274_s23  ;;  %v1610_v2 = vshll.u32 %v8681_v39, 16 }
  0x8a   : > { %v8710_v46 = vsel %vm1081_vm0, %v1576_v48, %v1580_v60  ;;  %v1614_v60 = vshrl.u32 %v8681_v39, 16 }
  0x8b   : > { %14550 = vst [vmem:[#allocation61_spill] sm:$0xff] %v8710_v46 }
  0x8c   : > { %1968 = vrot.lane.b32.xlu1 %v8672_v9, %s8274_s23  ;;  %v1606_v9 = vshrl.u32 %v7947_v62, 16  ;;  %v7951_v62 = vld [vmem:[%s8335_s22 + $0x228] sm:$0xff]  }
  0x8d   : > { %1966 = vrot.lane.b32.xlu0 %v8678_v24, %s8274_s23  ;;  %v1626_v24 = vshll.u32 %v7950_v11, 16  ;;  %v1634_v55 = vshll.u32 %v7951_v62, 16 }
  0x8e   : > { %v8691_v53 = vpop.permute.xlu1 %1858  ;;  %v1608_v48 = vor.u32 %v1606_v9, %v1604_v37 }
  0x8f   : > { %14547 = vst [vmem:[#allocation58_spill] sm:$0xff] %v8691_v53  ;;  %v8699_v33 = vpop.permute.xlu0 %1854  ;;  %v1612_v53 = vrot.slane %v1610_v2, 1  ;;  %v8734_v2 = vsel %vm1081_vm0, %v1584_v40, %v1588_v12  ;;  %v1628_v21 = vrot.slane %v1626_v24, 1  ;;  %v7955_v40 = vld [vmem:[%s8335_s22 + $0x248] sm:$0xff]  }
  0x90   : > { %14549 = vst [vmem:[#allocation60_spill] sm:$0xff] %v8699_v33  ;;  %1972 = vrot.lane.b32.xlu1 %v8687_v47, %s8274_s23  ;;  %v1598_v33 = vshrl.u32 %v7946_v58, 16  ;;  %14556 = vst [vmem:[#allocation67_spill] sm:$0xff] %v8734_v2 }
  0x91   : > { %1970 = vrot.lane.b32.xlu0 %v8694_v19, %s8274_s23  ;;  %v8726_v19 = vsel %vm1081_vm0, %v1592_v5, %v1596_v43  ;;  %v8742_v31 = vsel %vm1081_vm0, %v1608_v48, %v1612_v53  ;;  %v1650_v5 = vshll.u32 %v7953_v17, 16  ;;  %v1630_v48 = vshrl.u32 %v7950_v11, 16 }
  0x92   : > { %v8715_v44 = vpop.permute.xlu1 %1860  ;;  %14554 = vst [vmem:[#allocation65_spill] sm:$0xff] %v8726_v19  ;;  %v1600_v9 = vor.u32 %v1598_v33, %v1596_v43  ;;  %14558 = vst [vmem:[#allocation69_spill] sm:$0xff] %v8742_v31  ;;  %v1616_v43 = vor.u32 %v1614_v60, %v1612_v53  ;;  %v8764_v53 = vld [vmem:[%s8335_s22 + $0x258] sm:$0xff]  }
  0x93   : > { %14551 = vst [vmem:[#allocation62_spill] sm:$0xff] %v8715_v44  ;;  %v8720_v47 = vpop.permute.xlu0 %1856  ;;  %v7952_v44 = vld [vmem:[%s8335_s22 + $0x230] sm:$0xff]  }
  0x94   : > { %14553 = vst [vmem:[#allocation64_spill] sm:$0xff] %v8720_v47  ;;  %1976 = vrot.lane.b32.xlu1 %v8710_v46, %s8274_s23  ;;  %v1624_v47 = vor.u32 %v1622_v26, %v1620_v16  ;;  %v1638_v46 = vshrl.u32 %v7951_v62, 16  ;;  %v1642_v12 = vshll.u32 %v7952_v44, 16  ;;  %v8751_v33 = vsel %vm1081_vm0, %v1600_v9, %v1604_v37 }
  0x95   : > { %1974 = vrot.lane.b32.xlu0 %v8718_v27, %s8274_s23  ;;  %14560 = vst [vmem:[#allocation71_spill] sm:$0xff] %v8751_v33  ;;  %v1652_v26 = vrot.slane %v1650_v5, 1  ;;  %v1654_v62 = vshrl.u32 %v7953_v17, 16  ;;  %v1666_v37 = vshll.u32 %v7955_v40, 16  ;;  %v8771_v17 = vsel %vm1081_vm0, %v1616_v43, %v1620_v16  ;;  %v8785_v43 = vld [vmem:[%s8335_s22 + $0x260] sm:$0xff]  }
  0x96   : > { %v8731_v58 = vpop.permute.xlu1 %1864  ;;  %14564 = vst [vmem:[#allocation75_spill] sm:$0xff] %v8771_v17  ;;  %v1632_v9 = vor.u32 %v1630_v48, %v1628_v21  ;;  %v1646_v60 = vshrl.u32 %v7952_v44, 16  ;;  %v1670_v16 = vshrl.u32 %v7955_v40, 16  ;;  %v1682_v44 = vshll.u32 %v8764_v53, 16 }
  0x97   : > { %14555 = vst [vmem:[#allocation66_spill] sm:$0xff] %v8731_v58  ;;  %v8737_v63 = vpop.permute.xlu0 %1862  ;;  %v1636_v58 = vrot.slane %v1634_v55, 1  ;;  %v1658_v55 = vshll.u32 %v7954_v23, 16 }
  0x98   : > { %14557 = vst [vmem:[#allocation68_spill] sm:$0xff] %v8737_v63  ;;  %1980 = vrot.lane.b32.xlu1 %v8726_v19, %s8274_s23  ;;  %v8758_v63 = vld [vmem:[%s8335_s22 + $0x250] sm:$0xff]   ;;  %v8761_v19 = vsel %vm1081_vm0, %v1624_v47, %v1628_v21  ;;  %v1656_v47 = vor.u32 %v1654_v62, %v1652_v26 }
  0x99   : > { %1978 = vrot.lane.b32.xlu0 %v8734_v2, %s8274_s23  ;;  %14562 = vst [vmem:[#allocation73_spill] sm:$0xff] %v8761_v19  ;;  %v1644_v2 = vrot.slane %v1642_v12, 1  ;;  %v1674_v12 = vshll.u32 %v8758_v63, 16  ;;  %v8793_v48 = vsel %vm1081_vm0, %v1632_v9, %v1636_v58 }
  0x9a   : > { %v8748_v39 = vpop.permute.xlu1 %1868  ;;  %14568 = vst [vmem:[#allocation79_spill] sm:$0xff] %v8793_v48 }
  0x9b   : > { %14559 = vst [vmem:[#allocation70_spill] sm:$0xff] %v8748_v39  ;;  %v8753_v24 = vpop.permute.xlu0 %1866  ;;  %v1640_v39 = vor.u32 %v1638_v46, %v1636_v58  ;;  %v1660_v46 = vrot.slane %v1658_v55, 1  ;;  %v1648_v62 = vor.u32 %v1646_v60, %v1644_v2  ;;  %v1662_v55 = vshrl.u32 %v7954_v23, 16  ;;  %v8809_v23 = vld [vmem:[%s8335_s22 + $0x278] sm:$0xff]  }
  0x9c   : > { %14561 = vst [vmem:[#allocation72_spill] sm:$0xff] %v8753_v24  ;;  %1984 = vrot.lane.b32.xlu1 %v8742_v31, %s8274_s23  ;;  %v8779_v24 = vld [vmem:[%s8335_s22 + $0x268] sm:$0xff]   ;;  %v1686_v58 = vshrl.u32 %v8764_v53, 16 }
  0x9d   : > { %1982 = vrot.lane.b32.xlu0 %v8751_v33, %s8274_s23  ;;  %v8782_v31 = vsel %vm1081_vm0, %v1640_v39, %v1644_v2  ;;  %v8800_v40 = vsel %vm1081_vm0, %v1656_v47, %v1660_v46  ;;  %v1676_v39 = vrot.slane %v1674_v12, 1  ;;  %v1690_v2 = vshll.u32 %v8785_v43, 16  ;;  %v8826_v33 = vld [vmem:[%s8335_s22 + $0x280] sm:$0xff]  }
  0x9e   : > { %v8768_v11 = vpop.permute.xlu1 %1872  ;;  %14566 = vst [vmem:[#allocation77_spill] sm:$0xff] %v8782_v31  ;;  %14570 = vst [vmem:[#allocation81_spill] sm:$0xff] %v8800_v40  ;;  %v8816_v60 = vsel %vm1081_vm0, %v1648_v62, %v1652_v26  ;;  %v1664_v47 = vor.u32 %v1662_v55, %v1660_v46  ;;  %v1678_v12 = vshrl.u32 %v8758_v63, 16  ;;  %v1714_v62 = vshll.u32 %v8809_v23, 16  ;;  %v8833_v55 = vld [vmem:[%s8335_s22 + $0x288] sm:$0xff]  }
  0x9f   : > { %14563 = vst [vmem:[#allocation74_spill] sm:$0xff] %v8768_v11  ;;  %v8773_v5 = vpop.permute.xlu0 %1870  ;;  %v1668_v11 = vrot.slane %v1666_v37, 1  ;;  %v8803_v37 = vld [vmem:[%s8335_s22 + $0x270] sm:$0xff]   ;;  %14572 = vst [vmem:[#allocation83_spill] sm:$0xff] %v8816_v60  ;;  %v1692_v46 = vrot.slane %v1690_v2, 1  ;;  %v1722_v27 = vshll.u32 %v8826_v33, 16 }
  0xa0   : > { %14565 = vst [vmem:[#allocation76_spill] sm:$0xff] %v8773_v5  ;;  %1988 = vrot.lane.b32.xlu1 %v8761_v19, %s8274_s23  ;;  %v1698_v19 = vshll.u32 %v8779_v24, 16 }
  0xa1   : > { %1986 = vrot.lane.b32.xlu0 %v8771_v17, %s8274_s23  ;;  %v1684_v17 = vrot.slane %v1682_v44, 1  ;;  %v1724_v28 = vrot.slane %v1722_v27, 1 }
  0xa2   : > { %v8790_v21 = vpop.permute.xlu1 %1876  ;;  %v1700_v44 = vrot.slane %v1698_v19, 1 }
  0xa3   : > { %14567 = vst [vmem:[#allocation78_spill] sm:$0xff] %v8790_v21  ;;  %v8795_v5 = vpop.permute.xlu0 %1874  ;;  %v1672_v21 = vor.u32 %v1670_v16, %v1668_v11  ;;  %v1688_v26 = vor.u32 %v1686_v58, %v1684_v17 }
  0xa4   : > { %14569 = vst [vmem:[#allocation80_spill] sm:$0xff] %v8795_v5  ;;  %1992 = vrot.lane.b32.xlu1 %v8782_v31, %s8274_s23  ;;  %v1702_v5 = vshrl.u32 %v8779_v24, 16  ;;  %v1706_v31 = vshll.u32 %v8803_v37, 16 }
  0xa5   : > { %1990 = vrot.lane.b32.xlu0 %v8793_v48, %s8274_s23  ;;  %v1694_v48 = vshrl.u32 %v8785_v43, 16 }
  0xa6   : > { %v8813_v9 = vpop.permute.xlu1 %1880  ;;  %v1704_v58 = vor.u32 %v1702_v5, %v1700_v44  ;;  %v1708_v2 = vrot.slane %v1706_v31, 1 }
  0xa7   : > { %14571 = vst [vmem:[#allocation82_spill] sm:$0xff] %v8813_v9  ;;  %v8819_v16 = vpop.permute.xlu0 %1878  ;;  %v8829_v9 = vsel %vm1081_vm0, %v1672_v21, %v1676_v39 }
  0xa8   : > { %14573 = vst [vmem:[#allocation84_spill] sm:$0xff] %v8819_v16  ;;  %1996 = vrot.lane.b32.xlu1 %v8800_v40, %s8274_s23  ;;  %14574 = vst [vmem:[#allocation85_spill] sm:$0xff] %v8829_v9  ;;  %v8840_v16 = vsel %vm1081_vm0, %v1664_v47, %v1668_v11  ;;  %v1680_v40 = vor.u32 %v1678_v12, %v1676_v39  ;;  %v1716_v11 = vrot.slane %v1714_v62, 1  ;;  %v1718_v39 = vshrl.u32 %v8809_v23, 16  ;;  %v8856_v47 = vld [vmem:[%s8335_s22 + $0x290] sm:$0xff]  }
  0xa9   : > { %1994 = vrot.lane.b32.xlu0 %v8816_v60, %s8274_s23  ;;  %14576 = vst [vmem:[#allocation87_spill] sm:$0xff] %v8840_v16  ;;  %v1730_v12 = vshll.u32 %v8833_v55, 16  ;;  %v8875_v60 = vsel %vm1081_vm0, %v1704_v58, %v1708_v2  ;;  %v1742_v50 = vshrl.u32 %v8856_v47, 16 }
  0xaa   : > { %v8837_v19 = vpop.permute.xlu1 %1884  ;;  %v8864_v31 = vsel %vm1081_vm0, %v1680_v40, %v1684_v17  ;;  %14582 = vst [vmem:[#allocation93_spill] sm:$0xff] %v8875_v60  ;;  %v1720_v17 = vor.u32 %v1718_v39, %v1716_v11  ;;  %v1734_v40 = vshrl.u32 %v8833_v55, 16 }
  0xab   : > { %14575 = vst [vmem:[#allocation86_spill] sm:$0xff] %v8837_v19  ;;  %v8843_v21 = vpop.permute.xlu0 %1882  ;;  %v8852_v19 = vsel %vm1081_vm0, %v1688_v26, %v1692_v46  ;;  %14580 = vst [vmem:[#allocation91_spill] sm:$0xff] %v8864_v31  ;;  %v1710_v26 = vshrl.u32 %v8803_v37, 16 }
  0xac   : > { %14577 = vst [vmem:[#allocation88_spill] sm:$0xff] %v8843_v21  ;;  %2000 = vrot.lane.b32.xlu1 %v8829_v9, %s8274_s23  ;;  %14578 = vst [vmem:[#allocation89_spill] sm:$0xff] %v8852_v19  ;;  %v1696_v21 = vor.u32 %v1694_v48, %v1692_v46  ;;  %v8868_v9 = vld [vmem:[%s8335_s22 + $0x2a0] sm:$0xff]   ;;  %v1732_v48 = vrot.slane %v1730_v12, 1  ;;  %v1738_v46 = vshll.u32 %v8856_v47, 16 }
  0xad   : > { %1998 = vrot.lane.b32.xlu0 %v8840_v16, %s8274_s23  ;;  %v1746_v16 = vshll.u32 %v8849_v6, 16  ;;  %v1712_v27 = vor.u32 %v1710_v26, %v1708_v2  ;;  %v1754_v54 = vshll.u32 %v8868_v9, 16  ;;  %v8905_v26 = vld [vmem:[%s8335_s22 + $0x2b8] sm:$0xff]  }
  0xae   : > { %v8861_v5 = vpop.permute.xlu1 %1888  ;;  %v8888_v58 = vsel %vm1081_vm0, %v1696_v21, %v1700_v44  ;;  %v8902_v44 = vsel %vm1081_vm0, %v1720_v17, %v1724_v28  ;;  %v1736_v21 = vor.u32 %v1734_v40, %v1732_v48  ;;  %v1740_v2 = vrot.slane %v1738_v46, 1 }
  0xaf   : > { %14579 = vst [vmem:[#allocation90_spill] sm:$0xff] %v8861_v5  ;;  %v8870_v62 = vpop.permute.xlu0 %1886  ;;  %v8879_v5 = vld [vmem:[%s8335_s22 + $0x2a8] sm:$0xff]   ;;  %14584 = vst [vmem:[#allocation95_spill] sm:$0xff] %v8888_v58  ;;  %v1748_v12 = vrot.slane %v1746_v16, 1  ;;  %v8912_v16 = vsel %vm1081_vm0, %v1712_v27, %v1716_v11  ;;  %v8925_v11 = vld [vmem:[%s8335_s22 + $0x2c0] sm:$0xff]   ;;  %v1758_v27 = vshrl.u32 %v8868_v9, 16 }
  0xb0   : > { %14581 = vst [vmem:[#allocation92_spill] sm:$0xff] %v8870_v62  ;;  %2004 = vrot.lane.b32.xlu1 %v8852_v19, %s8274_s23  ;;  %v1726_v19 = vshrl.u32 %v8826_v33, 16  ;;  %14586 = vst [vmem:[#allocation97_spill] sm:$0xff] %v8902_v44  ;;  %v1766_v10 = vshrl.u32 %v8879_v5, 16  ;;  %v1790_v41 = vshrl.u32 %v8925_v11, 16 }
  0xb1   : > { %2002 = vrot.lane.b32.xlu0 %v8864_v31, %s8274_s23  ;;  %14588 = vst [vmem:[#allocation99_spill] sm:$0xff] %v8912_v16  ;;  %v1756_v31 = vrot.slane %v1754_v54, 1  ;;  %v1752_v40 = vor.u32 %v1750_v7, %v1748_v12  ;;  %v8929_v54 = vld [vmem:[%s8335_s22 + $0x2c8] sm:$0xff]  }
  0xb2   : > { %v8885_v62 = vpop.permute.xlu1 %1892  ;;  %v1798_v57 = vshrl.u32 %v8929_v54, 16 }
  0xb3   : > { %14583 = vst [vmem:[#allocation94_spill] sm:$0xff] %v8885_v62  ;;  %v8892_v39 = vpop.permute.xlu0 %1890  ;;  %v1762_v62 = vshll.u32 %v8879_v5, 16 }
  0xb4   : > { %14585 = vst [vmem:[#allocation96_spill] sm:$0xff] %v8892_v39  ;;  %2008 = vrot.lane.b32.xlu1 %v8875_v60, %s8274_s23  ;;  %v1728_v60 = vor.u32 %v1726_v19, %v1724_v28  ;;  %v1778_v28 = vshll.u32 %v8905_v26, 16 }
  0xb5   : > { %2006 = vrot.lane.b32.xlu0 %v8888_v58, %s8274_s23  ;;  %v1764_v46 = vrot.slane %v1762_v62, 1  ;;  %v1770_v58 = vshll.u32 %v8898_v36, 16  ;;  %v1744_v62 = vor.u32 %v1742_v50, %v1740_v2  ;;  %v1786_v50 = vshll.u32 %v8925_v11, 16 }
  0xb6   : > { %v8909_v39 = vpop.permute.xlu1 %1896  ;;  %v8936_v19 = vsel %vm1081_vm0, %v1728_v60, %v1732_v48  ;;  %v1782_v60 = vshrl.u32 %v8905_v26, 16  ;;  %v8952_v48 = vld [vmem:[%s8335_s22 + $0x2d0] sm:$0xff]  }
  0xb7   : > { %14587 = vst [vmem:[#allocation98_spill] sm:$0xff] %v8909_v39  ;;  %v8915_v17 = vpop.permute.xlu0 %1894  ;;  %v8922_v39 = vsel %vm1081_vm0, %v1736_v21, %v1740_v2  ;;  %14592 = vst [vmem:[#allocation103_spill] sm:$0xff] %v8936_v19  ;;  %v1772_v32 = vrot.slane %v1770_v58, 1  ;;  %v1794_v2 = vshll.u32 %v8929_v54, 16  ;;  %v1760_v58 = vor.u32 %v1758_v27, %v1756_v31 }
  0xb8   : > { %14589 = vst [vmem:[#allocation100_spill] sm:$0xff] %v8915_v17  ;;  %2012 = vrot.lane.b32.xlu1 %v8902_v44, %s8274_s23  ;;  %14590 = vst [vmem:[#allocation101_spill] sm:$0xff] %v8922_v39  ;;  %v8944_v17 = vsel %vm1081_vm0, %v1752_v40, %v1756_v31  ;;  %v1768_v44 = vor.u32 %v1766_v10, %v1764_v46  ;;  %v8960_v10 = vsel %vm1081_vm0, %v1744_v62, %v1748_v12 }
  0xb9   : > { %2010 = vrot.lane.b32.xlu0 %v8912_v16, %s8274_s23  ;;  %14594 = vst [vmem:[#allocation105_spill] sm:$0xff] %v8944_v17  ;;  %v8947_v16 = vld [vmem:[%s8335_s22 + $0x2d8] sm:$0xff]   ;;  %14596 = vst [vmem:[#allocation107_spill] sm:$0xff] %v8960_v10  ;;  %v1788_v62 = vrot.slane %v1786_v50, 1  ;;  %v1796_v31 = vrot.slane %v1794_v2, 1  ;;  %v1802_v27 = vshll.u32 %v8952_v48, 16 }
  0xba   : > { %v8933_v7 = vpop.permute.xlu1 %1900  ;;  %v1814_v50 = vshrl.u32 %v8947_v16, 16  ;;  %v1818_v2 = vshll.u32 %v8972_v14, 16 }
  0xbb   : > { %14591 = vst [vmem:[#allocation102_spill] sm:$0xff] %v8933_v7  ;;  %v8939_v21 = vpop.permute.xlu0 %1898  ;;  %v1780_v7 = vrot.slane %v1778_v28, 1  ;;  %v1774_v28 = vshrl.u32 %v8898_v36, 16 }
  0xbc   : > { %14593 = vst [vmem:[#allocation104_spill] sm:$0xff] %v8939_v21  ;;  %2016 = vrot.lane.b32.xlu1 %v8922_v39, %s8274_s23  ;;  %v8968_v39 = vsel %vm1081_vm0, %v1768_v44, %v1772_v32 }
  0xbd   : > { %2014 = vrot.lane.b32.xlu0 %v8936_v19, %s8274_s23  ;;  %14598 = vst [vmem:[#allocation109_spill] sm:$0xff] %v8968_v39  ;;  %v1784_v12 = vor.u32 %v1782_v60, %v1780_v7  ;;  %v8977_v19 = vld [vmem:[%s8335_s22 + $0x2e8] sm:$0xff]  }
  0xbe   : > { %v8957_v40 = vpop.permute.xlu1 %1904 }
  0xbf   : > { %14595 = vst [vmem:[#allocation106_spill] sm:$0xff] %v8957_v40  ;;  %v8963_v21 = vpop.permute.xlu0 %1902  ;;  %v1810_v40 = vshll.u32 %v8947_v16, 16 }
  0xc0   : > { %14597 = vst [vmem:[#allocation108_spill] sm:$0xff] %v8963_v21  ;;  %2020 = vrot.lane.b32.xlu1 %v8944_v17, %s8274_s23  ;;  %v8984_v21 = vsel %vm1081_vm0, %v1760_v58, %v1764_v46  ;;  %v1776_v17 = vor.u32 %v1774_v28, %v1772_v32  ;;  %v1800_v46 = vor.u32 %v1798_v57, %v1796_v31  ;;  %v1804_v58 = vrot.slane %v1802_v27, 1  ;;  %v9001_v28 = vld [vmem:[%s8335_s22 + $0x2f8] sm:$0xff]  }
  0xc1   : > { %2018 = vrot.lane.b32.xlu0 %v8960_v10, %s8274_s23  ;;  %14600 = vst [vmem:[#allocation111_spill] sm:$0xff] %v8984_v21  ;;  %v1812_v60 = vrot.slane %v1810_v40, 1  ;;  %v1826_v32 = vshll.u32 %v8977_v19, 16  ;;  %v1806_v10 = vshrl.u32 %v8952_v48, 16  ;;  %v1820_v27 = vrot.slane %v1818_v2, 1 }
  0xc2   : > { %v8981_v44 = vpop.permute.xlu1 %1908  ;;  %v9017_v3 = vsel %vm1081_vm0, %v1800_v46, %v1804_v58  ;;  %v1822_v2 = vshrl.u32 %v8972_v14, 16 }
  0xc3   : > { %14599 = vst [vmem:[#allocation110_spill] sm:$0xff] %v8981_v44  ;;  %v8987_v61 = vpop.permute.xlu0 %1906  ;;  %v8997_v44 = vsel %vm1081_vm0, %v1784_v12, %v1788_v62  ;;  %v1816_v57 = vor.u32 %v1814_v50, %v1812_v60  ;;  %14606 = vst [vmem:[#allocation117_spill] sm:$0xff] %v9017_v3  ;;  %v1808_v50 = vor.u32 %v1806_v10, %v1804_v58  ;;  %v1838_v58 = vshrl.u32 %v8994_v22, 16 }
  0xc4   : > { %14601 = vst [vmem:[#allocation112_spill] sm:$0xff] %v8987_v61  ;;  %2024 = vrot.lane.b32.xlu1 %v8968_v39, %s8274_s23  ;;  %14602 = vst [vmem:[#allocation113_spill] sm:$0xff] %v8997_v44  ;;  %v9008_v61 = vsel %vm1081_vm0, %v1776_v17, %v1780_v7  ;;  %v1792_v39 = vor.u32 %v1790_v41, %v1788_v62  ;;  %v9021_v17 = vld [vmem:[%s8707_s27] sm:$0xff]   ;;  %v1842_v41 = vshll.u32 %v9001_v28, 16 }
  0xc5   : > { %2022 = vrot.lane.b32.xlu0 %v8984_v21, %s8274_s23  ;;  %14604 = vst [vmem:[#allocation115_spill] sm:$0xff] %v9008_v61  ;;  %v1828_v21 = vrot.slane %v1826_v32, 1  ;;  %v9037_v32 = vsel %vm1081_vm0, %v1816_v57, %v1820_v27  ;;  %v9046_v10 = vsel %vm1081_vm0, %v1808_v50, %v1812_v60 }
  0xc6   : > { %v9005_v40 = vpop.permute.xlu1 %1912  ;;  %v9029_v62 = vsel %vm1081_vm0, %v1792_v39, %v1796_v31  ;;  %14610 = vst [vmem:[#allocation121_spill] sm:$0xff] %v9037_v32  ;;  %v1844_v30 = vrot.slane %v1842_v41, 1  ;;  %14612 = vst [vmem:[#allocation123_spill] sm:$0xff] %v9046_v10  ;;  %v1824_v31 = vor.u32 %v1822_v2, %v1820_v27 }
  0xc7   : > { %14603 = vst [vmem:[#allocation114_spill] sm:$0xff] %v9005_v40  ;;  %v9011_v12 = vpop.permute.xlu0 %1910  ;;  %v1830_v40 = vshrl.u32 %v8977_v19, 16  ;;  %14608 = vst [vmem:[#allocation119_spill] sm:$0xff] %v9029_v62 }
  0xc8   : > { %14605 = vst [vmem:[#allocation116_spill] sm:$0xff] %v9011_v12  ;;  %2028 = vrot.lane.b32.xlu1 %v8997_v44, %s8274_s23  ;;  %v1836_v12 = vrot.slane %v1834_v45, 1  ;;  %v9063_v27 = vsel %vm1081_vm0, %v1824_v31, %v1828_v21  ;;  %v7988_v31 = vld [vmem:[%s8335_s22] sm:$0xff]  }
  0xc9   : > { %2026 = vrot.lane.b32.xlu0 %v9008_v61, %s8274_s23  ;;  %v1832_v44 = vor.u32 %v1830_v40, %v1828_v21  ;;  %v1846_v61 = vshrl.u32 %v9001_v28, 16  ;;  %14617 = vst [vmem:[#allocation128_spill] sm:$0xff] %v9063_v27 }
  0xca   : > { %v9026_v7 = vpop.permute.xlu1 %1916  ;;  %v1840_v50 = vor.u32 %v1838_v58, %v1836_v12  ;;  %v2047_v58 = vrot.slane %v7988_v31, 1 }
  0xcb   : > { %14607 = vst [vmem:[#allocation118_spill] sm:$0xff] %v9026_v7  ;;  %v9032_v46 = vpop.permute.xlu0 %1914  ;;  %v1850_v7 = vshll.u32 %v9021_v17, 16  ;;  %v9054_v40 = vsel %vm1081_vm0, %v1832_v44, %v1836_v12  ;;  %v1848_v57 = vor.u32 %v1846_v61, %v1844_v30  ;;  %v7986_v44 = vld [vmem:[%s8335_s22 + $0x8] sm:$0xff]  }
  0xcc   : > { %14609 = vst [vmem:[#allocation120_spill] sm:$0xff] %v9032_v46  ;;  %2032 = vrot.lane.b32.xlu1 %v9017_v3, %s8274_s23  ;;  %14614 = vst [vmem:[#allocation125_spill] sm:$0xff] %v9054_v40  ;;  %v9080_v12 = vsel %vm1081_vm0, %v1840_v50, %v1844_v30  ;;  %v9108_v46 = vld [vmem:[%s8335_s22 + $0x28] sm:$0xff]   ;;  %v9170_v3 = vld [vmem:[%s8335_s22 + $0x58] sm:$0xff]  }
  0xcd   : > { %2030 = vrot.lane.b32.xlu0 %v9029_v62, %s8274_s23  ;;  %v9056_v41 = vrot.slane %v1850_v7, 1  ;;  %v2048_v7 = vrot.slane %v7986_v44, 1  ;;  %14621 = vst [vmem:[#allocation132_spill] sm:$0xff] %v9080_v12  ;;  %v9192_v62 = vld [vmem:[%s8335_s22 + $0x68] sm:$0xff]  }
  0xce   : > { %v9043_v39 = vpop.permute.xlu1 %1920  ;;  %v2072_v52 = vrot.slane %v9192_v62, 1 }
  0xcf   : > { %14611 = vst [vmem:[#allocation122_spill] sm:$0xff] %v9043_v39  ;;  %v9049_v45 = vpop.permute.xlu0 %1918  ;;  %14615 = vst [vmem:[#allocation126_spill] sm:$0xff] %v9056_v41  ;;  %v9071_v61 = vsel %vm1081_vm0, %v1848_v57, %v9056_v41  ;;  %v7987_v39 = vld [vmem:[%s8335_s22 + $0x10] sm:$0xff]   ;;  %v9089_v57 = vld [vmem:[%s8335_s22 + $0x18] sm:$0xff]   ;;  %v2049_v31 = vsel %vm2046_vm1, %v2047_v58, %v2048_v7 }
  0xd0   : > { %14613 = vst [vmem:[#allocation124_spill] sm:$0xff] %v9049_v45  ;;  %2036 = vrot.lane.b32.xlu1 %v9037_v32, %s8274_s23  ;;  %14619 = vst [vmem:[#allocation130_spill] sm:$0xff] %v9071_v61  ;;  %v2050_v45 = vrot.slane %v7987_v39, 1  ;;  %v2052_v44 = vrot.slane %v9089_v57, 1  ;;  %v9131_v41 = vld [vmem:[%s8335_s22 + $0x40] sm:$0xff]  }
  0xd1   : > { %2034 = vrot.lane.b32.xlu0 %v9046_v10, %s8274_s23  ;;  %v2068_v10 = vrot.slane %v9170_v3, 1 }
  0xd2   : > { %v9060_v60 = vpop.permute.xlu1 %1924  ;;  %v2051_v39 = vsel %vm2046_vm1, %v2048_v7, %v2050_v45  ;;  %v2053_v58 = vsel %vm2046_vm1, %v2050_v45, %v2052_v44 }
  0xd3   : > { %14616 = vst [vmem:[#allocation127_spill] sm:$0xff] %v9060_v60  ;;  %v9065_v2 = vpop.permute.xlu0 %1922 }
  0xd4   : > { %14618 = vst [vmem:[#allocation129_spill] sm:$0xff] %v9065_v2  ;;  %2040 = vrot.lane.b32.xlu1 %v9054_v40, %s8274_s23  ;;  %v9112_v40 = vld [vmem:[%s8335_s22 + $0x30] sm:$0xff]  }
  0xd5   : > { %2038 = vrot.lane.b32.xlu0 %v9063_v27, %s8274_s23 }
  0xd6   : > { %v9077_v21 = vpop.permute.xlu1 %1928 }
  0xd7   : > { %14620 = vst [vmem:[#allocation131_spill] sm:$0xff] %v9077_v21  ;;  %v9083_v2 = vpop.permute.xlu0 %1926  ;;  %v9093_v21 = vld [vmem:[%s8335_s22 + $0x20] sm:$0xff]  }
  0xd8   : > { %14622 = vst [vmem:[#allocation133_spill] sm:$0xff] %v9083_v2  ;;  %2044 = vrot.lane.b32.xlu1 %v9071_v61, %s8274_s23  ;;  %v2054_v30 = vrot.slane %v9093_v21, 1  ;;  %v2056_v61 = vrot.slane %v9108_v46, 1 }
  0xd9   : > { %2042 = vrot.lane.b32.xlu0 %v9080_v12, %s8274_s23  ;;  %v9127_v12 = vld [vmem:[%s8335_s22 + $0x38] sm:$0xff]  }
  0xda   : > { %v9098_v50 = vpop.permute.xlu1 %1932  ;;  %v9105_v60 = vsel %vm2046_vm1, %v2052_v44, %v2054_v30  ;;  %v2060_v32 = vrot.slane %v9127_v12, 1  ;;  %v9138_v44 = vsel %vm2046_vm1, %v2054_v30, %v2056_v61 }
  0xdb   : > { %14623 = vst [vmem:[#allocation134_spill] sm:$0xff] %v9098_v50  ;;  %v9101_v2 = vpop.permute.xlu0 %1930  ;;  %14625 = vst [vmem:[#allocation136_spill] sm:$0xff] %v9105_v60  ;;  %v2058_v50 = vrot.slane %v9112_v40, 1 }
  0xdc   : > { %14624 = vst [vmem:[#allocation135_spill] sm:$0xff] %v9101_v2  ;;  %2242 = vrot.lane.b32.xlu1 %v2051_v39, %s8275_s28  ;;  %14630 = vst [vmem:[#allocation141_spill] sm:$0xff] %v9138_v44 }
  0xdd   : > { %2240 = vrot.lane.b32.xlu0 %v2049_v31, %s8275_s28  ;;  %v9124_v2 = vsel %vm2046_vm1, %v2056_v61, %v2058_v50  ;;  %v2062_v31 = vrot.slane %v9131_v41, 1  ;;  %v9160_v30 = vsel %vm2046_vm1, %v2058_v50, %v2060_v32 }
  0xde   : > { %v9116_v7 = vpop.permute.xlu1 %1936  ;;  %14628 = vst [vmem:[#allocation139_spill] sm:$0xff] %v9124_v2  ;;  %14634 = vst [vmem:[#allocation145_spill] sm:$0xff] %v9160_v30 }
  0xdf   : > { %14626 = vst [vmem:[#allocation137_spill] sm:$0xff] %v9116_v7  ;;  %v9119_v39 = vpop.permute.xlu0 %1934  ;;  %v9145_v7 = vsel %vm2046_vm1, %v2060_v32, %v2062_v31 }
  0xe0   : > { %14627 = vst [vmem:[#allocation138_spill] sm:$0xff] %v9119_v39  ;;  %2246 = vrot.lane.b32.xlu1 %v9105_v60, %s8275_s28  ;;  %14632 = vst [vmem:[#allocation143_spill] sm:$0xff] %v9145_v7  ;;  %v9148_v60 = vld [vmem:[%s8335_s22 + $0x48] sm:$0xff]  }
  0xe1   : > { %2244 = vrot.lane.b32.xlu0 %v2053_v58, %s8275_s28  ;;  %v2064_v27 = vrot.slane %v9148_v60, 1  ;;  %v9152_v58 = vld [vmem:[%s8335_s22 + $0x50] sm:$0xff]  }
  0xe2   : > { %v9135_v45 = vpop.permute.xlu1 %1940 }
  0xe3   : > { %14629 = vst [vmem:[#allocation140_spill] sm:$0xff] %v9135_v45  ;;  %v9140_v39 = vpop.permute.xlu0 %1938  ;;  %v2066_v45 = vrot.slane %v9152_v58, 1  ;;  %v9182_v50 = vsel %vm2046_vm1, %v2062_v31, %v2064_v27 }
  0xe4   : > { %14631 = vst [vmem:[#allocation142_spill] sm:$0xff] %v9140_v39  ;;  %2250 = vrot.lane.b32.xlu1 %v9124_v2, %s8275_s28  ;;  %14638 = vst [vmem:[#allocation149_spill] sm:$0xff] %v9182_v50 }
  0xe5   : > { %2248 = vrot.lane.b32.xlu0 %v9138_v44, %s8275_s28  ;;  %v9167_v2 = vsel %vm2046_vm1, %v2064_v27, %v2066_v45  ;;  %v9174_v44 = vld [vmem:[%s8335_s22 + $0x60] sm:$0xff]   ;;  %v9204_v31 = vsel %vm2046_vm1, %v2066_v45, %v2068_v10 }
  0xe6   : > { %v9157_v61 = vpop.permute.xlu1 %1944  ;;  %14636 = vst [vmem:[#allocation147_spill] sm:$0xff] %v9167_v2  ;;  %14642 = vst [vmem:[#allocation153_spill] sm:$0xff] %v9204_v31 }
  0xe7   : > { %14633 = vst [vmem:[#allocation144_spill] sm:$0xff] %v9157_v61  ;;  %v9162_v39 = vpop.permute.xlu0 %1942  ;;  %v2070_v61 = vrot.slane %v9174_v44, 1 }
  0xe8   : > { %14635 = vst [vmem:[#allocation146_spill] sm:$0xff] %v9162_v39  ;;  %2254 = vrot.lane.b32.xlu1 %v9145_v7, %s8275_s28 }
  0xe9   : > { %2252 = vrot.lane.b32.xlu0 %v9160_v30, %s8275_s28  ;;  %v9189_v7 = vsel %vm2046_vm1, %v2068_v10, %v2070_v61  ;;  %v9196_v30 = vld [vmem:[%s8335_s22 + $0x70] sm:$0xff]   ;;  %v9226_v45 = vsel %vm2046_vm1, %v2070_v61, %v2072_v52 }
  0xea   : > { %v9179_v32 = vpop.permute.xlu1 %1948  ;;  %14640 = vst [vmem:[#allocation151_spill] sm:$0xff] %v9189_v7  ;;  %14646 = vst [vmem:[#allocation157_spill] sm:$0xff] %v9226_v45 }
  0xeb   : > { %14637 = vst [vmem:[#allocation148_spill] sm:$0xff] %v9179_v32  ;;  %v9184_v39 = vpop.permute.xlu0 %1946  ;;  %v2074_v32 = vrot.slane %v9196_v30, 1 }
  0xec   : > { %14639 = vst [vmem:[#allocation150_spill] sm:$0xff] %v9184_v39  ;;  %2258 = vrot.lane.b32.xlu1 %v9167_v2, %s8275_s28 }
  0xed   : > { %2256 = vrot.lane.b32.xlu0 %v9182_v50, %s8275_s28  ;;  %v9211_v2 = vsel %vm2046_vm1, %v2072_v52, %v2074_v32  ;;  %v9218_v50 = vld [vmem:[%s8335_s22 + $0x80] sm:$0xff]   ;;  %v9248_v61 = vsel %vm2046_vm1, %v2074_v32, %v2076_v35 }
  0xee   : > { %v9201_v27 = vpop.permute.xlu1 %1952  ;;  %14644 = vst [vmem:[#allocation155_spill] sm:$0xff] %v9211_v2  ;;  %14650 = vst [vmem:[#allocation161_spill] sm:$0xff] %v9248_v61 }
  0xef   : > { %14641 = vst [vmem:[#allocation152_spill] sm:$0xff] %v9201_v27  ;;  %v9206_v39 = vpop.permute.xlu0 %1950  ;;  %v2078_v27 = vrot.slane %v9218_v50, 1 }
  0xf0   : > { %14643 = vst [vmem:[#allocation154_spill] sm:$0xff] %v9206_v39  ;;  %2262 = vrot.lane.b32.xlu1 %v9189_v7, %s8275_s28 }
  0xf1   : > { %2260 = vrot.lane.b32.xlu0 %v9204_v31, %s8275_s28  ;;  %v9233_v7 = vsel %vm2046_vm1, %v2076_v35, %v2078_v27  ;;  %v9240_v31 = vld [vmem:[%s8335_s22 + $0x90] sm:$0xff]   ;;  %v9270_v32 = vsel %vm2046_vm1, %v2078_v27, %v2080_v20 }
  0xf2   : > { %v9223_v10 = vpop.permute.xlu1 %1956  ;;  %14648 = vst [vmem:[#allocation159_spill] sm:$0xff] %v9233_v7  ;;  %14654 = vst [vmem:[#allocation165_spill] sm:$0xff] %v9270_v32 }
  0xf3   : > { %14645 = vst [vmem:[#allocation156_spill] sm:$0xff] %v9223_v10  ;;  %v9228_v39 = vpop.permute.xlu0 %1954  ;;  %v2082_v10 = vrot.slane %v9240_v31, 1 }
  0xf4   : > { %14647 = vst [vmem:[#allocation158_spill] sm:$0xff] %v9228_v39  ;;  %2266 = vrot.lane.b32.xlu1 %v9211_v2, %s8275_s28 }
  0xf5   : > { %2264 = vrot.lane.b32.xlu0 %v9226_v45, %s8275_s28  ;;  %v9255_v2 = vsel %vm2046_vm1, %v2080_v20, %v2082_v10  ;;  %v9262_v45 = vld [vmem:[%s8335_s22 + $0xa0] sm:$0xff]   ;;  %v9292_v27 = vsel %vm2046_vm1, %v2082_v10, %v2084_v8 }
  0xf6   : > { %v9245_v52 = vpop.permute.xlu1 %1960  ;;  %14652 = vst [vmem:[#allocation163_spill] sm:$0xff] %v9255_v2  ;;  %14658 = vst [vmem:[#allocation169_spill] sm:$0xff] %v9292_v27 }
  0xf7   : > { %14649 = vst [vmem:[#allocation160_spill] sm:$0xff] %v9245_v52  ;;  %v9250_v39 = vpop.permute.xlu0 %1958  ;;  %v2086_v52 = vrot.slane %v9262_v45, 1 }
  0xf8   : > { %14651 = vst [vmem:[#allocation162_spill] sm:$0xff] %v9250_v39  ;;  %2270 = vrot.lane.b32.xlu1 %v9233_v7, %s8275_s28 }
  0xf9   : > { %2268 = vrot.lane.b32.xlu0 %v9248_v61, %s8275_s28  ;;  %v9277_v7 = vsel %vm2046_vm1, %v2084_v8, %v2086_v52  ;;  %v9284_v61 = vld [vmem:[%s8335_s22 + $0xb0] sm:$0xff]   ;;  %v9314_v10 = vsel %vm2046_vm1, %v2086_v52, %v2088_v56 }
  0xfa   : > { %v9267_v35 = vpop.permute.xlu1 %1964  ;;  %14656 = vst [vmem:[#allocation167_spill] sm:$0xff] %v9277_v7  ;;  %14662 = vst [vmem:[#allocation173_spill] sm:$0xff] %v9314_v10 }
  0xfb   : > { %14653 = vst [vmem:[#allocation164_spill] sm:$0xff] %v9267_v35  ;;  %v9272_v39 = vpop.permute.xlu0 %1962  ;;  %v2090_v35 = vrot.slane %v9284_v61, 1 }
  0xfc   : > { %14655 = vst [vmem:[#allocation166_spill] sm:$0xff] %v9272_v39  ;;  %2274 = vrot.lane.b32.xlu1 %v9255_v2, %s8275_s28 }
  0xfd   : > { %2272 = vrot.lane.b32.xlu0 %v9270_v32, %s8275_s28  ;;  %v9299_v2 = vsel %vm2046_vm1, %v2088_v56, %v2090_v35  ;;  %v9306_v32 = vld [vmem:[%s8335_s22 + $0xc0] sm:$0xff]   ;;  %v9336_v52 = vsel %vm2046_vm1, %v2090_v35, %v2092_v42 }
  0xfe   : > { %v9289_v20 = vpop.permute.xlu1 %1968  ;;  %14660 = vst [vmem:[#allocation171_spill] sm:$0xff] %v9299_v2  ;;  %14666 = vst [vmem:[#allocation177_spill] sm:$0xff] %v9336_v52 }
  0xff   : > { %14657 = vst [vmem:[#allocation168_spill] sm:$0xff] %v9289_v20  ;;  %v9294_v39 = vpop.permute.xlu0 %1966  ;;  %v2094_v20 = vrot.slane %v9306_v32, 1 }
 0x100   : > { %14659 = vst [vmem:[#allocation170_spill] sm:$0xff] %v9294_v39  ;;  %2278 = vrot.lane.b32.xlu1 %v9277_v7, %s8275_s28 }
 0x101   : > { %2276 = vrot.lane.b32.xlu0 %v9292_v27, %s8275_s28  ;;  %v9321_v7 = vsel %vm2046_vm1, %v2092_v42, %v2094_v20  ;;  %v9328_v27 = vld [vmem:[%s8335_s22 + $0xd0] sm:$0xff]   ;;  %v9358_v35 = vsel %vm2046_vm1, %v2094_v20, %v2096_v29 }
 0x102   : > { %v9311_v8 = vpop.permute.xlu1 %1972  ;;  %14664 = vst [vmem:[#allocation175_spill] sm:$0xff] %v9321_v7  ;;  %14670 = vst [vmem:[#allocation181_spill] sm:$0xff] %v9358_v35 }
 0x103   : > { %14661 = vst [vmem:[#allocation172_spill] sm:$0xff] %v9311_v8  ;;  %v9316_v39 = vpop.permute.xlu0 %1970  ;;  %v2098_v8 = vrot.slane %v9328_v27, 1 }
 0x104   : > { %14663 = vst [vmem:[#allocation174_spill] sm:$0xff] %v9316_v39  ;;  %2282 = vrot.lane.b32.xlu1 %v9299_v2, %s8275_s28 }
 0x105   : > { %2280 = vrot.lane.b32.xlu0 %v9314_v10, %s8275_s28  ;;  %v9343_v2 = vsel %vm2046_vm1, %v2096_v29, %v2098_v8  ;;  %v9350_v10 = vld [vmem:[%s8335_s22 + $0xe0] sm:$0xff]   ;;  %v9380_v20 = vsel %vm2046_vm1, %v2098_v8, %v2100_v18 }
 0x106   : > { %v9333_v56 = vpop.permute.xlu1 %1976  ;;  %14668 = vst [vmem:[#allocation179_spill] sm:$0xff] %v9343_v2  ;;  %14675 = vst [vmem:[#allocation186_spill] sm:$0xff] %v9380_v20 }
 0x107   : > { %14665 = vst [vmem:[#allocation176_spill] sm:$0xff] %v9333_v56  ;;  %v9338_v39 = vpop.permute.xlu0 %1974  ;;  %v2102_v56 = vrot.slane %v9350_v10, 1 }
 0x108   : > { %14667 = vst [vmem:[#allocation178_spill] sm:$0xff] %v9338_v39  ;;  %2286 = vrot.lane.b32.xlu1 %v9321_v7, %s8275_s28 }
 0x109   : > { %2284 = vrot.lane.b32.xlu0 %v9336_v52, %s8275_s28  ;;  %v9365_v7 = vsel %vm2046_vm1, %v2100_v18, %v2102_v56  ;;  %v9372_v52 = vld [vmem:[%s8335_s22 + $0xf0] sm:$0xff]   ;;  %v9402_v8 = vsel %vm2046_vm1, %v2102_v56, %v2104_v4 }
 0x10a   : > { %v9355_v42 = vpop.permute.xlu1 %1980  ;;  %14672 = vst [vmem:[#allocation183_spill] sm:$0xff] %v9365_v7  ;;  %14681 = vst [vmem:[#allocation192_spill] sm:$0xff] %v9402_v8 }
 0x10b   : > { %14669 = vst [vmem:[#allocation180_spill] sm:$0xff] %v9355_v42  ;;  %v9360_v39 = vpop.permute.xlu0 %1978  ;;  %v2106_v42 = vrot.slane %v9372_v52, 1 }
 0x10c   : > { %14671 = vst [vmem:[#allocation182_spill] sm:$0xff] %v9360_v39  ;;  %2290 = vrot.lane.b32.xlu1 %v9343_v2, %s8275_s28 }
 0x10d   : > { %2288 = vrot.lane.b32.xlu0 %v9358_v35, %s8275_s28  ;;  %v9387_v2 = vsel %vm2046_vm1, %v2104_v4, %v2106_v42  ;;  %v9394_v35 = vld [vmem:[%s8335_s22 + $0x100] sm:$0xff]   ;;  %v9424_v56 = vsel %vm2046_vm1, %v2106_v42, %v2108_v59 }
 0x10e   : > { %v9377_v29 = vpop.permute.xlu1 %1984  ;;  %14677 = vst [vmem:[#allocation188_spill] sm:$0xff] %v9387_v2  ;;  %14679 = vst [vmem:[#allocation190_spill] sm:$0xff] %v9394_v35 }
 0x10f   : > { %14674 = vst [vmem:[#allocation185_spill] sm:$0xff] %v9377_v29  ;;  %v9382_v39 = vpop.permute.xlu0 %1982  ;;  %v2110_v29 = vrot.slane %v9394_v35, 1  ;;  %v2112_v35 = vrot.slane %v9412_v34, 1  ;;  %14687 = vst [vmem:[#allocation198_spill] sm:$0xff] %v9424_v56  ;;  %v9434_v34 = vld [vmem:[%s8335_s22 + $0x118] sm:$0xff]  }
 0x110   : > { %14676 = vst [vmem:[#allocation187_spill] sm:$0xff] %v9382_v39  ;;  %2294 = vrot.lane.b32.xlu1 %v9365_v7, %s8275_s28  ;;  %14690 = vst [vmem:[#allocation201_spill] sm:$0xff] %v9434_v34 }
 0x111   : > { %2292 = vrot.lane.b32.xlu0 %v9380_v20, %s8275_s28  ;;  %v9409_v7 = vsel %vm2046_vm1, %v2108_v59, %v2110_v29  ;;  %v9416_v20 = vld [vmem:[%s8335_s22 + $0x110] sm:$0xff]   ;;  %v9446_v42 = vsel %vm2046_vm1, %v2110_v29, %v2112_v35 }
 0x112   : > { %v9399_v18 = vpop.permute.xlu1 %1988  ;;  %14683 = vst [vmem:[#allocation194_spill] sm:$0xff] %v9409_v7  ;;  %14685 = vst [vmem:[#allocation196_spill] sm:$0xff] %v9416_v20 }
 0x113   : > { %14680 = vst [vmem:[#allocation191_spill] sm:$0xff] %v9399_v18  ;;  %v9404_v39 = vpop.permute.xlu0 %1986  ;;  %v2114_v18 = vrot.slane %v9416_v20, 1  ;;  %v2116_v20 = vrot.slane %v9434_v34, 1  ;;  %14693 = vst [vmem:[#allocation204_spill] sm:$0xff] %v9446_v42  ;;  %v9456_v34 = vld [vmem:[%s8335_s22 + $0x128] sm:$0xff]  }
 0x114   : > { %14682 = vst [vmem:[#allocation193_spill] sm:$0xff] %v9404_v39  ;;  %2298 = vrot.lane.b32.xlu1 %v9387_v2, %s8275_s28  ;;  %14696 = vst [vmem:[#allocation207_spill] sm:$0xff] %v9456_v34 }
 0x115   : > { %2296 = vrot.lane.b32.xlu0 %v9402_v8, %s8275_s28  ;;  %v9431_v2 = vsel %vm2046_vm1, %v2112_v35, %v2114_v18  ;;  %v9438_v8 = vld [vmem:[%s8335_s22 + $0x120] sm:$0xff]   ;;  %v9468_v29 = vsel %vm2046_vm1, %v2114_v18, %v2116_v20 }
 0x116   : > { %v9421_v4 = vpop.permute.xlu1 %1992  ;;  %14689 = vst [vmem:[#allocation200_spill] sm:$0xff] %v9431_v2  ;;  %14691 = vst [vmem:[#allocation202_spill] sm:$0xff] %v9438_v8 }
 0x117   : > { %14686 = vst [vmem:[#allocation197_spill] sm:$0xff] %v9421_v4  ;;  %v9426_v39 = vpop.permute.xlu0 %1990  ;;  %v2118_v4 = vrot.slane %v9438_v8, 1  ;;  %v2120_v8 = vrot.slane %v9456_v34, 1  ;;  %14699 = vst [vmem:[#allocation210_spill] sm:$0xff] %v9468_v29  ;;  %v9478_v34 = vld [vmem:[%s8335_s22 + $0x138] sm:$0xff]  }
 0x118   : > { %14688 = vst [vmem:[#allocation199_spill] sm:$0xff] %v9426_v39  ;;  %2302 = vrot.lane.b32.xlu1 %v9409_v7, %s8275_s28  ;;  %14702 = vst [vmem:[#allocation213_spill] sm:$0xff] %v9478_v34 }
 0x119   : > { %2300 = vrot.lane.b32.xlu0 %v9424_v56, %s8275_s28  ;;  %v9453_v7 = vsel %vm2046_vm1, %v2116_v20, %v2118_v4  ;;  %v9460_v56 = vld [vmem:[%s8335_s22 + $0x130] sm:$0xff]   ;;  %v9490_v18 = vsel %vm2046_vm1, %v2118_v4, %v2120_v8 }
 0x11a   : > { %v9443_v59 = vpop.permute.xlu1 %1996  ;;  %14695 = vst [vmem:[#allocation206_spill] sm:$0xff] %v9453_v7  ;;  %14697 = vst [vmem:[#allocation208_spill] sm:$0xff] %v9460_v56 }
 0x11b   : > { %14692 = vst [vmem:[#allocation203_spill] sm:$0xff] %v9443_v59  ;;  %v9448_v39 = vpop.permute.xlu0 %1994  ;;  %v2122_v59 = vrot.slane %v9460_v56, 1  ;;  %v2124_v56 = vrot.slane %v9478_v34, 1  ;;  %14705 = vst [vmem:[#allocation216_spill] sm:$0xff] %v9490_v18  ;;  %v9500_v34 = vld [vmem:[%s8335_s22 + $0x148] sm:$0xff]  }
 0x11c   : > { %14694 = vst [vmem:[#allocation205_spill] sm:$0xff] %v9448_v39  ;;  %2306 = vrot.lane.b32.xlu1 %v9431_v2, %s8275_s28  ;;  %14708 = vst [vmem:[#allocation219_spill] sm:$0xff] %v9500_v34 }
 0x11d   : > { %2304 = vrot.lane.b32.xlu0 %v9446_v42, %s8275_s28  ;;  %v9475_v2 = vsel %vm2046_vm1, %v2120_v8, %v2122_v59  ;;  %v9482_v42 = vld [vmem:[%s8335_s22 + $0x140] sm:$0xff]   ;;  %v9512_v4 = vsel %vm2046_vm1, %v2122_v59, %v2124_v56 }
 0x11e   : > { %v9465_v35 = vpop.permute.xlu1 %2000  ;;  %14701 = vst [vmem:[#allocation212_spill] sm:$0xff] %v9475_v2  ;;  %14703 = vst [vmem:[#allocation214_spill] sm:$0xff] %v9482_v42 }
 0x11f   : > { %14698 = vst [vmem:[#allocation209_spill] sm:$0xff] %v9465_v35  ;;  %v9470_v39 = vpop.permute.xlu0 %1998  ;;  %v2126_v35 = vrot.slane %v9482_v42, 1  ;;  %v2128_v42 = vrot.slane %v9500_v34, 1  ;;  %14711 = vst [vmem:[#allocation222_spill] sm:$0xff] %v9512_v4  ;;  %v9522_v34 = vld [vmem:[%s8335_s22 + $0x158] sm:$0xff]  }
 0x120   : > { %14700 = vst [vmem:[#allocation211_spill] sm:$0xff] %v9470_v39  ;;  %2310 = vrot.lane.b32.xlu1 %v9453_v7, %s8275_s28  ;;  %14714 = vst [vmem:[#allocation225_spill] sm:$0xff] %v9522_v34 }
 0x121   : > { %2308 = vrot.lane.b32.xlu0 %v9468_v29, %s8275_s28  ;;  %v9497_v7 = vsel %vm2046_vm1, %v2124_v56, %v2126_v35  ;;  %v9504_v29 = vld [vmem:[%s8335_s22 + $0x150] sm:$0xff]   ;;  %v9534_v59 = vsel %vm2046_vm1, %v2126_v35, %v2128_v42 }
 0x122   : > { %v9487_v20 = vpop.permute.xlu1 %2004  ;;  %14707 = vst [vmem:[#allocation218_spill] sm:$0xff] %v9497_v7  ;;  %14709 = vst [vmem:[#allocation220_spill] sm:$0xff] %v9504_v29 }
 0x123   : > { %14704 = vst [vmem:[#allocation215_spill] sm:$0xff] %v9487_v20  ;;  %v9492_v39 = vpop.permute.xlu0 %2002  ;;  %v2130_v20 = vrot.slane %v9504_v29, 1  ;;  %v2132_v29 = vrot.slane %v9522_v34, 1  ;;  %14717 = vst [vmem:[#allocation228_spill] sm:$0xff] %v9534_v59  ;;  %v9544_v34 = vld [vmem:[%s8335_s22 + $0x168] sm:$0xff]  }
 0x124   : > { %14706 = vst [vmem:[#allocation217_spill] sm:$0xff] %v9492_v39  ;;  %2314 = vrot.lane.b32.xlu1 %v9475_v2, %s8275_s28  ;;  %14720 = vst [vmem:[#allocation231_spill] sm:$0xff] %v9544_v34 }
 0x125   : > { %2312 = vrot.lane.b32.xlu0 %v9490_v18, %s8275_s28  ;;  %v9519_v2 = vsel %vm2046_vm1, %v2128_v42, %v2130_v20  ;;  %v9526_v18 = vld [vmem:[%s8335_s22 + $0x160] sm:$0xff]   ;;  %v9556_v35 = vsel %vm2046_vm1, %v2130_v20, %v2132_v29 }
 0x126   : > { %v9509_v8 = vpop.permute.xlu1 %2008  ;;  %14713 = vst [vmem:[#allocation224_spill] sm:$0xff] %v9519_v2  ;;  %14715 = vst [vmem:[#allocation226_spill] sm:$0xff] %v9526_v18 }
 0x127   : > { %14710 = vst [vmem:[#allocation221_spill] sm:$0xff] %v9509_v8  ;;  %v9514_v39 = vpop.permute.xlu0 %2006  ;;  %v2134_v8 = vrot.slane %v9526_v18, 1  ;;  %v2136_v18 = vrot.slane %v9544_v34, 1  ;;  %14723 = vst [vmem:[#allocation234_spill] sm:$0xff] %v9556_v35  ;;  %v9566_v34 = vld [vmem:[%s8335_s22 + $0x178] sm:$0xff]  }
 0x128   : > { %14712 = vst [vmem:[#allocation223_spill] sm:$0xff] %v9514_v39  ;;  %2318 = vrot.lane.b32.xlu1 %v9497_v7, %s8275_s28  ;;  %14726 = vst [vmem:[#allocation237_spill] sm:$0xff] %v9566_v34 }
 0x129   : > { %2316 = vrot.lane.b32.xlu0 %v9512_v4, %s8275_s28  ;;  %v9541_v7 = vsel %vm2046_vm1, %v2132_v29, %v2134_v8  ;;  %v9548_v4 = vld [vmem:[%s8335_s22 + $0x170] sm:$0xff]   ;;  %v9578_v20 = vsel %vm2046_vm1, %v2134_v8, %v2136_v18 }
 0x12a   : > { %v9531_v56 = vpop.permute.xlu1 %2012  ;;  %14719 = vst [vmem:[#allocation230_spill] sm:$0xff] %v9541_v7  ;;  %14721 = vst [vmem:[#allocation232_spill] sm:$0xff] %v9548_v4 }
 0x12b   : > { %14716 = vst [vmem:[#allocation227_spill] sm:$0xff] %v9531_v56  ;;  %v9536_v39 = vpop.permute.xlu0 %2010  ;;  %v2138_v56 = vrot.slane %v9548_v4, 1  ;;  %v2140_v4 = vrot.slane %v9566_v34, 1  ;;  %14729 = vst [vmem:[#allocation240_spill] sm:$0xff] %v9578_v20  ;;  %v9588_v34 = vld [vmem:[%s8335_s22 + $0x188] sm:$0xff]  }
 0x12c   : > { %14718 = vst [vmem:[#allocation229_spill] sm:$0xff] %v9536_v39  ;;  %2322 = vrot.lane.b32.xlu1 %v9519_v2, %s8275_s28  ;;  %14732 = vst [vmem:[#allocation243_spill] sm:$0xff] %v9588_v34 }
 0x12d   : > { %2320 = vrot.lane.b32.xlu0 %v9534_v59, %s8275_s28  ;;  %v9563_v2 = vsel %vm2046_vm1, %v2136_v18, %v2138_v56  ;;  %v9570_v59 = vld [vmem:[%s8335_s22 + $0x180] sm:$0xff]   ;;  %v9600_v8 = vsel %vm2046_vm1, %v2138_v56, %v2140_v4 }
 0x12e   : > { %v9553_v42 = vpop.permute.xlu1 %2016  ;;  %14725 = vst [vmem:[#allocation236_spill] sm:$0xff] %v9563_v2  ;;  %14727 = vst [vmem:[#allocation238_spill] sm:$0xff] %v9570_v59 }
 0x12f   : > { %14722 = vst [vmem:[#allocation233_spill] sm:$0xff] %v9553_v42  ;;  %v9558_v39 = vpop.permute.xlu0 %2014  ;;  %v2142_v42 = vrot.slane %v9570_v59, 1  ;;  %v2144_v59 = vrot.slane %v9588_v34, 1  ;;  %14735 = vst [vmem:[#allocation246_spill] sm:$0xff] %v9600_v8  ;;  %v9610_v34 = vld [vmem:[%s8335_s22 + $0x198] sm:$0xff]  }
 0x130   : > { %14724 = vst [vmem:[#allocation235_spill] sm:$0xff] %v9558_v39  ;;  %2326 = vrot.lane.b32.xlu1 %v9541_v7, %s8275_s28  ;;  %14738 = vst [vmem:[#allocation249_spill] sm:$0xff] %v9610_v34 }
 0x131   : > { %2324 = vrot.lane.b32.xlu0 %v9556_v35, %s8275_s28  ;;  %v9585_v7 = vsel %vm2046_vm1, %v2140_v4, %v2142_v42  ;;  %v9592_v35 = vld [vmem:[%s8335_s22 + $0x190] sm:$0xff]   ;;  %v9622_v56 = vsel %vm2046_vm1, %v2142_v42, %v2144_v59 }
 0x132   : > { %v9575_v29 = vpop.permute.xlu1 %2020  ;;  %14731 = vst [vmem:[#allocation242_spill] sm:$0xff] %v9585_v7  ;;  %14733 = vst [vmem:[#allocation244_spill] sm:$0xff] %v9592_v35 }
 0x133   : > { %14728 = vst [vmem:[#allocation239_spill] sm:$0xff] %v9575_v29  ;;  %v9580_v39 = vpop.permute.xlu0 %2018  ;;  %v2146_v29 = vrot.slane %v9592_v35, 1  ;;  %v2148_v35 = vrot.slane %v9610_v34, 1  ;;  %14741 = vst [vmem:[#allocation252_spill] sm:$0xff] %v9622_v56  ;;  %v9632_v34 = vld [vmem:[%s8335_s22 + $0x1a8] sm:$0xff]  }
 0x134   : > { %14730 = vst [vmem:[#allocation241_spill] sm:$0xff] %v9580_v39  ;;  %2330 = vrot.lane.b32.xlu1 %v9563_v2, %s8275_s28  ;;  %14744 = vst [vmem:[#allocation255_spill] sm:$0xff] %v9632_v34 }
 0x135   : > { %2328 = vrot.lane.b32.xlu0 %v9578_v20, %s8275_s28  ;;  %v9607_v2 = vsel %vm2046_vm1, %v2144_v59, %v2146_v29  ;;  %v9614_v20 = vld [vmem:[%s8335_s22 + $0x1a0] sm:$0xff]   ;;  %v9644_v42 = vsel %vm2046_vm1, %v2146_v29, %v2148_v35 }
 0x136   : > { %v9597_v18 = vpop.permute.xlu1 %2024  ;;  %14737 = vst [vmem:[#allocation248_spill] sm:$0xff] %v9607_v2  ;;  %14739 = vst [vmem:[#allocation250_spill] sm:$0xff] %v9614_v20 }
 0x137   : > { %14734 = vst [vmem:[#allocation245_spill] sm:$0xff] %v9597_v18  ;;  %v9602_v39 = vpop.permute.xlu0 %2022  ;;  %v2150_v18 = vrot.slane %v9614_v20, 1  ;;  %v2152_v20 = vrot.slane %v9632_v34, 1  ;;  %14747 = vst [vmem:[#allocation258_spill] sm:$0xff] %v9644_v42  ;;  %v9654_v34 = vld [vmem:[%s8335_s22 + $0x1b8] sm:$0xff]  }
 0x138   : > { %14736 = vst [vmem:[#allocation247_spill] sm:$0xff] %v9602_v39  ;;  %2334 = vrot.lane.b32.xlu1 %v9585_v7, %s8275_s28  ;;  %14750 = vst [vmem:[#allocation261_spill] sm:$0xff] %v9654_v34 }
 0x139   : > { %2332 = vrot.lane.b32.xlu0 %v9600_v8, %s8275_s28  ;;  %v9629_v7 = vsel %vm2046_vm1, %v2148_v35, %v2150_v18  ;;  %v9636_v8 = vld [vmem:[%s8335_s22 + $0x1b0] sm:$0xff]   ;;  %v9666_v29 = vsel %vm2046_vm1, %v2150_v18, %v2152_v20 }
 0x13a   : > { %v9619_v4 = vpop.permute.xlu1 %2028  ;;  %14743 = vst [vmem:[#allocation254_spill] sm:$0xff] %v9629_v7  ;;  %14745 = vst [vmem:[#allocation256_spill] sm:$0xff] %v9636_v8 }
 0x13b   : > { %14740 = vst [vmem:[#allocation251_spill] sm:$0xff] %v9619_v4  ;;  %v9624_v39 = vpop.permute.xlu0 %2026  ;;  %v2154_v4 = vrot.slane %v9636_v8, 1  ;;  %v2156_v8 = vrot.slane %v9654_v34, 1  ;;  %14753 = vst [vmem:[#allocation264_spill] sm:$0xff] %v9666_v29  ;;  %v9676_v34 = vld [vmem:[%s8335_s22 + $0x1c8] sm:$0xff]  }
 0x13c   : > { %14742 = vst [vmem:[#allocation253_spill] sm:$0xff] %v9624_v39  ;;  %2338 = vrot.lane.b32.xlu1 %v9607_v2, %s8275_s28  ;;  %14756 = vst [vmem:[#allocation267_spill] sm:$0xff] %v9676_v34 }
 0x13d   : > { %2336 = vrot.lane.b32.xlu0 %v9622_v56, %s8275_s28  ;;  %v9651_v2 = vsel %vm2046_vm1, %v2152_v20, %v2154_v4  ;;  %v9658_v56 = vld [vmem:[%s8335_s22 + $0x1c0] sm:$0xff]   ;;  %v9688_v18 = vsel %vm2046_vm1, %v2154_v4, %v2156_v8 }
 0x13e   : > { %v9641_v59 = vpop.permute.xlu1 %2032  ;;  %14749 = vst [vmem:[#allocation260_spill] sm:$0xff] %v9651_v2  ;;  %14751 = vst [vmem:[#allocation262_spill] sm:$0xff] %v9658_v56 }
 0x13f   : > { %14746 = vst [vmem:[#allocation257_spill] sm:$0xff] %v9641_v59  ;;  %v9646_v39 = vpop.permute.xlu0 %2030  ;;  %v2158_v59 = vrot.slane %v9658_v56, 1  ;;  %v2160_v56 = vrot.slane %v9676_v34, 1  ;;  %14759 = vst [vmem:[#allocation270_spill] sm:$0xff] %v9688_v18  ;;  %v9698_v34 = vld [vmem:[%s8335_s22 + $0x1d8] sm:$0xff]  }
 0x140   : > { %14748 = vst [vmem:[#allocation259_spill] sm:$0xff] %v9646_v39  ;;  %2342 = vrot.lane.b32.xlu1 %v9629_v7, %s8275_s28  ;;  %14762 = vst [vmem:[#allocation273_spill] sm:$0xff] %v9698_v34 }
 0x141   : > { %2340 = vrot.lane.b32.xlu0 %v9644_v42, %s8275_s28  ;;  %v9673_v7 = vsel %vm2046_vm1, %v2156_v8, %v2158_v59  ;;  %v9680_v42 = vld [vmem:[%s8335_s22 + $0x1d0] sm:$0xff]   ;;  %v9710_v4 = vsel %vm2046_vm1, %v2158_v59, %v2160_v56 }
 0x142   : > { %v9663_v35 = vpop.permute.xlu1 %2036  ;;  %14755 = vst [vmem:[#allocation266_spill] sm:$0xff] %v9673_v7  ;;  %14757 = vst [vmem:[#allocation268_spill] sm:$0xff] %v9680_v42 }
 0x143   : > { %14752 = vst [vmem:[#allocation263_spill] sm:$0xff] %v9663_v35  ;;  %v9668_v39 = vpop.permute.xlu0 %2034  ;;  %v2162_v35 = vrot.slane %v9680_v42, 1  ;;  %v2164_v42 = vrot.slane %v9698_v34, 1  ;;  %14765 = vst [vmem:[#allocation276_spill] sm:$0xff] %v9710_v4  ;;  %v9720_v34 = vld [vmem:[%s8335_s22 + $0x1e8] sm:$0xff]  }
 0x144   : > { %14754 = vst [vmem:[#allocation265_spill] sm:$0xff] %v9668_v39  ;;  %2346 = vrot.lane.b32.xlu1 %v9651_v2, %s8275_s28  ;;  %14768 = vst [vmem:[#allocation279_spill] sm:$0xff] %v9720_v34 }
 0x145   : > { %2344 = vrot.lane.b32.xlu0 %v9666_v29, %s8275_s28  ;;  %v9695_v2 = vsel %vm2046_vm1, %v2160_v56, %v2162_v35  ;;  %v9702_v29 = vld [vmem:[%s8335_s22 + $0x1e0] sm:$0xff]   ;;  %v9732_v59 = vsel %vm2046_vm1, %v2162_v35, %v2164_v42 }
 0x146   : > { %v9685_v20 = vpop.permute.xlu1 %2040  ;;  %14761 = vst [vmem:[#allocation272_spill] sm:$0xff] %v9695_v2  ;;  %14763 = vst [vmem:[#allocation274_spill] sm:$0xff] %v9702_v29 }
 0x147   : > { %14758 = vst [vmem:[#allocation269_spill] sm:$0xff] %v9685_v20  ;;  %v9690_v39 = vpop.permute.xlu0 %2038  ;;  %v2166_v20 = vrot.slane %v9702_v29, 1  ;;  %v2168_v29 = vrot.slane %v9720_v34, 1  ;;  %14771 = vst [vmem:[#allocation282_spill] sm:$0xff] %v9732_v59  ;;  %v9742_v34 = vld [vmem:[%s8335_s22 + $0x1f8] sm:$0xff]  }
 0x148   : > { %14760 = vst [vmem:[#allocation271_spill] sm:$0xff] %v9690_v39  ;;  %2350 = vrot.lane.b32.xlu1 %v9673_v7, %s8275_s28  ;;  %14774 = vst [vmem:[#allocation285_spill] sm:$0xff] %v9742_v34 }
 0x149   : > { %2348 = vrot.lane.b32.xlu0 %v9688_v18, %s8275_s28  ;;  %v9717_v7 = vsel %vm2046_vm1, %v2164_v42, %v2166_v20  ;;  %v9724_v18 = vld [vmem:[%s8335_s22 + $0x1f0] sm:$0xff]   ;;  %v9754_v35 = vsel %vm2046_vm1, %v2166_v20, %v2168_v29 }
 0x14a   : > { %v9707_v8 = vpop.permute.xlu1 %2044  ;;  %14767 = vst [vmem:[#allocation278_spill] sm:$0xff] %v9717_v7  ;;  %14769 = vst [vmem:[#allocation280_spill] sm:$0xff] %v9724_v18 }
 0x14b   : > { %14764 = vst [vmem:[#allocation275_spill] sm:$0xff] %v9707_v8  ;;  %v9712_v39 = vpop.permute.xlu0 %2042  ;;  %v2170_v8 = vrot.slane %v9724_v18, 1  ;;  %v2172_v18 = vrot.slane %v9742_v34, 1  ;;  %14777 = vst [vmem:[#allocation288_spill] sm:$0xff] %v9754_v35  ;;  %v9764_v34 = vld [vmem:[%s8335_s22 + $0x208] sm:$0xff]  }
 0x14c   : > { %14766 = vst [vmem:[#allocation277_spill] sm:$0xff] %v9712_v39  ;;  %2354 = vrot.lane.b32.xlu1 %v9695_v2, %s8275_s28  ;;  %14780 = vst [vmem:[#allocation291_spill] sm:$0xff] %v9764_v34 }
 0x14d   : > { %2352 = vrot.lane.b32.xlu0 %v9710_v4, %s8275_s28  ;;  %v9739_v2 = vsel %vm2046_vm1, %v2168_v29, %v2170_v8  ;;  %v9746_v4 = vld [vmem:[%s8335_s22 + $0x200] sm:$0xff]   ;;  %v9776_v20 = vsel %vm2046_vm1, %v2170_v8, %v2172_v18 }
 0x14e   : > { %v9729_v56 = vpop.permute.xlu1 %2242  ;;  %14773 = vst [vmem:[#allocation284_spill] sm:$0xff] %v9739_v2  ;;  %14775 = vst [vmem:[#allocation286_spill] sm:$0xff] %v9746_v4 }
 0x14f   : > { %14770 = vst [vmem:[#allocation281_spill] sm:$0xff] %v9729_v56  ;;  %v9734_v39 = vpop.permute.xlu0 %2240  ;;  %v2174_v56 = vrot.slane %v9746_v4, 1  ;;  %v2176_v4 = vrot.slane %v9764_v34, 1  ;;  %14783 = vst [vmem:[#allocation294_spill] sm:$0xff] %v9776_v20  ;;  %v9786_v34 = vld [vmem:[%s8335_s22 + $0x218] sm:$0xff]  }
 0x150   : > { %14772 = vst [vmem:[#allocation283_spill] sm:$0xff] %v9734_v39  ;;  %2358 = vrot.lane.b32.xlu1 %v9717_v7, %s8275_s28  ;;  %14786 = vst [vmem:[#allocation297_spill] sm:$0xff] %v9786_v34 }
 0x151   : > { %2356 = vrot.lane.b32.xlu0 %v9732_v59, %s8275_s28  ;;  %v9761_v7 = vsel %vm2046_vm1, %v2172_v18, %v2174_v56  ;;  %v9768_v59 = vld [vmem:[%s8335_s22 + $0x210] sm:$0xff]   ;;  %v9798_v8 = vsel %vm2046_vm1, %v2174_v56, %v2176_v4 }
 0x152   : > { %v9751_v42 = vpop.permute.xlu1 %2246  ;;  %14779 = vst [vmem:[#allocation290_spill] sm:$0xff] %v9761_v7  ;;  %14781 = vst [vmem:[#allocation292_spill] sm:$0xff] %v9768_v59 }
 0x153   : > { %14776 = vst [vmem:[#allocation287_spill] sm:$0xff] %v9751_v42  ;;  %v9756_v39 = vpop.permute.xlu0 %2244  ;;  %v2178_v42 = vrot.slane %v9768_v59, 1  ;;  %v2180_v59 = vrot.slane %v9786_v34, 1  ;;  %14789 = vst [vmem:[#allocation300_spill] sm:$0xff] %v9798_v8  ;;  %v9808_v34 = vld [vmem:[%s8335_s22 + $0x228] sm:$0xff]  }
 0x154   : > { %14778 = vst [vmem:[#allocation289_spill] sm:$0xff] %v9756_v39  ;;  %2362 = vrot.lane.b32.xlu1 %v9739_v2, %s8275_s28  ;;  %14792 = vst [vmem:[#allocation303_spill] sm:$0xff] %v9808_v34 }
 0x155   : > { %2360 = vrot.lane.b32.xlu0 %v9754_v35, %s8275_s28  ;;  %v9783_v2 = vsel %vm2046_vm1, %v2176_v4, %v2178_v42  ;;  %v9790_v35 = vld [vmem:[%s8335_s22 + $0x220] sm:$0xff]   ;;  %v9820_v56 = vsel %vm2046_vm1, %v2178_v42, %v2180_v59 }
 0x156   : > { %v9773_v29 = vpop.permute.xlu1 %2250  ;;  %14785 = vst [vmem:[#allocation296_spill] sm:$0xff] %v9783_v2  ;;  %14787 = vst [vmem:[#allocation298_spill] sm:$0xff] %v9790_v35 }
 0x157   : > { %14782 = vst [vmem:[#allocation293_spill] sm:$0xff] %v9773_v29  ;;  %v9778_v39 = vpop.permute.xlu0 %2248  ;;  %v2182_v29 = vrot.slane %v9790_v35, 1  ;;  %v2184_v35 = vrot.slane %v9808_v34, 1  ;;  %14795 = vst [vmem:[#allocation306_spill] sm:$0xff] %v9820_v56  ;;  %v9830_v34 = vld [vmem:[%s8335_s22 + $0x238] sm:$0xff]  }
 0x158   : > { %14784 = vst [vmem:[#allocation295_spill] sm:$0xff] %v9778_v39  ;;  %2366 = vrot.lane.b32.xlu1 %v9761_v7, %s8275_s28  ;;  %14798 = vst [vmem:[#allocation309_spill] sm:$0xff] %v9830_v34 }
 0x159   : > { %2364 = vrot.lane.b32.xlu0 %v9776_v20, %s8275_s28  ;;  %v9805_v7 = vsel %vm2046_vm1, %v2180_v59, %v2182_v29  ;;  %v9812_v20 = vld [vmem:[%s8335_s22 + $0x230] sm:$0xff]   ;;  %v9842_v42 = vsel %vm2046_vm1, %v2182_v29, %v2184_v35 }
 0x15a   : > { %v9795_v18 = vpop.permute.xlu1 %2254  ;;  %14791 = vst [vmem:[#allocation302_spill] sm:$0xff] %v9805_v7  ;;  %14793 = vst [vmem:[#allocation304_spill] sm:$0xff] %v9812_v20 }
 0x15b   : > { %14788 = vst [vmem:[#allocation299_spill] sm:$0xff] %v9795_v18  ;;  %v9800_v39 = vpop.permute.xlu0 %2252  ;;  %v2186_v18 = vrot.slane %v9812_v20, 1  ;;  %v2188_v20 = vrot.slane %v9830_v34, 1  ;;  %14801 = vst [vmem:[#allocation312_spill] sm:$0xff] %v9842_v42 }
 0x15c   : > { %14790 = vst [vmem:[#allocation301_spill] sm:$0xff] %v9800_v39  ;;  %2370 = vrot.lane.b32.xlu1 %v9783_v2, %s8275_s28 }
 0x15d   : > { %2368 = vrot.lane.b32.xlu0 %v9798_v8, %s8275_s28  ;;  %v9827_v2 = vsel %vm2046_vm1, %v2184_v35, %v2186_v18  ;;  %v2190_v8 = vrot.slane %v9834_v49, 1  ;;  %v2194_v49 = vrot.slane %v8758_v63, 1  ;;  %v9861_v35 = vsel %vm2046_vm1, %v2186_v18, %v2188_v20 }
 0x15e   : > { %v9817_v4 = vpop.permute.xlu1 %2258  ;;  %14797 = vst [vmem:[#allocation308_spill] sm:$0xff] %v9827_v2  ;;  %v2198_v63 = vrot.slane %v8785_v43, 1  ;;  %v2202_v43 = vrot.slane %v8803_v37, 1  ;;  %v2206_v37 = vrot.slane %v8826_v33, 1  ;;  %v2210_v33 = vrot.slane %v8856_v47, 1 }
 0x15f   : > { %14794 = vst [vmem:[#allocation305_spill] sm:$0xff] %v9817_v4  ;;  %v9822_v39 = vpop.permute.xlu0 %2256  ;;  %v2214_v47 = vrot.slane %v8868_v9, 1  ;;  %v2218_v9 = vrot.slane %v8898_v36, 1  ;;  %v2222_v36 = vrot.slane %v8925_v11, 1  ;;  %v2226_v11 = vrot.slane %v8952_v48, 1 }
 0x160   : > { %14796 = vst [vmem:[#allocation307_spill] sm:$0xff] %v9822_v39  ;;  %2374 = vrot.lane.b32.xlu1 %v9805_v7, %s8275_s28  ;;  %v9849_v39 = vsel %vm2046_vm1, %v2188_v20, %v2190_v8  ;;  %v9852_v7 = vld [vmem:[%s8335_s22 + $0x248] sm:$0xff]   ;;  %v2230_v48 = vrot.slane %v8972_v14, 1  ;;  %v2234_v14 = vrot.slane %v8994_v22, 1  ;;  %v14450_v22 = vrot.slane %v9021_v17, 1 }
 0x161   : > { %2372 = vrot.lane.b32.xlu0 %v9820_v56, %s8275_s28  ;;  %v2192_v34 = vrot.slane %v9852_v7, 1 }
 0x162   : > { %v9839_v59 = vpop.permute.xlu1 %2262 }
 0x163   : > { %14800 = vst [vmem:[#allocation311_spill] sm:$0xff] %v9839_v59  ;;  %v9844_v4 = vpop.permute.xlu0 %2260  ;;  %v9877_v20 = vsel %vm2046_vm1, %v2190_v8, %v2192_v34 }
 0x164   : > { %14802 = vst [vmem:[#allocation313_spill] sm:$0xff] %v9844_v4  ;;  %2378 = vrot.lane.b32.xlu1 %v9827_v2, %s8275_s28  ;;  %v9868_v4 = vsel %vm2046_vm1, %v2192_v34, %v2194_v49  ;;  %v2196_v2 = vrot.slane %v8764_v53, 1  ;;  %v2200_v53 = vrot.slane %v8779_v24, 1  ;;  %v2204_v24 = vrot.slane %v8809_v23, 1 }
 0x165   : > { %2376 = vrot.lane.b32.xlu0 %v9842_v42, %s8275_s28  ;;  %v2208_v23 = vrot.slane %v8833_v55, 1  ;;  %v2212_v55 = vrot.slane %v8849_v6, 1  ;;  %v2216_v6 = vrot.slane %v8879_v5, 1  ;;  %v2220_v5 = vrot.slane %v8905_v26, 1 }
 0x166   : > { %v9858_v59 = vpop.permute.xlu1 %2266  ;;  %v9893_v34 = vsel %vm2046_vm1, %v2194_v49, %v2196_v2  ;;  %v9909_v49 = vsel %vm2046_vm1, %v2198_v63, %v2200_v53  ;;  %v2224_v26 = vrot.slane %v8929_v54, 1  ;;  %v2228_v54 = vrot.slane %v8947_v16, 1 }
 0x167   : > { %14803 = vst [vmem:[#allocation314_spill] sm:$0xff] %v9858_v59  ;;  %v9863_v29 = vpop.permute.xlu0 %2264  ;;  %v9884_v59 = vsel %vm2046_vm1, %v2196_v2, %v2198_v63  ;;  %14809 = vst [vmem:[#allocation320_spill] sm:$0xff] %v9893_v34  ;;  %v9925_v63 = vsel %vm2046_vm1, %v2202_v43, %v2204_v24  ;;  %v2232_v16 = vrot.slane %v8977_v19, 1  ;;  %v2236_v19 = vrot.slane %v9001_v28, 1 }
 0x168   : > { %14804 = vst [vmem:[#allocation315_spill] sm:$0xff] %v9863_v29  ;;  %2382 = vrot.lane.b32.xlu1 %v9849_v39, %s8275_s28  ;;  %14807 = vst [vmem:[#allocation318_spill] sm:$0xff] %v9884_v59 }
 0x169   : > { %2380 = vrot.lane.b32.xlu0 %v9861_v35, %s8275_s28  ;;  %14813 = vst [vmem:[#allocation324_spill] sm:$0xff] %v9909_v49  ;;  %14817 = vst [vmem:[#allocation328_spill] sm:$0xff] %v9925_v63 }
 0x16a   : > { %v9874_v42 = vpop.permute.xlu1 %2270 }
 0x16b   : > { %14805 = vst [vmem:[#allocation316_spill] sm:$0xff] %v9874_v42  ;;  %v9879_v18 = vpop.permute.xlu0 %2268  ;;  %v9900_v42 = vsel %vm2046_vm1, %v2200_v53, %v2202_v43  ;;  %v9941_v43 = vsel %vm2046_vm1, %v2206_v37, %v2208_v23 }
 0x16c   : > { %14806 = vst [vmem:[#allocation317_spill] sm:$0xff] %v9879_v18  ;;  %2386 = vrot.lane.b32.xlu1 %v9868_v4, %s8275_s28  ;;  %14811 = vst [vmem:[#allocation322_spill] sm:$0xff] %v9900_v42 }
 0x16d   : > { %2384 = vrot.lane.b32.xlu0 %v9877_v20, %s8275_s28  ;;  %14821 = vst [vmem:[#allocation332_spill] sm:$0xff] %v9941_v43 }
 0x16e   : > { %v9890_v29 = vpop.permute.xlu1 %2274 }
 0x16f   : > { %14808 = vst [vmem:[#allocation319_spill] sm:$0xff] %v9890_v29  ;;  %v9895_v8 = vpop.permute.xlu0 %2272  ;;  %v9916_v29 = vsel %vm2046_vm1, %v2204_v24, %v2206_v37  ;;  %v9957_v37 = vsel %vm2046_vm1, %v2210_v33, %v2212_v55 }
 0x170   : > { %14810 = vst [vmem:[#allocation321_spill] sm:$0xff] %v9895_v8  ;;  %2390 = vrot.lane.b32.xlu1 %v9884_v59, %s8275_s28  ;;  %14815 = vst [vmem:[#allocation326_spill] sm:$0xff] %v9916_v29 }
 0x171   : > { %2388 = vrot.lane.b32.xlu0 %v9893_v34, %s8275_s28  ;;  %14825 = vst [vmem:[#allocation336_spill] sm:$0xff] %v9957_v37 }
 0x172   : > { %v9906_v18 = vpop.permute.xlu1 %2278 }
 0x173   : > { %14812 = vst [vmem:[#allocation323_spill] sm:$0xff] %v9906_v18  ;;  %v9911_v2 = vpop.permute.xlu0 %2276  ;;  %v9932_v18 = vsel %vm2046_vm1, %v2208_v23, %v2210_v33  ;;  %v9973_v33 = vsel %vm2046_vm1, %v2214_v47, %v2216_v6 }
 0x174   : > { %14814 = vst [vmem:[#allocation325_spill] sm:$0xff] %v9911_v2  ;;  %2394 = vrot.lane.b32.xlu1 %v9900_v42, %s8275_s28  ;;  %14819 = vst [vmem:[#allocation330_spill] sm:$0xff] %v9932_v18 }
 0x175   : > { %2392 = vrot.lane.b32.xlu0 %v9909_v49, %s8275_s28  ;;  %14829 = vst [vmem:[#allocation340_spill] sm:$0xff] %v9973_v33 }
 0x176   : > { %v9922_v8 = vpop.permute.xlu1 %2282 }
 0x177   : > { %14816 = vst [vmem:[#allocation327_spill] sm:$0xff] %v9922_v8  ;;  %v9927_v53 = vpop.permute.xlu0 %2280  ;;  %v9948_v8 = vsel %vm2046_vm1, %v2212_v55, %v2214_v47  ;;  %v9989_v47 = vsel %vm2046_vm1, %v2218_v9, %v2220_v5 }
 0x178   : > { %14818 = vst [vmem:[#allocation329_spill] sm:$0xff] %v9927_v53  ;;  %2398 = vrot.lane.b32.xlu1 %v9916_v29, %s8275_s28  ;;  %14823 = vst [vmem:[#allocation334_spill] sm:$0xff] %v9948_v8 }
 0x179   : > { %2396 = vrot.lane.b32.xlu0 %v9925_v63, %s8275_s28  ;;  %14833 = vst [vmem:[#allocation344_spill] sm:$0xff] %v9989_v47 }
 0x17a   : > { %v9938_v2 = vpop.permute.xlu1 %2286 }
 0x17b   : > { %14820 = vst [vmem:[#allocation331_spill] sm:$0xff] %v9938_v2  ;;  %v9943_v24 = vpop.permute.xlu0 %2284  ;;  %v9964_v2 = vsel %vm2046_vm1, %v2216_v6, %v2218_v9  ;;  %v10005_v9 = vsel %vm2046_vm1, %v2222_v36, %v2224_v26 }
 0x17c   : > { %14822 = vst [vmem:[#allocation333_spill] sm:$0xff] %v9943_v24  ;;  %2402 = vrot.lane.b32.xlu1 %v9932_v18, %s8275_s28  ;;  %14827 = vst [vmem:[#allocation338_spill] sm:$0xff] %v9964_v2 }
 0x17d   : > { %2400 = vrot.lane.b32.xlu0 %v9941_v43, %s8275_s28  ;;  %14837 = vst [vmem:[#allocation348_spill] sm:$0xff] %v10005_v9 }
 0x17e   : > { %v9954_v53 = vpop.permute.xlu1 %2290 }
 0x17f   : > { %14824 = vst [vmem:[#allocation335_spill] sm:$0xff] %v9954_v53  ;;  %v9959_v23 = vpop.permute.xlu0 %2288  ;;  %v9980_v53 = vsel %vm2046_vm1, %v2220_v5, %v2222_v36  ;;  %v10021_v36 = vsel %vm2046_vm1, %v2226_v11, %v2228_v54 }
 0x180   : > { %14826 = vst [vmem:[#allocation337_spill] sm:$0xff] %v9959_v23  ;;  %2406 = vrot.lane.b32.xlu1 %v9948_v8, %s8275_s28  ;;  %14831 = vst [vmem:[#allocation342_spill] sm:$0xff] %v9980_v53 }
 0x181   : > { %2404 = vrot.lane.b32.xlu0 %v9957_v37, %s8275_s28  ;;  %14841 = vst [vmem:[#allocation352_spill] sm:$0xff] %v10021_v36 }
 0x182   : > { %v9970_v24 = vpop.permute.xlu1 %2294 }
 0x183   : > { %14828 = vst [vmem:[#allocation339_spill] sm:$0xff] %v9970_v24  ;;  %v9975_v55 = vpop.permute.xlu0 %2292  ;;  %v9996_v24 = vsel %vm2046_vm1, %v2224_v26, %v2226_v11  ;;  %v10037_v11 = vsel %vm2046_vm1, %v2230_v48, %v2232_v16 }
 0x184   : > { %14830 = vst [vmem:[#allocation341_spill] sm:$0xff] %v9975_v55  ;;  %2410 = vrot.lane.b32.xlu1 %v9964_v2, %s8275_s28  ;;  %14835 = vst [vmem:[#allocation346_spill] sm:$0xff] %v9996_v24 }
 0x185   : > { %2408 = vrot.lane.b32.xlu0 %v9973_v33, %s8275_s28  ;;  %14845 = vst [vmem:[#allocation356_spill] sm:$0xff] %v10037_v11 }
 0x186   : > { %v9986_v23 = vpop.permute.xlu1 %2298 }
 0x187   : > { %14832 = vst [vmem:[#allocation343_spill] sm:$0xff] %v9986_v23  ;;  %v9991_v6 = vpop.permute.xlu0 %2296 }
 0x188   : > { %14834 = vst [vmem:[#allocation345_spill] sm:$0xff] %v9991_v6  ;;  %2414 = vrot.lane.b32.xlu1 %v9980_v53, %s8275_s28  ;;  %v10012_v6 = vsel %vm2046_vm1, %v2228_v54, %v2230_v48 }
 0x189   : > { %2412 = vrot.lane.b32.xlu0 %v9989_v47, %s8275_s28  ;;  %14839 = vst [vmem:[#allocation350_spill] sm:$0xff] %v10012_v6 }
 0x18a   : > { %v10002_v55 = vpop.permute.xlu1 %2302 }
 0x18b   : > { %14836 = vst [vmem:[#allocation347_spill] sm:$0xff] %v10002_v55  ;;  %v10007_v5 = vpop.permute.xlu0 %2300  ;;  %v10028_v55 = vsel %vm2046_vm1, %v2232_v16, %v2234_v14 }
 0x18c   : > { %14838 = vst [vmem:[#allocation349_spill] sm:$0xff] %v10007_v5  ;;  %2418 = vrot.lane.b32.xlu1 %v9996_v24, %s8275_s28  ;;  %14843 = vst [vmem:[#allocation354_spill] sm:$0xff] %v10028_v55 }
 0x18d   : > { %2416 = vrot.lane.b32.xlu0 %v10005_v9, %s8275_s28 }
 0x18e   : > { %v10018_v23 = vpop.permute.xlu1 %2306 }
 0x18f   : > { %14840 = vst [vmem:[#allocation351_spill] sm:$0xff] %v10018_v23  ;;  %v10023_v26 = vpop.permute.xlu0 %2304  ;;  %v10046_v23 = vsel %vm2046_vm1, %v2236_v19, %v14450_v22 }
 0x190   : > { %14842 = vst [vmem:[#allocation353_spill] sm:$0xff] %v10023_v26  ;;  %2422 = vrot.lane.b32.xlu1 %v10012_v6, %s8275_s28  ;;  %14847 = vst [vmem:[#allocation358_spill] sm:$0xff] %v10046_v23  ;;  %v14902_v26 = vld [vmem:[#allocation220_spill] sm:$0xff] }
 0x191   : > { %2420 = vrot.lane.b32.xlu0 %v10021_v36, %s8275_s28 }
 0x192   : > { %v10034_v5 = vpop.permute.xlu1 %2310 }
 0x193   : > { %14844 = vst [vmem:[#allocation355_spill] sm:$0xff] %v10034_v5  ;;  %v10039_v54 = vpop.permute.xlu0 %2308  ;;  %v10053_v5 = vsel %vm2046_vm1, %v2234_v14, %v2236_v19 }
 0x194   : > { %14846 = vst [vmem:[#allocation357_spill] sm:$0xff] %v10039_v54  ;;  %2426 = vrot.lane.b32.xlu1 %v10028_v55, %s8275_s28  ;;  %14849 = vst [vmem:[#allocation360_spill] sm:$0xff] %v10053_v5 }
 0x195   : > { %2424 = vrot.lane.b32.xlu0 %v10037_v11, %s8275_s28 }
 0x196   : > { %v10050_v28 = vpop.permute.xlu1 %2314 }
 0x197   : > { %14848 = vst [vmem:[#allocation359_spill] sm:$0xff] %v10050_v28  ;;  %v10055_v48 = vpop.permute.xlu0 %2312 }
 0x198   : > { %14850 = vst [vmem:[#allocation361_spill] sm:$0xff] %v10055_v48  ;;  %2430 = vrot.lane.b32.xlu1 %v10046_v23, %s8275_s28  ;;  %v14898_v48 = vld [vmem:[#allocation214_spill] sm:$0xff] }
 0x199   : > { %2428 = vrot.lane.b32.xlu0 %v10053_v5, %s8275_s28 }
 0x19a   : > { %v10061_v16 = vpop.permute.xlu1 %2318 }
 0x19b   : > { %14851 = vst [vmem:[#allocation362_spill] sm:$0xff] %v10061_v16  ;;  %v10063_v22 = vpop.permute.xlu0 %2316 }
 0x19c   : > { %14852 = vst [vmem:[#allocation363_spill] sm:$0xff] %v10063_v22  ;;  %2434 = vrot.lane.b32.xlu1 %v9093_v21, %s8276_s29 }
 0x19d   : > { %2432 = vrot.lane.b32.xlu0 %v9089_v57, %s8276_s29 }
 0x19e   : > { %v10069_v14 = vpop.permute.xlu1 %2322 }
 0x19f   : > { %14853 = vst [vmem:[#allocation364_spill] sm:$0xff] %v10069_v14  ;;  %v10071_v19 = vpop.permute.xlu0 %2320  ;;  %v14894_v14 = vld [vmem:[#allocation208_spill] sm:$0xff] }
 0x1a0   : > { %14854 = vst [vmem:[#allocation365_spill] sm:$0xff] %v10071_v19  ;;  %2438 = vrot.lane.b32.xlu1 %v9112_v40, %s8276_s29 }
 0x1a1   : > { %2436 = vrot.lane.b32.xlu0 %v9108_v46, %s8276_s29 }
 0x1a2   : > { %v10077_v16 = vpop.permute.xlu1 %2326 }
 0x1a3   : > { %14855 = vst [vmem:[#allocation366_spill] sm:$0xff] %v10077_v16  ;;  %v10079_v22 = vpop.permute.xlu0 %2324 }
 0x1a4   : > { %14856 = vst [vmem:[#allocation367_spill] sm:$0xff] %v10079_v22  ;;  %2442 = vrot.lane.b32.xlu1 %v9131_v41, %s8276_s29  ;;  %v14890_v22 = vld [vmem:[#allocation202_spill] sm:$0xff] }
 0x1a5   : > { %2440 = vrot.lane.b32.xlu0 %v9127_v12, %s8276_s29 }
 0x1a6   : > { %v10085_v21 = vpop.permute.xlu1 %2330 }
 0x1a7   : > { %14857 = vst [vmem:[#allocation368_spill] sm:$0xff] %v10085_v21  ;;  %v10087_v57 = vpop.permute.xlu0 %2328 }
 0x1a8   : > { %14858 = vst [vmem:[#allocation369_spill] sm:$0xff] %v10087_v57  ;;  %2446 = vrot.lane.b32.xlu1 %v9152_v58, %s8276_s29  ;;  %v14886_v57 = vld [vmem:[#allocation196_spill] sm:$0xff] }
 0x1a9   : > { %2444 = vrot.lane.b32.xlu0 %v9148_v60, %s8276_s29 }
 0x1aa   : > { %v10093_v46 = vpop.permute.xlu1 %2334 }
 0x1ab   : > { %14859 = vst [vmem:[#allocation370_spill] sm:$0xff] %v10093_v46  ;;  %v10095_v40 = vpop.permute.xlu0 %2332  ;;  %v14882_v46 = vld [vmem:[#allocation190_spill] sm:$0xff] }
 0x1ac   : > { %14860 = vst [vmem:[#allocation371_spill] sm:$0xff] %v10095_v40  ;;  %2450 = vrot.lane.b32.xlu1 %v9174_v44, %s8276_s29 }
 0x1ad   : > { %2448 = vrot.lane.b32.xlu0 %v9170_v3, %s8276_s29 }
 0x1ae   : > { %v10101_v41 = vpop.permute.xlu1 %2338 }
 0x1af   : > { %14861 = vst [vmem:[#allocation372_spill] sm:$0xff] %v10101_v41  ;;  %v10103_v12 = vpop.permute.xlu0 %2336  ;;  %v15113_v41 = vld [vmem:[#allocation65_spill] sm:$0xff] }
 0x1b0   : > { %14862 = vst [vmem:[#allocation373_spill] sm:$0xff] %v10103_v12  ;;  %2454 = vrot.lane.b32.xlu1 %v9196_v30, %s8276_s29  ;;  %v15116_v12 = vld [vmem:[#allocation75_spill] sm:$0xff] }
 0x1b1   : > { %2452 = vrot.lane.b32.xlu0 %v9192_v62, %s8276_s29 }
 0x1b2   : > { %v10109_v60 = vpop.permute.xlu1 %2342 }
 0x1b3   : > { %14863 = vst [vmem:[#allocation374_spill] sm:$0xff] %v10109_v60  ;;  %v10111_v58 = vpop.permute.xlu0 %2340  ;;  %v15033_v60 = vld [vmem:[#allocation21_spill] sm:$0xff] }
 0x1b4   : > { %14864 = vst [vmem:[#allocation375_spill] sm:$0xff] %v10111_v58  ;;  %2458 = vrot.lane.b32.xlu1 %v9218_v50, %s8276_s29 }
 0x1b5   : > { %2456 = vrot.lane.b32.xlu0 %v9214_v15, %s8276_s29 }
 0x1b6   : > { %v10117_v3 = vpop.permute.xlu1 %2346 }
 0x1b7   : > { %14865 = vst [vmem:[#allocation376_spill] sm:$0xff] %v10117_v3  ;;  %v10119_v44 = vpop.permute.xlu0 %2344  ;;  %v15024_v3 = vld [vmem:[#allocation20_spill] sm:$0xff] }
 0x1b8   : > { %14866 = vst [vmem:[#allocation377_spill] sm:$0xff] %v10119_v44  ;;  %2462 = vrot.lane.b32.xlu1 %v9240_v31, %s8276_s29  ;;  %v15025_v44 = vld [vmem:[#allocation17_spill] sm:$0xff] }
 0x1b9   : > { %2460 = vrot.lane.b32.xlu0 %v9236_v1, %s8276_s29 }
 0x1ba   : > { %v10125_v62 = vpop.permute.xlu1 %2350 }
 0x1bb   : > { %14867 = vst [vmem:[#allocation378_spill] sm:$0xff] %v10125_v62  ;;  %v10127_v30 = vpop.permute.xlu0 %2348  ;;  %v15021_v62 = vld [vmem:[#allocation15_spill] sm:$0xff] }
 0x1bc   : > { %14868 = vst [vmem:[#allocation379_spill] sm:$0xff] %v10127_v30  ;;  %2466 = vrot.lane.b32.xlu1 %v9262_v45, %s8276_s29 }
 0x1bd   : > { %2464 = vrot.lane.b32.xlu0 %v9258_v51, %s8276_s29 }
 0x1be   : > { %v10133_v15 = vpop.permute.xlu1 %2354 }
 0x1bf   : > { %14869 = vst [vmem:[#allocation380_spill] sm:$0xff] %v10133_v15  ;;  %v10135_v50 = vpop.permute.xlu0 %2352  ;;  %v15017_v15 = vld [vmem:[#allocation13_spill] sm:$0xff] }
 0x1c0   : > { %14870 = vst [vmem:[#allocation381_spill] sm:$0xff] %v10135_v50  ;;  %2470 = vrot.lane.b32.xlu1 %v9284_v61, %s8276_s29 }
 0x1c1   : > { %2468 = vrot.lane.b32.xlu0 %v9280_v38, %s8276_s29 }
 0x1c2   : > { %v10141_v1 = vpop.permute.xlu1 %2358 }
 0x1c3   : > { %14871 = vst [vmem:[#allocation382_spill] sm:$0xff] %v10141_v1  ;;  %v10143_v31 = vpop.permute.xlu0 %2356  ;;  %v15009_v1 = vld [vmem:[#allocation9_spill] sm:$0xff] }
 0x1c4   : > { %14872 = vst [vmem:[#allocation383_spill] sm:$0xff] %v10143_v31  ;;  %2474 = vrot.lane.b32.xlu1 %v9306_v32, %s8276_s29  ;;  %v15013_v31 = vld [vmem:[#allocation11_spill] sm:$0xff] }
 0x1c5   : > { %2472 = vrot.lane.b32.xlu0 %v9302_v25, %s8276_s29 }
 0x1c6   : > { %v10149_v51 = vpop.permute.xlu1 %2362 }
 0x1c7   : > { %14873 = vst [vmem:[#allocation384_spill] sm:$0xff] %v10149_v51  ;;  %v10151_v45 = vpop.permute.xlu0 %2360  ;;  %v14996_v51 = vld [vmem:[#allocation6_spill] sm:$0xff] }
 0x1c8   : > { %14874 = vst [vmem:[#allocation385_spill] sm:$0xff] %v10151_v45  ;;  %2478 = vrot.lane.b32.xlu1 %v9328_v27, %s8276_s29  ;;  %v14879_v27 = vld [vmem:[#allocation184_spill] sm:$0xff] }
 0x1c9   : > { %2476 = vrot.lane.b32.xlu0 %v9324_v13, %s8276_s29  ;;  %v15000_v45 = vld [vmem:[#allocation8_spill] sm:$0xff] }
 0x1ca   : > { %v10157_v38 = vpop.permute.xlu1 %2366 }
 0x1cb   : > { %14875 = vst [vmem:[#allocation386_spill] sm:$0xff] %v10157_v38  ;;  %v10159_v61 = vpop.permute.xlu0 %2364 }
 0x1cc   : > { %14876 = vst [vmem:[#allocation387_spill] sm:$0xff] %v10159_v61  ;;  %2482 = vrot.lane.b32.xlu1 %v9350_v10, %s8276_s29  ;;  %v14883_v10 = vld [vmem:[#allocation189_spill] sm:$0xff]  ;;  %v8063_v61 = vld [vmem:[%s8335_s22 + $0x270] sm:$0xff]  }
 0x1cd   : > { %2480 = vrot.lane.b32.xlu0 %v9346_v0, %s8276_s29 }
 0x1ce   : > { %v10165_v25 = vpop.permute.xlu1 %2370 }
 0x1cf   : > { %14877 = vst [vmem:[#allocation388_spill] sm:$0xff] %v10165_v25  ;;  %v10167_v32 = vpop.permute.xlu0 %2368 }
 0x1d0   : > { %14878 = vst [vmem:[#allocation389_spill] sm:$0xff] %v10167_v32  ;;  %2486 = vrot.lane.b32.xlu1 %v9372_v52, %s8276_s29  ;;  %v14887_v52 = vld [vmem:[#allocation195_spill] sm:$0xff] }
 0x1d1   : > { %2484 = vrot.lane.b32.xlu0 %v14879_v27, %s8276_s29 }
 0x1d2   : > { %v10173_v13 = vpop.permute.xlu1 %2374 }
 0x1d3   : > { %14880 = vst [vmem:[#allocation184_spill] sm:$0xff] %v10173_v13  ;;  %v10175_v40 = vpop.permute.xlu0 %2372 }
 0x1d4   : > { %14881 = vst [vmem:[#allocation390_spill] sm:$0xff] %v10175_v40  ;;  %2490 = vrot.lane.b32.xlu1 %v14882_v46, %s8276_s29  ;;  %v14891_v46 = vld [vmem:[#allocation201_spill] sm:$0xff] }
 0x1d5   : > { %2488 = vrot.lane.b32.xlu0 %v14883_v10, %s8276_s29 }
 0x1d6   : > { %v10181_v0 = vpop.permute.xlu1 %2378 }
 0x1d7   : > { %14884 = vst [vmem:[#allocation190_spill] sm:$0xff] %v10181_v0  ;;  %v10183_v21 = vpop.permute.xlu0 %2376 }
 0x1d8   : > { %14885 = vst [vmem:[#allocation189_spill] sm:$0xff] %v10183_v21  ;;  %2494 = vrot.lane.b32.xlu1 %v14886_v57, %s8276_s29  ;;  %v14895_v57 = vld [vmem:[#allocation207_spill] sm:$0xff] }
 0x1d9   : > { %2492 = vrot.lane.b32.xlu0 %v14887_v52, %s8276_s29 }
 0x1da   : > { %v10189_v27 = vpop.permute.xlu1 %2382 }
 0x1db   : > { %14888 = vst [vmem:[#allocation196_spill] sm:$0xff] %v10189_v27  ;;  %v10191_v16 = vpop.permute.xlu0 %2380 }
 0x1dc   : > { %14889 = vst [vmem:[#allocation195_spill] sm:$0xff] %v10191_v16  ;;  %2498 = vrot.lane.b32.xlu1 %v14890_v22, %s8276_s29  ;;  %v14899_v22 = vld [vmem:[#allocation213_spill] sm:$0xff] }
 0x1dd   : > { %2496 = vrot.lane.b32.xlu0 %v14891_v46, %s8276_s29 }
 0x1de   : > { %v10197_v10 = vpop.permute.xlu1 %2386 }
 0x1df   : > { %14892 = vst [vmem:[#allocation202_spill] sm:$0xff] %v10197_v10  ;;  %v10199_v19 = vpop.permute.xlu0 %2384 }
 0x1e0   : > { %14893 = vst [vmem:[#allocation201_spill] sm:$0xff] %v10199_v19  ;;  %2502 = vrot.lane.b32.xlu1 %v14894_v14, %s8276_s29  ;;  %v14903_v14 = vld [vmem:[#allocation219_spill] sm:$0xff]  ;;  %v14950_v19 = vld [vmem:[#allocation292_spill] sm:$0xff] }
 0x1e1   : > { %2500 = vrot.lane.b32.xlu0 %v14895_v57, %s8276_s29 }
 0x1e2   : > { %v10205_v52 = vpop.permute.xlu1 %2390 }
 0x1e3   : > { %14896 = vst [vmem:[#allocation208_spill] sm:$0xff] %v10205_v52  ;;  %v10207_v28 = vpop.permute.xlu0 %2388 }
 0x1e4   : > { %14897 = vst [vmem:[#allocation207_spill] sm:$0xff] %v10207_v28  ;;  %2506 = vrot.lane.b32.xlu1 %v14898_v48, %s8276_s29  ;;  %v14906_v28 = vld [vmem:[#allocation226_spill] sm:$0xff]  ;;  %v14907_v48 = vld [vmem:[#allocation225_spill] sm:$0xff] }
 0x1e5   : > { %2504 = vrot.lane.b32.xlu0 %v14899_v22, %s8276_s29 }
 0x1e6   : > { %v10213_v46 = vpop.permute.xlu1 %2394 }
 0x1e7   : > { %14900 = vst [vmem:[#allocation214_spill] sm:$0xff] %v10213_v46  ;;  %v10215_v54 = vpop.permute.xlu0 %2392 }
 0x1e8   : > { %14901 = vst [vmem:[#allocation213_spill] sm:$0xff] %v10215_v54  ;;  %2510 = vrot.lane.b32.xlu1 %v14902_v26, %s8276_s29  ;;  %v14910_v54 = vld [vmem:[#allocation232_spill] sm:$0xff]  ;;  %v14911_v26 = vld [vmem:[#allocation231_spill] sm:$0xff] }
 0x1e9   : > { %2508 = vrot.lane.b32.xlu0 %v14903_v14, %s8276_s29 }
 0x1ea   : > { %v10221_v57 = vpop.permute.xlu1 %2398 }
 0x1eb   : > { %14904 = vst [vmem:[#allocation220_spill] sm:$0xff] %v10221_v57  ;;  %v10223_v52 = vpop.permute.xlu0 %2396 }
 0x1ec   : > { %14905 = vst [vmem:[#allocation219_spill] sm:$0xff] %v10223_v52  ;;  %2514 = vrot.lane.b32.xlu1 %v14906_v28, %s8276_s29  ;;  %v14914_v52 = vld [vmem:[#allocation238_spill] sm:$0xff]  ;;  %v14915_v28 = vld [vmem:[#allocation237_spill] sm:$0xff] }
 0x1ed   : > { %2512 = vrot.lane.b32.xlu0 %v14907_v48, %s8276_s29 }
 0x1ee   : > { %v10229_v22 = vpop.permute.xlu1 %2402 }
 0x1ef   : > { %14908 = vst [vmem:[#allocation226_spill] sm:$0xff] %v10229_v22  ;;  %v10231_v46 = vpop.permute.xlu0 %2400 }
 0x1f0   : > { %14909 = vst [vmem:[#allocation225_spill] sm:$0xff] %v10231_v46  ;;  %2518 = vrot.lane.b32.xlu1 %v14910_v54, %s8276_s29  ;;  %v14918_v46 = vld [vmem:[#allocation244_spill] sm:$0xff]  ;;  %v14919_v54 = vld [vmem:[#allocation243_spill] sm:$0xff] }
 0x1f1   : > { %2516 = vrot.lane.b32.xlu0 %v14911_v26, %s8276_s29 }
 0x1f2   : > { %v10237_v14 = vpop.permute.xlu1 %2406 }
 0x1f3   : > { %14912 = vst [vmem:[#allocation232_spill] sm:$0xff] %v10237_v14  ;;  %v10239_v57 = vpop.permute.xlu0 %2404 }
 0x1f4   : > { %14913 = vst [vmem:[#allocation231_spill] sm:$0xff] %v10239_v57  ;;  %2522 = vrot.lane.b32.xlu1 %v14914_v52, %s8276_s29  ;;  %v14922_v57 = vld [vmem:[#allocation250_spill] sm:$0xff]  ;;  %v14923_v52 = vld [vmem:[#allocation249_spill] sm:$0xff] }
 0x1f5   : > { %2520 = vrot.lane.b32.xlu0 %v14915_v28, %s8276_s29 }
 0x1f6   : > { %v10245_v48 = vpop.permute.xlu1 %2410 }
 0x1f7   : > { %14916 = vst [vmem:[#allocation238_spill] sm:$0xff] %v10245_v48  ;;  %v10247_v22 = vpop.permute.xlu0 %2408 }
 0x1f8   : > { %14917 = vst [vmem:[#allocation237_spill] sm:$0xff] %v10247_v22  ;;  %2526 = vrot.lane.b32.xlu1 %v14918_v46, %s8276_s29  ;;  %v14926_v22 = vld [vmem:[#allocation256_spill] sm:$0xff]  ;;  %v14927_v46 = vld [vmem:[#allocation255_spill] sm:$0xff] }
 0x1f9   : > { %2524 = vrot.lane.b32.xlu0 %v14919_v54, %s8276_s29 }
 0x1fa   : > { %v10253_v26 = vpop.permute.xlu1 %2414 }
 0x1fb   : > { %14920 = vst [vmem:[#allocation244_spill] sm:$0xff] %v10253_v26  ;;  %v10255_v14 = vpop.permute.xlu0 %2412 }
 0x1fc   : > { %14921 = vst [vmem:[#allocation243_spill] sm:$0xff] %v10255_v14  ;;  %2530 = vrot.lane.b32.xlu1 %v14922_v57, %s8276_s29  ;;  %v14930_v14 = vld [vmem:[#allocation262_spill] sm:$0xff]  ;;  %v14931_v57 = vld [vmem:[#allocation261_spill] sm:$0xff] }
 0x1fd   : > { %2528 = vrot.lane.b32.xlu0 %v14923_v52, %s8276_s29 }
 0x1fe   : > { %v10261_v28 = vpop.permute.xlu1 %2418 }
 0x1ff   : > { %14924 = vst [vmem:[#allocation250_spill] sm:$0xff] %v10261_v28  ;;  %v10263_v48 = vpop.permute.xlu0 %2416 }
 0x200   : > { %14925 = vst [vmem:[#allocation249_spill] sm:$0xff] %v10263_v48  ;;  %2534 = vrot.lane.b32.xlu1 %v14926_v22, %s8276_s29  ;;  %v14934_v48 = vld [vmem:[#allocation268_spill] sm:$0xff]  ;;  %v14935_v22 = vld [vmem:[#allocation267_spill] sm:$0xff] }
 0x201   : > { %2532 = vrot.lane.b32.xlu0 %v14927_v46, %s8276_s29 }
 0x202   : > { %v10269_v54 = vpop.permute.xlu1 %2422 }
 0x203   : > { %14928 = vst [vmem:[#allocation256_spill] sm:$0xff] %v10269_v54  ;;  %v10271_v26 = vpop.permute.xlu0 %2420 }
 0x204   : > { %14929 = vst [vmem:[#allocation255_spill] sm:$0xff] %v10271_v26  ;;  %2538 = vrot.lane.b32.xlu1 %v14930_v14, %s8276_s29  ;;  %v14938_v26 = vld [vmem:[#allocation274_spill] sm:$0xff]  ;;  %v14939_v14 = vld [vmem:[#allocation273_spill] sm:$0xff] }
 0x205   : > { %2536 = vrot.lane.b32.xlu0 %v14931_v57, %s8276_s29 }
 0x206   : > { %v10277_v52 = vpop.permute.xlu1 %2426 }
 0x207   : > { %14932 = vst [vmem:[#allocation262_spill] sm:$0xff] %v10277_v52  ;;  %v10279_v28 = vpop.permute.xlu0 %2424 }
 0x208   : > { %14933 = vst [vmem:[#allocation261_spill] sm:$0xff] %v10279_v28  ;;  %2542 = vrot.lane.b32.xlu1 %v14934_v48, %s8276_s29  ;;  %v14942_v28 = vld [vmem:[#allocation280_spill] sm:$0xff]  ;;  %v14943_v48 = vld [vmem:[#allocation279_spill] sm:$0xff] }
 0x209   : > { %2540 = vrot.lane.b32.xlu0 %v14935_v22, %s8276_s29 }
 0x20a   : > { %v10285_v46 = vpop.permute.xlu1 %2430 }
 0x20b   : > { %14936 = vst [vmem:[#allocation268_spill] sm:$0xff] %v10285_v46  ;;  %v10287_v54 = vpop.permute.xlu0 %2428 }
 0x20c   : > { %14937 = vst [vmem:[#allocation267_spill] sm:$0xff] %v10287_v54  ;;  %2546 = vrot.lane.b32.xlu1 %v14938_v26, %s8276_s29  ;;  %v14946_v54 = vld [vmem:[#allocation286_spill] sm:$0xff]  ;;  %v14947_v26 = vld [vmem:[#allocation285_spill] sm:$0xff] }
 0x20d   : > { %2544 = vrot.lane.b32.xlu0 %v14939_v14, %s8276_s29 }
 0x20e   : > { %v10293_v57 = vpop.permute.xlu1 %2434 }
 0x20f   : > { %14940 = vst [vmem:[#allocation274_spill] sm:$0xff] %v10293_v57  ;;  %v10295_v52 = vpop.permute.xlu0 %2432  ;;  %v15117_v57 = vld [vmem:[#allocation69_spill] sm:$0xff] }
 0x210   : > { %14941 = vst [vmem:[#allocation273_spill] sm:$0xff] %v10295_v52  ;;  %2550 = vrot.lane.b32.xlu1 %v14942_v28, %s8276_s29  ;;  %v14951_v28 = vld [vmem:[#allocation291_spill] sm:$0xff] }
 0x211   : > { %2548 = vrot.lane.b32.xlu0 %v14943_v48, %s8276_s29 }
 0x212   : > { %v10301_v22 = vpop.permute.xlu1 %2438 }
 0x213   : > { %14944 = vst [vmem:[#allocation280_spill] sm:$0xff] %v10301_v22  ;;  %v10303_v46 = vpop.permute.xlu0 %2436  ;;  %v15105_v22 = vld [vmem:[#allocation57_spill] sm:$0xff] }
 0x214   : > { %14945 = vst [vmem:[#allocation279_spill] sm:$0xff] %v10303_v46  ;;  %2554 = vrot.lane.b32.xlu1 %v14946_v54, %s8276_s29  ;;  %v14954_v54 = vld [vmem:[#allocation298_spill] sm:$0xff]  ;;  %v15109_v46 = vld [vmem:[#allocation61_spill] sm:$0xff] }
 0x215   : > { %2552 = vrot.lane.b32.xlu0 %v14947_v26, %s8276_s29  ;;  %v14955_v26 = vld [vmem:[#allocation297_spill] sm:$0xff] }
 0x216   : > { %v10309_v14 = vpop.permute.xlu1 %2442 }
 0x217   : > { %14948 = vst [vmem:[#allocation286_spill] sm:$0xff] %v10309_v14  ;;  %v10311_v10 = vpop.permute.xlu0 %2440 }
 0x218   : > { %14949 = vst [vmem:[#allocation285_spill] sm:$0xff] %v10311_v10  ;;  %2558 = vrot.lane.b32.xlu1 %v14950_v19, %s8276_s29  ;;  %v14958_v19 = vld [vmem:[#allocation304_spill] sm:$0xff]  ;;  %v15029_v10 = vld [vmem:[#allocation19_spill] sm:$0xff] }
 0x219   : > { %2556 = vrot.lane.b32.xlu0 %v14951_v28, %s8276_s29  ;;  %v14959_v28 = vld [vmem:[#allocation303_spill] sm:$0xff] }
 0x21a   : > { %v10317_v48 = vpop.permute.xlu1 %2446 }
 0x21b   : > { %14952 = vst [vmem:[#allocation292_spill] sm:$0xff] %v10317_v48  ;;  %v10319_v27 = vpop.permute.xlu0 %2444  ;;  %v15020_v48 = vld [vmem:[#allocation18_spill] sm:$0xff] }
 0x21c   : > { %14953 = vst [vmem:[#allocation291_spill] sm:$0xff] %v10319_v27  ;;  %2562 = vrot.lane.b32.xlu1 %v14954_v54, %s8276_s29  ;;  %v14962_v54 = vld [vmem:[#allocation310_spill] sm:$0xff] }
 0x21d   : > { %2560 = vrot.lane.b32.xlu0 %v14955_v26, %s8276_s29  ;;  %v14963_v26 = vld [vmem:[#allocation309_spill] sm:$0xff] }
 0x21e   : > { %v10325_v16 = vpop.permute.xlu1 %2450 }
 0x21f   : > { %14956 = vst [vmem:[#allocation298_spill] sm:$0xff] %v10325_v16  ;;  %v10327_v0 = vpop.permute.xlu0 %2448 }
 0x220   : > { %14957 = vst [vmem:[#allocation297_spill] sm:$0xff] %v10327_v0  ;;  %2566 = vrot.lane.b32.xlu1 %v14958_v19, %s8276_s29  ;;  %v8060_v19 = vld [vmem:[%s8335_s22 + $0x250] sm:$0xff]  }
 0x221   : > { %2564 = vrot.lane.b32.xlu0 %v14959_v28, %s8276_s29 }
 0x222   : > { %v10333_v21 = vpop.permute.xlu1 %2454 }
 0x223   : > { %14960 = vst [vmem:[#allocation304_spill] sm:$0xff] %v10333_v21  ;;  %v10335_v13 = vpop.permute.xlu0 %2452  ;;  %v15005_v21 = vld [vmem:[#allocation7_spill] sm:$0xff] }
 0x224   : > { %14961 = vst [vmem:[#allocation303_spill] sm:$0xff] %v10335_v13  ;;  %2570 = vrot.lane.b32.xlu1 %v14962_v54, %s8276_s29  ;;  %v8061_v54 = vld [vmem:[%s8335_s22 + $0x260] sm:$0xff]  }
 0x225   : > { %2568 = vrot.lane.b32.xlu0 %v14963_v26, %s8276_s29  ;;  %v8062_v26 = vld [vmem:[%s8335_s22 + $0x258] sm:$0xff]  }
 0x226   : > { %v10341_v40 = vpop.permute.xlu1 %2458 }
 0x227   : > { %14964 = vst [vmem:[#allocation310_spill] sm:$0xff] %v10341_v40  ;;  %v10343_v25 = vpop.permute.xlu0 %2456  ;;  %v10434_v40 = vld [vmem:[%s8707_s27] sm:$0xff]  }
 0x228   : > { %14965 = vst [vmem:[#allocation309_spill] sm:$0xff] %v10343_v25  ;;  %2574 = vrot.lane.b32.xlu1 %v8060_v19, %s8276_s29  ;;  %v14997_v25 = vld [vmem:[#allocation3_spill] sm:$0xff] }
 0x229   : > { %2572 = vrot.lane.b32.xlu0 %v9852_v7, %s8276_s29  ;;  %v8064_v7 = vld [vmem:[%s8335_s22 + $0x268] sm:$0xff]  }
 0x22a   : > { %v10349_v28 = vpop.permute.xlu1 %2462 }
 0x22b   : > { %14966 = vst [vmem:[#allocation391_spill] sm:$0xff] %v10349_v28  ;;  %v10351_v32 = vpop.permute.xlu0 %2460 }
 0x22c   : > { %14967 = vst [vmem:[#allocation392_spill] sm:$0xff] %v10351_v32  ;;  %2578 = vrot.lane.b32.xlu1 %v8061_v54, %s8276_s29  ;;  %v8065_v32 = vld [vmem:[%s8335_s22 + $0x280] sm:$0xff]  }
 0x22d   : > { %2576 = vrot.lane.b32.xlu0 %v8062_v26, %s8276_s29  ;;  %v8066_v26 = vld [vmem:[%s8335_s22 + $0x278] sm:$0xff]  }
 0x22e   : > { %v10357_v38 = vpop.permute.xlu1 %2466 }
 0x22f   : > { %14968 = vst [vmem:[#allocation393_spill] sm:$0xff] %v10357_v38  ;;  %v10359_v19 = vpop.permute.xlu0 %2464 }
 0x230   : > { %14969 = vst [vmem:[#allocation394_spill] sm:$0xff] %v10359_v19  ;;  %2582 = vrot.lane.b32.xlu1 %v8063_v61, %s8276_s29  ;;  %v8067_v19 = vld [vmem:[%s8335_s22 + $0x290] sm:$0xff]  }
 0x231   : > { %2580 = vrot.lane.b32.xlu0 %v8064_v7, %s8276_s29  ;;  %v8068_v7 = vld [vmem:[%s8335_s22 + $0x288] sm:$0xff]  }
 0x232   : > { %v10365_v28 = vpop.permute.xlu1 %2470 }
 0x233   : > { %14970 = vst [vmem:[#allocation395_spill] sm:$0xff] %v10365_v28  ;;  %v10367_v54 = vpop.permute.xlu0 %2468 }
 0x234   : > { %14971 = vst [vmem:[#allocation396_spill] sm:$0xff] %v10367_v54  ;;  %2586 = vrot.lane.b32.xlu1 %v8065_v32, %s8276_s29  ;;  %v8069_v54 = vld [vmem:[%s8335_s22 + $0x2a0] sm:$0xff]  }
 0x235   : > { %2584 = vrot.lane.b32.xlu0 %v8066_v26, %s8276_s29  ;;  %v8070_v26 = vld [vmem:[%s8335_s22 + $0x298] sm:$0xff]  }
 0x236   : > { %v10373_v38 = vpop.permute.xlu1 %2474 }
 0x237   : > { %14972 = vst [vmem:[#allocation397_spill] sm:$0xff] %v10373_v38  ;;  %v10375_v61 = vpop.permute.xlu0 %2472 }
 0x238   : > { %14973 = vst [vmem:[#allocation398_spill] sm:$0xff] %v10375_v61  ;;  %2590 = vrot.lane.b32.xlu1 %v8067_v19, %s8276_s29  ;;  %v8071_v61 = vld [vmem:[%s8335_s22 + $0x2b0] sm:$0xff]  }
 0x239   : > { %2588 = vrot.lane.b32.xlu0 %v8068_v7, %s8276_s29  ;;  %v8072_v7 = vld [vmem:[%s8335_s22 + $0x2a8] sm:$0xff]  }
 0x23a   : > { %v10381_v28 = vpop.permute.xlu1 %2478 }
 0x23b   : > { %14974 = vst [vmem:[#allocation399_spill] sm:$0xff] %v10381_v28  ;;  %v10383_v32 = vpop.permute.xlu0 %2476 }
 0x23c   : > { %14975 = vst [vmem:[#allocation400_spill] sm:$0xff] %v10383_v32  ;;  %2594 = vrot.lane.b32.xlu1 %v8069_v54, %s8276_s29  ;;  %v8073_v32 = vld [vmem:[%s8335_s22 + $0x2c0] sm:$0xff]  }
 0x23d   : > { %2592 = vrot.lane.b32.xlu0 %v8070_v26, %s8276_s29  ;;  %v8074_v26 = vld [vmem:[%s8335_s22 + $0x2b8] sm:$0xff]  }
 0x23e   : > { %v10389_v38 = vpop.permute.xlu1 %2482 }
 0x23f   : > { %14976 = vst [vmem:[#allocation401_spill] sm:$0xff] %v10389_v38  ;;  %v10391_v19 = vpop.permute.xlu0 %2480 }
 0x240   : > { %14977 = vst [vmem:[#allocation402_spill] sm:$0xff] %v10391_v19  ;;  %2598 = vrot.lane.b32.xlu1 %v8071_v61, %s8276_s29  ;;  %v8075_v19 = vld [vmem:[%s8335_s22 + $0x2d0] sm:$0xff]  }
 0x241   : > { %2596 = vrot.lane.b32.xlu0 %v8072_v7, %s8276_s29  ;;  %v8076_v7 = vld [vmem:[%s8335_s22 + $0x2c8] sm:$0xff]  }
 0x242   : > { %v10397_v28 = vpop.permute.xlu1 %2486 }
 0x243   : > { %14978 = vst [vmem:[#allocation403_spill] sm:$0xff] %v10397_v28  ;;  %v10399_v54 = vpop.permute.xlu0 %2484 }
 0x244   : > { %14979 = vst [vmem:[#allocation404_spill] sm:$0xff] %v10399_v54  ;;  %2602 = vrot.lane.b32.xlu1 %v8073_v32, %s8276_s29  ;;  %v8077_v54 = vld [vmem:[%s8335_s22 + $0x2e0] sm:$0xff]  }
 0x245   : > { %2600 = vrot.lane.b32.xlu0 %v8074_v26, %s8276_s29  ;;  %v8078_v26 = vld [vmem:[%s8335_s22 + $0x2d8] sm:$0xff]  }
 0x246   : > { %v10405_v38 = vpop.permute.xlu1 %2490 }
 0x247   : > { %14980 = vst [vmem:[#allocation405_spill] sm:$0xff] %v10405_v38  ;;  %v10407_v61 = vpop.permute.xlu0 %2488  ;;  %v8079_v38 = vld [vmem:[%s8335_s22 + $0x2f0] sm:$0xff]  }
 0x248   : > { %14981 = vst [vmem:[#allocation406_spill] sm:$0xff] %v10407_v61  ;;  %2606 = vrot.lane.b32.xlu1 %v8075_v19, %s8276_s29 }
 0x249   : > { %2604 = vrot.lane.b32.xlu0 %v8076_v7, %s8276_s29  ;;  %v8080_v7 = vld [vmem:[%s8335_s22 + $0x2e8] sm:$0xff]  }
 0x24a   : > { %v10413_v28 = vpop.permute.xlu1 %2494 }
 0x24b   : > { %14982 = vst [vmem:[#allocation407_spill] sm:$0xff] %v10413_v28  ;;  %v10415_v32 = vpop.permute.xlu0 %2492 }
 0x24c   : > { %14983 = vst [vmem:[#allocation408_spill] sm:$0xff] %v10415_v32  ;;  %2610 = vrot.lane.b32.xlu1 %v8077_v54, %s8276_s29  ;;  %v10439_v54 = vld [vmem:[%s8707_s27 + $0x10] sm:$0xff]  }
 0x24d   : > { %2608 = vrot.lane.b32.xlu0 %v8078_v26, %s8276_s29  ;;  %v8082_v26 = vld [vmem:[%s8335_s22 + $0x2f8] sm:$0xff]  }
 0x24e   : > { %v10421_v61 = vpop.permute.xlu1 %2498 }
 0x24f   : > { %14984 = vst [vmem:[#allocation409_spill] sm:$0xff] %v10421_v61  ;;  %v10423_v19 = vpop.permute.xlu0 %2496 }
 0x250   : > { %14985 = vst [vmem:[#allocation410_spill] sm:$0xff] %v10423_v19  ;;  %2614 = vrot.lane.b32.xlu1 %v8079_v38, %s8276_s29  ;;  %v10446_v38 = vld [vmem:[%s8707_s27 + $0x8] sm:$0xff]  }
 0x251   : > { %2612 = vrot.lane.b32.xlu0 %v8080_v7, %s8276_s29 }
 0x252   : > { %v10429_v28 = vpop.permute.xlu1 %2502 }
 0x253   : > { %14986 = vst [vmem:[#allocation411_spill] sm:$0xff] %v10429_v28  ;;  %v10431_v32 = vpop.permute.xlu0 %2500  ;;  %v14992_v28 = vld [vmem:[#allocation4_spill] sm:$0xff] }
 0x254   : > { %14987 = vst [vmem:[#allocation412_spill] sm:$0xff] %v10431_v32  ;;  %2618 = vrot.lane.b32.xlu1 %v10434_v40, %s8276_s29 }
 0x255   : > { %2616 = vrot.lane.b32.xlu0 %v8082_v26, %s8276_s29  ;;  %v14993_v26 = vld [vmem:[#allocation2_spill] sm:$0xff] }
 0x256   : > { %v10443_v61 = vpop.permute.xlu1 %2506 }
 0x257   : > { %14988 = vst [vmem:[#allocation413_spill] sm:$0xff] %v10443_v61  ;;  %v10448_v19 = vpop.permute.xlu0 %2504 }
 0x258   : > { %14989 = vst [vmem:[#allocation414_spill] sm:$0xff] %v10448_v19  ;;  %2622 = vrot.lane.b32.xlu1 %v10439_v54, %s8276_s29 }
 0x259   : > { %2620 = vrot.lane.b32.xlu0 %v10446_v38, %s8276_s29 }
 0x25a   : > { %v10454_v7 = vpop.permute.xlu1 %2510 }
 0x25b   : > { %14990 = vst [vmem:[#allocation415_spill] sm:$0xff] %v10454_v7  ;;  %v10456_v32 = vpop.permute.xlu0 %2508 }
 0x25c   : > { %14991 = vst [vmem:[#allocation416_spill] sm:$0xff] %v10456_v32  ;;  %2650 = vrot.lane.b32.xlu1 %v14992_v28, %s8277_s30  ;;  %v15001_v28 = vld [vmem:[#allocation5_spill] sm:$0xff] }
 0x25d   : > { %2648 = vrot.lane.b32.xlu0 %v14993_v26, %s8277_s30 }
 0x25e   : > { %v10462_v61 = vpop.permute.xlu1 %2514 }
 0x25f   : > { %14994 = vst [vmem:[#allocation4_spill] sm:$0xff] %v10462_v61  ;;  %v10464_v19 = vpop.permute.xlu0 %2512 }
 0x260   : > { %14995 = vst [vmem:[#allocation2_spill] sm:$0xff] %v10464_v19  ;;  %2654 = vrot.lane.b32.xlu1 %v14996_v51, %s8277_s30  ;;  %v15004_v19 = vld [vmem:[#allocation10_spill] sm:$0xff] }
 0x261   : > { %2652 = vrot.lane.b32.xlu0 %v14997_v25, %s8277_s30 }
 0x262   : > { %v10470_v7 = vpop.permute.xlu1 %2518 }
 0x263   : > { %14998 = vst [vmem:[#allocation6_spill] sm:$0xff] %v10470_v7  ;;  %v10472_v32 = vpop.permute.xlu0 %2516 }
 0x264   : > { %14999 = vst [vmem:[#allocation3_spill] sm:$0xff] %v10472_v32  ;;  %2658 = vrot.lane.b32.xlu1 %v15000_v45, %s8277_s30  ;;  %v15008_v32 = vld [vmem:[#allocation12_spill] sm:$0xff] }
 0x265   : > { %2656 = vrot.lane.b32.xlu0 %v15001_v28, %s8277_s30 }
 0x266   : > { %v10478_v26 = vpop.permute.xlu1 %2522 }
 0x267   : > { %15002 = vst [vmem:[#allocation8_spill] sm:$0xff] %v10478_v26  ;;  %v10480_v61 = vpop.permute.xlu0 %2520 }
 0x268   : > { %15003 = vst [vmem:[#allocation5_spill] sm:$0xff] %v10480_v61  ;;  %2662 = vrot.lane.b32.xlu1 %v15004_v19, %s8277_s30  ;;  %v15012_v61 = vld [vmem:[#allocation14_spill] sm:$0xff] }
 0x269   : > { %2660 = vrot.lane.b32.xlu0 %v15005_v21, %s8277_s30 }
 0x26a   : > { %v10486_v25 = vpop.permute.xlu1 %2526 }
 0x26b   : > { %15006 = vst [vmem:[#allocation10_spill] sm:$0xff] %v10486_v25  ;;  %v10488_v7 = vpop.permute.xlu0 %2524 }
 0x26c   : > { %15007 = vst [vmem:[#allocation7_spill] sm:$0xff] %v10488_v7  ;;  %2666 = vrot.lane.b32.xlu1 %v15008_v32, %s8277_s30  ;;  %v15016_v7 = vld [vmem:[#allocation16_spill] sm:$0xff] }
 0x26d   : > { %2664 = vrot.lane.b32.xlu0 %v15009_v1, %s8277_s30 }
 0x26e   : > { %v10494_v13 = vpop.permute.xlu1 %2530 }
 0x26f   : > { %15010 = vst [vmem:[#allocation9_spill] sm:$0xff] %v10494_v13  ;;  %v10496_v26 = vpop.permute.xlu0 %2528 }
 0x270   : > { %15011 = vst [vmem:[#allocation417_spill] sm:$0xff] %v10496_v26  ;;  %2670 = vrot.lane.b32.xlu1 %v15012_v61, %s8277_s30 }
 0x271   : > { %2668 = vrot.lane.b32.xlu0 %v15013_v31, %s8277_s30 }
 0x272   : > { %v10502_v16 = vpop.permute.xlu1 %2534 }
 0x273   : > { %15014 = vst [vmem:[#allocation418_spill] sm:$0xff] %v10502_v16  ;;  %v10504_v25 = vpop.permute.xlu0 %2532 }
 0x274   : > { %15015 = vst [vmem:[#allocation419_spill] sm:$0xff] %v10504_v25  ;;  %2674 = vrot.lane.b32.xlu1 %v15016_v7, %s8277_s30  ;;  %v2640_v7 = vshrl.u32 %v10439_v54, 16 }
 0x275   : > { %2672 = vrot.lane.b32.xlu0 %v15017_v15, %s8277_s30  ;;  %v15171_v15 = vld [vmem:[#allocation121_spill] sm:$0xff] }
 0x276   : > { %v10510_v0 = vpop.permute.xlu1 %2538 }
 0x277   : > { %15018 = vst [vmem:[#allocation420_spill] sm:$0xff] %v10510_v0  ;;  %v10512_v50 = vpop.permute.xlu0 %2536 }
 0x278   : > { %15019 = vst [vmem:[#allocation421_spill] sm:$0xff] %v10512_v50  ;;  %2678 = vrot.lane.b32.xlu1 %v15020_v48, %s8277_s30  ;;  %v15028_v50 = vld [vmem:[#allocation22_spill] sm:$0xff]  ;;  %v15125_v48 = vld [vmem:[#allocation77_spill] sm:$0xff] }
 0x279   : > { %2676 = vrot.lane.b32.xlu0 %v15021_v62, %s8277_s30 }
 0x27a   : > { %v10518_v27 = vpop.permute.xlu1 %2542 }
 0x27b   : > { %15022 = vst [vmem:[#allocation422_spill] sm:$0xff] %v10518_v27  ;;  %v10520_v30 = vpop.permute.xlu0 %2540 }
 0x27c   : > { %15023 = vst [vmem:[#allocation423_spill] sm:$0xff] %v10520_v30  ;;  %2682 = vrot.lane.b32.xlu1 %v15024_v3, %s8277_s30  ;;  %v15032_v30 = vld [vmem:[#allocation24_spill] sm:$0xff] }
 0x27d   : > { %2680 = vrot.lane.b32.xlu0 %v15025_v44, %s8277_s30  ;;  %v15121_v44 = vld [vmem:[#allocation73_spill] sm:$0xff] }
 0x27e   : > { %v10526_v14 = vpop.permute.xlu1 %2546 }
 0x27f   : > { %15026 = vst [vmem:[#allocation424_spill] sm:$0xff] %v10526_v14  ;;  %v10528_v0 = vpop.permute.xlu0 %2544 }
 0x280   : > { %15027 = vst [vmem:[#allocation425_spill] sm:$0xff] %v10528_v0  ;;  %2686 = vrot.lane.b32.xlu1 %v15028_v50, %s8277_s30  ;;  %v15036_v0 = vld [vmem:[#allocation26_spill] sm:$0xff]  ;;  %v15037_v50 = vld [vmem:[#allocation23_spill] sm:$0xff] }
 0x281   : > { %2684 = vrot.lane.b32.xlu0 %v15029_v10, %s8277_s30  ;;  %v15101_v10 = vld [vmem:[#allocation55_spill] sm:$0xff] }
 0x282   : > { %v10534_v16 = vpop.permute.xlu1 %2550 }
 0x283   : > { %15030 = vst [vmem:[#allocation426_spill] sm:$0xff] %v10534_v16  ;;  %v10536_v27 = vpop.permute.xlu0 %2548 }
 0x284   : > { %15031 = vst [vmem:[#allocation427_spill] sm:$0xff] %v10536_v27  ;;  %2690 = vrot.lane.b32.xlu1 %v15032_v30, %s8277_s30  ;;  %v15040_v27 = vld [vmem:[#allocation28_spill] sm:$0xff]  ;;  %v15041_v30 = vld [vmem:[#allocation25_spill] sm:$0xff] }
 0x285   : > { %2688 = vrot.lane.b32.xlu0 %v15033_v60, %s8277_s30 }
 0x286   : > { %v10542_v25 = vpop.permute.xlu1 %2554 }
 0x287   : > { %15034 = vst [vmem:[#allocation428_spill] sm:$0xff] %v10542_v25  ;;  %v10544_v14 = vpop.permute.xlu0 %2552 }
 0x288   : > { %15035 = vst [vmem:[#allocation429_spill] sm:$0xff] %v10544_v14  ;;  %2694 = vrot.lane.b32.xlu1 %v15036_v0, %s8277_s30  ;;  %v15044_v14 = vld [vmem:[#allocation30_spill] sm:$0xff]  ;;  %v15045_v0 = vld [vmem:[#allocation27_spill] sm:$0xff] }
 0x289   : > { %2692 = vrot.lane.b32.xlu0 %v15037_v50, %s8277_s30 }
 0x28a   : > { %v10550_v58 = vpop.permute.xlu1 %2558 }
 0x28b   : > { %15038 = vst [vmem:[#allocation430_spill] sm:$0xff] %v10550_v58  ;;  %v10552_v16 = vpop.permute.xlu0 %2556 }
 0x28c   : > { %15039 = vst [vmem:[#allocation431_spill] sm:$0xff] %v10552_v16  ;;  %2698 = vrot.lane.b32.xlu1 %v15040_v27, %s8277_s30  ;;  %v15048_v16 = vld [vmem:[#allocation32_spill] sm:$0xff]  ;;  %v15049_v27 = vld [vmem:[#allocation29_spill] sm:$0xff] }
 0x28d   : > { %2696 = vrot.lane.b32.xlu0 %v15041_v30, %s8277_s30 }
 0x28e   : > { %v10558_v60 = vpop.permute.xlu1 %2562 }
 0x28f   : > { %15042 = vst [vmem:[#allocation432_spill] sm:$0xff] %v10558_v60  ;;  %v10560_v25 = vpop.permute.xlu0 %2560 }
 0x290   : > { %15043 = vst [vmem:[#allocation433_spill] sm:$0xff] %v10560_v25  ;;  %2702 = vrot.lane.b32.xlu1 %v15044_v14, %s8277_s30  ;;  %v15052_v25 = vld [vmem:[#allocation34_spill] sm:$0xff]  ;;  %v15053_v14 = vld [vmem:[#allocation31_spill] sm:$0xff] }
 0x291   : > { %2700 = vrot.lane.b32.xlu0 %v15045_v0, %s8277_s30 }
 0x292   : > { %v10566_v50 = vpop.permute.xlu1 %2566 }
 0x293   : > { %15046 = vst [vmem:[#allocation434_spill] sm:$0xff] %v10566_v50  ;;  %v10568_v58 = vpop.permute.xlu0 %2564 }
 0x294   : > { %15047 = vst [vmem:[#allocation435_spill] sm:$0xff] %v10568_v58  ;;  %2706 = vrot.lane.b32.xlu1 %v15048_v16, %s8277_s30  ;;  %v15056_v58 = vld [vmem:[#allocation36_spill] sm:$0xff]  ;;  %v15057_v16 = vld [vmem:[#allocation33_spill] sm:$0xff] }
 0x295   : > { %2704 = vrot.lane.b32.xlu0 %v15049_v27, %s8277_s30 }
 0x296   : > { %v10574_v30 = vpop.permute.xlu1 %2570 }
 0x297   : > { %15050 = vst [vmem:[#allocation436_spill] sm:$0xff] %v10574_v30  ;;  %v10576_v60 = vpop.permute.xlu0 %2568 }
 0x298   : > { %15051 = vst [vmem:[#allocation437_spill] sm:$0xff] %v10576_v60  ;;  %2710 = vrot.lane.b32.xlu1 %v15052_v25, %s8277_s30  ;;  %v15060_v60 = vld [vmem:[#allocation38_spill] sm:$0xff]  ;;  %v15061_v25 = vld [vmem:[#allocation35_spill] sm:$0xff] }
 0x299   : > { %2708 = vrot.lane.b32.xlu0 %v15053_v14, %s8277_s30 }
 0x29a   : > { %v10582_v0 = vpop.permute.xlu1 %2574 }
 0x29b   : > { %15054 = vst [vmem:[#allocation438_spill] sm:$0xff] %v10582_v0  ;;  %v10584_v50 = vpop.permute.xlu0 %2572 }
 0x29c   : > { %15055 = vst [vmem:[#allocation439_spill] sm:$0xff] %v10584_v50  ;;  %2714 = vrot.lane.b32.xlu1 %v15056_v58, %s8277_s30  ;;  %v15064_v50 = vld [vmem:[#allocation40_spill] sm:$0xff]  ;;  %v15065_v58 = vld [vmem:[#allocation37_spill] sm:$0xff] }
 0x29d   : > { %2712 = vrot.lane.b32.xlu0 %v15057_v16, %s8277_s30 }
 0x29e   : > { %v10590_v27 = vpop.permute.xlu1 %2578 }
 0x29f   : > { %15058 = vst [vmem:[#allocation440_spill] sm:$0xff] %v10590_v27  ;;  %v10592_v30 = vpop.permute.xlu0 %2576 }
 0x2a0   : > { %15059 = vst [vmem:[#allocation441_spill] sm:$0xff] %v10592_v30  ;;  %2718 = vrot.lane.b32.xlu1 %v15060_v60, %s8277_s30  ;;  %v15068_v30 = vld [vmem:[#allocation42_spill] sm:$0xff]  ;;  %v15069_v60 = vld [vmem:[#allocation39_spill] sm:$0xff] }
 0x2a1   : > { %2716 = vrot.lane.b32.xlu0 %v15061_v25, %s8277_s30 }
 0x2a2   : > { %v10598_v14 = vpop.permute.xlu1 %2582 }
 0x2a3   : > { %15062 = vst [vmem:[#allocation442_spill] sm:$0xff] %v10598_v14  ;;  %v10600_v0 = vpop.permute.xlu0 %2580 }
 0x2a4   : > { %15063 = vst [vmem:[#allocation443_spill] sm:$0xff] %v10600_v0  ;;  %2722 = vrot.lane.b32.xlu1 %v15064_v50, %s8277_s30  ;;  %v15072_v0 = vld [vmem:[#allocation44_spill] sm:$0xff]  ;;  %v15073_v50 = vld [vmem:[#allocation41_spill] sm:$0xff] }
 0x2a5   : > { %2720 = vrot.lane.b32.xlu0 %v15065_v58, %s8277_s30 }
 0x2a6   : > { %v10606_v16 = vpop.permute.xlu1 %2586 }
 0x2a7   : > { %15066 = vst [vmem:[#allocation444_spill] sm:$0xff] %v10606_v16  ;;  %v10608_v27 = vpop.permute.xlu0 %2584 }
 0x2a8   : > { %15067 = vst [vmem:[#allocation445_spill] sm:$0xff] %v10608_v27  ;;  %2726 = vrot.lane.b32.xlu1 %v15068_v30, %s8277_s30  ;;  %v15076_v27 = vld [vmem:[#allocation46_spill] sm:$0xff]  ;;  %v15077_v30 = vld [vmem:[#allocation43_spill] sm:$0xff] }
 0x2a9   : > { %2724 = vrot.lane.b32.xlu0 %v15069_v60, %s8277_s30 }
 0x2aa   : > { %v10614_v25 = vpop.permute.xlu1 %2590 }
 0x2ab   : > { %15070 = vst [vmem:[#allocation446_spill] sm:$0xff] %v10614_v25  ;;  %v10616_v14 = vpop.permute.xlu0 %2588 }
 0x2ac   : > { %15071 = vst [vmem:[#allocation447_spill] sm:$0xff] %v10616_v14  ;;  %2730 = vrot.lane.b32.xlu1 %v15072_v0, %s8277_s30  ;;  %v15080_v14 = vld [vmem:[#allocation48_spill] sm:$0xff]  ;;  %v15081_v0 = vld [vmem:[#allocation45_spill] sm:$0xff] }
 0x2ad   : > { %2728 = vrot.lane.b32.xlu0 %v15073_v50, %s8277_s30 }
 0x2ae   : > { %v10622_v58 = vpop.permute.xlu1 %2594 }
 0x2af   : > { %15074 = vst [vmem:[#allocation448_spill] sm:$0xff] %v10622_v58  ;;  %v10624_v16 = vpop.permute.xlu0 %2592 }
 0x2b0   : > { %15075 = vst [vmem:[#allocation449_spill] sm:$0xff] %v10624_v16  ;;  %2734 = vrot.lane.b32.xlu1 %v15076_v27, %s8277_s30  ;;  %v15084_v16 = vld [vmem:[#allocation50_spill] sm:$0xff]  ;;  %v15085_v27 = vld [vmem:[#allocation47_spill] sm:$0xff] }
 0x2b1   : > { %2732 = vrot.lane.b32.xlu0 %v15077_v30, %s8277_s30 }
 0x2b2   : > { %v10630_v60 = vpop.permute.xlu1 %2598 }
 0x2b3   : > { %15078 = vst [vmem:[#allocation450_spill] sm:$0xff] %v10630_v60  ;;  %v10632_v25 = vpop.permute.xlu0 %2596 }
 0x2b4   : > { %15079 = vst [vmem:[#allocation451_spill] sm:$0xff] %v10632_v25  ;;  %2738 = vrot.lane.b32.xlu1 %v15080_v14, %s8277_s30  ;;  %v15088_v25 = vld [vmem:[#allocation52_spill] sm:$0xff]  ;;  %v15089_v14 = vld [vmem:[#allocation49_spill] sm:$0xff] }
 0x2b5   : > { %2736 = vrot.lane.b32.xlu0 %v15081_v0, %s8277_s30 }
 0x2b6   : > { %v10638_v50 = vpop.permute.xlu1 %2602 }
 0x2b7   : > { %15082 = vst [vmem:[#allocation452_spill] sm:$0xff] %v10638_v50  ;;  %v10640_v58 = vpop.permute.xlu0 %2600 }
 0x2b8   : > { %15083 = vst [vmem:[#allocation453_spill] sm:$0xff] %v10640_v58  ;;  %2742 = vrot.lane.b32.xlu1 %v15084_v16, %s8277_s30  ;;  %v15092_v58 = vld [vmem:[#allocation54_spill] sm:$0xff]  ;;  %v15093_v16 = vld [vmem:[#allocation51_spill] sm:$0xff] }
 0x2b9   : > { %2740 = vrot.lane.b32.xlu0 %v15085_v27, %s8277_s30 }
 0x2ba   : > { %v10646_v30 = vpop.permute.xlu1 %2606 }
 0x2bb   : > { %15086 = vst [vmem:[#allocation454_spill] sm:$0xff] %v10646_v30  ;;  %v10648_v60 = vpop.permute.xlu0 %2604 }
 0x2bc   : > { %15087 = vst [vmem:[#allocation455_spill] sm:$0xff] %v10648_v60  ;;  %2746 = vrot.lane.b32.xlu1 %v15088_v25, %s8277_s30  ;;  %v15096_v60 = vld [vmem:[#allocation56_spill] sm:$0xff]  ;;  %v15097_v25 = vld [vmem:[#allocation53_spill] sm:$0xff] }
 0x2bd   : > { %2744 = vrot.lane.b32.xlu0 %v15089_v14, %s8277_s30 }
 0x2be   : > { %v10654_v0 = vpop.permute.xlu1 %2610 }
 0x2bf   : > { %15090 = vst [vmem:[#allocation456_spill] sm:$0xff] %v10654_v0  ;;  %v10656_v50 = vpop.permute.xlu0 %2608 }
 0x2c0   : > { %15091 = vst [vmem:[#allocation457_spill] sm:$0xff] %v10656_v50  ;;  %2750 = vrot.lane.b32.xlu1 %v15092_v58, %s8277_s30  ;;  %v15100_v50 = vld [vmem:[#allocation59_spill] sm:$0xff] }
 0x2c1   : > { %2748 = vrot.lane.b32.xlu0 %v15093_v16, %s8277_s30 }
 0x2c2   : > { %v10662_v27 = vpop.permute.xlu1 %2614 }
 0x2c3   : > { %15094 = vst [vmem:[#allocation54_spill] sm:$0xff] %v10662_v27  ;;  %v10664_v30 = vpop.permute.xlu0 %2612 }
 0x2c4   : > { %15095 = vst [vmem:[#allocation458_spill] sm:$0xff] %v10664_v30  ;;  %2754 = vrot.lane.b32.xlu1 %v15096_v60, %s8277_s30  ;;  %v15104_v30 = vld [vmem:[#allocation63_spill] sm:$0xff] }
 0x2c5   : > { %2752 = vrot.lane.b32.xlu0 %v15097_v25, %s8277_s30 }
 0x2c6   : > { %v10670_v14 = vpop.permute.xlu1 %2618 }
 0x2c7   : > { %15098 = vst [vmem:[#allocation56_spill] sm:$0xff] %v10670_v14  ;;  %v10672_v0 = vpop.permute.xlu0 %2616 }
 0x2c8   : > { %15099 = vst [vmem:[#allocation53_spill] sm:$0xff] %v10672_v0  ;;  %2758 = vrot.lane.b32.xlu1 %v15100_v50, %s8277_s30  ;;  %v15108_v0 = vld [vmem:[#allocation67_spill] sm:$0xff] }
 0x2c9   : > { %2756 = vrot.lane.b32.xlu0 %v15101_v10, %s8277_s30 }
 0x2ca   : > { %v10678_v16 = vpop.permute.xlu1 %2622 }
 0x2cb   : > { %15102 = vst [vmem:[#allocation59_spill] sm:$0xff] %v10678_v16  ;;  %v10680_v27 = vpop.permute.xlu0 %2620 }
 0x2cc   : > { %15103 = vst [vmem:[#allocation55_spill] sm:$0xff] %v10680_v27  ;;  %2762 = vrot.lane.b32.xlu1 %v15104_v30, %s8277_s30  ;;  %v15112_v27 = vld [vmem:[#allocation71_spill] sm:$0xff] }
 0x2cd   : > { %2760 = vrot.lane.b32.xlu0 %v15105_v22, %s8277_s30 }
 0x2ce   : > { %v10686_v3 = vpop.permute.xlu1 %2650 }
 0x2cf   : > { %15106 = vst [vmem:[#allocation57_spill] sm:$0xff] %v10686_v3  ;;  %v10688_v14 = vpop.permute.xlu0 %2648 }
 0x2d0   : > { %15107 = vst [vmem:[#allocation459_spill] sm:$0xff] %v10688_v14  ;;  %2766 = vrot.lane.b32.xlu1 %v15108_v0, %s8277_s30 }
 0x2d1   : > { %2764 = vrot.lane.b32.xlu0 %v15109_v46, %s8277_s30  ;;  %v15304_v46 = vld [vmem:[#allocation284_spill] sm:$0xff] }
 0x2d2   : > { %v10694_v13 = vpop.permute.xlu1 %2654 }
 0x2d3   : > { %15110 = vst [vmem:[#allocation460_spill] sm:$0xff] %v10694_v13  ;;  %v10696_v16 = vpop.permute.xlu0 %2652 }
 0x2d4   : > { %15111 = vst [vmem:[#allocation461_spill] sm:$0xff] %v10696_v16  ;;  %2770 = vrot.lane.b32.xlu1 %v15112_v27, %s8277_s30  ;;  %v15120_v16 = vld [vmem:[#allocation79_spill] sm:$0xff] }
 0x2d5   : > { %2768 = vrot.lane.b32.xlu0 %v15113_v41, %s8277_s30 }
 0x2d6   : > { %v10702_v26 = vpop.permute.xlu1 %2658 }
 0x2d7   : > { %15114 = vst [vmem:[#allocation462_spill] sm:$0xff] %v10702_v26  ;;  %v10704_v3 = vpop.permute.xlu0 %2656 }
 0x2d8   : > { %15115 = vst [vmem:[#allocation463_spill] sm:$0xff] %v10704_v3  ;;  %2774 = vrot.lane.b32.xlu1 %v15116_v12, %s8277_s30  ;;  %v15124_v3 = vld [vmem:[#allocation83_spill] sm:$0xff] }
 0x2d9   : > { %2772 = vrot.lane.b32.xlu0 %v15117_v57, %s8277_s30 }
 0x2da   : > { %v10710_v14 = vpop.permute.xlu1 %2662 }
 0x2db   : > { %15118 = vst [vmem:[#allocation464_spill] sm:$0xff] %v10710_v14  ;;  %v10712_v13 = vpop.permute.xlu0 %2660 }
 0x2dc   : > { %15119 = vst [vmem:[#allocation465_spill] sm:$0xff] %v10712_v13  ;;  %2778 = vrot.lane.b32.xlu1 %v15120_v16, %s8277_s30  ;;  %v15128_v13 = vld [vmem:[#allocation87_spill] sm:$0xff]  ;;  %v15129_v16 = vld [vmem:[#allocation81_spill] sm:$0xff] }
 0x2dd   : > { %2776 = vrot.lane.b32.xlu0 %v15121_v44, %s8277_s30 }
 0x2de   : > { %v10718_v52 = vpop.permute.xlu1 %2666 }
 0x2df   : > { %15122 = vst [vmem:[#allocation466_spill] sm:$0xff] %v10718_v52  ;;  %v10720_v26 = vpop.permute.xlu0 %2664 }
 0x2e0   : > { %15123 = vst [vmem:[#allocation467_spill] sm:$0xff] %v10720_v26  ;;  %2782 = vrot.lane.b32.xlu1 %v15124_v3, %s8277_s30  ;;  %v15132_v26 = vld [vmem:[#allocation91_spill] sm:$0xff]  ;;  %v15133_v3 = vld [vmem:[#allocation85_spill] sm:$0xff] }
 0x2e1   : > { %2780 = vrot.lane.b32.xlu0 %v15125_v48, %s8277_s30 }
 0x2e2   : > { %v10726_v12 = vpop.permute.xlu1 %2670 }
 0x2e3   : > { %15126 = vst [vmem:[#allocation468_spill] sm:$0xff] %v10726_v12  ;;  %v10728_v14 = vpop.permute.xlu0 %2668 }
 0x2e4   : > { %15127 = vst [vmem:[#allocation469_spill] sm:$0xff] %v10728_v14  ;;  %2786 = vrot.lane.b32.xlu1 %v15128_v13, %s8277_s30  ;;  %v15136_v14 = vld [vmem:[#allocation95_spill] sm:$0xff]  ;;  %v15137_v13 = vld [vmem:[#allocation89_spill] sm:$0xff] }
 0x2e5   : > { %2784 = vrot.lane.b32.xlu0 %v15129_v16, %s8277_s30 }
 0x2e6   : > { %v10734_v44 = vpop.permute.xlu1 %2674 }
 0x2e7   : > { %15130 = vst [vmem:[#allocation470_spill] sm:$0xff] %v10734_v44  ;;  %v10736_v52 = vpop.permute.xlu0 %2672 }
 0x2e8   : > { %15131 = vst [vmem:[#allocation471_spill] sm:$0xff] %v10736_v52  ;;  %2790 = vrot.lane.b32.xlu1 %v15132_v26, %s8277_s30  ;;  %v15140_v52 = vld [vmem:[#allocation99_spill] sm:$0xff]  ;;  %v15141_v26 = vld [vmem:[#allocation93_spill] sm:$0xff] }
 0x2e9   : > { %2788 = vrot.lane.b32.xlu0 %v15133_v3, %s8277_s30 }
 0x2ea   : > { %v10742_v48 = vpop.permute.xlu1 %2678 }
 0x2eb   : > { %15134 = vst [vmem:[#allocation472_spill] sm:$0xff] %v10742_v48  ;;  %v10744_v12 = vpop.permute.xlu0 %2676 }
 0x2ec   : > { %15135 = vst [vmem:[#allocation473_spill] sm:$0xff] %v10744_v12  ;;  %2794 = vrot.lane.b32.xlu1 %v15136_v14, %s8277_s30  ;;  %v15144_v12 = vld [vmem:[#allocation103_spill] sm:$0xff]  ;;  %v15145_v14 = vld [vmem:[#allocation97_spill] sm:$0xff] }
 0x2ed   : > { %2792 = vrot.lane.b32.xlu0 %v15137_v13, %s8277_s30 }
 0x2ee   : > { %v10750_v16 = vpop.permute.xlu1 %2682 }
 0x2ef   : > { %15138 = vst [vmem:[#allocation474_spill] sm:$0xff] %v10750_v16  ;;  %v10752_v44 = vpop.permute.xlu0 %2680 }
 0x2f0   : > { %15139 = vst [vmem:[#allocation475_spill] sm:$0xff] %v10752_v44  ;;  %2798 = vrot.lane.b32.xlu1 %v15140_v52, %s8277_s30  ;;  %v15148_v44 = vld [vmem:[#allocation107_spill] sm:$0xff]  ;;  %v15149_v52 = vld [vmem:[#allocation101_spill] sm:$0xff] }
 0x2f1   : > { %2796 = vrot.lane.b32.xlu0 %v15141_v26, %s8277_s30 }
 0x2f2   : > { %v10758_v3 = vpop.permute.xlu1 %2686 }
 0x2f3   : > { %15142 = vst [vmem:[#allocation476_spill] sm:$0xff] %v10758_v3  ;;  %v10760_v48 = vpop.permute.xlu0 %2684 }
 0x2f4   : > { %15143 = vst [vmem:[#allocation477_spill] sm:$0xff] %v10760_v48  ;;  %2802 = vrot.lane.b32.xlu1 %v15144_v12, %s8277_s30  ;;  %v15152_v48 = vld [vmem:[#allocation111_spill] sm:$0xff]  ;;  %v15153_v12 = vld [vmem:[#allocation105_spill] sm:$0xff] }
 0x2f5   : > { %2800 = vrot.lane.b32.xlu0 %v15145_v14, %s8277_s30  ;;  %v15160_v14 = vld [vmem:[#allocation119_spill] sm:$0xff] }
 0x2f6   : > { %v10766_v13 = vpop.permute.xlu1 %2690 }
 0x2f7   : > { %15146 = vst [vmem:[#allocation478_spill] sm:$0xff] %v10766_v13  ;;  %v10768_v16 = vpop.permute.xlu0 %2688 }
 0x2f8   : > { %15147 = vst [vmem:[#allocation479_spill] sm:$0xff] %v10768_v16  ;;  %2806 = vrot.lane.b32.xlu1 %v15148_v44, %s8277_s30  ;;  %v15156_v44 = vld [vmem:[#allocation115_spill] sm:$0xff] }
 0x2f9   : > { %2804 = vrot.lane.b32.xlu0 %v15149_v52, %s8277_s30  ;;  %v15157_v52 = vld [vmem:[#allocation109_spill] sm:$0xff] }
 0x2fa   : > { %v10774_v26 = vpop.permute.xlu1 %2694 }
 0x2fb   : > { %15150 = vst [vmem:[#allocation480_spill] sm:$0xff] %v10774_v26  ;;  %v10776_v3 = vpop.permute.xlu0 %2692 }
 0x2fc   : > { %15151 = vst [vmem:[#allocation481_spill] sm:$0xff] %v10776_v3  ;;  %2810 = vrot.lane.b32.xlu1 %v15152_v48, %s8277_s30  ;;  %v15161_v48 = vld [vmem:[#allocation113_spill] sm:$0xff] }
 0x2fd   : > { %2808 = vrot.lane.b32.xlu0 %v15153_v12, %s8277_s30 }
 0x2fe   : > { %v10782_v13 = vpop.permute.xlu1 %2698 }
 0x2ff   : > { %15154 = vst [vmem:[#allocation482_spill] sm:$0xff] %v10782_v13  ;;  %v10784_v16 = vpop.permute.xlu0 %2696 }
 0x300   : > { %15155 = vst [vmem:[#allocation483_spill] sm:$0xff] %v10784_v16  ;;  %2814 = vrot.lane.b32.xlu1 %v15156_v44, %s8277_s30  ;;  %v15164_v16 = vld [vmem:[#allocation123_spill] sm:$0xff]  ;;  %v2624_v44 = vshrl.u32 %v10434_v40, 16 }
 0x301   : > { %2812 = vrot.lane.b32.xlu0 %v15157_v52, %s8277_s30  ;;  %v2628_v52 = vshll.u32 %v10446_v38, 16 }
 0x302   : > { %v10790_v26 = vpop.permute.xlu1 %2702 }
 0x303   : > { %15158 = vst [vmem:[#allocation484_spill] sm:$0xff] %v10790_v26  ;;  %v10792_v3 = vpop.permute.xlu0 %2700  ;;  %v10807_v26 = vld [vmem:[%s8707_s27 + $0x18] sm:$0xff]   ;;  %v2630_v57 = vrot.slane %v2628_v52, 1 }
 0x304   : > { %15159 = vst [vmem:[#allocation485_spill] sm:$0xff] %v10792_v3  ;;  %2818 = vrot.lane.b32.xlu1 %v15160_v14, %s8277_s30  ;;  %15165 = vst [vmem:[#allocation488_spill] sm:$0xff] %v10807_v26  ;;  %v2636_v3 = vshll.u32 %v10439_v54, 16  ;;  %v15166_v14 = vld [vmem:[#allocation117_spill] sm:$0xff]  ;;  %v2644_v27 = vshll.u32 %v10807_v26, 16 }
 0x305   : > { %2816 = vrot.lane.b32.xlu0 %v15161_v48, %s8277_s30  ;;  %v15177_v52 = vld [vmem:[#allocation125_spill] sm:$0xff] }
 0x306   : > { %v10798_v12 = vpop.permute.xlu1 %2706  ;;  %v2638_v40 = vrot.slane %v2636_v3, 1 }
 0x307   : > { %15162 = vst [vmem:[#allocation486_spill] sm:$0xff] %v10798_v12  ;;  %v10800_v13 = vpop.permute.xlu0 %2704  ;;  %v15170_v12 = vld [vmem:[#allocation126_spill] sm:$0xff] }
 0x308   : > { %15163 = vst [vmem:[#allocation487_spill] sm:$0xff] %v10800_v13  ;;  %2822 = vrot.lane.b32.xlu1 %v15164_v16, %s8277_s30  ;;  %v15169_v13 = vld [vmem:[#allocation128_spill] sm:$0xff]  ;;  %v2626_v16 = vor.u32 %v2624_v44, %v15170_v12  ;;  %v2642_v3 = vor.u32 %v2640_v7, %v2638_v40  ;;  %v10833_v44 = vrot.slane %v2644_v27, 1 }
 0x309   : > { %2820 = vrot.lane.b32.xlu0 %v15166_v14, %s8277_s30 }
 0x30a   : > { %v10812_v62 = vpop.permute.xlu1 %2710  ;;  %v10831_v12 = vsel %vm1081_vm0, %v2626_v16, %v2630_v57  ;;  %15176 = vst [vmem:[#allocation493_spill] sm:$0xff] %v10833_v44  ;;  %v15181_v16 = vld [vmem:[#allocation130_spill] sm:$0xff] }
 0x30b   : > { %15167 = vst [vmem:[#allocation489_spill] sm:$0xff] %v10812_v62  ;;  %v10814_v48 = vpop.permute.xlu0 %2708  ;;  %v2632_v62 = vshrl.u32 %v10446_v38, 16  ;;  %15175 = vst [vmem:[#allocation492_spill] sm:$0xff] %v10831_v12 }
 0x30c   : > { %15168 = vst [vmem:[#allocation490_spill] sm:$0xff] %v10814_v48  ;;  %2826 = vrot.lane.b32.xlu1 %v15169_v13, %s8277_s30  ;;  %v15174_v48 = vld [vmem:[#allocation132_spill] sm:$0xff] }
 0x30d   : > { %2824 = vrot.lane.b32.xlu0 %v15171_v15, %s8277_s30  ;;  %v2634_v15 = vor.u32 %v2632_v62, %v2630_v57 }
 0x30e   : > { %v10823_v41 = vpop.permute.xlu1 %2714 }
 0x30f   : > { %15172 = vst [vmem:[#allocation126_spill] sm:$0xff] %v10823_v41  ;;  %v10826_v14 = vpop.permute.xlu0 %2712  ;;  %v10852_v7 = vsel %vm1081_vm0, %v2634_v15, %v2638_v40 }
 0x310   : > { %15173 = vst [vmem:[#allocation491_spill] sm:$0xff] %v10826_v14  ;;  %2830 = vrot.lane.b32.xlu1 %v15174_v48, %s8277_s30  ;;  %v10845_v14 = vsel %vm1081_vm0, %v2642_v3, %v10833_v44  ;;  %15183 = vst [vmem:[#allocation498_spill] sm:$0xff] %v10852_v7  ;;  %v15187_v3 = vld [vmem:[#allocation141_spill] sm:$0xff]  ;;  %v15204_v44 = vld [vmem:[#allocation151_spill] sm:$0xff] }
 0x311   : > { %2828 = vrot.lane.b32.xlu0 %v15177_v52, %s8277_s30  ;;  %15180 = vst [vmem:[#allocation496_spill] sm:$0xff] %v10845_v14  ;;  %v15212_v52 = vld [vmem:[#allocation159_spill] sm:$0xff] }
 0x312   : > { %v10837_v13 = vpop.permute.xlu1 %2718 }
 0x313   : > { %15178 = vst [vmem:[#allocation494_spill] sm:$0xff] %v10837_v13  ;;  %v10839_v41 = vpop.permute.xlu0 %2716  ;;  %v15195_v13 = vld [vmem:[#allocation149_spill] sm:$0xff] }
 0x314   : > { %15179 = vst [vmem:[#allocation495_spill] sm:$0xff] %v10839_v41  ;;  %2834 = vrot.lane.b32.xlu1 %v10831_v12, %s8277_s30  ;;  %v15192_v41 = vld [vmem:[#allocation139_spill] sm:$0xff] }
 0x315   : > { %2832 = vrot.lane.b32.xlu0 %v15181_v16, %s8277_s30  ;;  %v15208_v12 = vld [vmem:[#allocation155_spill] sm:$0xff] }
 0x316   : > { %v10849_v27 = vpop.permute.xlu1 %2722 }
 0x317   : > { %15182 = vst [vmem:[#allocation497_spill] sm:$0xff] %v10849_v27  ;;  %v10854_v48 = vpop.permute.xlu0 %2720  ;;  %v15188_v27 = vld [vmem:[#allocation136_spill] sm:$0xff] }
 0x318   : > { %15184 = vst [vmem:[#allocation499_spill] sm:$0xff] %v10854_v48  ;;  %2838 = vrot.lane.b32.xlu1 %v10845_v14, %s8277_s30  ;;  %v15191_v48 = vld [vmem:[#allocation145_spill] sm:$0xff]  ;;  %v15200_v14 = vld [vmem:[#allocation147_spill] sm:$0xff] }
 0x319   : > { %2836 = vrot.lane.b32.xlu0 %v10852_v7, %s8277_s30 }
 0x31a   : > { %v10860_v62 = vpop.permute.xlu1 %2726 }
 0x31b   : > { %15185 = vst [vmem:[#allocation500_spill] sm:$0xff] %v10860_v62  ;;  %v10862_v57 = vpop.permute.xlu0 %2724 }
 0x31c   : > { %15186 = vst [vmem:[#allocation501_spill] sm:$0xff] %v10862_v57  ;;  %2848 = vrot.lane.b32.xlu1 %v15187_v3, %s8278_s5  ;;  %v15196_v3 = vld [vmem:[#allocation143_spill] sm:$0xff] }
 0x31d   : > { %2846 = vrot.lane.b32.xlu0 %v15188_v27, %s8278_s5 }
 0x31e   : > { %v10868_v15 = vpop.permute.xlu1 %2730 }
 0x31f   : > { %15189 = vst [vmem:[#allocation141_spill] sm:$0xff] %v10868_v15  ;;  %v10870_v40 = vpop.permute.xlu0 %2728 }
 0x320   : > { %15190 = vst [vmem:[#allocation136_spill] sm:$0xff] %v10870_v40  ;;  %2852 = vrot.lane.b32.xlu1 %v15191_v48, %s8278_s5  ;;  %v15199_v40 = vld [vmem:[#allocation153_spill] sm:$0xff] }
 0x321   : > { %2850 = vrot.lane.b32.xlu0 %v15192_v41, %s8278_s5 }
 0x322   : > { %v10876_v62 = vpop.permute.xlu1 %2734 }
 0x323   : > { %15193 = vst [vmem:[#allocation145_spill] sm:$0xff] %v10876_v62  ;;  %v10878_v57 = vpop.permute.xlu0 %2732 }
 0x324   : > { %15194 = vst [vmem:[#allocation139_spill] sm:$0xff] %v10878_v57  ;;  %2856 = vrot.lane.b32.xlu1 %v15195_v13, %s8278_s5  ;;  %v15203_v57 = vld [vmem:[#allocation157_spill] sm:$0xff] }
 0x325   : > { %2854 = vrot.lane.b32.xlu0 %v15196_v3, %s8278_s5 }
 0x326   : > { %v10884_v27 = vpop.permute.xlu1 %2738 }
 0x327   : > { %15197 = vst [vmem:[#allocation149_spill] sm:$0xff] %v10884_v27  ;;  %v10886_v15 = vpop.permute.xlu0 %2736 }
 0x328   : > { %15198 = vst [vmem:[#allocation143_spill] sm:$0xff] %v10886_v15  ;;  %2860 = vrot.lane.b32.xlu1 %v15199_v40, %s8278_s5  ;;  %v15207_v15 = vld [vmem:[#allocation161_spill] sm:$0xff] }
 0x329   : > { %2858 = vrot.lane.b32.xlu0 %v15200_v14, %s8278_s5 }
 0x32a   : > { %v10892_v41 = vpop.permute.xlu1 %2742 }
 0x32b   : > { %15201 = vst [vmem:[#allocation153_spill] sm:$0xff] %v10892_v41  ;;  %v10894_v62 = vpop.permute.xlu0 %2740 }
 0x32c   : > { %15202 = vst [vmem:[#allocation147_spill] sm:$0xff] %v10894_v62  ;;  %2864 = vrot.lane.b32.xlu1 %v15203_v57, %s8278_s5  ;;  %v15211_v62 = vld [vmem:[#allocation165_spill] sm:$0xff]  ;;  %v15300_v57 = vld [vmem:[#allocation278_spill] sm:$0xff] }
 0x32d   : > { %2862 = vrot.lane.b32.xlu0 %v15204_v44, %s8278_s5 }
 0x32e   : > { %v10900_v7 = vpop.permute.xlu1 %2746 }
 0x32f   : > { %15205 = vst [vmem:[#allocation151_spill] sm:$0xff] %v10900_v7  ;;  %v10902_v27 = vpop.permute.xlu0 %2744 }
 0x330   : > { %15206 = vst [vmem:[#allocation502_spill] sm:$0xff] %v10902_v27  ;;  %2868 = vrot.lane.b32.xlu1 %v15207_v15, %s8278_s5  ;;  %v15215_v27 = vld [vmem:[#allocation169_spill] sm:$0xff]  ;;  %v15216_v15 = vld [vmem:[#allocation163_spill] sm:$0xff] }
 0x331   : > { %2866 = vrot.lane.b32.xlu0 %v15208_v12, %s8278_s5  ;;  %v15296_v12 = vld [vmem:[#allocation272_spill] sm:$0xff] }
 0x332   : > { %v10908_v16 = vpop.permute.xlu1 %2750 }
 0x333   : > { %15209 = vst [vmem:[#allocation503_spill] sm:$0xff] %v10908_v16  ;;  %v10910_v41 = vpop.permute.xlu0 %2748 }
 0x334   : > { %15210 = vst [vmem:[#allocation504_spill] sm:$0xff] %v10910_v41  ;;  %2872 = vrot.lane.b32.xlu1 %v15211_v62, %s8278_s5  ;;  %v15219_v41 = vld [vmem:[#allocation173_spill] sm:$0xff]  ;;  %v15220_v62 = vld [vmem:[#allocation167_spill] sm:$0xff] }
 0x335   : > { %2870 = vrot.lane.b32.xlu0 %v15212_v52, %s8278_s5 }
 0x336   : > { %v10916_v61 = vpop.permute.xlu1 %2754 }
 0x337   : > { %15213 = vst [vmem:[#allocation505_spill] sm:$0xff] %v10916_v61  ;;  %v10918_v7 = vpop.permute.xlu0 %2752 }
 0x338   : > { %15214 = vst [vmem:[#allocation506_spill] sm:$0xff] %v10918_v7  ;;  %2876 = vrot.lane.b32.xlu1 %v15215_v27, %s8278_s5  ;;  %v15223_v7 = vld [vmem:[#allocation177_spill] sm:$0xff]  ;;  %v15224_v27 = vld [vmem:[#allocation171_spill] sm:$0xff] }
 0x339   : > { %2874 = vrot.lane.b32.xlu0 %v15216_v15, %s8278_s5 }
 0x33a   : > { %v10924_v0 = vpop.permute.xlu1 %2758 }
 0x33b   : > { %15217 = vst [vmem:[#allocation507_spill] sm:$0xff] %v10924_v0  ;;  %v10926_v16 = vpop.permute.xlu0 %2756 }
 0x33c   : > { %15218 = vst [vmem:[#allocation508_spill] sm:$0xff] %v10926_v16  ;;  %2880 = vrot.lane.b32.xlu1 %v15219_v41, %s8278_s5  ;;  %v15227_v16 = vld [vmem:[#allocation181_spill] sm:$0xff]  ;;  %v15228_v41 = vld [vmem:[#allocation175_spill] sm:$0xff] }
 0x33d   : > { %2878 = vrot.lane.b32.xlu0 %v15220_v62, %s8278_s5 }
 0x33e   : > { %v10932_v52 = vpop.permute.xlu1 %2762 }
 0x33f   : > { %15221 = vst [vmem:[#allocation509_spill] sm:$0xff] %v10932_v52  ;;  %v10934_v61 = vpop.permute.xlu0 %2760 }
 0x340   : > { %15222 = vst [vmem:[#allocation510_spill] sm:$0xff] %v10934_v61  ;;  %2884 = vrot.lane.b32.xlu1 %v15223_v7, %s8278_s5  ;;  %v15231_v61 = vld [vmem:[#allocation186_spill] sm:$0xff]  ;;  %v15232_v7 = vld [vmem:[#allocation179_spill] sm:$0xff] }
 0x341   : > { %2882 = vrot.lane.b32.xlu0 %v15224_v27, %s8278_s5 }
 0x342   : > { %v10940_v15 = vpop.permute.xlu1 %2766 }
 0x343   : > { %15225 = vst [vmem:[#allocation511_spill] sm:$0xff] %v10940_v15  ;;  %v10942_v0 = vpop.permute.xlu0 %2764 }
 0x344   : > { %15226 = vst [vmem:[#allocation512_spill] sm:$0xff] %v10942_v0  ;;  %2888 = vrot.lane.b32.xlu1 %v15227_v16, %s8278_s5  ;;  %v15235_v0 = vld [vmem:[#allocation192_spill] sm:$0xff]  ;;  %v15236_v16 = vld [vmem:[#allocation183_spill] sm:$0xff] }
 0x345   : > { %2886 = vrot.lane.b32.xlu0 %v15228_v41, %s8278_s5 }
 0x346   : > { %v10948_v62 = vpop.permute.xlu1 %2770 }
 0x347   : > { %15229 = vst [vmem:[#allocation513_spill] sm:$0xff] %v10948_v62  ;;  %v10950_v52 = vpop.permute.xlu0 %2768 }
 0x348   : > { %15230 = vst [vmem:[#allocation514_spill] sm:$0xff] %v10950_v52  ;;  %2892 = vrot.lane.b32.xlu1 %v15231_v61, %s8278_s5  ;;  %v15239_v52 = vld [vmem:[#allocation198_spill] sm:$0xff]  ;;  %v15240_v61 = vld [vmem:[#allocation188_spill] sm:$0xff] }
 0x349   : > { %2890 = vrot.lane.b32.xlu0 %v15232_v7, %s8278_s5 }
 0x34a   : > { %v10956_v27 = vpop.permute.xlu1 %2774 }
 0x34b   : > { %15233 = vst [vmem:[#allocation515_spill] sm:$0xff] %v10956_v27  ;;  %v10958_v15 = vpop.permute.xlu0 %2772 }
 0x34c   : > { %15234 = vst [vmem:[#allocation516_spill] sm:$0xff] %v10958_v15  ;;  %2896 = vrot.lane.b32.xlu1 %v15235_v0, %s8278_s5  ;;  %v15243_v15 = vld [vmem:[#allocation204_spill] sm:$0xff]  ;;  %v15244_v0 = vld [vmem:[#allocation194_spill] sm:$0xff] }
 0x34d   : > { %2894 = vrot.lane.b32.xlu0 %v15236_v16, %s8278_s5 }
 0x34e   : > { %v10964_v41 = vpop.permute.xlu1 %2778 }
 0x34f   : > { %15237 = vst [vmem:[#allocation517_spill] sm:$0xff] %v10964_v41  ;;  %v10966_v62 = vpop.permute.xlu0 %2776 }
 0x350   : > { %15238 = vst [vmem:[#allocation518_spill] sm:$0xff] %v10966_v62  ;;  %2900 = vrot.lane.b32.xlu1 %v15239_v52, %s8278_s5  ;;  %v15247_v62 = vld [vmem:[#allocation210_spill] sm:$0xff]  ;;  %v15248_v52 = vld [vmem:[#allocation200_spill] sm:$0xff] }
 0x351   : > { %2898 = vrot.lane.b32.xlu0 %v15240_v61, %s8278_s5 }
 0x352   : > { %v10972_v7 = vpop.permute.xlu1 %2782 }
 0x353   : > { %15241 = vst [vmem:[#allocation519_spill] sm:$0xff] %v10972_v7  ;;  %v10974_v27 = vpop.permute.xlu0 %2780 }
 0x354   : > { %15242 = vst [vmem:[#allocation520_spill] sm:$0xff] %v10974_v27  ;;  %2904 = vrot.lane.b32.xlu1 %v15243_v15, %s8278_s5  ;;  %v15251_v27 = vld [vmem:[#allocation216_spill] sm:$0xff]  ;;  %v15252_v15 = vld [vmem:[#allocation206_spill] sm:$0xff] }
 0x355   : > { %2902 = vrot.lane.b32.xlu0 %v15244_v0, %s8278_s5 }
 0x356   : > { %v10980_v16 = vpop.permute.xlu1 %2786 }
 0x357   : > { %15245 = vst [vmem:[#allocation521_spill] sm:$0xff] %v10980_v16  ;;  %v10982_v41 = vpop.permute.xlu0 %2784 }
 0x358   : > { %15246 = vst [vmem:[#allocation522_spill] sm:$0xff] %v10982_v41  ;;  %2908 = vrot.lane.b32.xlu1 %v15247_v62, %s8278_s5  ;;  %v15255_v41 = vld [vmem:[#allocation222_spill] sm:$0xff]  ;;  %v15256_v62 = vld [vmem:[#allocation212_spill] sm:$0xff] }
 0x359   : > { %2906 = vrot.lane.b32.xlu0 %v15248_v52, %s8278_s5 }
 0x35a   : > { %v10988_v61 = vpop.permute.xlu1 %2790 }
 0x35b   : > { %15249 = vst [vmem:[#allocation523_spill] sm:$0xff] %v10988_v61  ;;  %v10990_v7 = vpop.permute.xlu0 %2788 }
 0x35c   : > { %15250 = vst [vmem:[#allocation524_spill] sm:$0xff] %v10990_v7  ;;  %2912 = vrot.lane.b32.xlu1 %v15251_v27, %s8278_s5  ;;  %v15259_v7 = vld [vmem:[#allocation228_spill] sm:$0xff]  ;;  %v15260_v27 = vld [vmem:[#allocation218_spill] sm:$0xff] }
 0x35d   : > { %2910 = vrot.lane.b32.xlu0 %v15252_v15, %s8278_s5 }
 0x35e   : > { %v10996_v0 = vpop.permute.xlu1 %2794 }
 0x35f   : > { %15253 = vst [vmem:[#allocation525_spill] sm:$0xff] %v10996_v0  ;;  %v10998_v16 = vpop.permute.xlu0 %2792 }
 0x360   : > { %15254 = vst [vmem:[#allocation526_spill] sm:$0xff] %v10998_v16  ;;  %2916 = vrot.lane.b32.xlu1 %v15255_v41, %s8278_s5  ;;  %v15263_v16 = vld [vmem:[#allocation234_spill] sm:$0xff]  ;;  %v15264_v41 = vld [vmem:[#allocation224_spill] sm:$0xff] }
 0x361   : > { %2914 = vrot.lane.b32.xlu0 %v15256_v62, %s8278_s5 }
 0x362   : > { %v11004_v52 = vpop.permute.xlu1 %2798 }
 0x363   : > { %15257 = vst [vmem:[#allocation527_spill] sm:$0xff] %v11004_v52  ;;  %v11006_v61 = vpop.permute.xlu0 %2796 }
 0x364   : > { %15258 = vst [vmem:[#allocation528_spill] sm:$0xff] %v11006_v61  ;;  %2920 = vrot.lane.b32.xlu1 %v15259_v7, %s8278_s5  ;;  %v15267_v61 = vld [vmem:[#allocation240_spill] sm:$0xff]  ;;  %v15268_v7 = vld [vmem:[#allocation230_spill] sm:$0xff] }
 0x365   : > { %2918 = vrot.lane.b32.xlu0 %v15260_v27, %s8278_s5 }
 0x366   : > { %v11012_v15 = vpop.permute.xlu1 %2802 }
 0x367   : > { %15261 = vst [vmem:[#allocation529_spill] sm:$0xff] %v11012_v15  ;;  %v11014_v0 = vpop.permute.xlu0 %2800 }
 0x368   : > { %15262 = vst [vmem:[#allocation530_spill] sm:$0xff] %v11014_v0  ;;  %2924 = vrot.lane.b32.xlu1 %v15263_v16, %s8278_s5  ;;  %v15271_v0 = vld [vmem:[#allocation246_spill] sm:$0xff]  ;;  %v15272_v16 = vld [vmem:[#allocation236_spill] sm:$0xff] }
 0x369   : > { %2922 = vrot.lane.b32.xlu0 %v15264_v41, %s8278_s5 }
 0x36a   : > { %v11020_v62 = vpop.permute.xlu1 %2806 }
 0x36b   : > { %15265 = vst [vmem:[#allocation531_spill] sm:$0xff] %v11020_v62  ;;  %v11022_v52 = vpop.permute.xlu0 %2804 }
 0x36c   : > { %15266 = vst [vmem:[#allocation532_spill] sm:$0xff] %v11022_v52  ;;  %2928 = vrot.lane.b32.xlu1 %v15267_v61, %s8278_s5  ;;  %v15275_v52 = vld [vmem:[#allocation252_spill] sm:$0xff]  ;;  %v15276_v61 = vld [vmem:[#allocation242_spill] sm:$0xff] }
 0x36d   : > { %2926 = vrot.lane.b32.xlu0 %v15268_v7, %s8278_s5 }
 0x36e   : > { %v11028_v27 = vpop.permute.xlu1 %2810 }
 0x36f   : > { %15269 = vst [vmem:[#allocation533_spill] sm:$0xff] %v11028_v27  ;;  %v11030_v15 = vpop.permute.xlu0 %2808 }
 0x370   : > { %15270 = vst [vmem:[#allocation534_spill] sm:$0xff] %v11030_v15  ;;  %2932 = vrot.lane.b32.xlu1 %v15271_v0, %s8278_s5  ;;  %v15279_v15 = vld [vmem:[#allocation258_spill] sm:$0xff]  ;;  %v15280_v0 = vld [vmem:[#allocation248_spill] sm:$0xff] }
 0x371   : > { %2930 = vrot.lane.b32.xlu0 %v15272_v16, %s8278_s5 }
 0x372   : > { %v11036_v41 = vpop.permute.xlu1 %2814 }
 0x373   : > { %15273 = vst [vmem:[#allocation535_spill] sm:$0xff] %v11036_v41  ;;  %v11038_v62 = vpop.permute.xlu0 %2812 }
 0x374   : > { %15274 = vst [vmem:[#allocation536_spill] sm:$0xff] %v11038_v62  ;;  %2936 = vrot.lane.b32.xlu1 %v15275_v52, %s8278_s5  ;;  %v15283_v62 = vld [vmem:[#allocation264_spill] sm:$0xff]  ;;  %v15284_v52 = vld [vmem:[#allocation254_spill] sm:$0xff] }
 0x375   : > { %2934 = vrot.lane.b32.xlu0 %v15276_v61, %s8278_s5 }
 0x376   : > { %v11044_v7 = vpop.permute.xlu1 %2818 }
 0x377   : > { %15277 = vst [vmem:[#allocation537_spill] sm:$0xff] %v11044_v7  ;;  %v11046_v27 = vpop.permute.xlu0 %2816 }
 0x378   : > { %15278 = vst [vmem:[#allocation538_spill] sm:$0xff] %v11046_v27  ;;  %2940 = vrot.lane.b32.xlu1 %v15279_v15, %s8278_s5  ;;  %v15287_v27 = vld [vmem:[#allocation270_spill] sm:$0xff]  ;;  %v15288_v15 = vld [vmem:[#allocation260_spill] sm:$0xff] }
 0x379   : > { %2938 = vrot.lane.b32.xlu0 %v15280_v0, %s8278_s5 }
 0x37a   : > { %v11052_v16 = vpop.permute.xlu1 %2822 }
 0x37b   : > { %15281 = vst [vmem:[#allocation539_spill] sm:$0xff] %v11052_v16  ;;  %v11054_v41 = vpop.permute.xlu0 %2820 }
 0x37c   : > { %15282 = vst [vmem:[#allocation540_spill] sm:$0xff] %v11054_v41  ;;  %2944 = vrot.lane.b32.xlu1 %v15283_v62, %s8278_s5  ;;  %v15291_v41 = vld [vmem:[#allocation276_spill] sm:$0xff]  ;;  %v15292_v62 = vld [vmem:[#allocation266_spill] sm:$0xff] }
 0x37d   : > { %2942 = vrot.lane.b32.xlu0 %v15284_v52, %s8278_s5 }
 0x37e   : > { %v11060_v61 = vpop.permute.xlu1 %2826 }
 0x37f   : > { %15285 = vst [vmem:[#allocation541_spill] sm:$0xff] %v11060_v61  ;;  %v11062_v7 = vpop.permute.xlu0 %2824 }
 0x380   : > { %15286 = vst [vmem:[#allocation542_spill] sm:$0xff] %v11062_v7  ;;  %2948 = vrot.lane.b32.xlu1 %v15287_v27, %s8278_s5  ;;  %v15295_v7 = vld [vmem:[#allocation282_spill] sm:$0xff] }
 0x381   : > { %2946 = vrot.lane.b32.xlu0 %v15288_v15, %s8278_s5 }
 0x382   : > { %v11068_v0 = vpop.permute.xlu1 %2830 }
 0x383   : > { %15289 = vst [vmem:[#allocation270_spill] sm:$0xff] %v11068_v0  ;;  %v11070_v16 = vpop.permute.xlu0 %2828 }
 0x384   : > { %15290 = vst [vmem:[#allocation543_spill] sm:$0xff] %v11070_v16  ;;  %2952 = vrot.lane.b32.xlu1 %v15291_v41, %s8278_s5  ;;  %v15299_v16 = vld [vmem:[#allocation288_spill] sm:$0xff] }
 0x385   : > { %2950 = vrot.lane.b32.xlu0 %v15292_v62, %s8278_s5 }
 0x386   : > { %v11076_v52 = vpop.permute.xlu1 %2834 }
 0x387   : > { %15293 = vst [vmem:[#allocation276_spill] sm:$0xff] %v11076_v52  ;;  %v11078_v61 = vpop.permute.xlu0 %2832 }
 0x388   : > { %15294 = vst [vmem:[#allocation266_spill] sm:$0xff] %v11078_v61  ;;  %2956 = vrot.lane.b32.xlu1 %v15295_v7, %s8278_s5  ;;  %v15303_v61 = vld [vmem:[#allocation294_spill] sm:$0xff] }
 0x389   : > { %2954 = vrot.lane.b32.xlu0 %v15296_v12, %s8278_s5 }
 0x38a   : > { %v11084_v15 = vpop.permute.xlu1 %2838 }
 0x38b   : > { %15297 = vst [vmem:[#allocation282_spill] sm:$0xff] %v11084_v15  ;;  %v11086_v0 = vpop.permute.xlu0 %2836 }
 0x38c   : > { %15298 = vst [vmem:[#allocation272_spill] sm:$0xff] %v11086_v0  ;;  %2960 = vrot.lane.b32.xlu1 %v15299_v16, %s8278_s5  ;;  %v15307_v0 = vld [vmem:[#allocation300_spill] sm:$0xff]  ;;  %v15308_v16 = vld [vmem:[#allocation290_spill] sm:$0xff] }
 0x38d   : > { %2958 = vrot.lane.b32.xlu0 %v15300_v57, %s8278_s5 }
 0x38e   : > { %v11092_v31 = vpop.permute.xlu1 %2848 }
 0x38f   : > { %15301 = vst [vmem:[#allocation278_spill] sm:$0xff] %v11092_v31  ;;  %v11094_v52 = vpop.permute.xlu0 %2846 }
 0x390   : > { %15302 = vst [vmem:[#allocation544_spill] sm:$0xff] %v11094_v52  ;;  %2964 = vrot.lane.b32.xlu1 %v15303_v61, %s8278_s5  ;;  %v15311_v52 = vld [vmem:[#allocation296_spill] sm:$0xff] }
 0x391   : > { %2962 = vrot.lane.b32.xlu0 %v15304_v46, %s8278_s5 }
 0x392   : > { %v11100_v32 = vpop.permute.xlu1 %2852 }
 0x393   : > { %15305 = vst [vmem:[#allocation284_spill] sm:$0xff] %v11100_v32  ;;  %v11102_v15 = vpop.permute.xlu0 %2850 }
 0x394   : > { %15306 = vst [vmem:[#allocation545_spill] sm:$0xff] %v11102_v15  ;;  %2968 = vrot.lane.b32.xlu1 %v15307_v0, %s8278_s5  ;;  %v15314_v15 = vld [vmem:[#allocation312_spill] sm:$0xff]  ;;  %v15315_v0 = vld [vmem:[#allocation302_spill] sm:$0xff] }
 0x395   : > { %2966 = vrot.lane.b32.xlu0 %v15308_v16, %s8278_s5 }
 0x396   : > { %v11108_v30 = vpop.permute.xlu1 %2856 }
 0x397   : > { %15309 = vst [vmem:[#allocation546_spill] sm:$0xff] %v11108_v30  ;;  %v11110_v31 = vpop.permute.xlu0 %2854 }
 0x398   : > { %15310 = vst [vmem:[#allocation547_spill] sm:$0xff] %v11110_v31  ;;  %2972 = vrot.lane.b32.xlu1 %v9820_v56, %s8278_s5  ;;  %v15318_v31 = vld [vmem:[#allocation308_spill] sm:$0xff] }
 0x399   : > { %2970 = vrot.lane.b32.xlu0 %v15311_v52, %s8278_s5 }
 0x39a   : > { %v11116_v61 = vpop.permute.xlu1 %2860 }
 0x39b   : > { %15312 = vst [vmem:[#allocation296_spill] sm:$0xff] %v11116_v61  ;;  %v11118_v32 = vpop.permute.xlu0 %2858 }
 0x39c   : > { %15313 = vst [vmem:[#allocation548_spill] sm:$0xff] %v11118_v32  ;;  %2976 = vrot.lane.b32.xlu1 %v15314_v15, %s8278_s5 }
 0x39d   : > { %2974 = vrot.lane.b32.xlu0 %v15315_v0, %s8278_s5 }
 0x39e   : > { %v11124_v16 = vpop.permute.xlu1 %2864 }
 0x39f   : > { %15316 = vst [vmem:[#allocation312_spill] sm:$0xff] %v11124_v16  ;;  %v11126_v30 = vpop.permute.xlu0 %2862 }
 0x3a0   : > { %15317 = vst [vmem:[#allocation302_spill] sm:$0xff] %v11126_v30  ;;  %2980 = vrot.lane.b32.xlu1 %v9861_v35, %s8278_s5 }
 0x3a1   : > { %2978 = vrot.lane.b32.xlu0 %v15318_v31, %s8278_s5 }
 0x3a2   : > { %v11132_v56 = vpop.permute.xlu1 %2868 }
 0x3a3   : > { %15319 = vst [vmem:[#allocation308_spill] sm:$0xff] %v11132_v56  ;;  %v11134_v61 = vpop.permute.xlu0 %2866 }
 0x3a4   : > { %15320 = vst [vmem:[#allocation549_spill] sm:$0xff] %v11134_v61  ;;  %2984 = vrot.lane.b32.xlu1 %v9877_v20, %s8278_s5 }
 0x3a5   : > { %2982 = vrot.lane.b32.xlu0 %v9849_v39, %s8278_s5 }
 0x3a6   : > { %v11140_v32 = vpop.permute.xlu1 %2872 }
 0x3a7   : > { %15321 = vst [vmem:[#allocation550_spill] sm:$0xff] %v11140_v32  ;;  %v11142_v16 = vpop.permute.xlu0 %2870 }
 0x3a8   : > { %15322 = vst [vmem:[#allocation551_spill] sm:$0xff] %v11142_v16  ;;  %2988 = vrot.lane.b32.xlu1 %v9893_v34, %s8278_s5 }
 0x3a9   : > { %2986 = vrot.lane.b32.xlu0 %v9868_v4, %s8278_s5 }
 0x3aa   : > { %v11148_v30 = vpop.permute.xlu1 %2876 }
 0x3ab   : > { %15323 = vst [vmem:[#allocation552_spill] sm:$0xff] %v11148_v30  ;;  %v11150_v56 = vpop.permute.xlu0 %2874 }
 0x3ac   : > { %15324 = vst [vmem:[#allocation553_spill] sm:$0xff] %v11150_v56  ;;  %2992 = vrot.lane.b32.xlu1 %v9909_v49, %s8278_s5  ;;  %v11501_v49 = vld [vmem:[%s8335_s22 + $0x1c8] sm:$0xff]  }
 0x3ad   : > { %2990 = vrot.lane.b32.xlu0 %v9884_v59, %s8278_s5 }
 0x3ae   : > { %v11156_v61 = vpop.permute.xlu1 %2880 }
 0x3af   : > { %15325 = vst [vmem:[#allocation554_spill] sm:$0xff] %v11156_v61  ;;  %v11158_v32 = vpop.permute.xlu0 %2878 }
 0x3b0   : > { %15326 = vst [vmem:[#allocation555_spill] sm:$0xff] %v11158_v32  ;;  %2996 = vrot.lane.b32.xlu1 %v9925_v63, %s8278_s5  ;;  %v11473_v63 = vld [vmem:[%s8335_s22 + $0x1a8] sm:$0xff]  }
 0x3b1   : > { %2994 = vrot.lane.b32.xlu0 %v9900_v42, %s8278_s5 }
 0x3b2   : > { %v11164_v16 = vpop.permute.xlu1 %2884 }
 0x3b3   : > { %15327 = vst [vmem:[#allocation556_spill] sm:$0xff] %v11164_v16  ;;  %v11166_v30 = vpop.permute.xlu0 %2882 }
 0x3b4   : > { %15328 = vst [vmem:[#allocation557_spill] sm:$0xff] %v11166_v30  ;;  %3000 = vrot.lane.b32.xlu1 %v9941_v43, %s8278_s5 }
 0x3b5   : > { %2998 = vrot.lane.b32.xlu0 %v9916_v29, %s8278_s5  ;;  %v8109_v29 = vld [vmem:[%s8335_s22 + $0x108] sm:$0xff]  }
 0x3b6   : > { %v11172_v56 = vpop.permute.xlu1 %2888 }
 0x3b7   : > { %15329 = vst [vmem:[#allocation558_spill] sm:$0xff] %v11172_v56  ;;  %v11174_v61 = vpop.permute.xlu0 %2886 }
 0x3b8   : > { %15330 = vst [vmem:[#allocation559_spill] sm:$0xff] %v11174_v61  ;;  %3004 = vrot.lane.b32.xlu1 %v9957_v37, %s8278_s5 }
 0x3b9   : > { %3002 = vrot.lane.b32.xlu0 %v9932_v18, %s8278_s5  ;;  %v8107_v18 = vld [vmem:[%s8335_s22 + $0xf8] sm:$0xff]  }
 0x3ba   : > { %v11180_v32 = vpop.permute.xlu1 %2892 }
 0x3bb   : > { %15331 = vst [vmem:[#allocation560_spill] sm:$0xff] %v11180_v32  ;;  %v11182_v16 = vpop.permute.xlu0 %2890 }
 0x3bc   : > { %15332 = vst [vmem:[#allocation561_spill] sm:$0xff] %v11182_v16  ;;  %3008 = vrot.lane.b32.xlu1 %v9973_v33, %s8278_s5 }
 0x3bd   : > { %3006 = vrot.lane.b32.xlu0 %v9948_v8, %s8278_s5  ;;  %v8105_v8 = vld [vmem:[%s8335_s22 + $0xe8] sm:$0xff]  }
 0x3be   : > { %v11188_v30 = vpop.permute.xlu1 %2896 }
 0x3bf   : > { %15333 = vst [vmem:[#allocation562_spill] sm:$0xff] %v11188_v30  ;;  %v11190_v56 = vpop.permute.xlu0 %2894 }
 0x3c0   : > { %15334 = vst [vmem:[#allocation563_spill] sm:$0xff] %v11190_v56  ;;  %3012 = vrot.lane.b32.xlu1 %v9989_v47, %s8278_s5 }
 0x3c1   : > { %3010 = vrot.lane.b32.xlu0 %v9964_v2, %s8278_s5  ;;  %v8103_v2 = vld [vmem:[%s8335_s22 + $0xd8] sm:$0xff]  }
 0x3c2   : > { %v11196_v61 = vpop.permute.xlu1 %2900 }
 0x3c3   : > { %15335 = vst [vmem:[#allocation564_spill] sm:$0xff] %v11196_v61  ;;  %v11198_v32 = vpop.permute.xlu0 %2898 }
 0x3c4   : > { %15336 = vst [vmem:[#allocation565_spill] sm:$0xff] %v11198_v32  ;;  %3016 = vrot.lane.b32.xlu1 %v10005_v9, %s8278_s5  ;;  %v2840_v32 = vrot.slane %v10446_v38, 1  ;;  %v14457_v38 = vrot.slane %v10807_v26, 1  ;;  %v11265_v26 = vld [vmem:[%s8335_s22 + $0x38] sm:$0xff]  }
 0x3c5   : > { %3014 = vrot.lane.b32.xlu0 %v9980_v53, %s8278_s5  ;;  %v8101_v53 = vld [vmem:[%s8335_s22 + $0xc8] sm:$0xff]  }
 0x3c6   : > { %v11204_v16 = vpop.permute.xlu1 %2904 }
 0x3c7   : > { %15337 = vst [vmem:[#allocation566_spill] sm:$0xff] %v11204_v16  ;;  %v11206_v30 = vpop.permute.xlu0 %2902 }
 0x3c8   : > { %15338 = vst [vmem:[#allocation567_spill] sm:$0xff] %v11206_v30  ;;  %3020 = vrot.lane.b32.xlu1 %v10021_v36, %s8278_s5  ;;  %v15343_v36 = vrot.slane %v9021_v17, 1 }
 0x3c9   : > { %3018 = vrot.lane.b32.xlu0 %v9996_v24, %s8278_s5  ;;  %v8099_v24 = vld [vmem:[%s8335_s22 + $0xb8] sm:$0xff]  }
 0x3ca   : > { %v11212_v56 = vpop.permute.xlu1 %2908 }
 0x3cb   : > { %15339 = vst [vmem:[#allocation568_spill] sm:$0xff] %v11212_v56  ;;  %v11214_v61 = vpop.permute.xlu0 %2906  ;;  %v11230_v56 = vsel %vm2046_vm1, %v15343_v36, %v2840_v32 }
 0x3cc   : > { %15340 = vst [vmem:[#allocation569_spill] sm:$0xff] %v11214_v61  ;;  %3024 = vrot.lane.b32.xlu1 %v10037_v11, %s8278_s5  ;;  %15344 = vst [vmem:[#allocation572_spill] sm:$0xff] %v11230_v56  ;;  %v2842_v61 = vrot.slane %v10439_v54, 1  ;;  %v8097_v11 = vld [vmem:[%s8335_s22 + $0xa8] sm:$0xff]  }
 0x3cd   : > { %3022 = vrot.lane.b32.xlu0 %v10012_v6, %s8278_s5 }
 0x3ce   : > { %v11221_v16 = vpop.permute.xlu1 %2912  ;;  %v11245_v17 = vsel %vm2046_vm1, %v2842_v61, %v14457_v38  ;;  %v11252_v54 = vsel %vm2046_vm1, %v2840_v32, %v2842_v61  ;;  %v11270_v61 = vld [vmem:[%s8335_s22 + $0x30] sm:$0xff]  }
 0x3cf   : > { %15341 = vst [vmem:[#allocation570_spill] sm:$0xff] %v11221_v16  ;;  %v11223_v30 = vpop.permute.xlu0 %2910  ;;  %15347 = vst [vmem:[#allocation575_spill] sm:$0xff] %v11245_v17 }
 0x3d0   : > { %15342 = vst [vmem:[#allocation571_spill] sm:$0xff] %v11223_v30  ;;  %3028 = vrot.lane.b32.xlu1 %v10053_v5, %s8278_s5  ;;  %15349 = vst [vmem:[#allocation577_spill] sm:$0xff] %v11252_v54  ;;  %v8090_v5 = vld [vmem:[%s8335_s22 + $0x60] sm:$0xff]  }
 0x3d1   : > { %3026 = vrot.lane.b32.xlu0 %v10028_v55, %s8278_s5 }
 0x3d2   : > { %v11236_v16 = vpop.permute.xlu1 %2916 }
 0x3d3   : > { %15345 = vst [vmem:[#allocation573_spill] sm:$0xff] %v11236_v16  ;;  %v11238_v30 = vpop.permute.xlu0 %2914 }
 0x3d4   : > { %15346 = vst [vmem:[#allocation574_spill] sm:$0xff] %v11238_v30  ;;  %3032 = vrot.lane.b32.xlu1 %v11230_v56, %s8278_s5 }
 0x3d5   : > { %3030 = vrot.lane.b32.xlu0 %v10046_v23, %s8278_s5  ;;  %v8089_v23 = vld [vmem:[%s8335_s22 + $0x68] sm:$0xff]  }
 0x3d6   : > { %v11249_v36 = vpop.permute.xlu1 %2920 }
 0x3d7   : > { %15348 = vst [vmem:[#allocation576_spill] sm:$0xff] %v11249_v36  ;;  %v11254_v16 = vpop.permute.xlu0 %2918 }
 0x3d8   : > { %15350 = vst [vmem:[#allocation578_spill] sm:$0xff] %v11254_v16  ;;  %3036 = vrot.lane.b32.xlu1 %v11245_v17, %s8278_s5 }
 0x3d9   : > { %3034 = vrot.lane.b32.xlu0 %v11252_v54, %s8278_s5 }
 0x3da   : > { %v11260_v38 = vpop.permute.xlu1 %2924 }
 0x3db   : > { %15351 = vst [vmem:[#allocation579_spill] sm:$0xff] %v11260_v38  ;;  %v11262_v30 = vpop.permute.xlu0 %2922  ;;  %v11279_v38 = vld [vmem:[%s8335_s22 + $0x48] sm:$0xff]  }
 0x3dc   : > { %15352 = vst [vmem:[#allocation580_spill] sm:$0xff] %v11262_v30  ;;  %3040 = vrot.lane.b32.xlu1 %v11265_v26, %s8279_s6  ;;  %15355 = vst [vmem:[#allocation583_spill] sm:$0xff] %v11279_v38  ;;  %v11284_v30 = vld [vmem:[%s8335_s22 + $0x40] sm:$0xff]  }
 0x3dd   : > { %3038 = vrot.lane.b32.xlu0 %v11270_v61, %s8279_s6 }
 0x3de   : > { %v11274_v32 = vpop.permute.xlu1 %2928 }
 0x3df   : > { %15353 = vst [vmem:[#allocation581_spill] sm:$0xff] %v11274_v32  ;;  %v11276_v36 = vpop.permute.xlu0 %2926  ;;  %v8087_v32 = vld [vmem:[%s8335_s22 + $0x58] sm:$0xff]  }
 0x3e0   : > { %15354 = vst [vmem:[#allocation582_spill] sm:$0xff] %v11276_v36  ;;  %3044 = vrot.lane.b32.xlu1 %v11279_v38, %s8279_s6  ;;  %v8088_v36 = vld [vmem:[%s8335_s22 + $0x50] sm:$0xff]  }
 0x3e1   : > { %3042 = vrot.lane.b32.xlu0 %v11284_v30, %s8279_s6  ;;  %v11526_v38 = vld [vmem:[%s8335_s22 + $0x1d0] sm:$0xff]  }
 0x3e2   : > { %v11288_v16 = vpop.permute.xlu1 %2932 }
 0x3e3   : > { %15356 = vst [vmem:[#allocation584_spill] sm:$0xff] %v11288_v16  ;;  %v11290_v17 = vpop.permute.xlu0 %2930 }
 0x3e4   : > { %15357 = vst [vmem:[#allocation585_spill] sm:$0xff] %v11290_v17  ;;  %3048 = vrot.lane.b32.xlu1 %v8087_v32, %s8279_s6  ;;  %v8091_v17 = vld [vmem:[%s8335_s22 + $0x78] sm:$0xff]  }
 0x3e5   : > { %3046 = vrot.lane.b32.xlu0 %v8088_v36, %s8279_s6  ;;  %v8092_v36 = vld [vmem:[%s8335_s22 + $0x70] sm:$0xff]  }
 0x3e6   : > { %v11296_v54 = vpop.permute.xlu1 %2936 }
 0x3e7   : > { %15358 = vst [vmem:[#allocation586_spill] sm:$0xff] %v11296_v54  ;;  %v11298_v56 = vpop.permute.xlu0 %2934 }
 0x3e8   : > { %15359 = vst [vmem:[#allocation587_spill] sm:$0xff] %v11298_v56  ;;  %3052 = vrot.lane.b32.xlu1 %v8089_v23, %s8279_s6  ;;  %v8093_v56 = vld [vmem:[%s8335_s22 + $0x88] sm:$0xff]  }
 0x3e9   : > { %3050 = vrot.lane.b32.xlu0 %v8090_v5, %s8279_s6  ;;  %v8094_v5 = vld [vmem:[%s8335_s22 + $0x80] sm:$0xff]  }
 0x3ea   : > { %v11304_v16 = vpop.permute.xlu1 %2940 }
 0x3eb   : > { %15360 = vst [vmem:[#allocation588_spill] sm:$0xff] %v11304_v16  ;;  %v11306_v32 = vpop.permute.xlu0 %2938  ;;  %v8095_v16 = vld [vmem:[%s8335_s22 + $0x98] sm:$0xff]  }
 0x3ec   : > { %15361 = vst [vmem:[#allocation589_spill] sm:$0xff] %v11306_v32  ;;  %3056 = vrot.lane.b32.xlu1 %v8091_v17, %s8279_s6 }
 0x3ed   : > { %3054 = vrot.lane.b32.xlu0 %v8092_v36, %s8279_s6  ;;  %v8096_v36 = vld [vmem:[%s8335_s22 + $0x90] sm:$0xff]  }
 0x3ee   : > { %v11312_v54 = vpop.permute.xlu1 %2944 }
 0x3ef   : > { %v11314_v23 = vpop.permute.xlu0 %2942 }
 0x3f0   : > { %3060 = vrot.lane.b32.xlu1 %v8093_v56, %s8279_s6 }
 0x3f1   : > { %3058 = vrot.lane.b32.xlu0 %v8094_v5, %s8279_s6  ;;  %v8098_v5 = vld [vmem:[%s8335_s22 + $0xa0] sm:$0xff]  }
 0x3f2   : > { %v11320_v32 = vpop.permute.xlu1 %2948 }
 0x3f3   : > { %v11322_v17 = vpop.permute.xlu0 %2946 }
 0x3f4   : > { %3064 = vrot.lane.b32.xlu1 %v8095_v16, %s8279_s6 }
 0x3f5   : > { %3062 = vrot.lane.b32.xlu0 %v8096_v36, %s8279_s6  ;;  %v8100_v36 = vld [vmem:[%s8335_s22 + $0xb0] sm:$0xff]  }
 0x3f6   : > { %v11328_v55 = vpop.permute.xlu1 %2952 }
 0x3f7   : > { %v11330_v56 = vpop.permute.xlu0 %2950 }
 0x3f8   : > { %3068 = vrot.lane.b32.xlu1 %v8097_v11, %s8279_s6 }
 0x3f9   : > { %3066 = vrot.lane.b32.xlu0 %v8098_v5, %s8279_s6  ;;  %v8102_v5 = vld [vmem:[%s8335_s22 + $0xc0] sm:$0xff]  }
 0x3fa   : > { %v11336_v6 = vpop.permute.xlu1 %2956 }
 0x3fb   : > { %v11338_v16 = vpop.permute.xlu0 %2954 }
 0x3fc   : > { %3072 = vrot.lane.b32.xlu1 %v8099_v24, %s8279_s6 }
 0x3fd   : > { %3070 = vrot.lane.b32.xlu0 %v8100_v36, %s8279_s6  ;;  %v8104_v36 = vld [vmem:[%s8335_s22 + $0xd0] sm:$0xff]  }
 0x3fe   : > { %v11344_v9 = vpop.permute.xlu1 %2960 }
 0x3ff   : > { %15362 = vst [vmem:[#allocation590_spill] sm:$0xff] %v11344_v9  ;;  %v11346_v11 = vpop.permute.xlu0 %2958  ;;  %v11521_v9 = vld [vmem:[%s8335_s22 + $0x1d8] sm:$0xff]  }
 0x400   : > { %15363 = vst [vmem:[#allocation591_spill] sm:$0xff] %v11346_v11  ;;  %3076 = vrot.lane.b32.xlu1 %v8101_v53, %s8279_s6 }
 0x401   : > { %3074 = vrot.lane.b32.xlu0 %v8102_v5, %s8279_s6  ;;  %v8106_v5 = vld [vmem:[%s8335_s22 + $0xe0] sm:$0xff]  }
 0x402   : > { %v11352_v47 = vpop.permute.xlu1 %2964 }
 0x403   : > { %15364 = vst [vmem:[#allocation592_spill] sm:$0xff] %v11352_v47  ;;  %v11354_v24 = vpop.permute.xlu0 %2962  ;;  %v8280_v47 = vmov 65535  }
 0x404   : > { %15365 = vst [vmem:[#allocation593_spill] sm:$0xff] %v11354_v24  ;;  %3080 = vrot.lane.b32.xlu1 %v8103_v2, %s8279_s6  ;;  %v5406_v24 = vsel %vm5404_vm2, 4294967295, %v8280_v47 }
 0x405   : > { %3078 = vrot.lane.b32.xlu0 %v8104_v36, %s8279_s6  ;;  %v8108_v36 = vld [vmem:[%s8335_s22 + $0xf0] sm:$0xff]   ;;  %v5407_v59 = vsel %vm5405_vm3, %v5406_v24, 0  ;;  %v11537_v24 = vld [vmem:[%s8335_s22 + $0x1e0] sm:$0xff]  }
 0x406   : > { %v11360_v33 = vpop.permute.xlu1 %2968  ;;  %15400 = vst [vmem:[#allocation628_spill] sm:$0xff] %v11537_v24 }
 0x407   : > { %15366 = vst [vmem:[#allocation594_spill] sm:$0xff] %v11360_v33  ;;  %v11362_v53 = vpop.permute.xlu0 %2966 }
 0x408   : > { %15367 = vst [vmem:[#allocation595_spill] sm:$0xff] %v11362_v53  ;;  %3084 = vrot.lane.b32.xlu1 %v8105_v8, %s8279_s6  ;;  %v11487_v53 = vld [vmem:[%s8335_s22 + $0x1b8] sm:$0xff]  }
 0x409   : > { %3082 = vrot.lane.b32.xlu0 %v8106_v5, %s8279_s6  ;;  %v8110_v5 = vld [vmem:[%s8335_s22 + $0x100] sm:$0xff]  }
 0x40a   : > { %v11368_v37 = vpop.permute.xlu1 %2972 }
 0x40b   : > { %15368 = vst [vmem:[#allocation596_spill] sm:$0xff] %v11368_v37  ;;  %v11370_v2 = vpop.permute.xlu0 %2970 }
 0x40c   : > { %15369 = vst [vmem:[#allocation597_spill] sm:$0xff] %v11370_v2  ;;  %3088 = vrot.lane.b32.xlu1 %v8107_v18, %s8279_s6  ;;  %v8111_v2 = vld [vmem:[%s8335_s22 + $0x118] sm:$0xff]  }
 0x40d   : > { %3086 = vrot.lane.b32.xlu0 %v8108_v36, %s8279_s6  ;;  %v8112_v36 = vld [vmem:[%s8335_s22 + $0x110] sm:$0xff]  }
 0x40e   : > { %v11376_v43 = vpop.permute.xlu1 %2976 }
 0x40f   : > { %15370 = vst [vmem:[#allocation598_spill] sm:$0xff] %v11376_v43  ;;  %v11378_v8 = vpop.permute.xlu0 %2974 }
 0x410   : > { %15371 = vst [vmem:[#allocation599_spill] sm:$0xff] %v11378_v8  ;;  %3092 = vrot.lane.b32.xlu1 %v8109_v29, %s8279_s6  ;;  %v8113_v8 = vld [vmem:[%s8335_s22 + $0x128] sm:$0xff]  }
 0x411   : > { %3090 = vrot.lane.b32.xlu0 %v8110_v5, %s8279_s6  ;;  %v8114_v5 = vld [vmem:[%s8335_s22 + $0x120] sm:$0xff]  }
 0x412   : > { %v11384_v37 = vpop.permute.xlu1 %2980 }
 0x413   : > { %15372 = vst [vmem:[#allocation600_spill] sm:$0xff] %v11384_v37  ;;  %v11386_v18 = vpop.permute.xlu0 %2978 }
 0x414   : > { %15373 = vst [vmem:[#allocation601_spill] sm:$0xff] %v11386_v18  ;;  %3096 = vrot.lane.b32.xlu1 %v8111_v2, %s8279_s6  ;;  %v8115_v18 = vld [vmem:[%s8335_s22 + $0x138] sm:$0xff]  }
 0x415   : > { %3094 = vrot.lane.b32.xlu0 %v8112_v36, %s8279_s6  ;;  %v8116_v36 = vld [vmem:[%s8335_s22 + $0x130] sm:$0xff]  }
 0x416   : > { %v11392_v43 = vpop.permute.xlu1 %2984 }
 0x417   : > { %15374 = vst [vmem:[#allocation602_spill] sm:$0xff] %v11392_v43  ;;  %v11394_v29 = vpop.permute.xlu0 %2982 }
 0x418   : > { %15375 = vst [vmem:[#allocation603_spill] sm:$0xff] %v11394_v29  ;;  %3100 = vrot.lane.b32.xlu1 %v8113_v8, %s8279_s6  ;;  %v8117_v29 = vld [vmem:[%s8335_s22 + $0x148] sm:$0xff]  }
 0x419   : > { %3098 = vrot.lane.b32.xlu0 %v8114_v5, %s8279_s6  ;;  %v8118_v5 = vld [vmem:[%s8335_s22 + $0x140] sm:$0xff]  }
 0x41a   : > { %v11400_v37 = vpop.permute.xlu1 %2988 }
 0x41b   : > { %15376 = vst [vmem:[#allocation604_spill] sm:$0xff] %v11400_v37  ;;  %v11402_v2 = vpop.permute.xlu0 %2986 }
 0x41c   : > { %15377 = vst [vmem:[#allocation605_spill] sm:$0xff] %v11402_v2  ;;  %3104 = vrot.lane.b32.xlu1 %v8115_v18, %s8279_s6  ;;  %v8119_v2 = vld [vmem:[%s8335_s22 + $0x158] sm:$0xff]  }
 0x41d   : > { %3102 = vrot.lane.b32.xlu0 %v8116_v36, %s8279_s6  ;;  %v8120_v36 = vld [vmem:[%s8335_s22 + $0x150] sm:$0xff]  }
 0x41e   : > { %v11408_v43 = vpop.permute.xlu1 %2992 }
 0x41f   : > { %15378 = vst [vmem:[#allocation606_spill] sm:$0xff] %v11408_v43  ;;  %v11410_v8 = vpop.permute.xlu0 %2990 }
 0x420   : > { %15379 = vst [vmem:[#allocation607_spill] sm:$0xff] %v11410_v8  ;;  %3108 = vrot.lane.b32.xlu1 %v8117_v29, %s8279_s6  ;;  %v8121_v8 = vld [vmem:[%s8335_s22 + $0x168] sm:$0xff]  }
 0x421   : > { %3106 = vrot.lane.b32.xlu0 %v8118_v5, %s8279_s6  ;;  %v8122_v5 = vld [vmem:[%s8335_s22 + $0x160] sm:$0xff]  }
 0x422   : > { %v11416_v37 = vpop.permute.xlu1 %2996 }
 0x423   : > { %15380 = vst [vmem:[#allocation608_spill] sm:$0xff] %v11416_v37  ;;  %v11418_v18 = vpop.permute.xlu0 %2994 }
 0x424   : > { %15381 = vst [vmem:[#allocation609_spill] sm:$0xff] %v11418_v18  ;;  %3112 = vrot.lane.b32.xlu1 %v8119_v2, %s8279_s6  ;;  %v8123_v18 = vld [vmem:[%s8335_s22 + $0x178] sm:$0xff]  }
 0x425   : > { %3110 = vrot.lane.b32.xlu0 %v8120_v36, %s8279_s6  ;;  %v8124_v36 = vld [vmem:[%s8335_s22 + $0x170] sm:$0xff]  }
 0x426   : > { %v11424_v43 = vpop.permute.xlu1 %3000 }
 0x427   : > { %15382 = vst [vmem:[#allocation610_spill] sm:$0xff] %v11424_v43  ;;  %v11426_v29 = vpop.permute.xlu0 %2998 }
 0x428   : > { %15383 = vst [vmem:[#allocation611_spill] sm:$0xff] %v11426_v29  ;;  %3116 = vrot.lane.b32.xlu1 %v8121_v8, %s8279_s6  ;;  %v11445_v29 = vld [vmem:[%s8335_s22 + $0x188] sm:$0xff]  }
 0x429   : > { %3114 = vrot.lane.b32.xlu0 %v8122_v5, %s8279_s6  ;;  %v11450_v5 = vld [vmem:[%s8335_s22 + $0x180] sm:$0xff]  }
 0x42a   : > { %v11432_v37 = vpop.permute.xlu1 %3004 }
 0x42b   : > { %15384 = vst [vmem:[#allocation612_spill] sm:$0xff] %v11432_v37  ;;  %v11434_v2 = vpop.permute.xlu0 %3002 }
 0x42c   : > { %15385 = vst [vmem:[#allocation613_spill] sm:$0xff] %v11434_v2  ;;  %3120 = vrot.lane.b32.xlu1 %v8123_v18, %s8279_s6 }
 0x42d   : > { %3118 = vrot.lane.b32.xlu0 %v8124_v36, %s8279_s6 }
 0x42e   : > { %v11440_v43 = vpop.permute.xlu1 %3008 }
 0x42f   : > { %15386 = vst [vmem:[#allocation614_spill] sm:$0xff] %v11440_v43  ;;  %v11442_v8 = vpop.permute.xlu0 %3006  ;;  %v11459_v43 = vld [vmem:[%s8335_s22 + $0x198] sm:$0xff]  }
 0x430   : > { %15387 = vst [vmem:[#allocation615_spill] sm:$0xff] %v11442_v8  ;;  %3124 = vrot.lane.b32.xlu1 %v11445_v29, %s8279_s6  ;;  %v11464_v8 = vld [vmem:[%s8335_s22 + $0x190] sm:$0xff]  }
 0x431   : > { %3122 = vrot.lane.b32.xlu0 %v11450_v5, %s8279_s6 }
 0x432   : > { %v11454_v18 = vpop.permute.xlu1 %3012 }
 0x433   : > { %15388 = vst [vmem:[#allocation616_spill] sm:$0xff] %v11454_v18  ;;  %v11456_v36 = vpop.permute.xlu0 %3010 }
 0x434   : > { %15389 = vst [vmem:[#allocation617_spill] sm:$0xff] %v11456_v36  ;;  %3128 = vrot.lane.b32.xlu1 %v11459_v43, %s8279_s6  ;;  %v11478_v36 = vld [vmem:[%s8335_s22 + $0x1a0] sm:$0xff]  }
 0x435   : > { %3126 = vrot.lane.b32.xlu0 %v11464_v8, %s8279_s6 }
 0x436   : > { %v11468_v37 = vpop.permute.xlu1 %3016 }
 0x437   : > { %15390 = vst [vmem:[#allocation618_spill] sm:$0xff] %v11468_v37  ;;  %v11470_v2 = vpop.permute.xlu0 %3014  ;;  %v11492_v37 = vld [vmem:[%s8335_s22 + $0x1b0] sm:$0xff]  }
 0x438   : > { %15391 = vst [vmem:[#allocation619_spill] sm:$0xff] %v11470_v2  ;;  %3132 = vrot.lane.b32.xlu1 %v11473_v63, %s8279_s6 }
 0x439   : > { %3130 = vrot.lane.b32.xlu0 %v11478_v36, %s8279_s6 }
 0x43a   : > { %v11482_v18 = vpop.permute.xlu1 %3020 }
 0x43b   : > { %15392 = vst [vmem:[#allocation620_spill] sm:$0xff] %v11482_v18  ;;  %v11484_v33 = vpop.permute.xlu0 %3018  ;;  %v7982_v18 = vld [vmem:[%s14091_s2] sm:$0xff]  }
 0x43c   : > { %15393 = vst [vmem:[#allocation621_spill] sm:$0xff] %v11484_v33  ;;  %3136 = vrot.lane.b32.xlu1 %v11487_v53, %s8279_s6  ;;  %v11509_v33 = vld [vmem:[%s8335_s22 + $0x1c0] sm:$0xff]   ;;  %7645 = vmatprep.subr.bf16.mxu0 %v7982_v18 }
 0x43d   : > { %3134 = vrot.lane.b32.xlu0 %v11492_v37, %s8279_s6  ;;  %7646 = vmatpush3.bf16.msra.mxu0 %v7982_v18 }
 0x43e   : > { %v11496_v2 = vpop.permute.xlu1 %3024  ;;  %7841 = vmatprep.subr.bf16.mxu1 %v7982_v18 }
 0x43f   : > { %15394 = vst [vmem:[#allocation622_spill] sm:$0xff] %v11496_v2  ;;  %v11498_v42 = vpop.permute.xlu0 %3022  ;;  %7843 = vmatpush3.bf16.msra.mxu1 %v7982_v18 }
 0x440   : > { %15395 = vst [vmem:[#allocation623_spill] sm:$0xff] %v11498_v42  ;;  %3140 = vrot.lane.b32.xlu1 %v11501_v49, %s8279_s6  ;;  %v7983_v42 = vld [vmem:[%s14091_s2 + $0x8] sm:$0x3f]  }
 0x441   : > { %3138 = vrot.lane.b32.xlu0 %v11509_v33, %s8279_s6 }
 0x442   : > { %v11513_v2 = vpop.permute.xlu1 %3028 }
 0x443   : > { %15396 = vst [vmem:[#allocation624_spill] sm:$0xff] %v11513_v2  ;;  %v11518_v34 = vpop.permute.xlu0 %3026  ;;  %v5409_v2 = vand.u32 %v7983_v42, %v5407_v59 }
 0x444   : > { %15397 = vst [vmem:[#allocation625_spill] sm:$0xff] %v11518_v34  ;;  %3144 = vrot.lane.b32.xlu1 %v11521_v9, %s8279_s6  ;;  %v15422_v34 = vld [vmem:[#allocation61_spill] sm:$0xff] }
 0x445   : > { %3142 = vrot.lane.b32.xlu0 %v11526_v38, %s8279_s6  ;;  %7647 = vmatprep.subr.bf16.mxu0 %v5409_v2 }
 0x446   : > { %v11530_v11 = vpop.permute.xlu1 %3032  ;;  %7648 = vmatpush3.bf16.msra.mxu0 %v5409_v2  ;;  %7842 = vmatprep.subr.bf16.mxu1 %v5409_v2 }
 0x447   : > { %15398 = vst [vmem:[#allocation626_spill] sm:$0xff] %v11530_v11  ;;  %v11532_v47 = vpop.permute.xlu0 %3030  ;;  %7844 = vmatpush3.bf16.msra.mxu1 %v5409_v2 }
 0x448   : > { %15399 = vst [vmem:[#allocation627_spill] sm:$0xff] %v11532_v47  ;;  %3254 = vrot.lane.b32.xlu1 %v14996_v51, %s8281_s11 }
 0x449   : > { %3146 = vrot.lane.b32.xlu0 %v11537_v24, %s8279_s6  ;;  %v15479_v24 = vld [vmem:[#allocation306_spill] sm:$0xff] }
 0x44a   : > { %v11541_v59 = vpop.permute.xlu1 %3036 }
 0x44b   : > { %15401 = vst [vmem:[#allocation629_spill] sm:$0xff] %v11541_v59  ;;  %v11543_v42 = vpop.permute.xlu0 %3034  ;;  %v11634_v59 = vld [vmem:[%s8335_s22 + $0x1e8] sm:$0xff]  }
 0x44c   : > { %15402 = vst [vmem:[#allocation630_spill] sm:$0xff] %v11543_v42  ;;  %3256 = vrot.lane.b32.xlu1 %v15001_v28, %s8281_s11  ;;  %15415 = vst [vmem:[#allocation643_spill] sm:$0xff] %v11634_v59 }
 0x44d   : > { %3350 = vrot.lane.b32.xlu0 %v15092_v58, %s8281_s11 }
 0x44e   : > { %v11549_v18 = vpop.permute.xlu1 %3040 }
 0x44f   : > { %v11551_v11 = vpop.permute.xlu0 %3038 }
 0x450   : > { %3453 = vrot.lane.b32.xlu1 %v15191_v48, %s8282_s12 }
 0x451   : > { %3352 = vrot.lane.b32.xlu0 %v15097_v25, %s8281_s11 }
 0x452   : > { %v11557_v51 = vpop.permute.xlu1 %3044 }
 0x453   : > { %v11559_v2 = vpop.permute.xlu0 %3042 }
 0x454   : > { %3455 = vrot.lane.b32.xlu1 %v15196_v3, %s8282_s12 }
 0x455   : > { %3549 = vrot.lane.b32.xlu0 %v15287_v27, %s8282_s12 }
 0x456   : > { %v11565_v58 = vpop.permute.xlu1 %3048 }
 0x457   : > { %v11567_v28 = vpop.permute.xlu0 %3046 }
 0x458   : > { %3258 = vrot.lane.b32.xlu1 %v15000_v45, %s8281_s11 }
 0x459   : > { %3551 = vrot.lane.b32.xlu0 %v15292_v62, %s8282_s12 }
 0x45a   : > { %v11573_v48 = vpop.permute.xlu1 %3052 }
 0x45b   : > { %v11575_v25 = vpop.permute.xlu0 %3050 }
 0x45c   : > { %3260 = vrot.lane.b32.xlu1 %v15005_v21, %s8281_s11 }
 0x45d   : > { %3354 = vrot.lane.b32.xlu0 %v15096_v60, %s8281_s11 }
 0x45e   : > { %v11581_v3 = vpop.permute.xlu1 %3056 }
 0x45f   : > { %v11583_v27 = vpop.permute.xlu0 %3054 }
 0x460   : > { %3457 = vrot.lane.b32.xlu1 %v15195_v13, %s8282_s12 }
 0x461   : > { %3356 = vrot.lane.b32.xlu0 %v15101_v10, %s8281_s11 }
 0x462   : > { %v11589_v45 = vpop.permute.xlu1 %3060 }
 0x463   : > { %15403 = vst [vmem:[#allocation631_spill] sm:$0xff] %v11589_v45  ;;  %v11591_v62 = vpop.permute.xlu0 %3058  ;;  %v15484_v45 = vld [vmem:[#allocation373_spill] sm:$0xff] }
 0x464   : > { %15404 = vst [vmem:[#allocation632_spill] sm:$0xff] %v11591_v62  ;;  %3459 = vrot.lane.b32.xlu1 %v15200_v14, %s8282_s12  ;;  %v15486_v62 = vld [vmem:[#allocation417_spill] sm:$0xff] }
 0x465   : > { %3553 = vrot.lane.b32.xlu0 %v15291_v41, %s8282_s12 }
 0x466   : > { %v11597_v21 = vpop.permute.xlu1 %3064 }
 0x467   : > { %15405 = vst [vmem:[#allocation633_spill] sm:$0xff] %v11597_v21  ;;  %v11599_v60 = vpop.permute.xlu0 %3062  ;;  %v15476_v21 = vld [vmem:[#allocation459_spill] sm:$0xff] }
 0x468   : > { %15406 = vst [vmem:[#allocation634_spill] sm:$0xff] %v11599_v60  ;;  %3262 = vrot.lane.b32.xlu1 %v15004_v19, %s8281_s11  ;;  %v15477_v60 = vld [vmem:[#allocation64_spill] sm:$0xff] }
 0x469   : > { %3555 = vrot.lane.b32.xlu0 %v15296_v12, %s8282_s12 }
 0x46a   : > { %v11605_v13 = vpop.permute.xlu1 %3068 }
 0x46b   : > { %15407 = vst [vmem:[#allocation635_spill] sm:$0xff] %v11605_v13  ;;  %v11607_v10 = vpop.permute.xlu0 %3066  ;;  %v15473_v13 = vld [vmem:[#allocation283_spill] sm:$0xff] }
 0x46c   : > { %15408 = vst [vmem:[#allocation636_spill] sm:$0xff] %v11607_v10  ;;  %3264 = vrot.lane.b32.xlu1 %v15009_v1, %s8281_s11  ;;  %v15474_v10 = vld [vmem:[#allocation273_spill] sm:$0xff] }
 0x46d   : > { %3358 = vrot.lane.b32.xlu0 %v15100_v50, %s8281_s11 }
 0x46e   : > { %v11613_v14 = vpop.permute.xlu1 %3072 }
 0x46f   : > { %15409 = vst [vmem:[#allocation637_spill] sm:$0xff] %v11613_v14  ;;  %v11615_v41 = vpop.permute.xlu0 %3070 }
 0x470   : > { %15410 = vst [vmem:[#allocation638_spill] sm:$0xff] %v11615_v41  ;;  %3461 = vrot.lane.b32.xlu1 %v15199_v40, %s8282_s12  ;;  %v15471_v41 = vld [vmem:[#allocation60_spill] sm:$0xff] }
 0x471   : > { %3360 = vrot.lane.b32.xlu0 %v15105_v22, %s8281_s11 }
 0x472   : > { %v11621_v19 = vpop.permute.xlu1 %3076 }
 0x473   : > { %15411 = vst [vmem:[#allocation639_spill] sm:$0xff] %v11621_v19  ;;  %v11623_v12 = vpop.permute.xlu0 %3074  ;;  %v15462_v19 = vld [vmem:[#allocation15_spill] sm:$0xff] }
 0x474   : > { %15412 = vst [vmem:[#allocation640_spill] sm:$0xff] %v11623_v12  ;;  %3463 = vrot.lane.b32.xlu1 %v15204_v44, %s8282_s12  ;;  %v15418_v44 = vld [vmem:[#allocation63_spill] sm:$0xff] }
 0x475   : > { %3557 = vrot.lane.b32.xlu0 %v15295_v7, %s8282_s12  ;;  %v15419_v7 = vld [vmem:[#allocation12_spill] sm:$0xff] }
 0x476   : > { %v11629_v50 = vpop.permute.xlu1 %3080 }
 0x477   : > { %15413 = vst [vmem:[#allocation641_spill] sm:$0xff] %v11629_v50  ;;  %v11631_v1 = vpop.permute.xlu0 %3078 }
 0x478   : > { %15414 = vst [vmem:[#allocation642_spill] sm:$0xff] %v11631_v1  ;;  %3148 = vrot.lane.b32.xlu1 %v11634_v59, %s8279_s6  ;;  %v15478_v59 = vld [vmem:[#allocation544_spill] sm:$0xff] }
 0x479   : > { %3559 = vrot.lane.b32.xlu0 %v15300_v57, %s8282_s12  ;;  %v15423_v57 = vld [vmem:[#allocation11_spill] sm:$0xff] }
 0x47a   : > { %v11640_v22 = vpop.permute.xlu1 %3084 }
 0x47b   : > { %15416 = vst [vmem:[#allocation644_spill] sm:$0xff] %v11640_v22  ;;  %v11642_v40 = vpop.permute.xlu0 %3082 }
 0x47c   : > { %15417 = vst [vmem:[#allocation645_spill] sm:$0xff] %v11642_v40  ;;  %3362 = vrot.lane.b32.xlu1 %v15418_v44, %s8281_s11  ;;  %v15426_v44 = vld [vmem:[#allocation288_spill] sm:$0xff] }
 0x47d   : > { %3266 = vrot.lane.b32.xlu0 %v15419_v7, %s8281_s11  ;;  %v15427_v7 = vld [vmem:[#allocation157_spill] sm:$0xff] }
 0x47e   : > { %v11648_v42 = vpop.permute.xlu1 %3088 }
 0x47f   : > { %15420 = vst [vmem:[#allocation63_spill] sm:$0xff] %v11648_v42  ;;  %v11650_v47 = vpop.permute.xlu0 %3086 }
 0x480   : > { %15421 = vst [vmem:[#allocation12_spill] sm:$0xff] %v11650_v47  ;;  %3364 = vrot.lane.b32.xlu1 %v15422_v34, %s8281_s11  ;;  %v15430_v34 = vld [vmem:[#allocation155_spill] sm:$0xff]  ;;  %v15442_v47 = vld [vmem:[#allocation13_spill] sm:$0xff] }
 0x481   : > { %3268 = vrot.lane.b32.xlu0 %v15423_v57, %s8281_s11 }
 0x482   : > { %v11656_v22 = vpop.permute.xlu1 %3092 }
 0x483   : > { %15424 = vst [vmem:[#allocation61_spill] sm:$0xff] %v11656_v22  ;;  %v11658_v40 = vpop.permute.xlu0 %3090 }
 0x484   : > { %15425 = vst [vmem:[#allocation11_spill] sm:$0xff] %v11658_v40  ;;  %3561 = vrot.lane.b32.xlu1 %v15426_v44, %s8282_s12  ;;  %v11677_v40 = vld [vmem:[%s8335_s22 + $0x1f8] sm:$0xff]   ;;  %v11682_v44 = vld [vmem:[%s8335_s22 + $0x1f0] sm:$0xff]  }
 0x485   : > { %3465 = vrot.lane.b32.xlu0 %v15427_v7, %s8282_s12  ;;  %15433 = vst [vmem:[#allocation647_spill] sm:$0xff] %v11677_v40  ;;  %15434 = vst [vmem:[#allocation648_spill] sm:$0xff] %v11682_v44 }
 0x486   : > { %v11664_v42 = vpop.permute.xlu1 %3096 }
 0x487   : > { %15428 = vst [vmem:[#allocation288_spill] sm:$0xff] %v11664_v42  ;;  %v11666_v50 = vpop.permute.xlu0 %3094  ;;  %v15441_v42 = vld [vmem:[#allocation65_spill] sm:$0xff] }
 0x488   : > { %15429 = vst [vmem:[#allocation157_spill] sm:$0xff] %v11666_v50  ;;  %3563 = vrot.lane.b32.xlu1 %v15304_v46, %s8282_s12 }
 0x489   : > { %3467 = vrot.lane.b32.xlu0 %v15430_v34, %s8282_s12  ;;  %v15437_v34 = vld [vmem:[#allocation67_spill] sm:$0xff] }
 0x48a   : > { %v11672_v57 = vpop.permute.xlu1 %3100 }
 0x48b   : > { %15431 = vst [vmem:[#allocation155_spill] sm:$0xff] %v11672_v57  ;;  %v11674_v22 = vpop.permute.xlu0 %3098  ;;  %v15438_v57 = vld [vmem:[#allocation14_spill] sm:$0xff] }
 0x48c   : > { %15432 = vst [vmem:[#allocation646_spill] sm:$0xff] %v11674_v22  ;;  %3152 = vrot.lane.b32.xlu1 %v11677_v40, %s8279_s6  ;;  %v15475_v40 = vld [vmem:[#allocation17_spill] sm:$0xff] }
 0x48d   : > { %3150 = vrot.lane.b32.xlu0 %v11682_v44, %s8279_s6 }
 0x48e   : > { %v11686_v7 = vpop.permute.xlu1 %3104 }
 0x48f   : > { %15435 = vst [vmem:[#allocation649_spill] sm:$0xff] %v11686_v7  ;;  %v11688_v46 = vpop.permute.xlu0 %3102 }
 0x490   : > { %15436 = vst [vmem:[#allocation650_spill] sm:$0xff] %v11688_v46  ;;  %3366 = vrot.lane.b32.xlu1 %v15437_v34, %s8281_s11  ;;  %v15445_v34 = vld [vmem:[#allocation294_spill] sm:$0xff] }
 0x491   : > { %3270 = vrot.lane.b32.xlu0 %v15438_v57, %s8281_s11  ;;  %v15446_v57 = vld [vmem:[#allocation161_spill] sm:$0xff] }
 0x492   : > { %v11694_v22 = vpop.permute.xlu1 %3108 }
 0x493   : > { %15439 = vst [vmem:[#allocation67_spill] sm:$0xff] %v11694_v22  ;;  %v11696_v50 = vpop.permute.xlu0 %3106 }
 0x494   : > { %15440 = vst [vmem:[#allocation14_spill] sm:$0xff] %v11696_v50  ;;  %3368 = vrot.lane.b32.xlu1 %v15441_v42, %s8281_s11  ;;  %v15449_v50 = vld [vmem:[#allocation290_spill] sm:$0xff]  ;;  %v15450_v42 = vld [vmem:[#allocation159_spill] sm:$0xff] }
 0x495   : > { %3272 = vrot.lane.b32.xlu0 %v15442_v47, %s8281_s11 }
 0x496   : > { %v11702_v7 = vpop.permute.xlu1 %3112 }
 0x497   : > { %15443 = vst [vmem:[#allocation65_spill] sm:$0xff] %v11702_v7  ;;  %v11704_v46 = vpop.permute.xlu0 %3110 }
 0x498   : > { %15444 = vst [vmem:[#allocation13_spill] sm:$0xff] %v11704_v46  ;;  %3565 = vrot.lane.b32.xlu1 %v15445_v34, %s8282_s12  ;;  %v11723_v46 = vld [vmem:[%s8335_s22 + $0x208] sm:$0xff]   ;;  %v11728_v34 = vld [vmem:[%s8335_s22 + $0x200] sm:$0xff]  }
 0x499   : > { %3469 = vrot.lane.b32.xlu0 %v15446_v57, %s8282_s12  ;;  %15453 = vst [vmem:[#allocation651_spill] sm:$0xff] %v11723_v46  ;;  %15454 = vst [vmem:[#allocation652_spill] sm:$0xff] %v11728_v34 }
 0x49a   : > { %v11710_v22 = vpop.permute.xlu1 %3116 }
 0x49b   : > { %15447 = vst [vmem:[#allocation294_spill] sm:$0xff] %v11710_v22  ;;  %v11712_v1 = vpop.permute.xlu0 %3114 }
 0x49c   : > { %15448 = vst [vmem:[#allocation161_spill] sm:$0xff] %v11712_v1  ;;  %3567 = vrot.lane.b32.xlu1 %v15449_v50, %s8282_s12  ;;  %v15461_v1 = vld [vmem:[#allocation69_spill] sm:$0xff] }
 0x49d   : > { %3471 = vrot.lane.b32.xlu0 %v15450_v42, %s8282_s12  ;;  %v15457_v42 = vld [vmem:[#allocation71_spill] sm:$0xff] }
 0x49e   : > { %v11718_v47 = vpop.permute.xlu1 %3120 }
 0x49f   : > { %15451 = vst [vmem:[#allocation290_spill] sm:$0xff] %v11718_v47  ;;  %v11720_v7 = vpop.permute.xlu0 %3118  ;;  %v15458_v47 = vld [vmem:[#allocation16_spill] sm:$0xff] }
 0x4a0   : > { %15452 = vst [vmem:[#allocation159_spill] sm:$0xff] %v11720_v7  ;;  %3156 = vrot.lane.b32.xlu1 %v11723_v46, %s8279_s6 }
 0x4a1   : > { %3154 = vrot.lane.b32.xlu0 %v11728_v34, %s8279_s6  ;;  %v15472_v34 = vld [vmem:[#allocation73_spill] sm:$0xff] }
 0x4a2   : > { %v11732_v57 = vpop.permute.xlu1 %3124 }
 0x4a3   : > { %15455 = vst [vmem:[#allocation653_spill] sm:$0xff] %v11732_v57  ;;  %v11734_v50 = vpop.permute.xlu0 %3122 }
 0x4a4   : > { %15456 = vst [vmem:[#allocation654_spill] sm:$0xff] %v11734_v50  ;;  %3370 = vrot.lane.b32.xlu1 %v15457_v42, %s8281_s11  ;;  %v15465_v42 = vld [vmem:[#allocation300_spill] sm:$0xff] }
 0x4a5   : > { %3274 = vrot.lane.b32.xlu0 %v15458_v47, %s8281_s11  ;;  %v15466_v47 = vld [vmem:[#allocation165_spill] sm:$0xff] }
 0x4a6   : > { %v11740_v7 = vpop.permute.xlu1 %3128 }
 0x4a7   : > { %15459 = vst [vmem:[#allocation71_spill] sm:$0xff] %v11740_v7  ;;  %v11742_v22 = vpop.permute.xlu0 %3126 }
 0x4a8   : > { %15460 = vst [vmem:[#allocation16_spill] sm:$0xff] %v11742_v22  ;;  %3372 = vrot.lane.b32.xlu1 %v15461_v1, %s8281_s11  ;;  %v15467_v1 = vld [vmem:[#allocation163_spill] sm:$0xff] }
 0x4a9   : > { %3276 = vrot.lane.b32.xlu0 %v15462_v19, %s8281_s11 }
 0x4aa   : > { %v11748_v57 = vpop.permute.xlu1 %3132 }
 0x4ab   : > { %15463 = vst [vmem:[#allocation69_spill] sm:$0xff] %v11748_v57  ;;  %v11750_v50 = vpop.permute.xlu0 %3130 }
 0x4ac   : > { %15464 = vst [vmem:[#allocation15_spill] sm:$0xff] %v11750_v50  ;;  %3569 = vrot.lane.b32.xlu1 %v15465_v42, %s8282_s12  ;;  %v8143_v50 = vld [vmem:[%s8335_s22 + $0x218] sm:$0xff]   ;;  %v11769_v42 = vld [vmem:[%s8335_s22 + $0x210] sm:$0xff]  }
 0x4ad   : > { %3473 = vrot.lane.b32.xlu0 %v15466_v47, %s8282_s12  ;;  %15468 = vst [vmem:[#allocation300_spill] sm:$0xff] %v11769_v42 }
 0x4ae   : > { %v11756_v7 = vpop.permute.xlu1 %3136 }
 0x4af   : > { %v3135_v12 = vpop.permute.xlu0 %3134 }
 0x4b0   : > { %3571 = vrot.lane.b32.xlu1 %v15311_v52, %s8282_s12  ;;  %v15469_v52 = vld [vmem:[#allocation75_spill] sm:$0xff] }
 0x4b1   : > { %3475 = vrot.lane.b32.xlu0 %v15467_v1, %s8282_s12  ;;  %v15470_v1 = vld [vmem:[#allocation18_spill] sm:$0xff] }
 0x4b2   : > { %v11762_v19 = vpop.permute.xlu1 %3140 }
 0x4b3   : > { %v11764_v57 = vpop.permute.xlu0 %3138 }
 0x4b4   : > { %3160 = vrot.lane.b32.xlu1 %v8143_v50, %s8279_s6  ;;  %v8145_v50 = vld [vmem:[%s8335_s22] sm:$0xff]  }
 0x4b5   : > { %3158 = vrot.lane.b32.xlu0 %v11769_v42, %s8279_s6  ;;  %v3647_v46 = vsel %vm3645_vm4, %v8145_v50, %v15471_v41  ;;  %v8146_v50 = vld [vmem:[%s8335_s22 + $0x8] sm:$0xff]  }
 0x4b6   : > { %v11773_v47 = vpop.permute.xlu1 %3144 }
 0x4b7   : > { %v11775_v22 = vpop.permute.xlu0 %3142 }
 0x4b8   : > { %3374 = vrot.lane.b32.xlu1 %v15469_v52, %s8281_s11  ;;  %v3840_v52 = vsel %vm3838_vm5, %v3647_v46, %v15473_v13 }
 0x4b9   : > { %3278 = vrot.lane.b32.xlu0 %v15470_v1, %s8281_s11  ;;  %v4033_v1 = vsel %vm4031_vm6, %v3840_v52, %v15474_v10  ;;  %v15480_v10 = vld [vmem:[#allocation281_spill] sm:$0xff] }
 0x4ba   : > { %v3255_v14 = vpop.permute.xlu1 %3254  ;;  %v4226_v41 = vsel %vm4224_vm7, %v4033_v1, %v15476_v21  ;;  %v15481_v21 = vld [vmem:[#allocation154_spill] sm:$0xff] }
 0x4bb   : > { %v11784_v42 = vpop.permute.xlu0 %3146  ;;  %v4419_v13 = vsel %vm4417_vm8, %v4226_v41, %v15478_v59  ;;  %v3743_v1 = vsel %vm3645_vm4, %v11450_v5, %v15481_v21  ;;  %v15483_v41 = vld [vmem:[#allocation169_spill] sm:$0xff]  ;;  %v15487_v21 = vld [vmem:[#allocation278_spill] sm:$0xff] }
 0x4bc   : > { %3376 = vrot.lane.b32.xlu1 %v15472_v34, %s8281_s11  ;;  %v3649_v34 = vsel %vm3645_vm4, %v8146_v50, %v15477_v60  ;;  %v4612_v52 = vsel %vm4610_vm9, %v4419_v13, %v11551_v11  ;;  %v15482_v60 = vld [vmem:[#allocation274_spill] sm:$0xff] }
 0x4bd   : > { %3280 = vrot.lane.b32.xlu0 %v15475_v40, %s8281_s11  ;;  %v3842_v40 = vsel %vm3838_vm5, %v3649_v34, %v15480_v10  ;;  %v4805_v59 = vsel %vm4803_vm10, %v4612_v52, %v3255_v14  ;;  %v3936_v34 = vsel %vm3838_vm5, %v3743_v1, %v15484_v45  ;;  %v15485_v10 = vld [vmem:[#allocation57_spill] sm:$0xff]  ;;  %v15488_v14 = vld [vmem:[#allocation502_spill] sm:$0xff]  ;;  %v15489_v1 = vld [vmem:[#allocation152_spill] sm:$0xff] }
 0x4be   : > { %v3257_v44 = vpop.permute.xlu1 %3256  ;;  %v4035_v50 = vsel %vm4031_vm6, %v3842_v40, %v15482_v60  ;;  %v4129_v5 = vsel %vm4031_vm6, %v3936_v34, %v15486_v62  ;;  %v3745_v62 = vsel %vm3645_vm4, %v11445_v29, %v15489_v1  ;;  %v15494_v1 = vld [vmem:[#allocation58_spill] sm:$0xff] }
 0x4bf   : > { %v3351_v46 = vpop.permute.xlu0 %3350  ;;  %v4228_v11 = vsel %vm4224_vm7, %v4035_v50, %v15485_v10  ;;  %v4322_v45 = vsel %vm4224_vm7, %v4129_v5, %v15488_v14  ;;  %v8147_v5 = vld [vmem:[%s8335_s22 + $0x228] sm:$0xff]   ;;  %v11855_v14 = vld [vmem:[%s8335_s22 + $0x220] sm:$0xff]  }
 0x4c0   : > { %3573 = vrot.lane.b32.xlu1 %v15479_v24, %s8282_s12  ;;  %v4421_v40 = vsel %vm4417_vm8, %v4228_v11, %v15487_v21  ;;  %v4515_v50 = vsel %vm4417_vm8, %v4322_v45, %v11314_v23  ;;  %v15492_v11 = vld [vmem:[#allocation9_spill] sm:$0xff] }
 0x4c1   : > { %3477 = vrot.lane.b32.xlu0 %v15483_v41, %s8282_s12  ;;  %v4614_v52 = vsel %vm4610_vm9, %v4421_v40, %v11549_v18  ;;  %v4708_v10 = vsel %vm4610_vm9, %v4515_v50, %v3135_v12 }
 0x4c2   : > { %v3454_v24 = vpop.permute.xlu1 %3453  ;;  %v4901_v23 = vsel %vm4803_vm10, %v4708_v10, %v3351_v46 }
 0x4c3   : > { %v4998_v13 = vsel %vm4996_vm11, %v4805_v59, %v3454_v24  ;;  %v3353_v60 = vpop.permute.xlu0 %3352  ;;  %v4807_v59 = vsel %vm4803_vm10, %v4614_v52, %v3257_v44  ;;  %v15491_v24 = vld [vmem:[#allocation372_spill] sm:$0xff]  ;;  %v15493_v44 = vld [vmem:[#allocation151_spill] sm:$0xff] }
 0x4c4   : > { %3575 = vrot.lane.b32.xlu1 %v15315_v0, %s8282_s12  ;;  %7649 = vmatprep.mubr.msk.bf16.mxu0 %vm5211_vm12, %v4998_v13  ;;  %v15490_v0 = vld [vmem:[#allocation167_spill] sm:$0xff]  ;;  %v3938_v34 = vsel %vm3838_vm5, %v3745_v62, %v15491_v24  ;;  %v8149_v52 = vld [vmem:[%s8335_s22 + $0x10] sm:$0xff]  }
 0x4c5   : > { %3479 = vrot.lane.b32.xlu0 %v15490_v0, %s8282_s12  ;;  %v4131_v29 = vsel %vm4031_vm6, %v3938_v34, %v15492_v11  ;;  %v3651_v62 = vsel %vm3645_vm4, %v8149_v52, %v15494_v1  ;;  %v15496_v0 = vld [vmem:[#allocation289_spill] sm:$0xff]  ;;  %v15497_v34 = vld [vmem:[#allocation279_spill] sm:$0xff]  ;;  %v15504_v1 = vld [vmem:[#allocation158_spill] sm:$0xff] }
 0x4c6   : > { %v3456_v41 = vpop.permute.xlu1 %3455  ;;  %v4324_v21 = vsel %vm4224_vm7, %v4131_v29, %v15493_v44  ;;  %v15499_v11 = vld [vmem:[#allocation461_spill] sm:$0xff] }
 0x4c7   : > { %v5000_v18 = vsel %vm4996_vm11, %v4807_v59, %v3456_v41  ;;  %v3550_v13 = vpop.permute.xlu0 %3549  ;;  %v4517_v12 = vsel %vm4417_vm8, %v4324_v21, %v11312_v54  ;;  %v15495_v54 = vld [vmem:[#allocation79_spill] sm:$0xff]  ;;  %v3844_v41 = vsel %vm3838_vm5, %v3651_v62, %v15496_v0  ;;  %v8150_v29 = vld [vmem:[%s8335_s22 + $0x18] sm:$0xff]   ;;  %v3747_v62 = vsel %vm3645_vm4, %v11464_v8, %v15504_v1  ;;  %v15514_v1 = vld [vmem:[#allocation374_spill] sm:$0xff] }
 0x4c8   : > { %3164 = vrot.lane.b32.xlu1 %v8147_v5, %s8279_s6  ;;  %7650 = vmatmul.mubr.msk.bf16.vlgmr.msra.gmra.mrb[0].mxu0 %vm5211_vm12, %v5000_v18  ;;  %v5094_v40 = vsel %vm4996_vm11, %v4901_v23, %v3550_v13  ;;  %v4710_v45 = vsel %vm4610_vm9, %v4517_v12, %v11756_v7  ;;  %v4037_v10 = vsel %vm4031_vm6, %v3844_v41, %v15497_v34  ;;  %v15498_v7 = vld [vmem:[#allocation20_spill] sm:$0xff]  ;;  %v15500_v23 = vld [vmem:[#allocation62_spill] sm:$0xff]  ;;  %v15501_v5 = vld [vmem:[#allocation545_spill] sm:$0xff] }
 0x4c9   : > { %3162 = vrot.lane.b32.xlu0 %v11855_v14, %s8279_s6  ;;  %7745 = vmatprep.mubr.msk.bf16.mxu1 %vm5211_vm12, %v5094_v40  ;;  %v4903_v50 = vsel %vm4803_vm10, %v4710_v45, %v3353_v60  ;;  %v4230_v60 = vsel %vm4224_vm7, %v4037_v10, %v15499_v11  ;;  %v3653_v13 = vsel %vm3645_vm4, %v8150_v29, %v15500_v23  ;;  %v15502_v40 = vld [vmem:[#allocation77_spill] sm:$0xff]  ;;  %v15503_v12 = vld [vmem:[#allocation287_spill] sm:$0xff]  ;;  %v15508_v10 = vld [vmem:[#allocation460_spill] sm:$0xff] }
 0x4ca   : > { %v3259_v46 = vpop.permute.xlu1 %3258  ;;  %v4423_v44 = vsel %vm4417_vm8, %v4230_v60, %v15501_v5  ;;  %v3846_v45 = vsel %vm3838_vm5, %v3653_v13, %v15503_v12  ;;  %v15506_v0 = vld [vmem:[#allocation19_spill] sm:$0xff]  ;;  %v15510_v60 = vld [vmem:[#allocation284_spill] sm:$0xff] }
 0x4cb   : > { %v3552_v59 = vpop.permute.xlu0 %3551  ;;  %v4616_v52 = vsel %vm4610_vm9, %v4423_v44, %v11559_v2  ;;  %v15509_v11 = vld [vmem:[#allocation419_spill] sm:$0xff]  ;;  %v15512_v44 = vld [vmem:[#allocation156_spill] sm:$0xff] }
 0x4cc   : > { %3378 = vrot.lane.b32.xlu1 %v15495_v54, %s8281_s11  ;;  %v5096_v24 = vsel %vm4996_vm11, %v4903_v50, %v3552_v59  ;;  %v15505_v50 = vld [vmem:[#allocation280_spill] sm:$0xff]  ;;  %v4809_v54 = vsel %vm4803_vm10, %v4616_v52, %v3259_v46  ;;  %v15513_v52 = vld [vmem:[#allocation173_spill] sm:$0xff] }
 0x4cd   : > { %3282 = vrot.lane.b32.xlu0 %v15498_v7, %s8281_s11  ;;  %7746 = vmatmul.mubr.msk.bf16.vlgmr.msra.gmra.mrb[0].mxu1 %vm5211_vm12, %v5096_v24  ;;  %v4039_v59 = vsel %vm4031_vm6, %v3846_v45, %v15505_v50  ;;  %v15507_v24 = vld [vmem:[#allocation375_spill] sm:$0xff]  ;;  %v15511_v46 = vld [vmem:[#allocation504_spill] sm:$0xff] }
 0x4ce   : > { %v3261_v18 = vpop.permute.xlu1 %3260  ;;  %v3940_v34 = vsel %vm3838_vm5, %v3747_v62, %v15507_v24  ;;  %v4232_v7 = vsel %vm4224_vm7, %v4039_v59, %v15508_v10  ;;  %v15515_v59 = vld [vmem:[#allocation418_spill] sm:$0xff]  ;;  %v15517_v24 = vld [vmem:[#allocation171_spill] sm:$0xff]  ;;  %v15518_v10 = vld [vmem:[#allocation68_spill] sm:$0xff] }
 0x4cf   : > { %v3355_v21 = vpop.permute.xlu0 %3354  ;;  %v4133_v8 = vsel %vm4031_vm6, %v3940_v34, %v15509_v11  ;;  %v4425_v29 = vsel %vm4417_vm8, %v4232_v7, %v15510_v60  ;;  %v8151_v34 = vld [vmem:[%s8335_s22 + $0x20] sm:$0xff]  }
 0x4d0   : > { %3380 = vrot.lane.b32.xlu1 %v15502_v40, %s8281_s11  ;;  %v4326_v13 = vsel %vm4224_vm7, %v4133_v8, %v15511_v46  ;;  %v4618_v5 = vsel %vm4610_vm9, %v4425_v29, %v11557_v51  ;;  %v3749_v40 = vsel %vm3645_vm4, %v11459_v43, %v15512_v44  ;;  %v3655_v7 = vsel %vm3645_vm4, %v8151_v34, %v15518_v10  ;;  %v8152_v8 = vld [vmem:[%s8335_s22 + $0x238] sm:$0xff]   ;;  %v15530_v34 = vld [vmem:[#allocation462_spill] sm:$0xff] }
 0x4d1   : > { %3284 = vrot.lane.b32.xlu0 %v15506_v0, %s8281_s11  ;;  %v4519_v12 = vsel %vm4417_vm8, %v4326_v13, %v11322_v17  ;;  %v4811_v45 = vsel %vm4803_vm10, %v4618_v5, %v3261_v18  ;;  %v3942_v62 = vsel %vm3838_vm5, %v3749_v40, %v15514_v1  ;;  %v15520_v46 = vld [vmem:[#allocation285_spill] sm:$0xff]  ;;  %v11954_v5 = vld [vmem:[%s8335_s22 + $0x230] sm:$0xff]   ;;  %v8154_v40 = vld [vmem:[%s8335_s22 + $0x28] sm:$0xff]  }
 0x4d2   : > { %v3458_v41 = vpop.permute.xlu1 %3457  ;;  %v4712_v51 = vsel %vm4610_vm9, %v4519_v12, %v11764_v57  ;;  %v4135_v43 = vsel %vm4031_vm6, %v3942_v62, %v15515_v59  ;;  %v15522_v12 = vld [vmem:[#allocation66_spill] sm:$0xff]  ;;  %v15524_v62 = vld [vmem:[#allocation83_spill] sm:$0xff] }
 0x4d3   : > { %v5002_v2 = vsel %vm4996_vm11, %v4809_v54, %v3458_v41  ;;  %v3357_v23 = vpop.permute.xlu0 %3356  ;;  %v4905_v17 = vsel %vm4803_vm10, %v4712_v51, %v3355_v21  ;;  %v15516_v54 = vld [vmem:[#allocation503_spill] sm:$0xff]  ;;  %v15525_v51 = vld [vmem:[#allocation293_spill] sm:$0xff] }
 0x4d4   : > { %3577 = vrot.lane.b32.xlu1 %v15314_v15, %s8282_s12  ;;  %7653 = vmatprep.mubr.msk.bf16.mxu0 %vm5211_vm12, %v5002_v2  ;;  %v4328_v0 = vsel %vm4224_vm7, %v4135_v43, %v15516_v54  ;;  %v15526_v43 = vld [vmem:[#allocation162_spill] sm:$0xff] }
 0x4d5   : > { %3481 = vrot.lane.b32.xlu0 %v15513_v52, %s8282_s12  ;;  %v4521_v41 = vsel %vm4417_vm8, %v4328_v0, %v11320_v32  ;;  %v15519_v32 = vld [vmem:[#allocation295_spill] sm:$0xff] }
 0x4d6   : > { %v3460_v15 = vpop.permute.xlu1 %3459  ;;  %v3848_v60 = vsel %vm3838_vm5, %v3655_v7, %v15519_v32  ;;  %v15523_v52 = vld [vmem:[#allocation547_spill] sm:$0xff]  ;;  %v15531_v7 = vld [vmem:[#allocation421_spill] sm:$0xff]  ;;  %v15534_v32 = vld [vmem:[#allocation506_spill] sm:$0xff] }
 0x4d7   : > { %v5004_v50 = vsel %vm4996_vm11, %v4811_v45, %v3460_v15  ;;  %v3554_v18 = vpop.permute.xlu0 %3553  ;;  %v4041_v13 = vsel %vm4031_vm6, %v3848_v60, %v15520_v46  ;;  %v3657_v45 = vsel %vm3645_vm4, %v8154_v40, %v15522_v12  ;;  %v15535_v46 = vld [vmem:[#allocation160_spill] sm:$0xff]  ;;  %v15536_v40 = vld [vmem:[#allocation21_spill] sm:$0xff] }
 0x4d8   : > { %3579 = vrot.lane.b32.xlu1 %v15318_v31, %s8282_s12  ;;  %7654 = vmatmul.mubr.msk.bf16.gmra.mrb[4].mxu0 %vm5211_vm12, %v5004_v50  ;;  %v5098_v57 = vsel %vm4996_vm11, %v4905_v17, %v3554_v18  ;;  %v4714_v31 = vsel %vm4610_vm9, %v4521_v41, %v11762_v19  ;;  %v3850_v50 = vsel %vm3838_vm5, %v3657_v45, %v15525_v51  ;;  %v15527_v18 = vld [vmem:[#allocation286_spill] sm:$0xff]  ;;  %v15537_v45 = vld [vmem:[#allocation376_spill] sm:$0xff] }
 0x4d9   : > { %3483 = vrot.lane.b32.xlu0 %v15517_v24, %s8282_s12  ;;  %7749 = vmatprep.mubr.msk.bf16.mxu1 %vm5211_vm12, %v5098_v57  ;;  %v4907_v2 = vsel %vm4803_vm10, %v4714_v31, %v3357_v23  ;;  %v15521_v23 = vld [vmem:[#allocation463_spill] sm:$0xff]  ;;  %v3751_v17 = vsel %vm3645_vm4, %v11478_v36, %v15526_v43  ;;  %v4043_v54 = vsel %vm4031_vm6, %v3850_v50, %v15527_v18  ;;  %v15528_v57 = vld [vmem:[#allocation22_spill] sm:$0xff]  ;;  %v15529_v24 = vld [vmem:[#allocation377_spill] sm:$0xff] }
 0x4da   : > { %v3263_v21 = vpop.permute.xlu1 %3262  ;;  %v4234_v44 = vsel %vm4224_vm7, %v4041_v13, %v15521_v23  ;;  %v3944_v31 = vsel %vm3838_vm5, %v3751_v17, %v15529_v24  ;;  %v4236_v10 = vsel %vm4224_vm7, %v4043_v54, %v15530_v34  ;;  %v3753_v13 = vsel %vm3645_vm4, %v11473_v63, %v15535_v46  ;;  %v15540_v43 = vld [vmem:[#allocation177_spill] sm:$0xff] }
 0x4db   : > { %v3556_v11 = vpop.permute.xlu0 %3555  ;;  %v4427_v15 = vsel %vm4417_vm8, %v4234_v44, %v15523_v52  ;;  %v4137_v36 = vsel %vm4031_vm6, %v3944_v31, %v15531_v7  ;;  %v3946_v52 = vsel %vm3838_vm5, %v3753_v13, %v15537_v45  ;;  %v15543_v31 = vld [vmem:[#allocation379_spill] sm:$0xff] }
 0x4dc   : > { %3168 = vrot.lane.b32.xlu1 %v8152_v8, %s8279_s6  ;;  %v5100_v29 = vsel %vm4996_vm11, %v4907_v2, %v3556_v11  ;;  %v4620_v59 = vsel %vm4610_vm9, %v4427_v15, %v11567_v28  ;;  %v15532_v2 = vld [vmem:[#allocation546_spill] sm:$0xff]  ;;  %v4330_v60 = vsel %vm4224_vm7, %v4137_v36, %v15534_v32  ;;  %v15548_v32 = vld [vmem:[#allocation164_spill] sm:$0xff] }
 0x4dd   : > { %3166 = vrot.lane.b32.xlu0 %v11954_v5, %s8279_s6  ;;  %7750 = vmatmul.mubr.msk.bf16.gmra.mrb[4].mxu1 %vm5211_vm12, %v5100_v29  ;;  %v4813_v0 = vsel %vm4803_vm10, %v4620_v59, %v3263_v21  ;;  %v4429_v11 = vsel %vm4417_vm8, %v4236_v10, %v15532_v2  ;;  %v15533_v21 = vld [vmem:[#allocation81_spill] sm:$0xff]  ;;  %v4523_v23 = vsel %vm4417_vm8, %v4330_v60, %v11330_v56  ;;  %v8156_v36 = vld [vmem:[%s8335_s22 + $0x240] sm:$0xff]  }
 0x4de   : > { %v3265_v19 = vpop.permute.xlu1 %3264  ;;  %v4622_v29 = vsel %vm4610_vm9, %v4429_v11, %v11565_v58  ;;  %v4716_v15 = vsel %vm4610_vm9, %v4523_v23, %v11775_v22  ;;  %v15546_v11 = vld [vmem:[#allocation301_spill] sm:$0xff]  ;;  %v3757_v60 = vsel %vm3645_vm4, %v11487_v53, %v15548_v32  ;;  %v15550_v23 = vld [vmem:[#allocation87_spill] sm:$0xff]  ;;  %v15553_v53 = vld [vmem:[#allocation70_spill] sm:$0xff] }
 0x4df   : > { %v3359_v1 = vpop.permute.xlu0 %3358  ;;  %v4815_v44 = vsel %vm4803_vm10, %v4622_v29, %v3265_v19  ;;  %v15539_v19 = vld [vmem:[#allocation505_spill] sm:$0xff]  ;;  %v15549_v29 = vld [vmem:[#allocation291_spill] sm:$0xff] }
 0x4e0   : > { %3382 = vrot.lane.b32.xlu1 %v15524_v62, %s8281_s11  ;;  %v15538_v62 = vld [vmem:[#allocation420_spill] sm:$0xff]  ;;  %v4909_v51 = vsel %vm4803_vm10, %v4716_v15, %v3359_v1  ;;  %v3661_v15 = vsel %vm3645_vm4, %v11265_v26, %v15553_v53 }
 0x4e1   : > { %3286 = vrot.lane.b32.xlu0 %v15528_v57, %s8281_s11  ;;  %v4139_v63 = vsel %vm4031_vm6, %v3946_v52, %v15538_v62  ;;  %v15542_v57 = vld [vmem:[#allocation166_spill] sm:$0xff]  ;;  %v15555_v62 = vld [vmem:[#allocation548_spill] sm:$0xff] }
 0x4e2   : > { %v3462_v41 = vpop.permute.xlu1 %3461  ;;  %v4332_v50 = vsel %vm4224_vm7, %v4139_v63, %v15539_v19  ;;  %v15572_v53 = vld [vmem:[#allocation168_spill] sm:$0xff] }
 0x4e3   : > { %v5006_v28 = vsel %vm4996_vm11, %v4813_v0, %v3462_v41  ;;  %v3361_v8 = vpop.permute.xlu0 %3360  ;;  %v4525_v22 = vsel %vm4417_vm8, %v4332_v50, %v11328_v55  ;;  %v15541_v55 = vld [vmem:[#allocation175_spill] sm:$0xff]  ;;  %v3755_v41 = vsel %vm3645_vm4, %v11492_v37, %v15542_v57  ;;  %v15561_v57 = vld [vmem:[#allocation464_spill] sm:$0xff] }
 0x4e4   : > { %3384 = vrot.lane.b32.xlu1 %v15533_v21, %s8281_s11  ;;  %7657 = vmatprep.mubr.msk.bf16.mxu0 %vm5211_vm12, %v5006_v28  ;;  %v3948_v34 = vsel %vm3838_vm5, %v3755_v41, %v15543_v31  ;;  %v15545_v28 = vld [vmem:[#allocation423_spill] sm:$0xff]  ;;  %v15562_v31 = vld [vmem:[#allocation296_spill] sm:$0xff] }
 0x4e5   : > { %3288 = vrot.lane.b32.xlu0 %v15536_v40, %s8281_s11  ;;  %v4141_v7 = vsel %vm4031_vm6, %v3948_v34, %v15545_v28  ;;  %v15557_v50 = vld [vmem:[#allocation299_spill] sm:$0xff] }
 0x4e6   : > { %v3464_v12 = vpop.permute.xlu1 %3463 }
 0x4e7   : > { %v5008_v58 = vsel %vm4996_vm11, %v4815_v44, %v3464_v12  ;;  %v3558_v56 = vpop.permute.xlu0 %3557  ;;  %v15551_v44 = vld [vmem:[#allocation378_spill] sm:$0xff]  ;;  %v15552_v12 = vld [vmem:[#allocation465_spill] sm:$0xff] }
 0x4e8   : > { %3581 = vrot.lane.b32.xlu1 %v9861_v35, %s8282_s12  ;;  %7658 = vmatmul.mubr.msk.bf16.gmra.mrb[8].mxu0 %vm5211_vm12, %v5008_v58  ;;  %v5102_v59 = vsel %vm4996_vm11, %v4909_v51, %v3558_v56  ;;  %v4718_v35 = vsel %vm4610_vm9, %v4525_v22, %v11773_v47  ;;  %v8155_v47 = vld [vmem:[%s8335_s22 + $0x248] sm:$0xff]   ;;  %v3950_v40 = vsel %vm3838_vm5, %v3757_v60, %v15551_v44  ;;  %v15554_v58 = vld [vmem:[#allocation422_spill] sm:$0xff]  ;;  %v15556_v56 = vld [vmem:[#allocation24_spill] sm:$0xff] }
 0x4e9   : > { %3485 = vrot.lane.b32.xlu0 %v15540_v43, %s8282_s12  ;;  %7753 = vmatprep.mubr.msk.bf16.mxu1 %vm5211_vm12, %v5102_v59  ;;  %v4911_v17 = vsel %vm4803_vm10, %v4718_v35, %v3361_v8  ;;  %v15547_v8 = vld [vmem:[#allocation508_spill] sm:$0xff]  ;;  %v3854_v59 = vsel %vm3838_vm5, %v3661_v15, %v15557_v50  ;;  %v8157_v60 = vld [vmem:[%s8335_s22 + $0x258] sm:$0xff]   ;;  %v3761_v15 = vsel %vm3645_vm4, %v11501_v49, %v15572_v53  ;;  %v15577_v50 = vld [vmem:[#allocation467_spill] sm:$0xff] }
 0x4ea   : > { %v3149_v1 = vpop.permute.xlu1 %3148  ;;  %v4334_v21 = vsel %vm4224_vm7, %v4141_v7, %v15547_v8  ;;  %v15559_v35 = vld [vmem:[#allocation292_spill] sm:$0xff]  ;;  %v15579_v49 = vld [vmem:[#allocation583_spill] sm:$0xff] }
 0x4eb   : > { %v3560_v18 = vpop.permute.xlu0 %3559  ;;  %v4527_v46 = vsel %vm4417_vm8, %v4334_v21, %v11338_v16  ;;  %v4143_v16 = vsel %vm4031_vm6, %v3950_v40, %v15554_v58  ;;  %v8158_v44 = vld [vmem:[%s8335_s22 + $0x250] sm:$0xff]   ;;  %v15573_v58 = vld [vmem:[#allocation297_spill] sm:$0xff]  ;;  %v8159_v53 = vld [vmem:[%s8335_s22 + $0x268] sm:$0xff]  }
 0x4ec   : > { %3583 = vrot.lane.b32.xlu1 %v9849_v39, %s8282_s12  ;;  %v5104_v54 = vsel %vm4996_vm11, %v4911_v17, %v3560_v18  ;;  %v15544_v39 = vld [vmem:[#allocation72_spill] sm:$0xff]  ;;  %v4720_v52 = vsel %vm4610_vm9, %v4527_v46, %v11784_v42  ;;  %v15558_v42 = vld [vmem:[#allocation507_spill] sm:$0xff]  ;;  %v4047_v17 = vsel %vm4031_vm6, %v3854_v59, %v15559_v35 }
 0x4ed   : > { %3487 = vrot.lane.b32.xlu0 %v15541_v55, %s8282_s12  ;;  %7754 = vmatmul.mubr.msk.bf16.gmra.mrb[8].mxu1 %vm5211_vm12, %v5104_v54  ;;  %v3659_v10 = vsel %vm3645_vm4, %v11270_v61, %v15544_v39  ;;  %v4336_v22 = vsel %vm4224_vm7, %v4143_v16, %v15558_v42  ;;  %v4240_v41 = vsel %vm4224_vm7, %v4047_v17, %v15561_v57  ;;  %v15568_v46 = vld [vmem:[#allocation76_spill] sm:$0xff]  ;;  %v15574_v16 = vld [vmem:[#allocation591_spill] sm:$0xff]  ;;  %v15581_v17 = vld [vmem:[#allocation302_spill] sm:$0xff] }
 0x4ee   : > { %v3363_v0 = vpop.permute.xlu1 %3362  ;;  %v3852_v37 = vsel %vm3838_vm5, %v3659_v10, %v15546_v11  ;;  %v4529_v18 = vsel %vm4417_vm8, %v4336_v22, %v11336_v6  ;;  %v4433_v34 = vsel %vm4417_vm8, %v4240_v41, %v15562_v31  ;;  %v15578_v22 = vld [vmem:[#allocation74_spill] sm:$0xff]  ;;  %v15583_v57 = vld [vmem:[#allocation305_spill] sm:$0xff] }
 0x4ef   : > { %v3267_v24 = vpop.permute.xlu0 %3266  ;;  %v4045_v61 = vsel %vm4031_vm6, %v3852_v37, %v15549_v29  ;;  %v4913_v51 = vsel %vm4803_vm10, %v4720_v52, %v3363_v0  ;;  %v15560_v0 = vld [vmem:[#allocation85_spill] sm:$0xff]  ;;  %v4626_v10 = vsel %vm4610_vm9, %v4433_v34, %v11573_v48  ;;  %v15565_v37 = vld [vmem:[#allocation179_spill] sm:$0xff] }
 0x4f0   : > { %3172 = vrot.lane.b32.xlu1 %v8155_v47, %s8279_s6  ;;  %v4238_v45 = vsel %vm4224_vm7, %v4045_v61, %v15552_v12  ;;  %v15567_v29 = vld [vmem:[#allocation381_spill] sm:$0xff]  ;;  %v15570_v12 = vld [vmem:[#allocation307_spill] sm:$0xff] }
 0x4f1   : > { %3170 = vrot.lane.b32.xlu0 %v8156_v36, %s8279_s6  ;;  %v4431_v63 = vsel %vm4417_vm8, %v4238_v45, %v15555_v62  ;;  %v15571_v45 = vld [vmem:[#allocation510_spill] sm:$0xff] }
 0x4f2   : > { %v3365_v2 = vpop.permute.xlu1 %3364  ;;  %v4624_v26 = vsel %vm4610_vm9, %v4431_v63, %v11575_v25  ;;  %v4722_v25 = vsel %vm4610_vm9, %v4529_v18, %v3149_v1 }
 0x4f3   : > { %v3269_v13 = vpop.permute.xlu0 %3268  ;;  %v4817_v54 = vsel %vm4803_vm10, %v4624_v26, %v3267_v24  ;;  %v4915_v6 = vsel %vm4803_vm10, %v4722_v25, %v3365_v2  ;;  %v15563_v24 = vld [vmem:[#allocation23_spill] sm:$0xff]  ;;  %v15564_v2 = vld [vmem:[#allocation181_spill] sm:$0xff]  ;;  %v3665_v26 = vsel %vm3645_vm4, %v15579_v49, %v15578_v22  ;;  %v15601_v22 = vld [vmem:[#allocation172_spill] sm:$0xff] }
 0x4f4   : > { %3386 = vrot.lane.b32.xlu1 %v15550_v23, %s8281_s11  ;;  %v4819_v1 = vsel %vm4803_vm10, %v4626_v10, %v3269_v13  ;;  %v3663_v13 = vsel %vm3645_vm4, %v11284_v30, %v15568_v46  ;;  %v3858_v41 = vsel %vm3838_vm5, %v3665_v26, %v15583_v57  ;;  %v15584_v25 = vld [vmem:[#allocation509_spill] sm:$0xff]  ;;  %v15591_v46 = vld [vmem:[#allocation320_spill] sm:$0xff]  ;;  %v3765_v49 = vsel %vm3645_vm4, %v11521_v9, %v15601_v22  ;;  %v15602_v26 = vld [vmem:[#allocation303_spill] sm:$0xff] }
 0x4f5   : > { %3290 = vrot.lane.b32.xlu0 %v15556_v56, %s8281_s11  ;;  %v15576_v56 = vld [vmem:[#allocation380_spill] sm:$0xff]  ;;  %v15606_v57 = vld [vmem:[#allocation469_spill] sm:$0xff]  ;;  %v15607_v9 = vld [vmem:[#allocation78_spill] sm:$0xff] }
 0x4f6   : > { %v3562_v19 = vpop.permute.xlu1 %3561 }
 0x4f7   : > { %v5106_v43 = vsel %vm4996_vm11, %v4913_v51, %v3562_v19  ;;  %v3466_v55 = vpop.permute.xlu0 %3465  ;;  %v15575_v51 = vld [vmem:[#allocation91_spill] sm:$0xff]  ;;  %v3954_v19 = vsel %vm3838_vm5, %v3761_v15, %v15576_v56  ;;  %v8161_v56 = vld [vmem:[%s8335_s22 + $0x260] sm:$0xff]  }
 0x4f8   : > { %3388 = vrot.lane.b32.xlu1 %v15560_v0, %s8281_s11  ;;  %7757 = vmatprep.mubr.msk.bf16.mxu1 %vm5211_vm12, %v5106_v43  ;;  %v5010_v47 = vsel %vm4996_vm11, %v4817_v54, %v3466_v55  ;;  %v15580_v43 = vld [vmem:[#allocation424_spill] sm:$0xff]  ;;  %v15582_v55 = vld [vmem:[#allocation26_spill] sm:$0xff]  ;;  %v15596_v15 = vld [vmem:[#allocation383_spill] sm:$0xff] }
 0x4f9   : > { %3292 = vrot.lane.b32.xlu0 %v15563_v24, %s8281_s11  ;;  %7661 = vmatprep.mubr.msk.bf16.mxu0 %vm5211_vm12, %v5010_v47  ;;  %v4147_v35 = vsel %vm4031_vm6, %v3954_v19, %v15580_v43 }
 0x4fa   : > { %v3564_v39 = vpop.permute.xlu1 %3563  ;;  %v4340_v47 = vsel %vm4224_vm7, %v4147_v35, %v15584_v25  ;;  %v15603_v35 = vld [vmem:[#allocation593_spill] sm:$0xff] }
 0x4fb   : > { %v5108_v28 = vsel %vm4996_vm11, %v4915_v6, %v3564_v39  ;;  %v3468_v7 = vpop.permute.xlu0 %3467  ;;  %v15585_v6 = vld [vmem:[#allocation298_spill] sm:$0xff] }
 0x4fc   : > { %3585 = vrot.lane.b32.xlu1 %v9877_v20, %s8282_s12  ;;  %7758 = vmatmul.mubr.msk.bf16.gmra.mrb[12].mxu1 %vm5211_vm12, %v5108_v28  ;;  %v5012_v36 = vsel %vm4996_vm11, %v4819_v1, %v3468_v7  ;;  %v15566_v20 = vld [vmem:[#allocation170_spill] sm:$0xff]  ;;  %v4051_v24 = vsel %vm4031_vm6, %v3858_v41, %v15585_v6  ;;  %v15587_v7 = vld [vmem:[#allocation89_spill] sm:$0xff] }
 0x4fd   : > { %3489 = vrot.lane.b32.xlu0 %v15564_v2, %s8282_s12  ;;  %7662 = vmatmul.mubr.msk.bf16.gmra.mrb[12].mxu0 %vm5211_vm12, %v5012_v36  ;;  %v3759_v21 = vsel %vm3645_vm4, %v11509_v33, %v15566_v20  ;;  %v3856_v33 = vsel %vm3838_vm5, %v3663_v13, %v15570_v12  ;;  %v15586_v39 = vld [vmem:[#allocation590_spill] sm:$0xff] }
 0x4fe   : > { %v3153_v48 = vpop.permute.xlu1 %3152  ;;  %v3952_v61 = vsel %vm3838_vm5, %v3759_v21, %v15567_v29  ;;  %v4049_v30 = vsel %vm4031_vm6, %v3856_v33, %v15573_v58  ;;  %v4533_v10 = vsel %vm4417_vm8, %v4340_v47, %v15586_v39  ;;  %v15588_v36 = vld [vmem:[#allocation466_spill] sm:$0xff]  ;;  %v15590_v21 = vld [vmem:[#allocation25_spill] sm:$0xff] }
 0x4ff   : > { %v3151_v11 = vpop.permute.xlu0 %3150  ;;  %v4242_v59 = vsel %vm4224_vm7, %v4049_v30, %v15577_v50  ;;  %v4244_v2 = vsel %vm4224_vm7, %v4051_v24, %v15588_v36  ;;  %v15595_v33 = vld [vmem:[#allocation174_spill] sm:$0xff]  ;;  %v8160_v30 = vld [vmem:[%s8335_s22 + $0x50] sm:$0xff]   ;;  %v8162_v47 = vld [vmem:[%s8335_s22 + $0x58] sm:$0xff]  }
 0x500   : > { %3587 = vrot.lane.b32.xlu1 %v9868_v4, %s8282_s12  ;;  %v15569_v4 = vld [vmem:[#allocation425_spill] sm:$0xff]  ;;  %v4435_v18 = vsel %vm4417_vm8, %v4242_v59, %v15581_v17  ;;  %v15600_v59 = vld [vmem:[#allocation512_spill] sm:$0xff] }
 0x501   : > { %3491 = vrot.lane.b32.xlu0 %v15565_v37, %s8282_s12  ;;  %v4145_v23 = vsel %vm4031_vm6, %v3952_v61, %v15569_v4  ;;  %v4628_v31 = vsel %vm4610_vm9, %v4435_v18, %v11583_v27  ;;  %v4726_v27 = vsel %vm4610_vm9, %v4533_v10, %v3153_v48  ;;  %v15589_v37 = vld [vmem:[#allocation312_spill] sm:$0xff]  ;;  %v15592_v4 = vld [vmem:[#allocation186_spill] sm:$0xff]  ;;  %v15609_v24 = vld [vmem:[#allocation549_spill] sm:$0xff] }
 0x502   : > { %v3367_v8 = vpop.permute.xlu1 %3366  ;;  %v4338_v52 = vsel %vm4224_vm7, %v4145_v23, %v15571_v45  ;;  %v3763_v45 = vsel %vm3645_vm4, %v11526_v38, %v15595_v33  ;;  %v15599_v38 = vld [vmem:[#allocation313_spill] sm:$0xff]  ;;  %v15619_v33 = vld [vmem:[#allocation27_spill] sm:$0xff] }
 0x503   : > { %v3271_v32 = vpop.permute.xlu0 %3270  ;;  %v4531_v62 = vsel %vm4417_vm8, %v4338_v52, %v15574_v16  ;;  %v3956_v58 = vsel %vm3838_vm5, %v3763_v45, %v15596_v15  ;;  %v15597_v16 = vld [vmem:[#allocation80_spill] sm:$0xff] }
 0x504   : > { %3176 = vrot.lane.b32.xlu1 %v8157_v60, %s8279_s6  ;;  %v4724_v42 = vsel %vm4610_vm9, %v4531_v62, %v3151_v11  ;;  %v4821_v28 = vsel %vm4803_vm10, %v4628_v31, %v3271_v32  ;;  %v3667_v62 = vsel %vm3645_vm4, %v8160_v30, %v15597_v16  ;;  %v3669_v31 = vsel %vm3645_vm4, %v8162_v47, %v15607_v9  ;;  %v15621_v30 = vld [vmem:[#allocation324_spill] sm:$0xff]  ;;  %v15631_v47 = vld [vmem:[#allocation514_spill] sm:$0xff] }
 0x505   : > { %3174 = vrot.lane.b32.xlu0 %v8158_v44, %s8279_s6  ;;  %v4917_v54 = vsel %vm4803_vm10, %v4724_v42, %v3367_v8  ;;  %v4437_v8 = vsel %vm4417_vm8, %v4244_v2, %v15589_v37  ;;  %v15593_v44 = vld [vmem:[#allocation318_spill] sm:$0xff]  ;;  %v3860_v50 = vsel %vm3838_vm5, %v3667_v62, %v15599_v38  ;;  %v15612_v2 = vld [vmem:[#allocation511_spill] sm:$0xff]  ;;  %v15622_v62 = vld [vmem:[#allocation192_spill] sm:$0xff] }
 0x506   : > { %v3369_v40 = vpop.permute.xlu1 %3368  ;;  %v4630_v60 = vsel %vm4610_vm9, %v4437_v8, %v11581_v3  ;;  %v4053_v43 = vsel %vm4031_vm6, %v3860_v50, %v15602_v26  ;;  %v15625_v50 = vld [vmem:[#allocation178_spill] sm:$0xff]  ;;  %v15627_v26 = vld [vmem:[#allocation385_spill] sm:$0xff] }
 0x507   : > { %v3273_v63 = vpop.permute.xlu0 %3272  ;;  %v4919_v20 = vsel %vm4803_vm10, %v4726_v27, %v3369_v40  ;;  %v15594_v40 = vld [vmem:[#allocation183_spill] sm:$0xff]  ;;  %v4246_v41 = vsel %vm4224_vm7, %v4053_v43, %v15606_v57 }
 0x508   : > { %3390 = vrot.lane.b32.xlu1 %v15575_v51, %s8281_s11  ;;  %v4823_v48 = vsel %vm4803_vm10, %v4630_v60, %v3273_v63  ;;  %v15598_v63 = vld [vmem:[#allocation427_spill] sm:$0xff]  ;;  %v4439_v39 = vsel %vm4417_vm8, %v4246_v41, %v15609_v24  ;;  %v15634_v24 = vld [vmem:[#allocation309_spill] sm:$0xff] }
 0x509   : > { %3294 = vrot.lane.b32.xlu0 %v15582_v55, %s8281_s11  ;;  %v4149_v51 = vsel %vm4031_vm6, %v3956_v58, %v15598_v63  ;;  %v15605_v55 = vld [vmem:[#allocation382_spill] sm:$0xff]  ;;  %v15630_v41 = vld [vmem:[#allocation315_spill] sm:$0xff] }
 0x50a   : > { %v3566_v0 = vpop.permute.xlu1 %3565  ;;  %v4342_v42 = vsel %vm4224_vm7, %v4149_v51, %v15600_v59  ;;  %v15626_v59 = vld [vmem:[#allocation628_spill] sm:$0xff] }
 0x50b   : > { %v5110_v34 = vsel %vm4996_vm11, %v4917_v54, %v3566_v0  ;;  %v3470_v1 = vpop.permute.xlu0 %3469  ;;  %v4535_v17 = vsel %vm4417_vm8, %v4342_v42, %v15603_v35  ;;  %v15604_v54 = vld [vmem:[#allocation95_spill] sm:$0xff]  ;;  %v3958_v0 = vsel %vm3838_vm5, %v3765_v49, %v15605_v55  ;;  %v3767_v42 = vsel %vm3645_vm4, %v15626_v59, %v15625_v50  ;;  %v8163_v49 = vld [vmem:[%s8335_s22 + $0x278] sm:$0xff]   ;;  %v8164_v35 = vld [vmem:[%s8335_s22 + $0x60] sm:$0xff]  }
 0x50c   : > { %3392 = vrot.lane.b32.xlu1 %v15587_v7, %s8281_s11  ;;  %7761 = vmatprep.mubr.msk.bf16.mxu1 %vm5211_vm12, %v5110_v34  ;;  %v5014_v11 = vsel %vm4996_vm11, %v4821_v28, %v3470_v1  ;;  %v15608_v34 = vld [vmem:[#allocation426_spill] sm:$0xff]  ;;  %v15610_v28 = vld [vmem:[#allocation28_spill] sm:$0xff]  ;;  %v15611_v7 = vld [vmem:[#allocation311_spill] sm:$0xff]  ;;  %v3960_v43 = vsel %vm3838_vm5, %v3767_v42, %v15627_v26 }
 0x50d   : > { %3296 = vrot.lane.b32.xlu0 %v15590_v21, %s8281_s11  ;;  %7665 = vmatprep.mubr.msk.bf16.mxu0 %vm5211_vm12, %v5014_v11  ;;  %v4151_v6 = vsel %vm4031_vm6, %v3958_v0, %v15608_v34  ;;  %v3862_v36 = vsel %vm3838_vm5, %v3669_v31, %v15611_v7  ;;  %v15613_v11 = vld [vmem:[#allocation632_spill] sm:$0xff]  ;;  %v15633_v34 = vld [vmem:[#allocation643_spill] sm:$0xff]  ;;  %v15651_v42 = vld [vmem:[#allocation29_spill] sm:$0xff] }
 0x50e   : > { %v3568_v32 = vpop.permute.xlu1 %3567  ;;  %v4344_v27 = vsel %vm4224_vm7, %v4151_v6, %v15612_v2  ;;  %v4632_v37 = vsel %vm4610_vm9, %v4439_v39, %v15613_v11  ;;  %v8165_v0 = vld [vmem:[%s8335_s22 + $0x270] sm:$0xff]   ;;  %v15636_v7 = vld [vmem:[#allocation99_spill] sm:$0xff] }
 0x50f   : > { %v5112_v29 = vsel %vm4996_vm11, %v4919_v20, %v3568_v32  ;;  %v3472_v61 = vpop.permute.xlu0 %3471  ;;  %v15614_v20 = vld [vmem:[#allocation304_spill] sm:$0xff] }
 0x510   : > { %3589 = vrot.lane.b32.xlu1 %v15591_v46, %s8282_s12  ;;  %7762 = vmatmul.mubr.msk.bf16.gmra.mrb[16].mxu1 %vm5211_vm12, %v5112_v29  ;;  %v5016_v13 = vsel %vm4996_vm11, %v4823_v48, %v3472_v61  ;;  %v4055_v21 = vsel %vm4031_vm6, %v3862_v36, %v15614_v20  ;;  %v15615_v32 = vld [vmem:[#allocation592_spill] sm:$0xff]  ;;  %v15616_v61 = vld [vmem:[#allocation93_spill] sm:$0xff]  ;;  %v15639_v20 = vld [vmem:[#allocation82_spill] sm:$0xff] }
 0x511   : > { %3493 = vrot.lane.b32.xlu0 %v15592_v4, %s8282_s12  ;;  %7666 = vmatmul.mubr.msk.bf16.gmra.mrb[16].mxu0 %vm5211_vm12, %v5016_v13  ;;  %v4537_v60 = vsel %vm4417_vm8, %v4344_v27, %v15615_v32  ;;  %v15617_v46 = vld [vmem:[#allocation468_spill] sm:$0xff]  ;;  %v15638_v27 = vld [vmem:[#allocation471_spill] sm:$0xff] }
 0x512   : > { %v3157_v3 = vpop.permute.xlu1 %3156  ;;  %v4248_v13 = vsel %vm4224_vm7, %v4055_v21, %v15617_v46  ;;  %v15632_v31 = vld [vmem:[#allocation176_spill] sm:$0xff]  ;;  %v15642_v46 = vld [vmem:[#allocation30_spill] sm:$0xff] }
 0x513   : > { %v3155_v23 = vpop.permute.xlu0 %3154  ;;  %v4730_v4 = vsel %vm4610_vm9, %v4537_v60, %v3157_v3  ;;  %v3769_v6 = vsel %vm3645_vm4, %v15633_v34, %v15632_v31  ;;  %v15637_v36 = vld [vmem:[#allocation384_spill] sm:$0xff] }
 0x514   : > { %3591 = vrot.lane.b32.xlu1 %v15593_v44, %s8282_s12  ;;  %v4728_v25 = vsel %vm4610_vm9, %v4535_v17, %v3155_v23  ;;  %v15618_v44 = vld [vmem:[#allocation308_spill] sm:$0xff]  ;;  %v3962_v2 = vsel %vm3838_vm5, %v3769_v6, %v15637_v36  ;;  %v8167_v6 = vld [vmem:[%s8335_s22 + $0x288] sm:$0xff]  }
 0x515   : > { %3495 = vrot.lane.b32.xlu0 %v15594_v40, %s8282_s12  ;;  %v4441_v40 = vsel %vm4417_vm8, %v4248_v13, %v15618_v44  ;;  %v15628_v17 = vld [vmem:[#allocation84_spill] sm:$0xff]  ;;  %v15644_v44 = vld [vmem:[#allocation513_spill] sm:$0xff] }
 0x516   : > { %v3371_v12 = vpop.permute.xlu1 %3370  ;;  %v15640_v32 = vld [vmem:[#allocation428_spill] sm:$0xff] }
 0x517   : > { %v3275_v52 = vpop.permute.xlu0 %3274  ;;  %v4921_v10 = vsel %vm4803_vm10, %v4728_v25, %v3371_v12  ;;  %v4155_v60 = vsel %vm4031_vm6, %v3962_v2, %v15640_v32  ;;  %v8169_v2 = vld [vmem:[%s8335_s22 + $0x280] sm:$0xff]   ;;  %v15665_v32 = vld [vmem:[#allocation647_spill] sm:$0xff] }
 0x518   : > { %3180 = vrot.lane.b32.xlu1 %v8159_v53, %s8279_s6  ;;  %v4825_v29 = vsel %vm4803_vm10, %v4632_v37, %v3275_v52  ;;  %v15620_v52 = vld [vmem:[#allocation631_spill] sm:$0xff] }
 0x519   : > { %3178 = vrot.lane.b32.xlu0 %v8161_v56, %s8279_s6  ;;  %v4634_v53 = vsel %vm4610_vm9, %v4441_v40, %v15620_v52  ;;  %v15623_v56 = vld [vmem:[#allocation322_spill] sm:$0xff]  ;;  %v4348_v40 = vsel %vm4224_vm7, %v4155_v60, %v15644_v44 }
 0x51a   : > { %v3373_v19 = vpop.permute.xlu1 %3372  ;;  %v15646_v52 = vld [vmem:[#allocation310_spill] sm:$0xff] }
 0x51b   : > { %v3277_v18 = vpop.permute.xlu0 %3276  ;;  %v4923_v12 = vsel %vm4803_vm10, %v4730_v4, %v3373_v19  ;;  %v15624_v19 = vld [vmem:[#allocation188_spill] sm:$0xff]  ;;  %v15643_v4 = vld [vmem:[#allocation314_spill] sm:$0xff] }
 0x51c   : > { %3394 = vrot.lane.b32.xlu1 %v15604_v54, %s8281_s11  ;;  %v4827_v3 = vsel %vm4803_vm10, %v4634_v53, %v3277_v18  ;;  %v3671_v18 = vsel %vm3645_vm4, %v8164_v35, %v15628_v17  ;;  %v15629_v54 = vld [vmem:[#allocation429_spill] sm:$0xff]  ;;  %v15653_v17 = vld [vmem:[#allocation328_spill] sm:$0xff] }
 0x51d   : > { %3298 = vrot.lane.b32.xlu0 %v15610_v28, %s8281_s11  ;;  %v4153_v55 = vsel %vm4031_vm6, %v3960_v43, %v15629_v54  ;;  %v3864_v25 = vsel %vm3838_vm5, %v3671_v18, %v15630_v41  ;;  %v15654_v54 = vld [vmem:[#allocation198_spill] sm:$0xff] }
 0x51e   : > { %v3570_v1 = vpop.permute.xlu1 %3569  ;;  %v4346_v9 = vsel %vm4224_vm7, %v4153_v55, %v15631_v47  ;;  %v4057_v39 = vsel %vm4031_vm6, %v3864_v25, %v15634_v24  ;;  %v15656_v41 = vld [vmem:[#allocation194_spill] sm:$0xff]  ;;  %v15659_v24 = vld [vmem:[#allocation387_spill] sm:$0xff] }
 0x51f   : > { %v5114_v8 = vsel %vm4996_vm11, %v4921_v10, %v3570_v1  ;;  %v3474_v48 = vpop.permute.xlu0 %3473  ;;  %v15635_v10 = vld [vmem:[#allocation595_spill] sm:$0xff]  ;;  %v4250_v11 = vsel %vm4224_vm7, %v4057_v39, %v15638_v27  ;;  %v15657_v47 = vld [vmem:[#allocation182_spill] sm:$0xff] }
 0x520   : > { %3396 = vrot.lane.b32.xlu1 %v15616_v61, %s8281_s11  ;;  %7765 = vmatprep.mubr.msk.bf16.mxu1 %vm5211_vm12, %v5114_v8  ;;  %v5018_v23 = vsel %vm4996_vm11, %v4825_v29, %v3474_v48  ;;  %v4539_v28 = vsel %vm4417_vm8, %v4346_v9, %v15635_v10  ;;  %v8166_v8 = vld [vmem:[%s8335_s22 + $0x68] sm:$0xff]   ;;  %v15658_v9 = vld [vmem:[#allocation648_spill] sm:$0xff] }
 0x521   : > { %3300 = vrot.lane.b32.xlu0 %v15619_v33, %s8281_s11  ;;  %7669 = vmatprep.mubr.msk.bf16.mxu0 %vm5211_vm12, %v5018_v23  ;;  %v3673_v21 = vsel %vm3645_vm4, %v8166_v8, %v15639_v20  ;;  %v15641_v29 = vld [vmem:[#allocation551_spill] sm:$0xff]  ;;  %v3771_v31 = vsel %vm3645_vm4, %v15658_v9, %v15657_v47  ;;  %v8168_v10 = vld [vmem:[%s8335_s22 + $0x70] sm:$0xff]  }
 0x522   : > { %v3572_v45 = vpop.permute.xlu1 %3571  ;;  %v4443_v48 = vsel %vm4417_vm8, %v4250_v11, %v15641_v29  ;;  %v3866_v23 = vsel %vm3838_vm5, %v3673_v21, %v15643_v4  ;;  %v3964_v39 = vsel %vm3838_vm5, %v3771_v31, %v15659_v24  ;;  %v15662_v11 = vld [vmem:[#allocation317_spill] sm:$0xff]  ;;  %v15663_v8 = vld [vmem:[#allocation516_spill] sm:$0xff]  ;;  %v15668_v4 = vld [vmem:[#allocation103_spill] sm:$0xff] }
 0x523   : > { %v5116_v15 = vsel %vm4996_vm11, %v4923_v12, %v3572_v45  ;;  %v3476_v58 = vpop.permute.xlu0 %3475  ;;  %v15645_v12 = vld [vmem:[#allocation634_spill] sm:$0xff]  ;;  %v4059_v53 = vsel %vm4031_vm6, %v3866_v23, %v15646_v52  ;;  %v15664_v21 = vld [vmem:[#allocation180_spill] sm:$0xff]  ;;  %v15683_v31 = vld [vmem:[#allocation31_spill] sm:$0xff] }
 0x524   : > { %3593 = vrot.lane.b32.xlu1 %v15621_v30, %s8282_s12  ;;  %7766 = vmatmul.mubr.msk.bf16.gmra.mrb[20].mxu1 %vm5211_vm12, %v5116_v15  ;;  %v5020_v16 = vsel %vm4996_vm11, %v4827_v3, %v3476_v58  ;;  %v4636_v33 = vsel %vm4610_vm9, %v4443_v48, %v15645_v12  ;;  %v15647_v15 = vld [vmem:[#allocation594_spill] sm:$0xff]  ;;  %v3773_v60 = vsel %vm3645_vm4, %v15665_v32, %v15664_v21  ;;  %v15666_v29 = vld [vmem:[#allocation392_spill] sm:$0xff] }
 0x525   : > { %3497 = vrot.lane.b32.xlu0 %v15622_v62, %s8282_s12  ;;  %7670 = vmatmul.mubr.msk.bf16.gmra.mrb[20].mxu0 %vm5211_vm12, %v5020_v16  ;;  %v4541_v3 = vsel %vm4417_vm8, %v4348_v40, %v15647_v15  ;;  %v15648_v16 = vld [vmem:[#allocation97_spill] sm:$0xff]  ;;  %v15649_v62 = vld [vmem:[#allocation470_spill] sm:$0xff] }
 0x526   : > { %v3161_v63 = vpop.permute.xlu1 %3160  ;;  %v15669_v23 = vld [vmem:[#allocation386_spill] sm:$0xff]  ;;  %v15670_v40 = vld [vmem:[#allocation473_spill] sm:$0xff] }
 0x527   : > { %v3159_v51 = vpop.permute.xlu0 %3158  ;;  %v3966_v44 = vsel %vm3838_vm5, %v3773_v60, %v15669_v23  ;;  %v15671_v52 = vld [vmem:[#allocation86_spill] sm:$0xff]  ;;  %v8171_v60 = vld [vmem:[%s8335_s22 + $0x298] sm:$0xff]  }
 0x528   : > { %3595 = vrot.lane.b32.xlu1 %v15623_v56, %s8282_s12  ;;  %v4732_v37 = vsel %vm4610_vm9, %v4539_v28, %v3159_v51  ;;  %v4252_v51 = vsel %vm4224_vm7, %v4059_v53, %v15649_v62  ;;  %v4734_v56 = vsel %vm4610_vm9, %v4541_v3, %v3161_v63  ;;  %v15660_v28 = vld [vmem:[#allocation88_spill] sm:$0xff]  ;;  %v15672_v15 = vld [vmem:[#allocation430_spill] sm:$0xff] }
 0x529   : > { %3499 = vrot.lane.b32.xlu0 %v15624_v19, %s8282_s12  ;;  %v4159_v3 = vsel %vm4031_vm6, %v3966_v44, %v15672_v15  ;;  %v15674_v62 = vld [vmem:[#allocation32_spill] sm:$0xff]  ;;  %v15697_v15 = vld [vmem:[#allocation651_spill] sm:$0xff] }
 0x52a   : > { %v3375_v38 = vpop.permute.xlu1 %3374  ;;  %v8173_v44 = vld [vmem:[%s8335_s22 + $0x290] sm:$0xff]  }
 0x52b   : > { %v3279_v22 = vpop.permute.xlu0 %3278  ;;  %v4925_v61 = vsel %vm4803_vm10, %v4732_v37, %v3375_v38  ;;  %v15650_v38 = vld [vmem:[#allocation550_spill] sm:$0xff] }
 0x52c   : > { %3184 = vrot.lane.b32.xlu1 %v8163_v49, %s8279_s6  ;;  %v4829_v58 = vsel %vm4803_vm10, %v4636_v33, %v3279_v22  ;;  %v4445_v50 = vsel %vm4417_vm8, %v4252_v51, %v15650_v38  ;;  %v15652_v49 = vld [vmem:[#allocation633_spill] sm:$0xff]  ;;  %v15676_v38 = vld [vmem:[#allocation515_spill] sm:$0xff] }
 0x52d   : > { %3182 = vrot.lane.b32.xlu0 %v8165_v0, %s8279_s6  ;;  %v4638_v26 = vsel %vm4610_vm9, %v4445_v50, %v15652_v49  ;;  %v4352_v50 = vsel %vm4224_vm7, %v4159_v3, %v15676_v38  ;;  %v15678_v49 = vld [vmem:[#allocation391_spill] sm:$0xff] }
 0x52e   : > { %v3377_v57 = vpop.permute.xlu1 %3376 }
 0x52f   : > { %v3281_v1 = vpop.permute.xlu0 %3280  ;;  %v4927_v59 = vsel %vm4803_vm10, %v4734_v56, %v3377_v57  ;;  %v15655_v57 = vld [vmem:[#allocation326_spill] sm:$0xff]  ;;  %v15675_v56 = vld [vmem:[#allocation316_spill] sm:$0xff] }
 0x530   : > { %3398 = vrot.lane.b32.xlu1 %v15636_v7, %s8281_s11  ;;  %v4831_v63 = vsel %vm4803_vm10, %v4638_v26, %v3281_v1  ;;  %v3675_v1 = vsel %vm3645_vm4, %v8168_v10, %v15660_v28  ;;  %v15661_v7 = vld [vmem:[#allocation431_spill] sm:$0xff]  ;;  %v15685_v28 = vld [vmem:[#allocation332_spill] sm:$0xff] }
 0x531   : > { %3302 = vrot.lane.b32.xlu0 %v15642_v46, %s8281_s11  ;;  %v4157_v36 = vsel %vm4031_vm6, %v3964_v39, %v15661_v7  ;;  %v3868_v37 = vsel %vm3838_vm5, %v3675_v1, %v15662_v11  ;;  %v15686_v7 = vld [vmem:[#allocation204_spill] sm:$0xff] }
 0x532   : > { %v3574_v13 = vpop.permute.xlu1 %3573  ;;  %v4350_v20 = vsel %vm4224_vm7, %v4157_v36, %v15663_v8  ;;  %v4061_v48 = vsel %vm4031_vm6, %v3868_v37, %v15666_v29  ;;  %v15688_v11 = vld [vmem:[#allocation200_spill] sm:$0xff]  ;;  %v15689_v8 = vld [vmem:[#allocation187_spill] sm:$0xff]  ;;  %v15691_v29 = vld [vmem:[#allocation389_spill] sm:$0xff] }
 0x533   : > { %v5118_v45 = vsel %vm4996_vm11, %v4925_v61, %v3574_v13  ;;  %v3478_v30 = vpop.permute.xlu0 %3477  ;;  %v15667_v61 = vld [vmem:[#allocation597_spill] sm:$0xff]  ;;  %v4254_v12 = vsel %vm4224_vm7, %v4061_v48, %v15670_v40 }
 0x534   : > { %3400 = vrot.lane.b32.xlu1 %v15648_v16, %s8281_s11  ;;  %7769 = vmatprep.mubr.msk.bf16.mxu1 %vm5211_vm12, %v5118_v45  ;;  %v5022_v19 = vsel %vm4996_vm11, %v4829_v58, %v3478_v30  ;;  %v4543_v46 = vsel %vm4417_vm8, %v4350_v20, %v15667_v61  ;;  %v8170_v45 = vld [vmem:[%s8335_s22 + $0x78] sm:$0xff]   ;;  %v15690_v20 = vld [vmem:[#allocation652_spill] sm:$0xff]  ;;  %v8172_v61 = vld [vmem:[%s8335_s22 + $0x80] sm:$0xff]  }
 0x535   : > { %3304 = vrot.lane.b32.xlu0 %v15651_v42, %s8281_s11  ;;  %7673 = vmatprep.mubr.msk.bf16.mxu0 %vm5211_vm12, %v5022_v19  ;;  %v3677_v53 = vsel %vm3645_vm4, %v8170_v45, %v15671_v52  ;;  %v15673_v58 = vld [vmem:[#allocation553_spill] sm:$0xff]  ;;  %v3775_v21 = vsel %vm3645_vm4, %v15690_v20, %v15689_v8  ;;  %v15695_v45 = vld [vmem:[#allocation518_spill] sm:$0xff] }
 0x536   : > { %v3576_v22 = vpop.permute.xlu1 %3575  ;;  %v4447_v30 = vsel %vm4417_vm8, %v4254_v12, %v15673_v58  ;;  %v3870_v19 = vsel %vm3838_vm5, %v3677_v53, %v15675_v56  ;;  %v3968_v48 = vsel %vm3838_vm5, %v3775_v21, %v15691_v29  ;;  %v15694_v12 = vld [vmem:[#allocation321_spill] sm:$0xff]  ;;  %v15698_v58 = vld [vmem:[#allocation394_spill] sm:$0xff]  ;;  %v15700_v56 = vld [vmem:[#allocation107_spill] sm:$0xff] }
 0x537   : > { %v5120_v43 = vsel %vm4996_vm11, %v4927_v59, %v3576_v22  ;;  %v3480_v35 = vpop.permute.xlu0 %3479  ;;  %v15677_v59 = vld [vmem:[#allocation636_spill] sm:$0xff]  ;;  %v4063_v26 = vsel %vm4031_vm6, %v3870_v19, %v15678_v49  ;;  %v15696_v53 = vld [vmem:[#allocation185_spill] sm:$0xff]  ;;  %v15703_v49 = vld [vmem:[#allocation90_spill] sm:$0xff] }
 0x538   : > { %3597 = vrot.lane.b32.xlu1 %v15653_v17, %s8282_s12  ;;  %7770 = vmatmul.mubr.msk.bf16.gmra.mrb[24].mxu1 %vm5211_vm12, %v5120_v43  ;;  %v5024_v18 = vsel %vm4996_vm11, %v4831_v63, %v3480_v35  ;;  %v4640_v42 = vsel %vm4610_vm9, %v4447_v30, %v15677_v59  ;;  %v15679_v43 = vld [vmem:[#allocation596_spill] sm:$0xff]  ;;  %v3777_v3 = vsel %vm3645_vm4, %v15697_v15, %v15696_v53  ;;  %v15715_v21 = vld [vmem:[#allocation33_spill] sm:$0xff] }
 0x539   : > { %3501 = vrot.lane.b32.xlu0 %v15654_v54, %s8282_s12  ;;  %7674 = vmatmul.mubr.msk.bf16.gmra.mrb[24].mxu0 %vm5211_vm12, %v5024_v18  ;;  %v4545_v63 = vsel %vm4417_vm8, %v4352_v50, %v15679_v43  ;;  %v15680_v18 = vld [vmem:[#allocation101_spill] sm:$0xff]  ;;  %v15681_v54 = vld [vmem:[#allocation472_spill] sm:$0xff]  ;;  %v15702_v50 = vld [vmem:[#allocation475_spill] sm:$0xff] }
 0x53a   : > { %v3165_v55 = vpop.permute.xlu1 %3164  ;;  %v15701_v19 = vld [vmem:[#allocation388_spill] sm:$0xff] }
 0x53b   : > { %v3163_v0 = vpop.permute.xlu0 %3162  ;;  %v3970_v38 = vsel %vm3838_vm5, %v3777_v3, %v15701_v19  ;;  %v15704_v43 = vld [vmem:[#allocation432_spill] sm:$0xff]  ;;  %v8175_v3 = vld [vmem:[%s8335_s22 + $0x2a8] sm:$0xff]  }
 0x53c   : > { %3599 = vrot.lane.b32.xlu1 %v15655_v57, %s8282_s12  ;;  %v4736_v33 = vsel %vm4610_vm9, %v4543_v46, %v3163_v0  ;;  %v4256_v0 = vsel %vm4224_vm7, %v4063_v26, %v15681_v54  ;;  %v4738_v57 = vsel %vm4610_vm9, %v4545_v63, %v3165_v55  ;;  %v15692_v46 = vld [vmem:[#allocation92_spill] sm:$0xff]  ;;  %v4163_v63 = vsel %vm4031_vm6, %v3970_v38, %v15704_v43  ;;  %v15706_v54 = vld [vmem:[#allocation34_spill] sm:$0xff]  ;;  %v15728_v43 = vld [vmem:[#allocation191_spill] sm:$0xff] }
 0x53d   : > { %3503 = vrot.lane.b32.xlu0 %v15656_v41, %s8282_s12  ;;  %v8177_v38 = vld [vmem:[%s8335_s22 + $0x2a0] sm:$0xff]  }
 0x53e   : > { %v3379_v25 = vpop.permute.xlu1 %3378 }
 0x53f   : > { %v3283_v34 = vpop.permute.xlu0 %3282  ;;  %v4929_v16 = vsel %vm4803_vm10, %v4736_v33, %v3379_v25  ;;  %v15682_v25 = vld [vmem:[#allocation552_spill] sm:$0xff] }
 0x540   : > { %3188 = vrot.lane.b32.xlu1 %v8167_v6, %s8279_s6  ;;  %v4833_v35 = vsel %vm4803_vm10, %v4640_v42, %v3283_v34  ;;  %v4449_v47 = vsel %vm4417_vm8, %v4256_v0, %v15682_v25  ;;  %v15684_v6 = vld [vmem:[#allocation635_spill] sm:$0xff]  ;;  %v15708_v25 = vld [vmem:[#allocation517_spill] sm:$0xff] }
 0x541   : > { %3186 = vrot.lane.b32.xlu0 %v8169_v2, %s8279_s6  ;;  %v4642_v24 = vsel %vm4610_vm9, %v4449_v47, %v15684_v6  ;;  %v4356_v47 = vsel %vm4224_vm7, %v4163_v63, %v15708_v25  ;;  %v15710_v6 = vld [vmem:[#allocation393_spill] sm:$0xff] }
 0x542   : > { %v3381_v27 = vpop.permute.xlu1 %3380 }
 0x543   : > { %v3285_v13 = vpop.permute.xlu0 %3284  ;;  %v4931_v9 = vsel %vm4803_vm10, %v4738_v57, %v3381_v27  ;;  %v15687_v27 = vld [vmem:[#allocation330_spill] sm:$0xff]  ;;  %v15707_v57 = vld [vmem:[#allocation319_spill] sm:$0xff] }
 0x544   : > { %3402 = vrot.lane.b32.xlu1 %v15668_v4, %s8281_s11  ;;  %v4835_v55 = vsel %vm4803_vm10, %v4642_v24, %v3285_v13  ;;  %v3679_v13 = vsel %vm3645_vm4, %v8172_v61, %v15692_v46  ;;  %v15693_v4 = vld [vmem:[#allocation433_spill] sm:$0xff]  ;;  %v15717_v46 = vld [vmem:[#allocation336_spill] sm:$0xff] }
 0x545   : > { %3306 = vrot.lane.b32.xlu0 %v15674_v62, %s8281_s11  ;;  %v4161_v23 = vsel %vm4031_vm6, %v3968_v48, %v15693_v4  ;;  %v3872_v33 = vsel %vm3838_vm5, %v3679_v13, %v15694_v12  ;;  %v15718_v4 = vld [vmem:[#allocation210_spill] sm:$0xff] }
 0x546   : > { %v3578_v51 = vpop.permute.xlu1 %3577  ;;  %v4354_v52 = vsel %vm4224_vm7, %v4161_v23, %v15695_v45  ;;  %v4065_v30 = vsel %vm4031_vm6, %v3872_v33, %v15698_v58  ;;  %v15720_v12 = vld [vmem:[#allocation206_spill] sm:$0xff]  ;;  %v15721_v45 = vld [vmem:[#allocation193_spill] sm:$0xff] }
 0x547   : > { %v5122_v22 = vsel %vm4996_vm11, %v4929_v16, %v3578_v51  ;;  %v3482_v17 = vpop.permute.xlu0 %3481  ;;  %v15699_v16 = vld [vmem:[#allocation599_spill] sm:$0xff]  ;;  %v4258_v59 = vsel %vm4224_vm7, %v4065_v30, %v15702_v50  ;;  %v15723_v58 = vld [vmem:[#allocation390_spill] sm:$0xff] }
 0x548   : > { %3404 = vrot.lane.b32.xlu1 %v15680_v18, %s8281_s11  ;;  %7773 = vmatprep.mubr.msk.bf16.mxu1 %vm5211_vm12, %v5122_v22  ;;  %v5026_v41 = vsel %vm4996_vm11, %v4833_v35, %v3482_v17  ;;  %v4547_v62 = vsel %vm4417_vm8, %v4354_v52, %v15699_v16  ;;  %v8174_v22 = vld [vmem:[%s8335_s22 + $0x88] sm:$0xff]   ;;  %v15722_v52 = vld [vmem:[#allocation300_spill] sm:$0xff] }
 0x549   : > { %3308 = vrot.lane.b32.xlu0 %v15683_v31, %s8281_s11  ;;  %7677 = vmatprep.mubr.msk.bf16.mxu0 %vm5211_vm12, %v5026_v41  ;;  %v3681_v26 = vsel %vm3645_vm4, %v8174_v22, %v15703_v49  ;;  %v15705_v35 = vld [vmem:[#allocation555_spill] sm:$0xff]  ;;  %v3779_v53 = vsel %vm3645_vm4, %v15722_v52, %v15721_v45  ;;  %v8176_v16 = vld [vmem:[%s8335_s22 + $0x90] sm:$0xff]  }
 0x54a   : > { %v3580_v34 = vpop.permute.xlu1 %3579  ;;  %v4451_v17 = vsel %vm4417_vm8, %v4258_v59, %v15705_v35  ;;  %v3874_v41 = vsel %vm3838_vm5, %v3681_v26, %v15707_v57  ;;  %v3972_v30 = vsel %vm3838_vm5, %v3779_v53, %v15723_v58  ;;  %v15726_v59 = vld [vmem:[#allocation325_spill] sm:$0xff]  ;;  %v15727_v22 = vld [vmem:[#allocation520_spill] sm:$0xff]  ;;  %v15731_v57 = vld [vmem:[#allocation111_spill] sm:$0xff] }
 0x54b   : > { %v5124_v39 = vsel %vm4996_vm11, %v4931_v9, %v3580_v34  ;;  %v3484_v10 = vpop.permute.xlu0 %3483  ;;  %v15709_v9 = vld [vmem:[#allocation638_spill] sm:$0xff]  ;;  %v4067_v24 = vsel %vm4031_vm6, %v3874_v41, %v15710_v6  ;;  %v8178_v26 = vld [vmem:[%s8335_s22 + $0x218] sm:$0xff]   ;;  %v15729_v35 = vld [vmem:[#allocation396_spill] sm:$0xff] }
 0x54c   : > { %3601 = vrot.lane.b32.xlu1 %v15685_v28, %s8282_s12  ;;  %7774 = vmatmul.mubr.msk.bf16.gmra.mrb[28].mxu1 %vm5211_vm12, %v5124_v39  ;;  %v5028_v1 = vsel %vm4996_vm11, %v4835_v55, %v3484_v10  ;;  %v4644_v31 = vsel %vm4610_vm9, %v4451_v17, %v15709_v9  ;;  %v15711_v39 = vld [vmem:[#allocation598_spill] sm:$0xff]  ;;  %v3781_v63 = vsel %vm3645_vm4, %v8178_v26, %v15728_v43  ;;  %v15732_v41 = vld [vmem:[#allocation184_spill] sm:$0xff]  ;;  %v15746_v53 = vld [vmem:[#allocation35_spill] sm:$0xff] }
 0x54d   : > { %3505 = vrot.lane.b32.xlu0 %v15686_v7, %s8282_s12  ;;  %7678 = vmatmul.mubr.msk.bf16.gmra.mrb[28].mxu0 %vm5211_vm12, %v5028_v1  ;;  %v4549_v55 = vsel %vm4417_vm8, %v4356_v47, %v15711_v39  ;;  %v15712_v1 = vld [vmem:[#allocation105_spill] sm:$0xff]  ;;  %v15713_v7 = vld [vmem:[#allocation474_spill] sm:$0xff]  ;;  %v3974_v25 = vsel %vm3838_vm5, %v3781_v63, %v15732_v41  ;;  %v8182_v41 = vld [vmem:[%s8335_s22 + $0x2b0] sm:$0xff]  }
 0x54e   : > { %v3169_v36 = vpop.permute.xlu1 %3168  ;;  %v15733_v47 = vld [vmem:[#allocation477_spill] sm:$0xff]  ;;  %v15734_v6 = vld [vmem:[#allocation94_spill] sm:$0xff] }
 0x54f   : > { %v3167_v2 = vpop.permute.xlu0 %3166  ;;  %v15735_v39 = vld [vmem:[#allocation434_spill] sm:$0xff]  ;;  %v8180_v43 = vld [vmem:[%s8335_s22 + $0x2b8] sm:$0xff]  }
 0x550   : > { %3603 = vrot.lane.b32.xlu1 %v15687_v27, %s8282_s12  ;;  %v4740_v42 = vsel %vm4610_vm9, %v4547_v62, %v3167_v2  ;;  %v4260_v2 = vsel %vm4224_vm7, %v4067_v24, %v15713_v7  ;;  %v4742_v27 = vsel %vm4610_vm9, %v4549_v55, %v3169_v36  ;;  %v15724_v62 = vld [vmem:[#allocation96_spill] sm:$0xff]  ;;  %v4167_v55 = vsel %vm4031_vm6, %v3974_v25, %v15735_v39  ;;  %v15753_v63 = vld [vmem:[#allocation189_spill] sm:$0xff]  ;;  %v15759_v39 = vld [vmem:[#allocation398_spill] sm:$0xff] }
 0x551   : > { %3507 = vrot.lane.b32.xlu0 %v15688_v11, %s8282_s12  ;;  %v15737_v7 = vld [vmem:[#allocation36_spill] sm:$0xff] }
 0x552   : > { %v3383_v37 = vpop.permute.xlu1 %3382 }
 0x553   : > { %v3287_v32 = vpop.permute.xlu0 %3286  ;;  %v4933_v18 = vsel %vm4803_vm10, %v4740_v42, %v3383_v37  ;;  %v15714_v37 = vld [vmem:[#allocation554_spill] sm:$0xff] }
 0x554   : > { %3192 = vrot.lane.b32.xlu1 %v8171_v60, %s8279_s6  ;;  %v4837_v10 = vsel %vm4803_vm10, %v4644_v31, %v3287_v32  ;;  %v4453_v8 = vsel %vm4417_vm8, %v4260_v2, %v15714_v37  ;;  %v15716_v60 = vld [vmem:[#allocation637_spill] sm:$0xff]  ;;  %v15739_v37 = vld [vmem:[#allocation519_spill] sm:$0xff] }
 0x555   : > { %3190 = vrot.lane.b32.xlu0 %v8173_v44, %s8279_s6  ;;  %v4646_v29 = vsel %vm4610_vm9, %v4453_v8, %v15716_v60  ;;  %v4360_v8 = vsel %vm4224_vm7, %v4167_v55, %v15739_v37  ;;  %v15741_v60 = vld [vmem:[#allocation395_spill] sm:$0xff] }
 0x556   : > { %v3385_v40 = vpop.permute.xlu1 %3384 }
 0x557   : > { %v3289_v51 = vpop.permute.xlu0 %3288  ;;  %v4935_v20 = vsel %vm4803_vm10, %v4742_v27, %v3385_v40  ;;  %v15719_v40 = vld [vmem:[#allocation334_spill] sm:$0xff]  ;;  %v15738_v27 = vld [vmem:[#allocation323_spill] sm:$0xff] }
 0x558   : > { %3406 = vrot.lane.b32.xlu1 %v15700_v56, %s8281_s11  ;;  %v4839_v36 = vsel %vm4803_vm10, %v4646_v29, %v3289_v51  ;;  %v3683_v51 = vsel %vm3645_vm4, %v8176_v16, %v15724_v62  ;;  %v15725_v56 = vld [vmem:[#allocation435_spill] sm:$0xff]  ;;  %v15748_v62 = vld [vmem:[#allocation340_spill] sm:$0xff] }
 0x559   : > { %3310 = vrot.lane.b32.xlu0 %v15706_v54, %s8281_s11  ;;  %v4165_v19 = vsel %vm4031_vm6, %v3972_v30, %v15725_v56  ;;  %v3876_v42 = vsel %vm3838_vm5, %v3683_v51, %v15726_v59  ;;  %v15749_v56 = vld [vmem:[#allocation216_spill] sm:$0xff] }
 0x55a   : > { %v3582_v0 = vpop.permute.xlu1 %3581  ;;  %v4358_v49 = vsel %vm4224_vm7, %v4165_v19, %v15727_v22  ;;  %v4069_v17 = vsel %vm4031_vm6, %v3876_v42, %v15729_v35  ;;  %v15751_v59 = vld [vmem:[#allocation212_spill] sm:$0xff]  ;;  %v15752_v22 = vld [vmem:[#allocation199_spill] sm:$0xff] }
 0x55b   : > { %v5126_v34 = vsel %vm4996_vm11, %v4933_v18, %v3582_v0  ;;  %v3486_v28 = vpop.permute.xlu0 %3485  ;;  %v15730_v18 = vld [vmem:[#allocation601_spill] sm:$0xff]  ;;  %v4262_v9 = vsel %vm4224_vm7, %v4069_v17, %v15733_v47  ;;  %v8181_v17 = vld [vmem:[%s8335_s22 + $0xa0] sm:$0xff]  }
 0x55c   : > { %3408 = vrot.lane.b32.xlu1 %v15712_v1, %s8281_s11  ;;  %7777 = vmatprep.mubr.msk.bf16.mxu1 %vm5211_vm12, %v5126_v34  ;;  %v5030_v11 = vsel %vm4996_vm11, %v4837_v10, %v3486_v28  ;;  %v4551_v54 = vsel %vm4417_vm8, %v4358_v49, %v15730_v18  ;;  %v8179_v34 = vld [vmem:[%s8335_s22 + $0x98] sm:$0xff]   ;;  %v3783_v49 = vsel %vm3645_vm4, %v11855_v14, %v15752_v22  ;;  %v15754_v18 = vld [vmem:[#allocation100_spill] sm:$0xff] }
 0x55d   : > { %3312 = vrot.lane.b32.xlu0 %v15715_v21, %s8281_s11  ;;  %7681 = vmatprep.mubr.msk.bf16.mxu0 %vm5211_vm12, %v5030_v11  ;;  %v3685_v24 = vsel %vm3645_vm4, %v8179_v34, %v15734_v6  ;;  %v15736_v10 = vld [vmem:[#allocation557_spill] sm:$0xff]  ;;  %v3976_v35 = vsel %vm3838_vm5, %v3783_v49, %v15753_v63  ;;  %v8183_v34 = vld [vmem:[%s8335_s22 + $0x228] sm:$0xff]  }
 0x55e   : > { %v3584_v32 = vpop.permute.xlu1 %3583  ;;  %v4455_v28 = vsel %vm4417_vm8, %v4262_v9, %v15736_v10  ;;  %v3878_v11 = vsel %vm3838_vm5, %v3685_v24, %v15738_v27  ;;  %v15756_v14 = vld [vmem:[#allocation329_spill] sm:$0xff]  ;;  %v15757_v9 = vld [vmem:[#allocation522_spill] sm:$0xff]  ;;  %v15760_v10 = vld [vmem:[#allocation603_spill] sm:$0xff] }
 0x55f   : > { %v5128_v48 = vsel %vm4996_vm11, %v4935_v20, %v3584_v32  ;;  %v3488_v61 = vpop.permute.xlu0 %3487  ;;  %v15740_v20 = vld [vmem:[#allocation640_spill] sm:$0xff]  ;;  %v4071_v29 = vsel %vm4031_vm6, %v3878_v11, %v15741_v60  ;;  %v15758_v6 = vld [vmem:[#allocation197_spill] sm:$0xff]  ;;  %v15763_v11 = vld [vmem:[#allocation479_spill] sm:$0xff] }
 0x560   : > { %3605 = vrot.lane.b32.xlu1 %v15717_v46, %s8282_s12  ;;  %7778 = vmatmul.mubr.msk.bf16.gmra.mrb[32].mxu1 %vm5211_vm12, %v5128_v48  ;;  %v5032_v13 = vsel %vm4996_vm11, %v4839_v36, %v3488_v61  ;;  %v4648_v21 = vsel %vm4610_vm9, %v4455_v28, %v15740_v20  ;;  %v15742_v48 = vld [vmem:[#allocation600_spill] sm:$0xff]  ;;  %v3785_v24 = vsel %vm3645_vm4, %v8183_v34, %v15758_v6  ;;  %v8184_v20 = vld [vmem:[%s8335_s22 + $0xa8] sm:$0xff]   ;;  %v15776_v22 = vld [vmem:[#allocation37_spill] sm:$0xff] }
 0x561   : > { %3509 = vrot.lane.b32.xlu0 %v15718_v4, %s8282_s12  ;;  %7682 = vmatmul.mubr.msk.bf16.gmra.mrb[32].mxu0 %vm5211_vm12, %v5032_v13  ;;  %v4553_v36 = vsel %vm4417_vm8, %v4360_v8, %v15742_v48  ;;  %v15743_v13 = vld [vmem:[#allocation109_spill] sm:$0xff]  ;;  %v15744_v4 = vld [vmem:[#allocation476_spill] sm:$0xff]  ;;  %v15766_v48 = vld [vmem:[#allocation559_spill] sm:$0xff] }
 0x562   : > { %v3173_v23 = vpop.permute.xlu1 %3172  ;;  %v15765_v60 = vld [vmem:[#allocation436_spill] sm:$0xff]  ;;  %v8185_v34 = vld [vmem:[%s8335_s22 + $0x2c8] sm:$0xff]  }
 0x563   : > { %v3171_v44 = vpop.permute.xlu0 %3170  ;;  %v15783_v6 = vld [vmem:[#allocation195_spill] sm:$0xff] }
 0x564   : > { %3607 = vrot.lane.b32.xlu1 %v15719_v40, %s8282_s12  ;;  %v4744_v31 = vsel %vm4610_vm9, %v4551_v54, %v3171_v44  ;;  %v4264_v44 = vsel %vm4224_vm7, %v4071_v29, %v15744_v4  ;;  %v4746_v40 = vsel %vm4610_vm9, %v4553_v36, %v3173_v23  ;;  %v3687_v54 = vsel %vm3645_vm4, %v8181_v17, %v15754_v18  ;;  %v15768_v4 = vld [vmem:[#allocation327_spill] sm:$0xff]  ;;  %v15778_v17 = vld [vmem:[#allocation344_spill] sm:$0xff] }
 0x565   : > { %3511 = vrot.lane.b32.xlu0 %v15720_v12, %s8282_s12  ;;  %v3880_v47 = vsel %vm3838_vm5, %v3687_v54, %v15756_v14  ;;  %v15779_v54 = vld [vmem:[#allocation222_spill] sm:$0xff] }
 0x566   : > { %v3387_v33 = vpop.permute.xlu1 %3386  ;;  %v4073_v55 = vsel %vm4031_vm6, %v3880_v47, %v15759_v39  ;;  %v15782_v47 = vld [vmem:[#allocation205_spill] sm:$0xff]  ;;  %v8186_v39 = vld [vmem:[%s8335_s22 + $0xb0] sm:$0xff]  }
 0x567   : > { %v3291_v15 = vpop.permute.xlu0 %3290  ;;  %v4937_v1 = vsel %vm4803_vm10, %v4744_v31, %v3387_v33  ;;  %v15745_v33 = vld [vmem:[#allocation556_spill] sm:$0xff]  ;;  %v4266_v37 = vsel %vm4224_vm7, %v4073_v55, %v15763_v11 }
 0x568   : > { %3196 = vrot.lane.b32.xlu1 %v8175_v3, %s8279_s6  ;;  %v4841_v61 = vsel %vm4803_vm10, %v4648_v21, %v3291_v15  ;;  %v4457_v45 = vsel %vm4417_vm8, %v4264_v44, %v15745_v33  ;;  %v15747_v3 = vld [vmem:[#allocation639_spill] sm:$0xff]  ;;  %v15764_v21 = vld [vmem:[#allocation98_spill] sm:$0xff]  ;;  %v4459_v36 = vsel %vm4417_vm8, %v4266_v37, %v15766_v48  ;;  %v15784_v55 = vld [vmem:[#allocation104_spill] sm:$0xff] }
 0x569   : > { %3194 = vrot.lane.b32.xlu0 %v8177_v38, %s8279_s6  ;;  %v4650_v58 = vsel %vm4610_vm9, %v4457_v45, %v15747_v3  ;;  %v15770_v33 = vld [vmem:[#allocation642_spill] sm:$0xff]  ;;  %v15787_v11 = vld [vmem:[#allocation524_spill] sm:$0xff] }
 0x56a   : > { %v3389_v50 = vpop.permute.xlu1 %3388  ;;  %v4652_v45 = vsel %vm4610_vm9, %v4459_v36, %v15770_v33  ;;  %v15772_v3 = vld [vmem:[#allocation602_spill] sm:$0xff] }
 0x56b   : > { %v3293_v0 = vpop.permute.xlu0 %3292  ;;  %v4939_v52 = vsel %vm4803_vm10, %v4746_v40, %v3389_v50  ;;  %v15750_v50 = vld [vmem:[#allocation338_spill] sm:$0xff]  ;;  %v15769_v40 = vld [vmem:[#allocation521_spill] sm:$0xff] }
 0x56c   : > { %3410 = vrot.lane.b32.xlu1 %v15731_v57, %s8281_s11  ;;  %v4843_v23 = vsel %vm4803_vm10, %v4650_v58, %v3293_v0  ;;  %v15755_v0 = vld [vmem:[#allocation437_spill] sm:$0xff]  ;;  %v15794_v33 = vld [vmem:[#allocation102_spill] sm:$0xff] }
 0x56d   : > { %3314 = vrot.lane.b32.xlu0 %v15737_v7, %s8281_s11  ;;  %v4169_v57 = vsel %vm4031_vm6, %v3976_v35, %v15755_v0  ;;  %v15761_v7 = vld [vmem:[#allocation115_spill] sm:$0xff] }
 0x56e   : > { %v3586_v2 = vpop.permute.xlu1 %3585  ;;  %v4362_v31 = vsel %vm4224_vm7, %v4169_v57, %v15757_v9  ;;  %v3787_v9 = vsel %vm3645_vm4, %v11954_v5, %v15782_v47  ;;  %v15786_v5 = vld [vmem:[#allocation333_spill] sm:$0xff]  ;;  %v15806_v47 = vld [vmem:[#allocation39_spill] sm:$0xff] }
 0x56f   : > { %v5130_v32 = vsel %vm4996_vm11, %v4937_v1, %v3586_v2  ;;  %v3490_v46 = vpop.permute.xlu0 %3489  ;;  %v4555_v28 = vsel %vm4417_vm8, %v4362_v31, %v15760_v10  ;;  %v15762_v2 = vld [vmem:[#allocation190_spill] sm:$0xff]  ;;  %v3691_v10 = vsel %vm3645_vm4, %v8186_v39, %v15784_v55 }
 0x570   : > { %3412 = vrot.lane.b32.xlu1 %v15743_v13, %s8281_s11  ;;  %7781 = vmatprep.mubr.msk.bf16.mxu1 %vm5211_vm12, %v5130_v32  ;;  %v5034_v12 = vsel %vm4996_vm11, %v4841_v61, %v3490_v46  ;;  %v3978_v27 = vsel %vm3838_vm5, %v3785_v24, %v15762_v2  ;;  %v3689_v32 = vsel %vm3645_vm4, %v8184_v20, %v15764_v21  ;;  %v15767_v46 = vld [vmem:[#allocation38_spill] sm:$0xff]  ;;  %v15788_v20 = vld [vmem:[#allocation203_spill] sm:$0xff] }
 0x571   : > { %3316 = vrot.lane.b32.xlu0 %v15746_v53, %s8281_s11  ;;  %7685 = vmatprep.mubr.msk.bf16.mxu0 %vm5211_vm12, %v5034_v12  ;;  %v4171_v29 = vsel %vm4031_vm6, %v3978_v27, %v15765_v60  ;;  %v3882_v44 = vsel %vm3838_vm5, %v3689_v32, %v15768_v4  ;;  %v15771_v53 = vld [vmem:[#allocation397_spill] sm:$0xff]  ;;  %v3980_v24 = vsel %vm3838_vm5, %v3787_v9, %v15783_v6  ;;  %v15789_v32 = vld [vmem:[#allocation400_spill] sm:$0xff] }
 0x572   : > { %v3588_v15 = vpop.permute.xlu1 %3587  ;;  %v4364_v12 = vsel %vm4224_vm7, %v4171_v29, %v15769_v40  ;;  %v3884_v27 = vsel %vm3838_vm5, %v3691_v10, %v15786_v5  ;;  %v15790_v29 = vld [vmem:[#allocation605_spill] sm:$0xff]  ;;  %v15808_v10 = vld [vmem:[#allocation348_spill] sm:$0xff] }
 0x573   : > { %v5132_v30 = vsel %vm4996_vm11, %v4939_v52, %v3588_v15  ;;  %v3492_v16 = vpop.permute.xlu0 %3491  ;;  %v4075_v15 = vsel %vm4031_vm6, %v3882_v44, %v15771_v53  ;;  %v4557_v58 = vsel %vm4417_vm8, %v4364_v12, %v15772_v3  ;;  %v4077_v60 = vsel %vm4031_vm6, %v3884_v27, %v15789_v32  ;;  %v15793_v4 = vld [vmem:[#allocation481_spill] sm:$0xff]  ;;  %v15809_v27 = vld [vmem:[#allocation228_spill] sm:$0xff] }
 0x574   : > { %3609 = vrot.lane.b32.xlu1 %v15748_v62, %s8282_s12  ;;  %7782 = vmatmul.mubr.msk.bf16.gmra.mrb[36].mxu1 %vm5211_vm12, %v5132_v30  ;;  %v5036_v51 = vsel %vm4996_vm11, %v4843_v23, %v3492_v16  ;;  %v15773_v16 = vld [vmem:[#allocation113_spill] sm:$0xff]  ;;  %v15774_v62 = vld [vmem:[#allocation478_spill] sm:$0xff]  ;;  %v4270_v44 = vsel %vm4224_vm7, %v4077_v60, %v15793_v4 }
 0x575   : > { %3513 = vrot.lane.b32.xlu0 %v15749_v56, %s8282_s12  ;;  %7686 = vmatmul.mubr.msk.bf16.gmra.mrb[36].mxu0 %vm5211_vm12, %v5036_v51  ;;  %v4268_v51 = vsel %vm4224_vm7, %v4075_v15, %v15774_v62  ;;  %v8189_v12 = vld [vmem:[%s8335_s22 + $0xb8] sm:$0xff]  }
 0x576   : > { %v3177_v19 = vpop.permute.xlu1 %3176  ;;  %v15796_v15 = vld [vmem:[#allocation561_spill] sm:$0xff] }
 0x577   : > { %v3175_v38 = vpop.permute.xlu0 %3174  ;;  %v4750_v56 = vsel %vm4610_vm9, %v4557_v58, %v3177_v19  ;;  %v4463_v3 = vsel %vm4417_vm8, %v4270_v44, %v15796_v15  ;;  %v15812_v15 = vld [vmem:[#allocation211_spill] sm:$0xff] }
 0x578   : > { %3611 = vrot.lane.b32.xlu1 %v15750_v50, %s8282_s12  ;;  %v4748_v8 = vsel %vm4610_vm9, %v4555_v28, %v3175_v38  ;;  %v15775_v50 = vld [vmem:[#allocation558_spill] sm:$0xff]  ;;  %v15785_v28 = vld [vmem:[#allocation439_spill] sm:$0xff] }
 0x579   : > { %3515 = vrot.lane.b32.xlu0 %v15751_v59, %s8282_s12  ;;  %v4461_v59 = vsel %vm4417_vm8, %v4268_v51, %v15775_v50  ;;  %v15799_v51 = vld [vmem:[#allocation523_spill] sm:$0xff] }
 0x57a   : > { %v3391_v42 = vpop.permute.xlu1 %3390 }
 0x57b   : > { %v3295_v26 = vpop.permute.xlu0 %3294  ;;  %v4941_v61 = vsel %vm4803_vm10, %v4748_v8, %v3391_v42  ;;  %v8188_v8 = vld [vmem:[%s8335_s22 + $0x238] sm:$0xff]  }
 0x57c   : > { %3200 = vrot.lane.b32.xlu1 %v8180_v43, %s8279_s6  ;;  %v4845_v30 = vsel %vm4803_vm10, %v4652_v45, %v3295_v26  ;;  %v15777_v26 = vld [vmem:[#allocation641_spill] sm:$0xff]  ;;  %v3789_v21 = vsel %vm3645_vm4, %v8188_v8, %v15788_v20  ;;  %v3693_v45 = vsel %vm3645_vm4, %v8189_v12, %v15794_v33 }
 0x57d   : > { %3198 = vrot.lane.b32.xlu0 %v8182_v41, %s8279_s6  ;;  %v4654_v43 = vsel %vm4610_vm9, %v4461_v59, %v15777_v26  ;;  %v15780_v41 = vld [vmem:[#allocation342_spill] sm:$0xff] }
 0x57e   : > { %v3393_v25 = vpop.permute.xlu1 %3392 }
 0x57f   : > { %v3297_v1 = vpop.permute.xlu0 %3296  ;;  %v4943_v42 = vsel %vm4803_vm10, %v4750_v56, %v3393_v25  ;;  %v15781_v25 = vld [vmem:[#allocation218_spill] sm:$0xff] }
 0x580   : > { %3414 = vrot.lane.b32.xlu1 %v15761_v7, %s8281_s11  ;;  %v4847_v19 = vsel %vm4803_vm10, %v4654_v43, %v3297_v1  ;;  %v4173_v1 = vsel %vm4031_vm6, %v3980_v24, %v15785_v28  ;;  %v8187_v7 = vld [vmem:[%s8335_s22 + $0x2c0] sm:$0xff]  }
 0x581   : > { %3318 = vrot.lane.b32.xlu0 %v15767_v46, %s8281_s11  ;;  %v4366_v37 = vsel %vm4224_vm7, %v4173_v1, %v15787_v11  ;;  %v15792_v46 = vld [vmem:[#allocation196_spill] sm:$0xff] }
 0x582   : > { %v3590_v13 = vpop.permute.xlu1 %3589  ;;  %v4559_v48 = vsel %vm4417_vm8, %v4366_v37, %v15790_v29 }
 0x583   : > { %v5134_v52 = vsel %vm4996_vm11, %v4941_v61, %v3590_v13  ;;  %v3494_v23 = vpop.permute.xlu0 %3493  ;;  %v15791_v61 = vld [vmem:[#allocation119_spill] sm:$0xff]  ;;  %v3982_v13 = vsel %vm3838_vm5, %v3789_v21, %v15792_v46 }
 0x584   : > { %3416 = vrot.lane.b32.xlu1 %v15773_v16, %s8281_s11  ;;  %7785 = vmatprep.mubr.msk.bf16.mxu1 %vm5211_vm12, %v5134_v52  ;;  %v5038_v38 = vsel %vm4996_vm11, %v4845_v30, %v3494_v23  ;;  %v15795_v52 = vld [vmem:[#allocation438_spill] sm:$0xff]  ;;  %v15797_v30 = vld [vmem:[#allocation40_spill] sm:$0xff]  ;;  %v15798_v16 = vld [vmem:[#allocation331_spill] sm:$0xff] }
 0x585   : > { %3320 = vrot.lane.b32.xlu0 %v15776_v22, %s8281_s11  ;;  %7689 = vmatprep.mubr.msk.bf16.mxu0 %vm5211_vm12, %v5038_v38  ;;  %v4175_v53 = vsel %vm4031_vm6, %v3982_v13, %v15795_v52  ;;  %v3886_v62 = vsel %vm3838_vm5, %v3693_v45, %v15798_v16  ;;  %v15800_v38 = vld [vmem:[#allocation645_spill] sm:$0xff] }
 0x586   : > { %v3592_v49 = vpop.permute.xlu1 %3591  ;;  %v4368_v56 = vsel %vm4224_vm7, %v4175_v53, %v15799_v51  ;;  %v4656_v50 = vsel %vm4610_vm9, %v4463_v3, %v15800_v38  ;;  %v8190_v53 = vld [vmem:[%s8335_s22 + $0x240] sm:$0xff]   ;;  %v8192_v51 = vld [vmem:[%s8335_s22 + $0xc8] sm:$0xff]  }
 0x587   : > { %v5136_v63 = vsel %vm4996_vm11, %v4943_v42, %v3592_v49  ;;  %v3496_v35 = vpop.permute.xlu0 %3495  ;;  %v15801_v42 = vld [vmem:[#allocation399_spill] sm:$0xff]  ;;  %v15802_v49 = vld [vmem:[#allocation604_spill] sm:$0xff]  ;;  %v3791_v3 = vsel %vm3645_vm4, %v8190_v53, %v15812_v15 }
 0x588   : > { %3613 = vrot.lane.b32.xlu1 %v15778_v17, %s8282_s12  ;;  %7786 = vmatmul.mubr.msk.bf16.gmra.mrb[40].mxu1 %vm5211_vm12, %v5136_v63  ;;  %v5040_v18 = vsel %vm4996_vm11, %v4847_v19, %v3496_v35  ;;  %v4079_v22 = vsel %vm4031_vm6, %v3886_v62, %v15801_v42  ;;  %v4561_v26 = vsel %vm4417_vm8, %v4368_v56, %v15802_v49  ;;  %v15803_v19 = vld [vmem:[#allocation117_spill] sm:$0xff]  ;;  %v15804_v35 = vld [vmem:[#allocation480_spill] sm:$0xff]  ;;  %v15813_v56 = vld [vmem:[#allocation106_spill] sm:$0xff] }
 0x589   : > { %3517 = vrot.lane.b32.xlu0 %v15779_v54, %s8282_s12  ;;  %7690 = vmatmul.mubr.msk.bf16.gmra.mrb[40].mxu0 %vm5211_vm12, %v5040_v18  ;;  %v4272_v17 = vsel %vm4224_vm7, %v4079_v22, %v15804_v35  ;;  %v8191_v62 = vld [vmem:[%s8335_s22 + $0x2d8] sm:$0xff]   ;;  %v3697_v38 = vsel %vm3645_vm4, %v8192_v51, %v15813_v56  ;;  %v8193_v49 = vld [vmem:[%s8335_s22 + $0xc0] sm:$0xff]  }
 0x58a   : > { %v3181_v0 = vpop.permute.xlu1 %3180  ;;  %v15834_v56 = vld [vmem:[#allocation482_spill] sm:$0xff] }
 0x58b   : > { %v3179_v57 = vpop.permute.xlu0 %3178  ;;  %v4754_v18 = vsel %vm4610_vm9, %v4561_v26, %v3181_v0  ;;  %v15815_v26 = vld [vmem:[#allocation108_spill] sm:$0xff] }
 0x58c   : > { %3615 = vrot.lane.b32.xlu1 %v15780_v41, %s8282_s12  ;;  %v4752_v40 = vsel %vm4610_vm9, %v4559_v48, %v3179_v57  ;;  %v12753_v57 = vld [vmem:[%s14092_s3] ss:$0 sm:$0xff]  ;;  %v15805_v41 = vld [vmem:[#allocation560_spill] sm:$0xff] }
 0x58d   : > { %3519 = vrot.lane.b32.xlu0 %v15781_v25, %s8282_s12  ;;  %v4465_v25 = vsel %vm4417_vm8, %v4272_v17, %v15805_v41  ;;  %v15810_v48 = vld [vmem:[#allocation346_spill] sm:$0xff]  ;;  %v15817_v41 = vld [vmem:[#allocation337_spill] sm:$0xff] }
 0x58e   : > { %v3395_v14 = vpop.permute.xlu1 %3394 }
 0x58f   : > { %v3299_v31 = vpop.permute.xlu0 %3298  ;;  %v4945_v58 = vsel %vm4803_vm10, %v4752_v40, %v3395_v14  ;;  %v15811_v40 = vld [vmem:[#allocation224_spill] sm:$0xff] }
 0x590   : > { %3204 = vrot.lane.b32.xlu1 %v8185_v34, %s8279_s6  ;;  %v4849_v43 = vsel %vm4803_vm10, %v4656_v50, %v3299_v31  ;;  %v15807_v31 = vld [vmem:[#allocation644_spill] sm:$0xff]  ;;  %v15814_v50 = vld [vmem:[#allocation201_spill] sm:$0xff] }
 0x591   : > { %3202 = vrot.lane.b32.xlu0 %v8187_v7, %s8279_s6  ;;  %v4658_v0 = vsel %vm4610_vm9, %v4465_v25, %v15807_v31 }
 0x592   : > { %v3397_v2 = vpop.permute.xlu1 %3396 }
 0x593   : > { %v3301_v36 = vpop.permute.xlu0 %3300  ;;  %v4947_v14 = vsel %vm4803_vm10, %v4754_v18, %v3397_v2  ;;  %v8194_v18 = vld [vmem:[%s8335_s22 + $0x2d0] sm:$0xff]  }
 0x594   : > { %3418 = vrot.lane.b32.xlu1 %v15791_v61, %s8281_s11  ;;  %v4851_v24 = vsel %vm4803_vm10, %v4658_v0, %v3301_v36  ;;  %v8195_v0 = vld [vmem:[%s8335_s22 + $0x248] sm:$0xff]  }
 0x595   : > { %3322 = vrot.lane.b32.xlu0 %v15797_v30, %s8281_s11 }
 0x596   : > { %v3594_v23 = vpop.permute.xlu1 %3593 }
 0x597   : > { %v5138_v59 = vsel %vm4996_vm11, %v4945_v58, %v3594_v23  ;;  %v3498_v63 = vpop.permute.xlu0 %3497 }
 0x598   : > { %3420 = vrot.lane.b32.xlu1 %v15803_v19, %s8281_s11  ;;  %7789 = vmatprep.mubr.msk.bf16.mxu1 %vm5211_vm12, %v5138_v59  ;;  %v5042_v54 = vsel %vm4996_vm11, %v4849_v43, %v3498_v63  ;;  %v3984_v59 = vsel %vm3838_vm5, %v3791_v3, %v15814_v50  ;;  %v3695_v43 = vsel %vm3645_vm4, %v8193_v49, %v15815_v26  ;;  %v15816_v63 = vld [vmem:[#allocation441_spill] sm:$0xff]  ;;  %v15832_v3 = vld [vmem:[#allocation606_spill] sm:$0xff] }
 0x599   : > { %3324 = vrot.lane.b32.xlu0 %v15806_v47, %s8281_s11  ;;  %7693 = vmatprep.mubr.msk.bf16.mxu0 %vm5211_vm12, %v5042_v54  ;;  %v4177_v19 = vsel %vm4031_vm6, %v3984_v59, %v15816_v63  ;;  %v3888_v25 = vsel %vm3838_vm5, %v3695_v43, %v15817_v41  ;;  %v15836_v43 = vld [vmem:[#allocation41_spill] sm:$0xff] }
 0x59a   : > { %v3596_v9 = vpop.permute.xlu1 %3595 }
 0x59b   : > { %v5140_v34 = vsel %vm4996_vm11, %v4947_v14, %v3596_v9  ;;  %v7651_v6 = vpop.f32.mrb[0].mxu0  ;;  %v3500_v39 = vpop.permute.xlu0 %3499  ;;  %v15818_v14 = vld [vmem:[#allocation526_spill] sm:$0xff] }
 0x59c   : > { %v5454_v55 = vadd.f32 %v7651_v6, %v12753_v57  ;;  %3617 = vrot.lane.b32.xlu1 %v15808_v10, %s8282_s12  ;;  %v5445_v28 = vpop.f32.mrb[1].mxu0  ;;  %7790 = vmatmul.mubr.msk.bf16.gmra.mrb[44].mxu1 %vm5211_vm12, %v5140_v34  ;;  %v5044_v1 = vsel %vm4996_vm11, %v4851_v24, %v3500_v39  ;;  %v4370_v47 = vsel %vm4224_vm7, %v4177_v19, %v15818_v14  ;;  %v15819_v34 = vld [vmem:[#allocation209_spill] sm:$0xff]  ;;  %v15820_v24 = vld [vmem:[#allocation402_spill] sm:$0xff] }
 0x59d   : > { %v5446_v7 = vadd.f32 %v12753_v57, %v5445_v28  ;;  %v7652_v2 = vpop.f32.mrb[2].mxu0  ;;  %3521 = vrot.lane.b32.xlu0 %v15809_v27, %s8282_s12  ;;  %7694 = vmatmul.mubr.msk.bf16.gmra.mrb[44].mxu0 %vm5211_vm12, %v5044_v1  ;;  %v3793_v6 = vsel %vm3645_vm4, %v8195_v0, %v15819_v34  ;;  %v4081_v39 = vsel %vm4031_vm6, %v3888_v25, %v15820_v24  ;;  %v15824_v27 = vld [vmem:[#allocation483_spill] sm:$0xff]  ;;  %v15839_v24 = vld [vmem:[#allocation234_spill] sm:$0xff] }
 0x59e   : > { %v6150_v5 = vmax.f32 %v5454_v55, 0.0  ;;  %v5457_v11 = vadd.f32 %v7652_v2, %v12753_v57  ;;  %v12776_v37 = vpop.permute.xlu1 %3184  ;;  %v5448_v8 = vpop.f32.mrb[3].mxu0  ;;  %v15821_v55 = vld [vmem:[#allocation607_spill] sm:$0xff]  ;;  %v15823_v2 = vld [vmem:[#allocation202_spill] sm:$0xff] }
 0x59f   : > { %v6148_v20 = vmax.f32 %v5446_v7, 0.0  ;;  %v5449_v21 = vadd.f32 %v12753_v57, %v5448_v8  ;;  %v3183_v29 = vpop.permute.xlu0 %3182  ;;  %v4563_v10 = vsel %vm4417_vm8, %v4370_v47, %v15821_v55  ;;  %v15822_v7 = vld [vmem:[#allocation123_spill] sm:$0xff]  ;;  %v15838_v47 = vld [vmem:[#allocation352_spill] sm:$0xff] }
 0x5a0   : > { %v7421_v32 = vpack.c.bf16 %v6150_v5, %v6150_v5  ;;  %v6151_v60 = vmax.f32 %v5457_v11, 0.0  ;;  %3619 = vrot.lane.b32.xlu1 %v15810_v48, %s8282_s12  ;;  %v7747_v46 = vpop.f32.mrb[0].mxu1  ;;  %v3986_v5 = vsel %vm3838_vm5, %v3793_v6, %v15823_v2  ;;  %v4274_v11 = vsel %vm4224_vm7, %v4081_v39, %v15824_v27  ;;  %v15840_v2 = vld [vmem:[#allocation350_spill] sm:$0xff] }
 0x5a1   : > { %v7419_v36 = vpack.c.bf16 %v6148_v20, %v6148_v20  ;;  %v6149_v61 = vmax.f32 %v5449_v21, 0.0  ;;  %v5806_v4 = vadd.f32 %v7747_v46, %v12753_v57  ;;  %v5797_v44 = vpop.f32.mrb[1].mxu1  ;;  %3523 = vrot.lane.b32.xlu0 %v15811_v40, %s8282_s12  ;;  %v4756_v8 = vsel %vm4610_vm9, %v4563_v10, %v3183_v29  ;;  %v15825_v21 = vld [vmem:[#allocation335_spill] sm:$0xff]  ;;  %v15830_v40 = vld [vmem:[#allocation525_spill] sm:$0xff] }
 0x5a2   : > { %6791 = vst.msk [vmem:[%s12781_s21 + $0x8] sm:$0xf] %vm6788_vm13, %v7421_v32  ;;  %v7422_v13 = vpack.c.bf16 %v6151_v60, %v6151_v60  ;;  %v3399_v12 = vpop.permute.xlu1 %3398  ;;  %v5798_v45 = vadd.f32 %v12753_v57, %v5797_v44  ;;  %v7748_v52 = vpop.f32.mrb[2].mxu1  ;;  %v3890_v32 = vsel %vm3838_vm5, %v3697_v38, %v15825_v21  ;;  %v15826_v60 = vld [vmem:[#allocation440_spill] sm:$0xff]  ;;  %v15842_v21 = vld [vmem:[#allocation217_spill] sm:$0xff] }
 0x5a3   : > { %6789 = vst.msk [vmem:[%s12781_s21] sm:$0xf] %vm6788_vm13, %v7419_v36  ;;  %v7420_v33 = vpack.c.bf16 %v6149_v61, %v6149_v61  ;;  %v6214_v58 = vmax.f32 %v5806_v4, 0.0  ;;  %v5809_v30 = vadd.f32 %v7748_v52, %v12753_v57  ;;  %v5800_v23 = vpop.f32.mrb[3].mxu1  ;;  %v3303_v16 = vpop.permute.xlu0 %3302  ;;  %v4179_v48 = vsel %vm4031_vm6, %v3986_v5, %v15826_v60  ;;  %v15827_v36 = vld [vmem:[#allocation563_spill] sm:$0xff]  ;;  %v15829_v4 = vld [vmem:[#allocation401_spill] sm:$0xff] }
 0x5a4   : > { %6792 = vst.msk [vmem:[%s12781_s21 + $0xc] sm:$0xf] %vm6788_vm13, %v7422_v13  ;;  %3208 = vrot.lane.b32.xlu1 %v8191_v62, %s8279_s6  ;;  %v6212_v42 = vmax.f32 %v5798_v45, 0.0  ;;  %v5801_v22 = vadd.f32 %v12753_v57, %v5800_v23  ;;  %v4467_v61 = vsel %vm4417_vm8, %v4274_v11, %v15827_v36  ;;  %v4949_v46 = vsel %vm4803_vm10, %v4756_v8, %v3399_v12  ;;  %v15828_v13 = vld [vmem:[#allocation42_spill] sm:$0xff]  ;;  %v15831_v45 = vld [vmem:[#allocation12_spill] sm:$0xff]  ;;  %v15833_v62 = vld [vmem:[#allocation121_spill] sm:$0xff] }
 0x5a5   : > { %6790 = vst.msk [vmem:[%s12781_s21 + $0x4] sm:$0xf] %vm6788_vm13, %v7420_v33  ;;  %v7485_v35 = vpack.c.bf16 %v6214_v58, %v6214_v58  ;;  %v6215_v17 = vmax.f32 %v5809_v30, 0.0  ;;  %3206 = vrot.lane.b32.xlu0 %v8194_v18, %s8279_s6  ;;  %v4083_v44 = vsel %vm4031_vm6, %v3890_v32, %v15829_v4  ;;  %v4372_v33 = vsel %vm4224_vm7, %v4179_v48, %v15830_v40  ;;  %v15841_v11 = vld [vmem:[#allocation230_spill] sm:$0xff]  ;;  %v8197_v36 = vld [vmem:[%s8335_s22 + $0x2e8] sm:$0xff]  }
 0x5a6   : > { %v3401_v54 = vpop.permute.xlu1 %3400  ;;  %v7483_v9 = vpack.c.bf16 %v6212_v42, %v6212_v42  ;;  %v6213_v31 = vmax.f32 %v5801_v22, 0.0  ;;  %v4660_v52 = vsel %vm4610_vm9, %v4467_v61, %v15831_v45  ;;  %v4565_v12 = vsel %vm4417_vm8, %v4372_v33, %v15832_v3  ;;  %v15835_v22 = vld [vmem:[#allocation562_spill] sm:$0xff]  ;;  %v15843_v61 = vld [vmem:[#allocation207_spill] sm:$0xff]  ;;  %v8201_v3 = vld [vmem:[%s8335_s22 + $0x258] sm:$0xff]  }
 0x5a7   : > { %6855 = vst.msk [vmem:[%s12781_s21 + $0x108] sm:$0xf] %vm6788_vm13, %v7485_v35  ;;  %v7486_v28 = vpack.c.bf16 %v6215_v17, %v6215_v17  ;;  %v3305_v1 = vpop.permute.xlu0 %3304  ;;  %v4853_v58 = vsel %vm4803_vm10, %v4660_v52, %v3303_v16  ;;  %v4276_v38 = vsel %vm4224_vm7, %v4083_v44, %v15834_v56  ;;  %v4758_v50 = vsel %vm4610_vm9, %v4565_v12, %v12776_v37  ;;  %v15837_v37 = vld [vmem:[#allocation63_spill] sm:$0xff]  ;;  %v8199_v33 = vld [vmem:[%s8335_s22 + $0x2e0] sm:$0xff]   ;;  %v8200_v52 = vld [vmem:[%s8335_s22 + $0xd8] sm:$0xff]  }
 0x5a8   : > { %3422 = vrot.lane.b32.xlu1 %v15822_v7, %s8281_s11  ;;  %6853 = vst.msk [vmem:[%s12781_s21 + $0x100] sm:$0xf] %vm6788_vm13, %v7483_v9  ;;  %v7484_v20 = vpack.c.bf16 %v6213_v31, %v6213_v31  ;;  %v4469_v16 = vsel %vm4417_vm8, %v4276_v38, %v15835_v22  ;;  %v4951_v49 = vsel %vm4803_vm10, %v4758_v50, %v3401_v54  ;;  %v15845_v44 = vld [vmem:[#allocation443_spill] sm:$0xff]  ;;  %v15852_v22 = vld [vmem:[#allocation404_spill] sm:$0xff] }
 0x5a9   : > { %6856 = vst.msk [vmem:[%s12781_s21 + $0x10c] sm:$0xf] %vm6788_vm13, %v7486_v28  ;;  %3326 = vrot.lane.b32.xlu0 %v15828_v13, %s8281_s11  ;;  %v4662_v17 = vsel %vm4610_vm9, %v4469_v16, %v15837_v37  ;;  %v8198_v13 = vld [vmem:[%s8335_s22 + $0xd0] sm:$0xff]   ;;  %v15847_v12 = vld [vmem:[#allocation215_spill] sm:$0xff] }
 0x5aa   : > { %v3598_v29 = vpop.permute.xlu1 %3597  ;;  %6854 = vst.msk [vmem:[%s12781_s21 + $0x104] sm:$0xf] %vm6788_vm13, %v7484_v20  ;;  %v4855_v41 = vsel %vm4803_vm10, %v4662_v17, %v3305_v1  ;;  %v8196_v20 = vld [vmem:[%s8335_s22 + $0x250] sm:$0xff]   ;;  %v15850_v38 = vld [vmem:[#allocation339_spill] sm:$0xff]  ;;  %v15856_v17 = vld [vmem:[#allocation485_spill] sm:$0xff] }
 0x5ab   : > { %v5142_v53 = vsel %vm4996_vm11, %v4949_v46, %v3598_v29  ;;  %v7655_v15 = vpop.f32.mrb[4].mxu0  ;;  %v3502_v30 = vpop.permute.xlu0 %3501  ;;  %v3795_v32 = vsel %vm3645_vm4, %v8196_v20, %v15842_v21  ;;  %v15844_v29 = vld [vmem:[#allocation112_spill] sm:$0xff] }
 0x5ac   : > { %v5468_v23 = vadd.f32 %v7655_v15, %v12753_v57  ;;  %3424 = vrot.lane.b32.xlu1 %v15833_v62, %s8281_s11  ;;  %v5461_v51 = vpop.f32.mrb[5].mxu0  ;;  %7793 = vmatprep.mubr.msk.bf16.mxu1 %vm5211_vm12, %v5142_v53  ;;  %v5046_v59 = vsel %vm4996_vm11, %v4853_v58, %v3502_v30  ;;  %v3988_v46 = vsel %vm3838_vm5, %v3795_v32, %v15843_v61  ;;  %v15846_v53 = vld [vmem:[#allocation110_spill] sm:$0xff]  ;;  %v15848_v30 = vld [vmem:[#allocation341_spill] sm:$0xff]  ;;  %v15849_v62 = vld [vmem:[#allocation528_spill] sm:$0xff] }
 0x5ad   : > { %v7656_v42 = vpop.f32.mrb[6].mxu0  ;;  %3328 = vrot.lane.b32.xlu0 %v15836_v43, %s8281_s11  ;;  %7697 = vmatprep.mubr.msk.bf16.mxu0 %vm5211_vm12, %v5046_v59  ;;  %v3699_v4 = vsel %vm3645_vm4, %v8198_v13, %v15844_v29  ;;  %v4181_v40 = vsel %vm4031_vm6, %v3988_v46, %v15845_v44  ;;  %v3701_v15 = vsel %vm3645_vm4, %v8200_v52, %v15846_v53  ;;  %v15851_v59 = vld [vmem:[#allocation208_spill] sm:$0xff]  ;;  %v15867_v53 = vld [vmem:[#allocation61_spill] sm:$0xff] }
 0x5ae   : > { %v6152_v26 = vmax.f32 %v5468_v23, 0.0  ;;  %v5471_v63 = vadd.f32 %v7656_v42, %v12753_v57  ;;  %v3600_v19 = vpop.permute.xlu1 %3599  ;;  %v5463_v35 = vpop.f32.mrb[7].mxu0  ;;  %v3797_v58 = vsel %vm3645_vm4, %v8201_v3, %v15847_v12  ;;  %v3892_v23 = vsel %vm3838_vm5, %v3699_v4, %v15848_v30  ;;  %v15863_v20 = vld [vmem:[#allocation608_spill] sm:$0xff] }
 0x5af   : > { %v5144_v18 = vsel %vm4996_vm11, %v4951_v49, %v3600_v19  ;;  %v3504_v14 = vpop.permute.xlu0 %3503  ;;  %v4374_v51 = vsel %vm4224_vm7, %v4181_v40, %v15849_v62  ;;  %v3894_v50 = vsel %vm3838_vm5, %v3701_v15, %v15850_v38  ;;  %v3990_v42 = vsel %vm3838_vm5, %v3797_v58, %v15851_v59  ;;  %v15853_v49 = vld [vmem:[#allocation609_spill] sm:$0xff]  ;;  %v15855_v35 = vld [vmem:[#allocation442_spill] sm:$0xff]  ;;  %v15865_v4 = vld [vmem:[#allocation564_spill] sm:$0xff] }
 0x5b0   : > { %v7423_v54 = vpack.c.bf16 %v6152_v26, %v6152_v26  ;;  %v6153_v25 = vmax.f32 %v5471_v63, 0.0  ;;  %3621 = vrot.lane.b32.xlu1 %v15838_v47, %s8282_s12  ;;  %7794 = vmatmul.mubr.msk.bf16.gmra.mrb[48].mxu1 %vm5211_vm12, %v5144_v18  ;;  %v5048_v9 = vsel %vm4996_vm11, %v4855_v41, %v3504_v14  ;;  %v7751_v31 = vpop.f32.mrb[4].mxu1  ;;  %v4085_v16 = vsel %vm4031_vm6, %v3892_v23, %v15852_v22  ;;  %v15854_v63 = vld [vmem:[#allocation128_spill] sm:$0xff]  ;;  %v15857_v14 = vld [vmem:[#allocation403_spill] sm:$0xff] }
 0x5b1   : > { %v5820_v34 = vadd.f32 %v7751_v31, %v12753_v57  ;;  %v5813_v6 = vpop.f32.mrb[5].mxu1  ;;  %3525 = vrot.lane.b32.xlu0 %v15839_v24, %s8282_s12  ;;  %7698 = vmatmul.mubr.msk.bf16.gmra.mrb[48].mxu0 %vm5211_vm12, %v5048_v9  ;;  %v4567_v26 = vsel %vm4417_vm8, %v4374_v51, %v15853_v49  ;;  %v4183_v37 = vsel %vm4031_vm6, %v3990_v42, %v15855_v35  ;;  %v15858_v9 = vld [vmem:[#allocation527_spill] sm:$0xff]  ;;  %v15860_v24 = vld [vmem:[#allocation44_spill] sm:$0xff]  ;;  %v15870_v49 = vld [vmem:[#allocation354_spill] sm:$0xff] }
 0x5b2   : > { %6793 = vst.msk [vmem:[%s12781_s21 + $0x10] sm:$0xf] %vm6788_vm13, %v7423_v54  ;;  %v7424_v0 = vpack.c.bf16 %v6153_v25, %v6153_v25  ;;  %v12892_v39 = vpop.permute.xlu1 %3188  ;;  %v7752_v55 = vpop.f32.mrb[6].mxu1  ;;  %v4278_v18 = vsel %vm4224_vm7, %v4085_v16, %v15856_v17  ;;  %v4087_v47 = vsel %vm4031_vm6, %v3894_v50, %v15857_v14  ;;  %v4376_v31 = vsel %vm4224_vm7, %v4183_v37, %v15858_v9  ;;  %v15868_v62 = vld [vmem:[#allocation356_spill] sm:$0xff]  ;;  %v15872_v35 = vld [vmem:[#allocation114_spill] sm:$0xff]  ;;  %v15875_v9 = vld [vmem:[#allocation221_spill] sm:$0xff] }
 0x5b3   : > { %v6216_v10 = vmax.f32 %v5820_v34, 0.0  ;;  %v5823_v28 = vadd.f32 %v7752_v55, %v12753_v57  ;;  %v5815_v1 = vpop.f32.mrb[7].mxu1  ;;  %v3187_v7 = vpop.permute.xlu0 %3186  ;;  %v4569_v21 = vsel %vm4417_vm8, %v4376_v31, %v15863_v20  ;;  %v15869_v50 = vld [vmem:[#allocation240_spill] sm:$0xff]  ;;  %v8203_v17 = vld [vmem:[%s8335_s22 + $0xe0] sm:$0xff]  }
 0x5b4   : > { %6794 = vst.msk [vmem:[%s12781_s21 + $0x14] sm:$0xf] %vm6788_vm13, %v7424_v0  ;;  %3623 = vrot.lane.b32.xlu1 %v15840_v2, %s8282_s12  ;;  %v4760_v41 = vsel %vm4610_vm9, %v4567_v26, %v3187_v7  ;;  %v15859_v0 = vld [vmem:[#allocation565_spill] sm:$0xff] }
 0x5b5   : > { %v7487_v5 = vpack.c.bf16 %v6216_v10, %v6216_v10  ;;  %v6217_v27 = vmax.f32 %v5823_v28, 0.0  ;;  %3527 = vrot.lane.b32.xlu0 %v15841_v11, %s8282_s12  ;;  %v4471_v34 = vsel %vm4417_vm8, %v4278_v18, %v15859_v0  ;;  %v15861_v28 = vld [vmem:[#allocation11_spill] sm:$0xff]  ;;  %v15873_v18 = vld [vmem:[#allocation116_spill] sm:$0xff] }
 0x5b6   : > { %v3403_v8 = vpop.permute.xlu1 %3402  ;;  %v4664_v1 = vsel %vm4610_vm9, %v4471_v34, %v15861_v28  ;;  %v15876_v0 = vld [vmem:[#allocation343_spill] sm:$0xff] }
 0x5b7   : > { %6857 = vst.msk [vmem:[%s12781_s21 + $0x110] sm:$0xf] %vm6788_vm13, %v7487_v5  ;;  %v7488_v60 = vpack.c.bf16 %v6217_v27, %v6217_v27  ;;  %v3307_v48 = vpop.permute.xlu0 %3306  ;;  %v4953_v6 = vsel %vm4803_vm10, %v4760_v41, %v3403_v8  ;;  %v15862_v27 = vld [vmem:[#allocation484_spill] sm:$0xff]  ;;  %v3703_v41 = vsel %vm3645_vm4, %v8203_v17, %v15873_v18 }
 0x5b8   : > { %3212 = vrot.lane.b32.xlu1 %v8197_v36, %s8279_s6  ;;  %v4280_v11 = vsel %vm4224_vm7, %v4087_v47, %v15862_v27  ;;  %v4857_v8 = vsel %vm4803_vm10, %v4664_v1, %v3307_v48  ;;  %v4762_v36 = vsel %vm4610_vm9, %v4569_v21, %v12892_v39  ;;  %v8205_v47 = vld [vmem:[%s8335_s22 + $0x268] sm:$0xff]   ;;  %v8206_v1 = vld [vmem:[%s8335_s22 + $0x2f8] sm:$0xff]  }
 0x5b9   : > { %6858 = vst.msk [vmem:[%s12781_s21 + $0x114] sm:$0xf] %vm6788_vm13, %v7488_v60  ;;  %3210 = vrot.lane.b32.xlu0 %v8199_v33, %s8279_s6  ;;  %v15864_v60 = vld [vmem:[#allocation125_spill] sm:$0xff]  ;;  %v4473_v44 = vsel %vm4417_vm8, %v4280_v11, %v15865_v4  ;;  %v15866_v33 = vld [vmem:[#allocation43_spill] sm:$0xff]  ;;  %v3801_v31 = vsel %vm3645_vm4, %v8205_v47, %v15875_v9  ;;  %v15881_v11 = vld [vmem:[#allocation406_spill] sm:$0xff] }
 0x5ba   : > { %v3405_v45 = vpop.permute.xlu1 %3404  ;;  %v4666_v39 = vsel %vm4610_vm9, %v4473_v44, %v15867_v53  ;;  %v15882_v21 = vld [vmem:[#allocation445_spill] sm:$0xff]  ;;  %v8207_v44 = vld [vmem:[%s8335_s22 + $0x2f0] sm:$0xff]  }
 0x5bb   : > { %v7659_v56 = vpop.f32.mrb[8].mxu0  ;;  %v3309_v43 = vpop.permute.xlu0 %3308  ;;  %v4955_v48 = vsel %vm4803_vm10, %v4762_v36, %v3405_v45  ;;  %v15884_v36 = vld [vmem:[#allocation486_spill] sm:$0xff] }
 0x5bc   : > { %3426 = vrot.lane.b32.xlu1 %v15854_v63, %s8281_s11  ;;  %v5475_v19 = vpop.f32.mrb[9].mxu0  ;;  %v4859_v45 = vsel %vm4803_vm10, %v4666_v39, %v3309_v43  ;;  %v15871_v43 = vld [vmem:[#allocation236_spill] sm:$0xff]  ;;  %v15889_v39 = vld [vmem:[#allocation567_spill] sm:$0xff] }
 0x5bd   : > { %v5476_v54 = vadd.f32 %v12753_v57, %v5475_v19  ;;  %v7660_v25 = vpop.f32.mrb[10].mxu0  ;;  %3330 = vrot.lane.b32.xlu0 %v15860_v24, %s8281_s11  ;;  %v8202_v19 = vld [vmem:[%s8335_s22 + $0xe8] sm:$0xff]  }
 0x5be   : > { %v3602_v55 = vpop.permute.xlu1 %3601  ;;  %v5478_v10 = vpop.f32.mrb[11].mxu0  ;;  %v3705_v37 = vsel %vm3645_vm4, %v8202_v19, %v15872_v35  ;;  %v15874_v25 = vld [vmem:[#allocation223_spill] sm:$0xff] }
 0x5bf   : > { %v6154_v7 = vmax.f32 %v5476_v54, 0.0  ;;  %v5146_v2 = vsel %vm4996_vm11, %v4953_v6, %v3602_v55  ;;  %v5479_v5 = vadd.f32 %v12753_v57, %v5478_v10  ;;  %v3506_v32 = vpop.permute.xlu0 %3505  ;;  %v8204_v54 = vld [vmem:[%s8335_s22 + $0x260] sm:$0xff]   ;;  %v3898_v34 = vsel %vm3838_vm5, %v3705_v37, %v15876_v0  ;;  %v15877_v6 = vld [vmem:[#allocation345_spill] sm:$0xff] }
 0x5c0   : > { %3428 = vrot.lane.b32.xlu1 %v15864_v60, %s8281_s11  ;;  %7797 = vmatprep.mubr.msk.bf16.mxu1 %vm5211_vm12, %v5146_v2  ;;  %v5050_v13 = vsel %vm4996_vm11, %v4857_v8, %v3506_v32  ;;  %v7755_v29 = vpop.f32.mrb[8].mxu1  ;;  %v3799_v14 = vsel %vm3645_vm4, %v8204_v54, %v15874_v25  ;;  %v3896_v24 = vsel %vm3838_vm5, %v3703_v41, %v15877_v6  ;;  %v15878_v55 = vld [vmem:[#allocation213_spill] sm:$0xff]  ;;  %v15883_v32 = vld [vmem:[#allocation444_spill] sm:$0xff]  ;;  %v15895_v54 = vld [vmem:[#allocation46_spill] sm:$0xff] }
 0x5c1   : > { %v7425_v61 = vpack.c.bf16 %v6154_v7, %v6154_v7  ;;  %v6155_v46 = vmax.f32 %v5479_v5, 0.0  ;;  %v5827_v40 = vpop.f32.mrb[9].mxu1  ;;  %3332 = vrot.lane.b32.xlu0 %v15866_v33, %s8281_s11  ;;  %7701 = vmatprep.mubr.msk.bf16.mxu0 %vm5211_vm12, %v5050_v13  ;;  %v3992_v10 = vsel %vm3838_vm5, %v3799_v14, %v15878_v55  ;;  %v15879_v7 = vld [vmem:[#allocation214_spill] sm:$0xff]  ;;  %v15880_v5 = vld [vmem:[#allocation405_spill] sm:$0xff]  ;;  %v4089_v20 = vsel %vm4031_vm6, %v3896_v24, %v15881_v11 }
 0x5c2   : > { %v3604_v52 = vpop.permute.xlu1 %3603  ;;  %v5828_v3 = vadd.f32 %v12753_v57, %v5827_v40  ;;  %v7756_v12 = vpop.f32.mrb[10].mxu1  ;;  %v3994_v2 = vsel %vm3838_vm5, %v3801_v31, %v15879_v7  ;;  %v4091_v27 = vsel %vm4031_vm6, %v3898_v34, %v15880_v5  ;;  %v4185_v8 = vsel %vm4031_vm6, %v3992_v10, %v15882_v21  ;;  %v15886_v29 = vld [vmem:[#allocation530_spill] sm:$0xff]  ;;  %v15887_v40 = vld [vmem:[#allocation529_spill] sm:$0xff] }
 0x5c3   : > { %6795 = vst.msk [vmem:[%s12781_s21 + $0x18] sm:$0xf] %vm6788_vm13, %v7425_v61  ;;  %v7426_v15 = vpack.c.bf16 %v6155_v46, %v6155_v46  ;;  %v5148_v58 = vsel %vm4996_vm11, %v4955_v48, %v3604_v52  ;;  %v5830_v30 = vpop.f32.mrb[11].mxu1  ;;  %v3508_v23 = vpop.permute.xlu0 %3507  ;;  %v4187_v60 = vsel %vm4031_vm6, %v3994_v2, %v15883_v32  ;;  %v4284_v61 = vsel %vm4224_vm7, %v4091_v27, %v15884_v36  ;;  %v15885_v46 = vld [vmem:[#allocation487_spill] sm:$0xff]  ;;  %v15888_v52 = vld [vmem:[#allocation566_spill] sm:$0xff]  ;;  %v15897_v32 = vld [vmem:[#allocation45_spill] sm:$0xff] }
 0x5c4   : > { %3625 = vrot.lane.b32.xlu1 %v15868_v62, %s8282_s12  ;;  %7798 = vmatmul.mubr.msk.bf16.gmra.mrb[52].mxu1 %vm5211_vm12, %v5148_v58  ;;  %v6218_v51 = vmax.f32 %v5828_v3, 0.0  ;;  %v5831_v56 = vadd.f32 %v12753_v57, %v5830_v30  ;;  %v5052_v38 = vsel %vm4996_vm11, %v4859_v45, %v3508_v23  ;;  %v4282_v13 = vsel %vm4224_vm7, %v4089_v20, %v15885_v46  ;;  %v15890_v3 = vld [vmem:[#allocation611_spill] sm:$0xff]  ;;  %v15891_v45 = vld [vmem:[#allocation610_spill] sm:$0xff]  ;;  %v15892_v23 = vld [vmem:[#allocation288_spill] sm:$0xff] }
 0x5c5   : > { %6796 = vst.msk [vmem:[%s12781_s21 + $0x1c] sm:$0xf] %vm6788_vm13, %v7426_v15  ;;  %3529 = vrot.lane.b32.xlu0 %v15869_v50, %s8282_s12  ;;  %7702 = vmatmul.mubr.msk.bf16.gmra.mrb[52].mxu0 %vm5211_vm12, %v5052_v38  ;;  %v4378_v4 = vsel %vm4224_vm7, %v4185_v8, %v15886_v29  ;;  %v4380_v33 = vsel %vm4224_vm7, %v4187_v60, %v15887_v40  ;;  %v15893_v50 = vld [vmem:[#allocation132_spill] sm:$0xff] }
 0x5c6   : > { %v3193_v59 = vpop.permute.xlu1 %3192  ;;  %v7489_v42 = vpack.c.bf16 %v6218_v51, %v6218_v51  ;;  %v6219_v22 = vmax.f32 %v5831_v56, 0.0  ;;  %v4477_v53 = vsel %vm4417_vm8, %v4284_v61, %v15888_v52  ;;  %v4475_v15 = vsel %vm4417_vm8, %v4282_v13, %v15889_v39 }
 0x5c7   : > { %v3191_v16 = vpop.permute.xlu0 %3190  ;;  %v4571_v12 = vsel %vm4417_vm8, %v4378_v4, %v15890_v3  ;;  %v4573_v30 = vsel %vm4417_vm8, %v4380_v33, %v15891_v45  ;;  %v4670_v62 = vsel %vm4610_vm9, %v4477_v53, %v15892_v23  ;;  %v15899_v53 = vld [vmem:[#allocation246_spill] sm:$0xff]  ;;  %v8208_v45 = vld [vmem:[%s8335_s22 + $0xf0] sm:$0xff]  }
 0x5c8   : > { %3627 = vrot.lane.b32.xlu1 %v15870_v49, %s8282_s12  ;;  %6859 = vst.msk [vmem:[%s12781_s21 + $0x118] sm:$0xf] %vm6788_vm13, %v7489_v42  ;;  %v7490_v26 = vpack.c.bf16 %v6219_v22, %v6219_v22  ;;  %v4764_v51 = vsel %vm4610_vm9, %v4571_v12, %v3191_v16  ;;  %v15894_v22 = vld [vmem:[#allocation157_spill] sm:$0xff]  ;;  %v15900_v3 = vld [vmem:[#allocation358_spill] sm:$0xff] }
 0x5c9   : > { %3531 = vrot.lane.b32.xlu0 %v15871_v43, %s8282_s12  ;;  %v4668_v49 = vsel %vm4610_vm9, %v4475_v15, %v15894_v22  ;;  %v15901_v12 = vld [vmem:[#allocation242_spill] sm:$0xff] }
 0x5ca   : > { %v3407_v63 = vpop.permute.xlu1 %3406  ;;  %6860 = vst.msk [vmem:[%s12781_s21 + $0x11c] sm:$0xf] %vm6788_vm13, %v7490_v26  ;;  %v4766_v26 = vsel %vm4610_vm9, %v4573_v30, %v3193_v59  ;;  %v15902_v30 = vld [vmem:[#allocation120_spill] sm:$0xff] }
 0x5cb   : > { %v3311_v28 = vpop.permute.xlu0 %3310  ;;  %v4957_v43 = vsel %vm4803_vm10, %v4764_v51, %v3407_v63  ;;  %v3707_v23 = vsel %vm3645_vm4, %v8208_v45, %v15902_v30  ;;  %v15903_v51 = vld [vmem:[#allocation229_spill] sm:$0xff]  ;;  %v15923_v30 = vld [vmem:[#allocation612_spill] sm:$0xff] }
 0x5cc   : > { %3216 = vrot.lane.b32.xlu1 %v8206_v1, %s8279_s6  ;;  %v4861_v16 = vsel %vm4803_vm10, %v4668_v49, %v3311_v28  ;;  %v15896_v1 = vld [vmem:[#allocation130_spill] sm:$0xff]  ;;  %v15905_v49 = vld [vmem:[#allocation219_spill] sm:$0xff] }
 0x5cd   : > { %3214 = vrot.lane.b32.xlu0 %v8207_v44, %s8279_s6 }
 0x5ce   : > { %v3409_v48 = vpop.permute.xlu1 %3408 }
 0x5cf   : > { %v7759_v58 = vpop.f32.mrb[12].mxu1  ;;  %v3313_v56 = vpop.permute.xlu0 %3312  ;;  %v4959_v59 = vsel %vm4803_vm10, %v4766_v26, %v3409_v48  ;;  %v15898_v48 = vld [vmem:[#allocation360_spill] sm:$0xff] }
 0x5d0   : > { %v5850_v38 = vadd.f32 %v7759_v58, %v12753_v57  ;;  %3430 = vrot.lane.b32.xlu1 %v15893_v50, %s8281_s11  ;;  %v5841_v42 = vpop.f32.mrb[13].mxu1  ;;  %v7663_v19 = vpop.f32.mrb[12].mxu0  ;;  %v4863_v29 = vsel %vm4803_vm10, %v4670_v62, %v3313_v56  ;;  %v8209_v62 = vld [vmem:[%s8335_s22 + $0x270] sm:$0xff]   ;;  %v8210_v50 = vld [vmem:[%s8707_s27 + $0x8] sm:$0xff]  }
 0x5d1   : > { %v5842_v35 = vadd.f32 %v12753_v57, %v5841_v42  ;;  %v7760_v37 = vpop.f32.mrb[14].mxu1  ;;  %v5498_v17 = vadd.f32 %v7663_v19, %v12753_v57  ;;  %v5489_v41 = vpop.f32.mrb[13].mxu0  ;;  %3334 = vrot.lane.b32.xlu0 %v15895_v54, %s8281_s11  ;;  %v3803_v56 = vsel %vm3645_vm4, %v8209_v62, %v15903_v51  ;;  %v15904_v42 = vld [vmem:[#allocation349_spill] sm:$0xff]  ;;  %v15906_v19 = vld [vmem:[#allocation118_spill] sm:$0xff]  ;;  %v15909_v54 = vld [vmem:[#allocation447_spill] sm:$0xff] }
 0x5d2   : > { %v6222_v18 = vmax.f32 %v5850_v38, 0.0  ;;  %v5853_v25 = vadd.f32 %v7760_v37, %v12753_v57  ;;  %v3606_v14 = vpop.permute.xlu1 %3605  ;;  %v5490_v63 = vadd.f32 %v12753_v57, %v5489_v41  ;;  %v7664_v9 = vpop.f32.mrb[14].mxu0  ;;  %v3900_v22 = vsel %vm3838_vm5, %v3707_v23, %v15904_v42  ;;  %v8212_v37 = vld [vmem:[%s8335_s22 + $0x278] sm:$0xff]  }
 0x5d3   : > { %v6220_v47 = vmax.f32 %v5842_v35, 0.0  ;;  %v5150_v31 = vsel %vm4996_vm11, %v4957_v43, %v3606_v14  ;;  %v5844_v0 = vpop.f32.mrb[15].mxu1  ;;  %v6158_v34 = vmax.f32 %v5498_v17, 0.0  ;;  %v5501_v24 = vadd.f32 %v7664_v9, %v12753_v57  ;;  %v5492_v10 = vpop.f32.mrb[15].mxu0  ;;  %v8211_v43 = vld [vmem:[%s8335_s22 + $0xf8] sm:$0xff]   ;;  %v8213_v14 = vld [vmem:[%s8707_s27] sm:$0xff]  }
 0x5d4   : > { %v7493_v6 = vpack.c.bf16 %v6222_v18, %v6222_v18  ;;  %v6223_v55 = vmax.f32 %v5853_v25, 0.0  ;;  %v3510_v28 = vpop.permute.xlu0 %3509  ;;  %3432 = vrot.lane.b32.xlu1 %v15896_v1, %s8281_s11  ;;  %7801 = vmatprep.mubr.msk.bf16.mxu1 %vm5211_vm12, %v5150_v31  ;;  %v6156_v7 = vmax.f32 %v5490_v63, 0.0  ;;  %v5493_v5 = vadd.f32 %v12753_v57, %v5492_v10  ;;  %v15908_v18 = vld [vmem:[#allocation408_spill] sm:$0xff]  ;;  %v15910_v63 = vld [vmem:[#allocation347_spill] sm:$0xff]  ;;  %v15914_v10 = vld [vmem:[#allocation446_spill] sm:$0xff] }
 0x5d5   : > { %v7491_v2 = vpack.c.bf16 %v6220_v47, %v6220_v47  ;;  %v5845_v27 = vadd.f32 %v12753_v57, %v5844_v0  ;;  %v7429_v11 = vpack.c.bf16 %v6158_v34, %v6158_v34  ;;  %v6159_v20 = vmax.f32 %v5501_v24, 0.0  ;;  %3336 = vrot.lane.b32.xlu0 %v15897_v32, %s8281_s11  ;;  %v15911_v9 = vld [vmem:[#allocation220_spill] sm:$0xff]  ;;  %v15912_v0 = vld [vmem:[#allocation490_spill] sm:$0xff]  ;;  %v15915_v1 = vld [vmem:[#allocation569_spill] sm:$0xff] }
 0x5d6   : > { %6863 = vst.msk [vmem:[%s12781_s21 + $0x128] sm:$0xf] %vm6788_vm13, %v7493_v6  ;;  %v7494_v21 = vpack.c.bf16 %v6223_v55, %v6223_v55  ;;  %v5054_v8 = vsel %vm4996_vm11, %v4861_v16, %v3510_v28  ;;  %v3608_v60 = vpop.permute.xlu1 %3607  ;;  %v7427_v36 = vpack.c.bf16 %v6156_v7, %v6156_v7  ;;  %v6157_v61 = vmax.f32 %v5493_v5, 0.0  ;;  %v15907_v16 = vld [vmem:[#allocation227_spill] sm:$0xff]  ;;  %v15913_v6 = vld [vmem:[#allocation532_spill] sm:$0xff] }
 0x5d7   : > { %6861 = vst.msk [vmem:[%s12781_s21 + $0x120] sm:$0xf] %vm6788_vm13, %v7491_v2  ;;  %v6221_v46 = vmax.f32 %v5845_v27, 0.0  ;;  %7705 = vmatprep.mubr.msk.bf16.mxu0 %vm5211_vm12, %v5054_v8  ;;  %v5152_v13 = vsel %vm4996_vm11, %v4959_v59, %v3608_v60  ;;  %6799 = vst.msk [vmem:[%s12781_s21 + $0x28] sm:$0xf] %vm6788_vm13, %v7429_v11  ;;  %v7430_v4 = vpack.c.bf16 %v6159_v20, %v6159_v20  ;;  %v15916_v2 = vld [vmem:[#allocation613_spill] sm:$0xff] }
 0x5d8   : > { %6864 = vst.msk [vmem:[%s12781_s21 + $0x12c] sm:$0xf] %vm6788_vm13, %v7494_v21  ;;  %v3512_v44 = vpop.permute.xlu0 %3511  ;;  %3629 = vrot.lane.b32.xlu1 %v15898_v48, %s8282_s12  ;;  %7802 = vmatmul.mubr.msk.bf16.gmra.mrb[56].mxu1 %vm5211_vm12, %v5152_v13  ;;  %6797 = vst.msk [vmem:[%s12781_s21 + $0x20] sm:$0xf] %vm6788_vm13, %v7427_v36  ;;  %v7428_v40 = vpack.c.bf16 %v6157_v61, %v6157_v61  ;;  %v3996_v26 = vsel %vm3838_vm5, %v3803_v56, %v15905_v49  ;;  %v15917_v20 = vld [vmem:[#allocation492_spill] sm:$0xff]  ;;  %v15918_v8 = vld [vmem:[#allocation407_spill] sm:$0xff] }
 0x5d9   : > { %v7492_v33 = vpack.c.bf16 %v6221_v46, %v6221_v46  ;;  %v5056_v52 = vsel %vm4996_vm11, %v4863_v29, %v3512_v44  ;;  %6800 = vst.msk [vmem:[%s12781_s21 + $0x2c] sm:$0xf] %vm6788_vm13, %v7430_v4  ;;  %3533 = vrot.lane.b32.xlu0 %v15899_v53, %s8282_s12  ;;  %v3709_v35 = vsel %vm3645_vm4, %v8211_v43, %v15906_v19  ;;  %v15919_v60 = vld [vmem:[#allocation531_spill] sm:$0xff]  ;;  %v15920_v61 = vld [vmem:[#allocation646_spill] sm:$0xff]  ;;  %v15925_v19 = vld [vmem:[#allocation568_spill] sm:$0xff] }
 0x5da   : > { %7706 = vmatmul.mubr.msk.bf16.gmra.mrb[56].mxu0 %vm5211_vm12, %v5056_v52  ;;  %v13098_v39 = vpop.permute.xlu1 %3196  ;;  %6798 = vst.msk [vmem:[%s12781_s21 + $0x24] sm:$0xf] %vm6788_vm13, %v7428_v40  ;;  %v3805_v17 = vsel %vm3645_vm4, %v8212_v37, %v15907_v16  ;;  %v4093_v41 = vsel %vm4031_vm6, %v3900_v22, %v15908_v18  ;;  %v4189_v25 = vsel %vm4031_vm6, %v3996_v26, %v15909_v54  ;;  %v15921_v52 = vld [vmem:[#allocation48_spill] sm:$0xff]  ;;  %v15924_v43 = vld [vmem:[#allocation498_spill] sm:$0xff]  ;;  %v15926_v54 = vld [vmem:[#allocation47_spill] sm:$0xff] }
 0x5db   : > { %6862 = vst.msk [vmem:[%s12781_s21 + $0x124] sm:$0xf] %vm6788_vm13, %v7492_v33  ;;  %v3902_v47 = vsel %vm3838_vm5, %v3709_v35, %v15910_v63  ;;  %v3998_v31 = vsel %vm3838_vm5, %v3805_v17, %v15911_v9  ;;  %v4286_v34 = vsel %vm4224_vm7, %v4093_v41, %v15912_v0  ;;  %v4382_v24 = vsel %vm4224_vm7, %v4189_v25, %v15913_v6  ;;  %v15929_v6 = vld [vmem:[#allocation252_spill] sm:$0xff] }
 0x5dc   : > { %v3195_v15 = vpop.permute.xlu0 %3194  ;;  %3631 = vrot.lane.b32.xlu1 %v15900_v3, %s8282_s12  ;;  %v4191_v28 = vsel %vm4031_vm6, %v3998_v31, %v15914_v10  ;;  %v4479_v7 = vsel %vm4417_vm8, %v4286_v34, %v15915_v1  ;;  %v4575_v5 = vsel %vm4417_vm8, %v4382_v24, %v15916_v2  ;;  %v4095_v32 = vsel %vm4031_vm6, %v3902_v47, %v15918_v8  ;;  %v15928_v31 = vld [vmem:[#allocation572_spill] sm:$0xff]  ;;  %v13195_v34 = vld [vmem:[%s8707_s27 + $0x20] sm:$0xff]   ;;  %v15930_v10 = vld [vmem:[#allocation577_spill] sm:$0xff] }
 0x5dd   : > { %3535 = vrot.lane.b32.xlu0 %v15901_v12, %s8282_s12  ;;  %v4384_v36 = vsel %vm4224_vm7, %v4191_v28, %v15919_v60  ;;  %v4672_v46 = vsel %vm4610_vm9, %v4479_v7, %v15920_v61  ;;  %v4768_v13 = vsel %vm4610_vm9, %v4575_v5, %v3195_v15  ;;  %v15922_v12 = vld [vmem:[#allocation489_spill] sm:$0xff]  ;;  %v3234_v7 = vshll.u32 %v13195_v34, 16  ;;  %v15931_v2 = vld [vmem:[#allocation248_spill] sm:$0xff]  ;;  %v8216_v8 = vld [vmem:[%s8335_s22 + $0x100] sm:$0xff]  }
 0x5de   : > { %v3411_v58 = vpop.permute.xlu1 %3410  ;;  %v4288_v45 = vsel %vm4224_vm7, %v4095_v32, %v15922_v12  ;;  %v4577_v15 = vsel %vm4417_vm8, %v4384_v36, %v15923_v30  ;;  %v8214_v28 = vld [vmem:[%s8707_s27 + $0x18] sm:$0xff]   ;;  %v15933_v32 = vld [vmem:[#allocation124_spill] sm:$0xff] }
 0x5df   : > { %v4961_v44 = vsel %vm4803_vm10, %v4768_v13, %v3411_v58  ;;  %v4770_v35 = vsel %vm4610_vm9, %v4577_v15, %v13098_v39  ;;  %v3230_v1 = vshrl.u32 %v8214_v28, 16  ;;  %v3711_v60 = vsel %vm3645_vm4, %v8216_v8, %v15933_v32  ;;  %v15934_v36 = vld [vmem:[#allocation225_spill] sm:$0xff]  ;;  %v8219_v30 = vld [vmem:[%s8707_s27 + $0x10] sm:$0xff]  }
 0x5e0   : > { %v3315_v38 = vpop.permute.xlu0 %3314  ;;  %3220 = vrot.lane.b32.xlu1 %v8210_v50, %s8279_s6  ;;  %v15939_v12 = vld [vmem:[#allocation449_spill] sm:$0xff] }
 0x5e1   : > { %3218 = vrot.lane.b32.xlu0 %v8213_v14, %s8279_s6  ;;  %v4865_v23 = vsel %vm4803_vm10, %v4672_v46, %v3315_v38  ;;  %v4481_v38 = vsel %vm4417_vm8, %v4288_v45, %v15925_v19  ;;  %v15927_v14 = vld [vmem:[#allocation155_spill] sm:$0xff]  ;;  %v15935_v46 = vld [vmem:[#allocation493_spill] sm:$0xff]  ;;  %v15945_v19 = vld [vmem:[#allocation448_spill] sm:$0xff] }
 0x5e2   : > { %v3413_v59 = vpop.permute.xlu1 %3412  ;;  %v4674_v39 = vsel %vm4610_vm9, %v4481_v38, %v15927_v14  ;;  %v3232_v13 = vor.u32 %v3230_v1, %v15935_v46 }
 0x5e3   : > { %v7763_v55 = vpop.f32.mrb[16].mxu1  ;;  %v4963_v16 = vsel %vm4803_vm10, %v4770_v35, %v3413_v59  ;;  %v15946_v35 = vld [vmem:[#allocation491_spill] sm:$0xff] }
 0x5e4   : > { %v3317_v27 = vpop.permute.xlu0 %3316  ;;  %v5864_v11 = vadd.f32 %v7763_v55, %v12753_v57  ;;  %3434 = vrot.lane.b32.xlu1 %v15917_v20, %s8281_s11  ;;  %v5857_v21 = vpop.f32.mrb[17].mxu1 }
 0x5e5   : > { %v7667_v29 = vpop.f32.mrb[16].mxu0  ;;  %v7764_v4 = vpop.f32.mrb[18].mxu1  ;;  %3338 = vrot.lane.b32.xlu0 %v15921_v52, %s8281_s11  ;;  %v4867_v59 = vsel %vm4803_vm10, %v4674_v39, %v3317_v27  ;;  %v8215_v27 = vld [vmem:[%s8335_s22 + $0x280] sm:$0xff]  }
 0x5e6   : > { %v5512_v48 = vadd.f32 %v7667_v29, %v12753_v57  ;;  %v6224_v40 = vmax.f32 %v5864_v11, 0.0  ;;  %v5505_v33 = vpop.f32.mrb[17].mxu0  ;;  %v5867_v53 = vadd.f32 %v7764_v4, %v12753_v57  ;;  %v3610_v3 = vpop.permute.xlu1 %3609  ;;  %v15932_v11 = vld [vmem:[#allocation235_spill] sm:$0xff]  ;;  %v13218_v29 = vrot.slane %v3234_v7, 1 }
 0x5e7   : > { %v7668_v62 = vpop.f32.mrb[18].mxu0  ;;  %v5154_v58 = vsel %vm4996_vm11, %v4961_v44, %v3610_v3  ;;  %v5859_v51 = vpop.f32.mrb[19].mxu1  ;;  %v3807_v20 = vsel %vm3645_vm4, %v8215_v27, %v15932_v11  ;;  %v8217_v4 = vld [vmem:[%s8335_s22 + $0x108] sm:$0xff]   ;;  %v15936_v44 = vld [vmem:[#allocation122_spill] sm:$0xff]  ;;  %v15937_v33 = vld [vmem:[#allocation233_spill] sm:$0xff] }
 0x5e8   : > { %v6160_v56 = vmax.f32 %v5512_v48, 0.0  ;;  %v7495_v50 = vpack.c.bf16 %v6224_v40, %v6224_v40  ;;  %v5515_v42 = vadd.f32 %v7668_v62, %v12753_v57  ;;  %v6225_v22 = vmax.f32 %v5867_v53, 0.0  ;;  %v5507_v49 = vpop.f32.mrb[19].mxu0  ;;  %v3514_v26 = vpop.permute.xlu0 %3513  ;;  %3436 = vrot.lane.b32.xlu1 %v15924_v43, %s8281_s11  ;;  %7805 = vmatprep.mubr.msk.bf16.mxu1 %vm5211_vm12, %v5154_v58  ;;  %v8218_v40 = vld [vmem:[%s8335_s22 + $0x288] sm:$0xff]   ;;  %v15938_v53 = vld [vmem:[#allocation353_spill] sm:$0xff]  ;;  %v15941_v58 = vld [vmem:[#allocation226_spill] sm:$0xff] }
 0x5e9   : > { %v5058_v37 = vsel %vm4996_vm11, %v4865_v23, %v3514_v26  ;;  %3340 = vrot.lane.b32.xlu0 %v15926_v54, %s8281_s11  ;;  %v4000_v61 = vsel %vm3838_vm5, %v3807_v20, %v15934_v36  ;;  %v3713_v48 = vsel %vm3645_vm4, %v8217_v4, %v15936_v44  ;;  %v3809_v52 = vsel %vm3645_vm4, %v8218_v40, %v15937_v33  ;;  %v15940_v23 = vld [vmem:[#allocation351_spill] sm:$0xff]  ;;  %v15944_v26 = vld [vmem:[#allocation409_spill] sm:$0xff]  ;;  %v15954_v11 = vld [vmem:[#allocation650_spill] sm:$0xff] }
 0x5ea   : > { %v7431_v17 = vpack.c.bf16 %v6160_v56, %v6160_v56  ;;  %6865 = vst.msk [vmem:[%s12781_s21 + $0x130] sm:$0xf] %vm6788_vm13, %v7495_v50  ;;  %v6161_v18 = vmax.f32 %v5515_v42, 0.0  ;;  %v7496_v41 = vpack.c.bf16 %v6225_v22, %v6225_v22  ;;  %7709 = vmatprep.mubr.msk.bf16.mxu0 %vm5211_vm12, %v5058_v37  ;;  %v3612_v25 = vpop.permute.xlu1 %3611  ;;  %v3904_v3 = vsel %vm3838_vm5, %v3711_v60, %v15938_v53  ;;  %v15942_v56 = vld [vmem:[#allocation410_spill] sm:$0xff] }
 0x5eb   : > { %v5156_v63 = vsel %vm4996_vm11, %v4963_v16, %v3612_v25  ;;  %v4193_v45 = vsel %vm4031_vm6, %v4000_v61, %v15939_v12  ;;  %v3906_v62 = vsel %vm3838_vm5, %v3713_v48, %v15940_v23  ;;  %v4002_v51 = vsel %vm3838_vm5, %v3809_v52, %v15941_v58  ;;  %v15943_v42 = vld [vmem:[#allocation534_spill] sm:$0xff]  ;;  %v15947_v16 = vld [vmem:[#allocation615_spill] sm:$0xff]  ;;  %v15949_v25 = vld [vmem:[#allocation533_spill] sm:$0xff] }
 0x5ec   : > { %6801 = vst.msk [vmem:[%s12781_s21 + $0x30] sm:$0xf] %vm6788_vm13, %v7431_v17  ;;  %v7432_v47 = vpack.c.bf16 %v6161_v18, %v6161_v18  ;;  %6866 = vst.msk [vmem:[%s12781_s21 + $0x134] sm:$0xf] %vm6788_vm13, %v7496_v41  ;;  %v3516_v9 = vpop.permute.xlu0 %3515  ;;  %3633 = vrot.lane.b32.xlu1 %v15928_v31, %s8282_s12  ;;  %7806 = vmatmul.mubr.msk.bf16.gmra.mrb[60].mxu1 %vm5211_vm12, %v5156_v63  ;;  %v4097_v50 = vsel %vm4031_vm6, %v3904_v3, %v15942_v56  ;;  %v15948_v41 = vld [vmem:[#allocation496_spill] sm:$0xff]  ;;  %v15950_v31 = vld [vmem:[#allocation126_spill] sm:$0xff] }
 0x5ed   : > { %v5060_v0 = vsel %vm4996_vm11, %v4867_v59, %v3516_v9  ;;  %3537 = vrot.lane.b32.xlu0 %v15929_v6, %s8282_s12  ;;  %v4386_v22 = vsel %vm4224_vm7, %v4193_v45, %v15943_v42  ;;  %v4099_v43 = vsel %vm4031_vm6, %v3906_v62, %v15944_v26  ;;  %v4195_v38 = vsel %vm4031_vm6, %v4002_v51, %v15945_v19  ;;  %v15951_v6 = vld [vmem:[#allocation571_spill] sm:$0xff]  ;;  %v15957_v62 = vld [vmem:[#allocation649_spill] sm:$0xff] }
 0x5ee   : > { %6802 = vst.msk [vmem:[%s12781_s21 + $0x34] sm:$0xf] %vm6788_vm13, %v7432_v47  ;;  %7710 = vmatmul.mubr.msk.bf16.gmra.mrb[60].mxu0 %vm5211_vm12, %v5060_v0  ;;  %v3201_v24 = vpop.permute.xlu1 %3200  ;;  %v4290_v37 = vsel %vm4224_vm7, %v4097_v50, %v15946_v35  ;;  %v4579_v17 = vsel %vm4417_vm8, %v4386_v22, %v15947_v16  ;;  %v4388_v14 = vsel %vm4224_vm7, %v4195_v38, %v15949_v25  ;;  %v3447_v48 = vrot.slane %v13195_v34, 1  ;;  %v15958_v22 = vld [vmem:[#allocation575_spill] sm:$0xff]  ;;  %v15961_v16 = vld [vmem:[#allocation258_spill] sm:$0xff] }
 0x5ef   : > { %v3237_v9 = vsel %vm1081_vm0, %v3232_v13, %v13218_v29  ;;  %v4292_v0 = vsel %vm4224_vm7, %v4099_v43, %v15950_v31  ;;  %v3238_v35 = vshrl.u32 %v13195_v34, 16  ;;  %v15962_v25 = vld [vmem:[#allocation127_spill] sm:$0xff]  ;;  %v8222_v31 = vld [vmem:[%s8335_s22 + $0x298] sm:$0xff]  }
 0x5f0   : > { %v3199_v55 = vpop.permute.xlu0 %3198  ;;  %3635 = vrot.lane.b32.xlu1 %v15930_v10, %s8282_s12  ;;  %v4483_v10 = vsel %vm4417_vm8, %v4290_v37, %v15951_v6 }
 0x5f1   : > { %3539 = vrot.lane.b32.xlu0 %v15931_v2, %s8282_s12  ;;  %v4772_v39 = vsel %vm4610_vm9, %v4579_v17, %v3199_v55  ;;  %v15953_v55 = vld [vmem:[#allocation50_spill] sm:$0xff]  ;;  %v4676_v20 = vsel %vm4610_vm9, %v4483_v10, %v15954_v11  ;;  %v8223_v10 = vld [vmem:[%s8335_s22 + $0x290] sm:$0xff]  }
 0x5f2   : > { %v3415_v5 = vpop.permute.xlu1 %3414 }
 0x5f3   : > { %v4965_v7 = vsel %vm4803_vm10, %v4772_v39, %v3415_v5  ;;  %v3240_v39 = vor.u32 %v3238_v35, %v13218_v29  ;;  %v15983_v35 = vld [vmem:[#allocation67_spill] sm:$0xff] }
 0x5f4   : > { %v3319_v21 = vpop.permute.xlu0 %3318  ;;  %3224 = vrot.lane.b32.xlu1 %v8214_v28, %s8279_s6  ;;  %v15952_v28 = vld [vmem:[#allocation614_spill] sm:$0xff] }
 0x5f5   : > { %3222 = vrot.lane.b32.xlu0 %v8219_v30, %s8279_s6  ;;  %v4581_v1 = vsel %vm4417_vm8, %v4388_v14, %v15952_v28  ;;  %v4869_v5 = vsel %vm4803_vm10, %v4676_v20, %v3319_v21  ;;  %v15955_v21 = vld [vmem:[#allocation570_spill] sm:$0xff]  ;;  %v15956_v30 = vld [vmem:[#allocation49_spill] sm:$0xff]  ;;  %v15969_v20 = vld [vmem:[#allocation232_spill] sm:$0xff] }
 0x5f6   : > { %v3417_v15 = vpop.permute.xlu1 %3416  ;;  %v4774_v46 = vsel %vm4610_vm9, %v4581_v1, %v3201_v24  ;;  %v13278_v24 = vld [vmem:[%s8707_s27 + $0x28] sm:$0xff]   ;;  %v4485_v3 = vsel %vm4417_vm8, %v4292_v0, %v15955_v21  ;;  %v15965_v28 = vld [vmem:[#allocation241_spill] sm:$0xff] }
 0x5f7   : > { %v7767_v49 = vpop.f32.mrb[20].mxu1  ;;  %v4967_v12 = vsel %vm4803_vm10, %v4774_v46, %v3417_v15  ;;  %v3242_v37 = vshll.u32 %v13278_v24, 16  ;;  %v15964_v0 = vld [vmem:[#allocation239_spill] sm:$0xff]  ;;  %v3811_v1 = vsel %vm3645_vm4, %v8223_v10, %v15965_v28  ;;  %v15972_v46 = vld [vmem:[#allocation412_spill] sm:$0xff] }
 0x5f8   : > { %v3321_v18 = vpop.permute.xlu0 %3320  ;;  %3438 = vrot.lane.b32.xlu1 %v15948_v41, %s8281_s11  ;;  %v5871_v54 = vpop.f32.mrb[21].mxu1  ;;  %v15959_v49 = vld [vmem:[#allocation488_spill] sm:$0xff]  ;;  %v3246_v41 = vshrl.u32 %v13278_v24, 16  ;;  %v3813_v6 = vsel %vm3645_vm4, %v8222_v31, %v15964_v0 }
 0x5f9   : > { %v7671_v63 = vpop.f32.mrb[20].mxu0  ;;  %v5872_v59 = vadd.f32 %v12753_v57, %v5871_v54  ;;  %v7768_v47 = vpop.f32.mrb[22].mxu1  ;;  %3342 = vrot.lane.b32.xlu0 %v15953_v55, %s8281_s11  ;;  %v15960_v26 = vrot.slane %v15959_v49, 1  ;;  %v8220_v54 = vld [vmem:[%s8335_s22 + $0x118] sm:$0xff]   ;;  %v15967_v55 = vld [vmem:[#allocation254_spill] sm:$0xff] }
 0x5fa   : > { %v5519_v2 = vpop.f32.mrb[21].mxu0  ;;  %v3614_v27 = vpop.permute.xlu1 %3613  ;;  %v3717_v14 = vsel %vm3645_vm4, %v8220_v54, %v15962_v25  ;;  %v3244_v63 = vrot.slane %v3242_v37, 1  ;;  %v15963_v47 = vld [vmem:[#allocation129_spill] sm:$0xff] }
 0x5fb   : > { %v5520_v8 = vadd.f32 %v12753_v57, %v5519_v2  ;;  %v6226_v32 = vmax.f32 %v5872_v59, 0.0  ;;  %v7672_v60 = vpop.f32.mrb[22].mxu0  ;;  %v5158_v36 = vsel %vm4996_vm11, %v4965_v7, %v3614_v27  ;;  %v5874_v61 = vpop.f32.mrb[23].mxu1  ;;  %v3448_v43 = vsel %vm2046_vm1, %v15960_v26, %v3447_v48  ;;  %v8221_v59 = vld [vmem:[%s8335_s22 + $0x110] sm:$0xff]   ;;  %v15966_v7 = vld [vmem:[#allocation355_spill] sm:$0xff]  ;;  %v15968_v27 = vld [vmem:[#allocation357_spill] sm:$0xff] }
 0x5fc   : > { %v5522_v13 = vpop.f32.mrb[23].mxu0  ;;  %v5875_v4 = vadd.f32 %v12753_v57, %v5874_v61  ;;  %v3518_v44 = vpop.permute.xlu0 %3517  ;;  %3440 = vrot.lane.b32.xlu1 %v3237_v9, %s8281_s11  ;;  %7809 = vmatprep.mubr.msk.bf16.mxu1 %vm5211_vm12, %v5158_v36  ;;  %v3715_v9 = vsel %vm3645_vm4, %v8221_v59, %v15963_v47  ;;  %v3910_v2 = vsel %vm3838_vm5, %v3717_v14, %v15966_v7  ;;  %v15971_v36 = vld [vmem:[#allocation411_spill] sm:$0xff]  ;;  %v15981_v26 = vld [vmem:[#allocation616_spill] sm:$0xff] }
 0x5fd   : > { %v6162_v40 = vmax.f32 %v5520_v8, 0.0  ;;  %v7497_v33 = vpack.c.bf16 %v6226_v32, %v6226_v32  ;;  %v5523_v52 = vadd.f32 %v12753_v57, %v5522_v13  ;;  %v5062_v53 = vsel %vm4996_vm11, %v4869_v5, %v3518_v44  ;;  %3344 = vrot.lane.b32.xlu0 %v15956_v30, %s8281_s11  ;;  %v15970_v32 = vld [vmem:[#allocation231_spill] sm:$0xff]  ;;  %v15973_v13 = vld [vmem:[#allocation450_spill] sm:$0xff] }
 0x5fe   : > { %v6227_v45 = vmax.f32 %v5875_v4, 0.0  ;;  %7713 = vmatprep.mubr.msk.bf16.mxu0 %vm5211_vm12, %v5062_v53  ;;  %v3616_v23 = vpop.permute.xlu1 %3615  ;;  %v4678_v57 = vsel %vm4610_vm9, %v4485_v3, %v15957_v62  ;;  %v3908_v11 = vsel %vm3838_vm5, %v3715_v9, %v15968_v27  ;;  %v4006_v8 = vsel %vm3838_vm5, %v3813_v6, %v15969_v20  ;;  %v15974_v53 = vld [vmem:[#allocation451_spill] sm:$0xff]  ;;  %v15975_v3 = vld [vmem:[#allocation494_spill] sm:$0xff] }
 0x5ff   : > { %v7433_v58 = vpack.c.bf16 %v6162_v40, %v6162_v40  ;;  %6867 = vst.msk [vmem:[%s12781_s21 + $0x138] sm:$0xf] %vm6788_vm13, %v7497_v33  ;;  %v6163_v51 = vmax.f32 %v5523_v52, 0.0  ;;  %v5160_v56 = vsel %vm4996_vm11, %v4967_v12, %v3616_v23  ;;  %v4871_v15 = vsel %vm4803_vm10, %v4678_v57, %v3321_v18  ;;  %v15976_v23 = vld [vmem:[#allocation495_spill] sm:$0xff] }
 0x600   : > { %v7498_v50 = vpack.c.bf16 %v6227_v45, %v6227_v45  ;;  %v3520_v42 = vpop.permute.xlu0 %3519  ;;  %3637 = vrot.lane.b32.xlu1 %v15958_v22, %s8282_s12  ;;  %7810 = vmatmul.mubr.msk.bf16.gmra.mrb[64].mxu1 %vm5211_vm12, %v5160_v56  ;;  %v4004_v60 = vsel %vm3838_vm5, %v3811_v1, %v15970_v32  ;;  %v4103_v61 = vsel %vm4031_vm6, %v3910_v2, %v15971_v36  ;;  %v8283_v33 = vmov 0   ;;  %v15977_v57 = vld [vmem:[#allocation535_spill] sm:$0xff]  ;;  %v15980_v22 = vld [vmem:[#allocation574_spill] sm:$0xff] }
 0x601   : > { %6803 = vst.msk [vmem:[%s12781_s21 + $0x38] sm:$0xf] %vm6788_vm13, %v7433_v58  ;;  %v7434_v19 = vpack.c.bf16 %v6163_v51, %v6163_v51  ;;  %v5064_v38 = vsel %vm4996_vm11, %v4871_v15, %v3520_v42  ;;  %3541 = vrot.lane.b32.xlu0 %v15961_v16, %s8282_s12  ;;  %v4101_v5 = vsel %vm4031_vm6, %v3908_v11, %v15972_v46  ;;  %v13345_v52 = vrot.slane %v8283_v33, 1  ;;  %v15978_v51 = vld [vmem:[#allocation536_spill] sm:$0xff]  ;;  %v15979_v15 = vld [vmem:[#allocation573_spill] sm:$0xff] }
 0x602   : > { %6868 = vst.msk [vmem:[%s12781_s21 + $0x13c] sm:$0xf] %vm6788_vm13, %v7498_v50  ;;  %7714 = vmatmul.mubr.msk.bf16.gmra.mrb[64].mxu0 %vm5211_vm12, %v5064_v38  ;;  %v3205_v17 = vpop.permute.xlu1 %3204  ;;  %v4199_v4 = vsel %vm4031_vm6, %v4006_v8, %v15973_v13  ;;  %v3248_v40 = vor.u32 %v3246_v41, %v3244_v63  ;;  %v4197_v21 = vsel %vm4031_vm6, %v4004_v60, %v15974_v53  ;;  %v3449_v30 = vrot.slane %v13278_v24, 1  ;;  %v15984_v41 = vld [vmem:[#allocation14_spill] sm:$0xff] }
 0x603   : > { %6804 = vst.msk [vmem:[%s12781_s21 + $0x3c] sm:$0xf] %vm6788_vm13, %v7434_v19  ;;  %v4296_v12 = vsel %vm4224_vm7, %v4103_v61, %v15975_v3  ;;  %v3245_v45 = vsel %vm1081_vm0, %v3240_v39, %v3244_v63  ;;  %v4294_v62 = vsel %vm4224_vm7, %v4101_v5, %v15976_v23  ;;  %v4392_v58 = vsel %vm4224_vm7, %v4199_v4, %v15977_v57  ;;  %v15982_v19 = vld [vmem:[#allocation617_spill] sm:$0xff]  ;;  %v13377_v39 = vld [vmem:[%s14092_s3] ss:$0 sm:$0xff] }
 0x604   : > { %v3203_v18 = vpop.permute.xlu0 %3202  ;;  %3639 = vrot.lane.b32.xlu1 %v3448_v43, %s8282_s12  ;;  %v4390_v56 = vsel %vm4224_vm7, %v4197_v21, %v15978_v51  ;;  %v4489_v50 = vsel %vm4417_vm8, %v4296_v12, %v15979_v15  ;;  %v4487_v49 = vsel %vm4417_vm8, %v4294_v62, %v15980_v22  ;;  %v4585_v43 = vsel %vm4417_vm8, %v4392_v58, %v15981_v26  ;;  %v15986_v12 = vld [vmem:[#allocation51_spill] sm:$0xff]  ;;  %v15987_v26 = vld [vmem:[#allocation264_spill] sm:$0xff] }
 0x605   : > { %3543 = vrot.lane.b32.xlu0 %v15967_v55, %s8282_s12  ;;  %v4583_v38 = vsel %vm4417_vm8, %v4390_v56, %v15982_v19  ;;  %v4682_v37 = vsel %vm4610_vm9, %v4489_v50, %v15983_v35  ;;  %v4680_v54 = vsel %vm4610_vm9, %v4487_v49, %v15984_v41  ;;  %v3253_v47 = vsel %vm1081_vm0, %v3248_v40, %v13345_v52 }
 0x606   : > { %v3419_v29 = vpop.permute.xlu1 %3418  ;;  %v4776_v25 = vsel %vm4610_vm9, %v4583_v38, %v3203_v18  ;;  %v4778_v9 = vsel %vm4610_vm9, %v4585_v43, %v3205_v17  ;;  %v3450_v10 = vsel %vm2046_vm1, %v3447_v48, %v3449_v30  ;;  %v15985_v17 = vld [vmem:[#allocation52_spill] sm:$0xff]  ;;  %v3452_v49 = vsel %vm2046_vm1, %v3449_v30, %v13345_v52  ;;  %v8225_v30 = vld [vmem:[%s8335_s22 + $0x120] sm:$0xff]   ;;  %v15989_v38 = vld [vmem:[#allocation133_spill] sm:$0xff] }
 0x607   : > { %v4969_v31 = vsel %vm4803_vm10, %v4776_v25, %v3419_v29  ;;  %v3719_v35 = vsel %vm3645_vm4, %v8225_v30, %v15989_v38  ;;  %v15991_v25 = vld [vmem:[#allocation361_spill] sm:$0xff] }
 0x608   : > { %v3323_v44 = vpop.permute.xlu0 %3322  ;;  %3228 = vrot.lane.b32.xlu1 %v13278_v24, %s8279_s6  ;;  %v15988_v24 = vld [vmem:[#allocation260_spill] sm:$0xff] }
 0x609   : > { %3226 = vrot.lane.b32.xlu0 %v13195_v34, %s8279_s6  ;;  %v4873_v28 = vsel %vm4803_vm10, %v4680_v54, %v3323_v44 }
 0x60a   : > { %v3421_v42 = vpop.permute.xlu1 %3420 }
 0x60b   : > { %v7771_v16 = vpop.f32.mrb[24].mxu1  ;;  %v4971_v27 = vsel %vm4803_vm10, %v4778_v9, %v3421_v42  ;;  %v15993_v9 = vld [vmem:[#allocation131_spill] sm:$0xff] }
 0x60c   : > { %v3325_v14 = vpop.permute.xlu0 %3324  ;;  %v5894_v63 = vadd.f32 %v13377_v39, %v7771_v16  ;;  %3442 = vrot.lane.b32.xlu1 %v3245_v45, %s8281_s11  ;;  %v5885_v59 = vpop.f32.mrb[25].mxu1  ;;  %v15990_v16 = vld [vmem:[#allocation247_spill] sm:$0xff] }
 0x60d   : > { %v7675_v0 = vpop.f32.mrb[24].mxu0  ;;  %v5886_v18 = vadd.f32 %v13377_v39, %v5885_v59  ;;  %v7772_v6 = vpop.f32.mrb[26].mxu1  ;;  %3346 = vrot.lane.b32.xlu0 %v15985_v17, %s8281_s11  ;;  %v4875_v51 = vsel %vm4803_vm10, %v4682_v37, %v3325_v14  ;;  %v8226_v37 = vld [vmem:[%s8335_s22 + $0x2a0] sm:$0xff]   ;;  %v3912_v14 = vsel %vm3838_vm5, %v3719_v35, %v15991_v25  ;;  %v15997_v17 = vld [vmem:[#allocation359_spill] sm:$0xff] }
 0x60e   : > { %v5542_v1 = vadd.f32 %v13377_v39, %v7675_v0  ;;  %v6230_v7 = vmax.f32 %v5894_v63, 0.0  ;;  %v5533_v2 = vpop.f32.mrb[25].mxu0  ;;  %v5897_v55 = vadd.f32 %v13377_v39, %v7772_v6  ;;  %v3618_v29 = vpop.permute.xlu1 %3617  ;;  %v3815_v41 = vsel %vm3645_vm4, %v8226_v37, %v15990_v16  ;;  %v15992_v63 = vld [vmem:[#allocation237_spill] sm:$0xff]  ;;  %v8228_v0 = vld [vmem:[%s8335_s22 + $0x2a8] sm:$0xff]  }
 0x60f   : > { %v5534_v11 = vadd.f32 %v13377_v39, %v5533_v2  ;;  %v6228_v20 = vmax.f32 %v5886_v18, 0.0  ;;  %v7676_v34 = vpop.f32.mrb[26].mxu0  ;;  %v5162_v48 = vsel %vm4996_vm11, %v4969_v31, %v3618_v29  ;;  %v5888_v8 = vpop.f32.mrb[27].mxu1  ;;  %v4008_v59 = vsel %vm3838_vm5, %v3815_v41, %v15992_v63  ;;  %v15994_v18 = vld [vmem:[#allocation245_spill] sm:$0xff]  ;;  %v15998_v29 = vld [vmem:[#allocation238_spill] sm:$0xff] }
 0x610   : > { %v6166_v32 = vmax.f32 %v5542_v1, 0.0  ;;  %v7501_v60 = vpack.c.bf16 %v6230_v7, %v6230_v7  ;;  %v5545_v36 = vadd.f32 %v13377_v39, %v7676_v34  ;;  %v6231_v61 = vmax.f32 %v5897_v55, 0.0  ;;  %v5536_v46 = vpop.f32.mrb[27].mxu0  ;;  %v3522_v5 = vpop.permute.xlu0 %3521  ;;  %3444 = vrot.lane.b32.xlu1 %v3253_v47, %s8281_s11  ;;  %7813 = vmatprep.mubr.msk.bf16.mxu1 %vm5211_vm12, %v5162_v48  ;;  %v8227_v47 = vld [vmem:[%s8335_s22 + $0x128] sm:$0xff]   ;;  %v15996_v1 = vld [vmem:[#allocation453_spill] sm:$0xff]  ;;  %v16000_v34 = vld [vmem:[#allocation538_spill] sm:$0xff] }
 0x611   : > { %v6164_v13 = vmax.f32 %v5534_v11, 0.0  ;;  %v7499_v4 = vpack.c.bf16 %v6228_v20, %v6228_v20  ;;  %v5537_v44 = vadd.f32 %v13377_v39, %v5536_v46  ;;  %v5889_v40 = vadd.f32 %v13377_v39, %v5888_v8  ;;  %3348 = vrot.lane.b32.xlu0 %v15986_v12, %s8281_s11  ;;  %v15999_v11 = vld [vmem:[#allocation499_spill] sm:$0xff] }
 0x612   : > { %v7437_v33 = vpack.c.bf16 %v6166_v32, %v6166_v32  ;;  %6871 = vst.msk [vmem:[%s12781_s21 + $0x148] sm:$0xf] %vm6788_vm13, %v7501_v60  ;;  %v6167_v53 = vmax.f32 %v5545_v36, 0.0  ;;  %v7502_v21 = vpack.c.bf16 %v6231_v61, %v6231_v61  ;;  %v5066_v3 = vsel %vm4996_vm11, %v4873_v28, %v3522_v5  ;;  %v3620_v45 = vpop.permute.xlu1 %3619  ;;  %v16001_v32 = vld [vmem:[#allocation452_spill] sm:$0xff]  ;;  %v16002_v36 = vld [vmem:[#allocation578_spill] sm:$0xff]  ;;  %v16003_v46 = vld [vmem:[#allocation619_spill] sm:$0xff] }
 0x613   : > { %v7435_v23 = vpack.c.bf16 %v6164_v13, %v6164_v13  ;;  %6869 = vst.msk [vmem:[%s12781_s21 + $0x140] sm:$0xf] %vm6788_vm13, %v7499_v4  ;;  %v6165_v62 = vmax.f32 %v5537_v44, 0.0  ;;  %v6229_v57 = vmax.f32 %v5889_v40, 0.0  ;;  %7717 = vmatprep.mubr.msk.bf16.mxu0 %vm5211_vm12, %v5066_v3  ;;  %v5164_v58 = vsel %vm4996_vm11, %v4971_v27, %v3620_v45  ;;  %v16004_v40 = vld [vmem:[#allocation413_spill] sm:$0xff] }
 0x614   : > { %6807 = vst.msk [vmem:[%s12781_s21 + $0x48] sm:$0xf] %vm6788_vm13, %v7437_v33  ;;  %v7438_v56 = vpack.c.bf16 %v6167_v53, %v6167_v53  ;;  %6872 = vst.msk [vmem:[%s12781_s21 + $0x14c] sm:$0xf] %vm6788_vm13, %v7502_v21  ;;  %v3524_v15 = vpop.permute.xlu0 %3523  ;;  %3641 = vrot.lane.b32.xlu1 %v3450_v10, %s8282_s12  ;;  %7814 = vmatmul.mubr.msk.bf16.gmra.mrb[68].mxu1 %vm5211_vm12, %v5164_v58  ;;  %v3721_v31 = vsel %vm3645_vm4, %v8227_v47, %v15993_v9  ;;  %v15995_v10 = vld [vmem:[#allocation414_spill] sm:$0xff]  ;;  %v16005_v53 = vld [vmem:[#allocation537_spill] sm:$0xff] }
 0x615   : > { %6805 = vst.msk [vmem:[%s12781_s21 + $0x40] sm:$0xf] %vm6788_vm13, %v7435_v23  ;;  %v7436_v50 = vpack.c.bf16 %v6165_v62, %v6165_v62  ;;  %v7500_v42 = vpack.c.bf16 %v6229_v57, %v6229_v57  ;;  %v5068_v22 = vsel %vm4996_vm11, %v4875_v51, %v3524_v15  ;;  %3545 = vrot.lane.b32.xlu0 %v15987_v26, %s8282_s12  ;;  %v16006_v3 = vld [vmem:[#allocation13_spill] sm:$0xff] }
 0x616   : > { %6808 = vst.msk [vmem:[%s12781_s21 + $0x4c] sm:$0xf] %vm6788_vm13, %v7438_v56  ;;  %7718 = vmatmul.mubr.msk.bf16.gmra.mrb[68].mxu0 %vm5211_vm12, %v5068_v22  ;;  %v3209_v43 = vpop.permute.xlu1 %3208  ;;  %v3817_v6 = vsel %vm3645_vm4, %v8228_v0, %v15994_v18  ;;  %v4105_v28 = vsel %vm4031_vm6, %v3912_v14, %v15995_v10  ;;  %v4201_v7 = vsel %vm4031_vm6, %v4008_v59, %v15996_v1  ;;  %v16009_v14 = vld [vmem:[#allocation576_spill] sm:$0xff] }
 0x617   : > { %6806 = vst.msk [vmem:[%s12781_s21 + $0x44] sm:$0xf] %vm6788_vm13, %v7436_v50  ;;  %6870 = vst.msk [vmem:[%s12781_s21 + $0x144] sm:$0xf] %vm6788_vm13, %v7500_v42  ;;  %v3914_v55 = vsel %vm3838_vm5, %v3721_v31, %v15997_v17  ;;  %v4010_v27 = vsel %vm3838_vm5, %v3817_v6, %v15998_v29  ;;  %v4298_v20 = vsel %vm4224_vm7, %v4105_v28, %v15999_v11  ;;  %v16007_v42 = vld [vmem:[#allocation497_spill] sm:$0xff] }
 0x618   : > { %v3207_v19 = vpop.permute.xlu0 %3206  ;;  %3643 = vrot.lane.b32.xlu1 %v3452_v49, %s8282_s12  ;;  %v4394_v48 = vsel %vm4224_vm7, %v4201_v7, %v16000_v34  ;;  %v4203_v60 = vsel %vm4031_vm6, %v4010_v27, %v16001_v32  ;;  %v4491_v61 = vsel %vm4417_vm8, %v4298_v20, %v16002_v36  ;;  %v4107_v33 = vsel %vm4031_vm6, %v3914_v55, %v16004_v40  ;;  %v16008_v49 = vld [vmem:[#allocation618_spill] sm:$0xff]  ;;  %v16010_v6 = vld [vmem:[#allocation65_spill] sm:$0xff]  ;;  %v8229_v27 = vld [vmem:[%s8335_s22 + $0x2b0] sm:$0xff]  }
 0x619   : > { %3547 = vrot.lane.b32.xlu0 %v15988_v24, %s8282_s12  ;;  %v4587_v5 = vsel %vm4417_vm8, %v4394_v48, %v16003_v46  ;;  %v4396_v21 = vsel %vm4224_vm7, %v4203_v60, %v16005_v53  ;;  %v4684_v12 = vsel %vm4610_vm9, %v4491_v61, %v16006_v3  ;;  %v4300_v22 = vsel %vm4224_vm7, %v4107_v33, %v16007_v42  ;;  %v16011_v11 = vld [vmem:[#allocation253_spill] sm:$0xff]  ;;  %v16012_v48 = vld [vmem:[#allocation243_spill] sm:$0xff]  ;;  %v8230_v32 = vld [vmem:[%s8335_s22 + $0x130] sm:$0xff]  }
 0x61a   : > { %v3423_v52 = vpop.permute.xlu1 %3422  ;;  %v4780_v45 = vsel %vm4610_vm9, %v4587_v5, %v3207_v19  ;;  %v4589_v26 = vsel %vm4417_vm8, %v4396_v21, %v16008_v49  ;;  %v4493_v63 = vsel %vm4417_vm8, %v4300_v22, %v16009_v14  ;;  %v3819_v20 = vsel %vm3645_vm4, %v8229_v27, %v16011_v11  ;;  %v16013_v60 = vld [vmem:[#allocation135_spill] sm:$0xff]  ;;  %v8231_v61 = vld [vmem:[%s8335_s22 + $0x2b8] sm:$0xff]   ;;  %v16016_v33 = vld [vmem:[#allocation134_spill] sm:$0xff] }
 0x61b   : > { %v4973_v57 = vsel %vm4803_vm10, %v4780_v45, %v3423_v52  ;;  %v4686_v10 = vsel %vm4610_vm9, %v4493_v63, %v16010_v6  ;;  %v3723_v36 = vsel %vm3645_vm4, %v8230_v32, %v16013_v60  ;;  %v16014_v46 = vld [vmem:[#allocation251_spill] sm:$0xff]  ;;  %v8232_v40 = vld [vmem:[%s8335_s22 + $0x138] sm:$0xff]   ;;  %v16027_v63 = vld [vmem:[#allocation580_spill] sm:$0xff] }
 0x61c   : > { %v3327_v54 = vpop.permute.xlu0 %3326  ;;  %v3821_v5 = vsel %vm3645_vm4, %v8231_v61, %v16014_v46  ;;  %v3725_v53 = vsel %vm3645_vm4, %v8232_v40, %v16016_v33  ;;  %v16017_v21 = vld [vmem:[#allocation363_spill] sm:$0xff]  ;;  %v16023_v22 = vld [vmem:[#allocation621_spill] sm:$0xff] }
 0x61d   : > { %v4877_v24 = vsel %vm4803_vm10, %v4684_v12, %v3327_v54  ;;  %v4782_v54 = vsel %vm4610_vm9, %v4589_v26, %v3209_v43  ;;  %v3916_v3 = vsel %vm3838_vm5, %v3723_v36, %v16017_v21  ;;  %v16018_v12 = vld [vmem:[#allocation244_spill] sm:$0xff]  ;;  %v16031_v61 = vld [vmem:[#allocation579_spill] sm:$0xff] }
 0x61e   : > { %v3425_v2 = vpop.permute.xlu1 %3424  ;;  %v4014_v45 = vsel %vm3838_vm5, %v3821_v5, %v16018_v12 }
 0x61f   : > { %v7775_v8 = vpop.f32.mrb[28].mxu1  ;;  %v4975_v47 = vsel %vm4803_vm10, %v4782_v54, %v3425_v2 }
 0x620   : > { %v3329_v13 = vpop.permute.xlu0 %3328  ;;  %v5908_v4 = vadd.f32 %v13377_v39, %v7775_v8  ;;  %v5901_v44 = vpop.f32.mrb[29].mxu1  ;;  %v4012_v8 = vsel %vm3838_vm5, %v3819_v20, %v16012_v48 }
 0x621   : > { %v7679_v23 = vpop.f32.mrb[28].mxu0  ;;  %v7776_v62 = vpop.f32.mrb[30].mxu1  ;;  %v4879_v43 = vsel %vm4803_vm10, %v4686_v10, %v3329_v13  ;;  %v16015_v13 = vld [vmem:[#allocation455_spill] sm:$0xff] }
 0x622   : > { %v5556_v58 = vadd.f32 %v13377_v39, %v7679_v23  ;;  %v6232_v51 = vmax.f32 %v5908_v4, 0.0  ;;  %v5549_v56 = vpop.f32.mrb[29].mxu0  ;;  %v5911_v15 = vadd.f32 %v13377_v39, %v7776_v62  ;;  %v3622_v50 = vpop.permute.xlu1 %3621  ;;  %v4205_v4 = vsel %vm4031_vm6, %v4012_v8, %v16015_v13  ;;  %v16019_v23 = vld [vmem:[#allocation540_spill] sm:$0xff]  ;;  %v16032_v13 = vld [vmem:[#allocation294_spill] sm:$0xff] }
 0x623   : > { %v7680_v19 = vpop.f32.mrb[30].mxu0  ;;  %v5166_v30 = vsel %vm4996_vm11, %v4973_v57, %v3622_v50  ;;  %v5903_v52 = vpop.f32.mrb[31].mxu1  ;;  %v4398_v62 = vsel %vm4224_vm7, %v4205_v4, %v16019_v23  ;;  %v16021_v56 = vld [vmem:[#allocation416_spill] sm:$0xff]  ;;  %v16022_v50 = vld [vmem:[#allocation454_spill] sm:$0xff] }
 0x624   : > { %v6168_v38 = vmax.f32 %v5556_v58, 0.0  ;;  %v7503_v35 = vpack.c.bf16 %v6232_v51, %v6232_v51  ;;  %v5559_v37 = vadd.f32 %v13377_v39, %v7680_v19  ;;  %v6233_v16 = vmax.f32 %v5911_v15, 0.0  ;;  %v5551_v41 = vpop.f32.mrb[31].mxu0  ;;  %v3526_v25 = vpop.permute.xlu0 %3525  ;;  %7817 = vmatprep.mubr.msk.bf16.mxu1 %vm5211_vm12, %v5166_v30  ;;  %v16020_v58 = vld [vmem:[#allocation362_spill] sm:$0xff]  ;;  %v16024_v19 = vld [vmem:[#allocation501_spill] sm:$0xff]  ;;  %v16025_v52 = vld [vmem:[#allocation539_spill] sm:$0xff] }
 0x625   : > { %v5070_v59 = vsel %vm4996_vm11, %v4877_v24, %v3526_v25  ;;  %v3918_v51 = vsel %vm3838_vm5, %v3725_v53, %v16020_v58  ;;  %v4109_v15 = vsel %vm4031_vm6, %v3916_v3, %v16021_v56  ;;  %v4207_v42 = vsel %vm4031_vm6, %v4014_v45, %v16022_v50  ;;  %v16026_v25 = vld [vmem:[#allocation415_spill] sm:$0xff]  ;;  %v16034_v50 = vld [vmem:[#allocation138_spill] sm:$0xff] }
 0x626   : > { %v7439_v9 = vpack.c.bf16 %v6168_v38, %v6168_v38  ;;  %6873 = vst.msk [vmem:[%s12781_s21 + $0x150] sm:$0xf] %vm6788_vm13, %v7503_v35  ;;  %v6169_v31 = vmax.f32 %v5559_v37, 0.0  ;;  %v7504_v0 = vpack.c.bf16 %v6233_v16, %v6233_v16  ;;  %7721 = vmatprep.mubr.msk.bf16.mxu0 %vm5211_vm12, %v5070_v59  ;;  %v3624_v18 = vpop.permute.xlu1 %3623  ;;  %v4591_v49 = vsel %vm4417_vm8, %v4398_v62, %v16023_v22  ;;  %v16028_v59 = vld [vmem:[#allocation620_spill] sm:$0xff]  ;;  %v8233_v58 = vld [vmem:[%s8335_s22 + $0x148] sm:$0xff]   ;;  %v8235_v22 = vld [vmem:[%s8335_s22 + $0x2c0] sm:$0xff]  }
 0x627   : > { %v5168_v28 = vsel %vm4996_vm11, %v4975_v47, %v3624_v18  ;;  %v4302_v30 = vsel %vm4224_vm7, %v4109_v15, %v16024_v19  ;;  %v4400_v38 = vsel %vm4224_vm7, %v4207_v42, %v16025_v52  ;;  %v4111_v14 = vsel %vm4031_vm6, %v3918_v51, %v16026_v25  ;;  %v16029_v18 = vld [vmem:[#allocation161_spill] sm:$0xff]  ;;  %v8234_v15 = vld [vmem:[%s8335_s22 + $0x140] sm:$0xff]   ;;  %v16037_v52 = vld [vmem:[#allocation364_spill] sm:$0xff] }
 0x628   : > { %6809 = vst.msk [vmem:[%s12781_s21 + $0x50] sm:$0xf] %vm6788_vm13, %v7439_v9  ;;  %v7440_v1 = vpack.c.bf16 %v6169_v31, %v6169_v31  ;;  %6874 = vst.msk [vmem:[%s12781_s21 + $0x154] sm:$0xf] %vm6788_vm13, %v7504_v0  ;;  %v3528_v7 = vpop.permute.xlu0 %3527  ;;  %7818 = vmatmul.mubr.msk.bf16.gmra.mrb[72].mxu1 %vm5211_vm12, %v5168_v28  ;;  %v4495_v54 = vsel %vm4417_vm8, %v4302_v30, %v16027_v63  ;;  %v4593_v47 = vsel %vm4417_vm8, %v4400_v38, %v16028_v59  ;;  %v16033_v51 = vld [vmem:[#allocation137_spill] sm:$0xff] }
 0x629   : > { %v5072_v2 = vsel %vm4996_vm11, %v4879_v43, %v3528_v7  ;;  %v4688_v6 = vsel %vm4610_vm9, %v4495_v54, %v16029_v18  ;;  %v3729_v56 = vsel %vm3645_vm4, %v8233_v58, %v16033_v51  ;;  %v3727_v42 = vsel %vm3645_vm4, %v8234_v15, %v16034_v50  ;;  %v16036_v19 = vld [vmem:[#allocation257_spill] sm:$0xff]  ;;  %v16041_v54 = vld [vmem:[#allocation4_spill] sm:$0xff] }
 0x62a   : > { %6810 = vst.msk [vmem:[%s12781_s21 + $0x54] sm:$0xf] %vm6788_vm13, %v7440_v1  ;;  %7722 = vmatmul.mubr.msk.bf16.gmra.mrb[72].mxu0 %vm5211_vm12, %v5072_v2  ;;  %v3213_v17 = vpop.permute.xlu1 %3212  ;;  %v16030_v2 = vld [vmem:[#allocation500_spill] sm:$0xff]  ;;  %v3922_v38 = vsel %vm3838_vm5, %v3729_v56, %v16037_v52 }
 0x62b   : > { %v4786_v27 = vsel %vm4610_vm9, %v4593_v47, %v3213_v17  ;;  %v4115_v59 = vsel %vm4031_vm6, %v3922_v38, %v16041_v54  ;;  %v16042_v47 = vld [vmem:[#allocation2_spill] sm:$0xff]  ;;  %v16044_v18 = vld [vmem:[#allocation456_spill] sm:$0xff] }
 0x62c   : > { %v3211_v55 = vpop.permute.xlu0 %3210 }
 0x62d   : > { %v4784_v35 = vsel %vm4610_vm9, %v4591_v49, %v3211_v55  ;;  %v4304_v55 = vsel %vm4224_vm7, %v4111_v14, %v16030_v2  ;;  %v16035_v49 = vld [vmem:[#allocation259_spill] sm:$0xff]  ;;  %v16040_v14 = vld [vmem:[#allocation250_spill] sm:$0xff] }
 0x62e   : > { %v3427_v29 = vpop.permute.xlu1 %3426  ;;  %v4497_v46 = vsel %vm4417_vm8, %v4304_v55, %v16031_v61  ;;  %v16052_v61 = vld [vmem:[#allocation622_spill] sm:$0xff] }
 0x62f   : > { %v4977_v9 = vsel %vm4803_vm10, %v4784_v35, %v3427_v29  ;;  %v4690_v4 = vsel %vm4610_vm9, %v4497_v46, %v16032_v13  ;;  %v16038_v35 = vld [vmem:[#allocation365_spill] sm:$0xff] }
 0x630   : > { %v3331_v34 = vpop.permute.xlu0 %3330 }
 0x631   : > { %v4881_v11 = vsel %vm4803_vm10, %v4688_v6, %v3331_v34 }
 0x632   : > { %v3429_v44 = vpop.permute.xlu1 %3428 }
 0x633   : > { %v7779_v57 = vpop.f32.mrb[32].mxu1  ;;  %v4979_v17 = vsel %vm4803_vm10, %v4786_v27, %v3429_v44  ;;  %v16048_v27 = vld [vmem:[#allocation541_spill] sm:$0xff] }
 0x634   : > { %v3333_v26 = vpop.permute.xlu0 %3332  ;;  %v5915_v24 = vpop.f32.mrb[33].mxu1 }
 0x635   : > { %v7683_v37 = vpop.f32.mrb[32].mxu0  ;;  %v5916_v16 = vadd.f32 %v13377_v39, %v5915_v24  ;;  %v7780_v41 = vpop.f32.mrb[34].mxu1  ;;  %v4883_v21 = vsel %vm4803_vm10, %v4690_v4, %v3333_v26  ;;  %v3823_v26 = vsel %vm3645_vm4, %v8235_v22, %v16035_v49  ;;  %v8236_v24 = vld [vmem:[%s8335_s22 + $0x2c8] sm:$0xff]  }
 0x636   : > { %v5563_v31 = vpop.f32.mrb[33].mxu0  ;;  %v3626_v0 = vpop.permute.xlu1 %3625  ;;  %v3825_v30 = vsel %vm3645_vm4, %v8236_v24, %v16036_v19  ;;  %v3920_v37 = vsel %vm3838_vm5, %v3727_v42, %v16038_v35 }
 0x637   : > { %v5564_v10 = vadd.f32 %v13377_v39, %v5563_v31  ;;  %v6234_v28 = vmax.f32 %v5916_v16, 0.0  ;;  %v7684_v43 = vpop.f32.mrb[34].mxu0  ;;  %v5170_v1 = vsel %vm4996_vm11, %v4977_v9, %v3626_v0  ;;  %v5918_v7 = vpop.f32.mrb[35].mxu1  ;;  %v16039_v16 = vld [vmem:[#allocation249_spill] sm:$0xff]  ;;  %v4018_v63 = vsel %vm3838_vm5, %v3825_v30, %v16040_v14 }
 0x638   : > { %v5566_v29 = vpop.f32.mrb[35].mxu0  ;;  %v5919_v20 = vadd.f32 %v13377_v39, %v5918_v7  ;;  %v3530_v48 = vpop.permute.xlu0 %3529  ;;  %7821 = vmatprep.mubr.msk.bf16.mxu1 %vm5211_vm12, %v5170_v1  ;;  %v4016_v41 = vsel %vm3838_vm5, %v3823_v26, %v16039_v16  ;;  %v4113_v9 = vsel %vm4031_vm6, %v3920_v37, %v16042_v47  ;;  %v16043_v31 = vld [vmem:[#allocation457_spill] sm:$0xff]  ;;  %v4211_v6 = vsel %vm4031_vm6, %v4018_v63, %v16044_v18  ;;  %v16046_v43 = vld [vmem:[#allocation136_spill] sm:$0xff]  ;;  %v16047_v7 = vld [vmem:[#allocation542_spill] sm:$0xff] }
 0x639   : > { %v6170_v8 = vmax.f32 %v5564_v10, 0.0  ;;  %v7505_v32 = vpack.c.bf16 %v6234_v28, %v6234_v28  ;;  %v5567_v60 = vadd.f32 %v13377_v39, %v5566_v29  ;;  %v5074_v36 = vsel %vm4996_vm11, %v4881_v11, %v3530_v48  ;;  %v16045_v10 = vld [vmem:[#allocation141_spill] sm:$0xff]  ;;  %v16050_v48 = vld [vmem:[#allocation582_spill] sm:$0xff] }
 0x63a   : > { %v6235_v34 = vmax.f32 %v5919_v20, 0.0  ;;  %7725 = vmatprep.mubr.msk.bf16.mxu0 %vm5211_vm12, %v5074_v36  ;;  %v3628_v5 = vpop.permute.xlu1 %3627  ;;  %v4209_v0 = vsel %vm4031_vm6, %v4016_v41, %v16043_v31  ;;  %v4308_v28 = vsel %vm4224_vm7, %v4115_v59, %v16045_v10  ;;  %v4306_v1 = vsel %vm4224_vm7, %v4113_v9, %v16046_v43  ;;  %v16049_v29 = vld [vmem:[#allocation581_spill] sm:$0xff] }
 0x63b   : > { %v7441_v40 = vpack.c.bf16 %v6170_v8, %v6170_v8  ;;  %6875 = vst.msk [vmem:[%s12781_s21 + $0x158] sm:$0xf] %vm6788_vm13, %v7505_v32  ;;  %v6171_v33 = vmax.f32 %v5567_v60, 0.0  ;;  %v5172_v53 = vsel %vm4996_vm11, %v4979_v17, %v3628_v5  ;;  %v4402_v2 = vsel %vm4224_vm7, %v4209_v0, %v16047_v7  ;;  %v16051_v32 = vld [vmem:[#allocation623_spill] sm:$0xff]  ;;  %v16053_v17 = vld [vmem:[#allocation290_spill] sm:$0xff] }
 0x63c   : > { %v7506_v44 = vpack.c.bf16 %v6235_v34, %v6235_v34  ;;  %v3532_v3 = vpop.permute.xlu0 %3531  ;;  %7822 = vmatmul.mubr.msk.bf16.gmra.mrb[76].mxu1 %vm5211_vm12, %v5172_v53  ;;  %v4404_v11 = vsel %vm4224_vm7, %v4211_v6, %v16048_v27  ;;  %v4501_v20 = vsel %vm4417_vm8, %v4308_v28, %v16049_v29  ;;  %v4499_v8 = vsel %vm4417_vm8, %v4306_v1, %v16050_v48  ;;  %v16055_v29 = vld [vmem:[#allocation142_spill] sm:$0xff]  ;;  %v8238_v48 = vld [vmem:[%s8335_s22 + $0x2d0] sm:$0xff]  }
 0x63d   : > { %6811 = vst.msk [vmem:[%s12781_s21 + $0x58] sm:$0xf] %vm6788_vm13, %v7441_v40  ;;  %v7442_v12 = vpack.c.bf16 %v6171_v33, %v6171_v33  ;;  %v5076_v45 = vsel %vm4996_vm11, %v4883_v21, %v3532_v3  ;;  %v4595_v60 = vsel %vm4417_vm8, %v4402_v2, %v16051_v32  ;;  %v4597_v46 = vsel %vm4417_vm8, %v4404_v11, %v16052_v61  ;;  %v16054_v33 = vld [vmem:[#allocation159_spill] sm:$0xff]  ;;  %v8237_v11 = vld [vmem:[%s8335_s22 + $0x150] sm:$0xff]  }
 0x63e   : > { %6876 = vst.msk [vmem:[%s12781_s21 + $0x15c] sm:$0xf] %vm6788_vm13, %v7506_v44  ;;  %7726 = vmatmul.mubr.msk.bf16.gmra.mrb[76].mxu0 %vm5211_vm12, %v5076_v45  ;;  %v3217_v23 = vpop.permute.xlu1 %3216  ;;  %v4694_v34 = vsel %vm4610_vm9, %v4501_v20, %v16053_v17  ;;  %v4692_v53 = vsel %vm4610_vm9, %v4499_v8, %v16054_v33  ;;  %v3731_v20 = vsel %vm3645_vm4, %v8237_v11, %v16055_v29  ;;  %v16056_v8 = vld [vmem:[#allocation265_spill] sm:$0xff] }
 0x63f   : > { %6812 = vst.msk [vmem:[%s12781_s21 + $0x5c] sm:$0xf] %vm6788_vm13, %v7442_v12  ;;  %v4790_v21 = vsel %vm4610_vm9, %v4597_v46, %v3217_v23  ;;  %v3827_v32 = vsel %vm3645_vm4, %v8238_v48, %v16056_v8  ;;  %v16058_v46 = vld [vmem:[#allocation255_spill] sm:$0xff] }
 0x640   : > { %v3215_v62 = vpop.permute.xlu0 %3214  ;;  %v4020_v17 = vsel %vm3838_vm5, %v3827_v32, %v16058_v46 }
 0x641   : > { %v4788_v5 = vsel %vm4610_vm9, %v4595_v60, %v3215_v62 }
 0x642   : > { %v3431_v57 = vpop.permute.xlu1 %3430 }
 0x643   : > { %v4981_v44 = vsel %vm4803_vm10, %v4788_v5, %v3431_v57  ;;  %v16059_v5 = vld [vmem:[#allocation140_spill] sm:$0xff] }
 0x644   : > { %v3335_v25 = vpop.permute.xlu0 %3334 }
 0x645   : > { %v4885_v58 = vsel %vm4803_vm10, %v4692_v53, %v3335_v25  ;;  %v16061_v53 = vld [vmem:[#allocation3_spill] sm:$0xff] }
 0x646   : > { %v3433_v55 = vpop.permute.xlu1 %3432 }
 0x647   : > { %v7783_v36 = vpop.f32.mrb[36].mxu1  ;;  %v4983_v42 = vsel %vm4803_vm10, %v4790_v21, %v3433_v55 }
 0x648   : > { %v3337_v13 = vpop.permute.xlu0 %3336  ;;  %v5938_v4 = vadd.f32 %v13377_v39, %v7783_v36  ;;  %v5929_v40 = vpop.f32.mrb[37].mxu1  ;;  %v16057_v36 = vld [vmem:[#allocation367_spill] sm:$0xff] }
 0x649   : > { %v7687_v3 = vpop.f32.mrb[36].mxu0  ;;  %v5930_v12 = vadd.f32 %v13377_v39, %v5929_v40  ;;  %v7784_v45 = vpop.f32.mrb[38].mxu1  ;;  %v4887_v6 = vsel %vm4803_vm10, %v4694_v34, %v3337_v13  ;;  %v3924_v61 = vsel %vm3838_vm5, %v3731_v20, %v16057_v36  ;;  %v8239_v34 = vld [vmem:[%s8335_s22 + $0x158] sm:$0xff]   ;;  %v16060_v40 = vld [vmem:[#allocation263_spill] sm:$0xff] }
 0x64a   : > { %v5586_v51 = vadd.f32 %v13377_v39, %v7687_v3  ;;  %v6238_v62 = vmax.f32 %v5938_v4, 0.0  ;;  %v5577_v56 = vpop.f32.mrb[37].mxu0  ;;  %v5941_v15 = vadd.f32 %v13377_v39, %v7784_v45  ;;  %v3630_v50 = vpop.permute.xlu1 %3629  ;;  %v3733_v13 = vsel %vm3645_vm4, %v8239_v34, %v16059_v5  ;;  %v8240_v4 = vld [vmem:[%s8335_s22 + $0x2d8] sm:$0xff]   ;;  %v16063_v45 = vld [vmem:[#allocation366_spill] sm:$0xff] }
 0x64b   : > { %v5578_v22 = vadd.f32 %v13377_v39, %v5577_v56  ;;  %v6236_v23 = vmax.f32 %v5930_v12, 0.0  ;;  %v7688_v57 = vpop.f32.mrb[38].mxu0  ;;  %v5174_v49 = vsel %vm4996_vm11, %v4981_v44, %v3630_v50  ;;  %v5932_v26 = vpop.f32.mrb[39].mxu1  ;;  %v3829_v33 = vsel %vm3645_vm4, %v8240_v4, %v16060_v40  ;;  %v16062_v44 = vld [vmem:[#allocation458_spill] sm:$0xff]  ;;  %v16065_v56 = vld [vmem:[#allocation139_spill] sm:$0xff] }
 0x64c   : > { %v6174_v24 = vmax.f32 %v5586_v51, 0.0  ;;  %v7509_v19 = vpack.c.bf16 %v6238_v62, %v6238_v62  ;;  %v5589_v30 = vadd.f32 %v13377_v39, %v7688_v57  ;;  %v6239_v52 = vmax.f32 %v5941_v15, 0.0  ;;  %v5580_v38 = vpop.f32.mrb[39].mxu0  ;;  %v3534_v35 = vpop.permute.xlu0 %3533  ;;  %7825 = vmatprep.mubr.msk.bf16.mxu1 %vm5211_vm12, %v5174_v49  ;;  %v16064_v51 = vld [vmem:[#allocation256_spill] sm:$0xff]  ;;  %v16066_v50 = vld [vmem:[#allocation543_spill] sm:$0xff]  ;;  %v16068_v49 = vld [vmem:[#allocation585_spill] sm:$0xff] }
 0x64d   : > { %v6172_v37 = vmax.f32 %v5578_v22, 0.0  ;;  %v7507_v16 = vpack.c.bf16 %v6236_v23, %v6236_v23  ;;  %v5581_v41 = vadd.f32 %v13377_v39, %v5580_v38  ;;  %v5933_v25 = vadd.f32 %v13377_v39, %v5932_v26  ;;  %v16067_v23 = vld [vmem:[#allocation54_spill] sm:$0xff] }
 0x64e   : > { %v7445_v14 = vpack.c.bf16 %v6174_v24, %v6174_v24  ;;  %6879 = vst.msk [vmem:[%s12781_s21 + $0x168] sm:$0xf] %vm6788_vm13, %v7509_v19  ;;  %v6175_v63 = vmax.f32 %v5589_v30, 0.0  ;;  %v7510_v54 = vpack.c.bf16 %v6239_v52, %v6239_v52  ;;  %v5078_v59 = vsel %vm4996_vm11, %v4885_v58, %v3534_v35  ;;  %v3632_v47 = vpop.permute.xlu1 %3631  ;;  %v16069_v24 = vld [vmem:[#allocation625_spill] sm:$0xff]  ;;  %v16070_v35 = vld [vmem:[#allocation6_spill] sm:$0xff] }
 0x64f   : > { %v7443_v9 = vpack.c.bf16 %v6172_v37, %v6172_v37  ;;  %6877 = vst.msk [vmem:[%s12781_s21 + $0x160] sm:$0xf] %vm6788_vm13, %v7507_v16  ;;  %v6173_v31 = vmax.f32 %v5581_v41, 0.0  ;;  %v6237_v0 = vmax.f32 %v5933_v25, 0.0  ;;  %7729 = vmatprep.mubr.msk.bf16.mxu0 %vm5211_vm12, %v5078_v59  ;;  %v5176_v18 = vsel %vm4996_vm11, %v4983_v42, %v3632_v47  ;;  %v16071_v16 = vld [vmem:[#allocation270_spill] sm:$0xff] }
 0x650   : > { %6815 = vst.msk [vmem:[%s12781_s21 + $0x68] sm:$0xf] %vm6788_vm13, %v7445_v14  ;;  %v7446_v10 = vpack.c.bf16 %v6175_v63, %v6175_v63  ;;  %6880 = vst.msk [vmem:[%s12781_s21 + $0x16c] sm:$0xf] %vm6788_vm13, %v7510_v54  ;;  %v3536_v28 = vpop.permute.xlu0 %3535  ;;  %7826 = vmatmul.mubr.msk.bf16.gmra.mrb[80].mxu1 %vm5211_vm12, %v5176_v18  ;;  %v4117_v21 = vsel %vm4031_vm6, %v3924_v61, %v16061_v53  ;;  %v4213_v3 = vsel %vm4031_vm6, %v4020_v17, %v16062_v44  ;;  %v16072_v25 = vld [vmem:[#allocation654_spill] sm:$0xff]  ;;  %v16075_v61 = vld [vmem:[#allocation584_spill] sm:$0xff] }
 0x651   : > { %6813 = vst.msk [vmem:[%s12781_s21 + $0x60] sm:$0xf] %vm6788_vm13, %v7443_v9  ;;  %v7444_v43 = vpack.c.bf16 %v6173_v31, %v6173_v31  ;;  %v7508_v1 = vpack.c.bf16 %v6237_v0, %v6237_v0  ;;  %v5080_v7 = vsel %vm4996_vm11, %v4887_v6, %v3536_v28  ;;  %v3926_v58 = vsel %vm3838_vm5, %v3733_v13, %v16063_v45 }
 0x652   : > { %6816 = vst.msk [vmem:[%s12781_s21 + $0x6c] sm:$0xf] %vm6788_vm13, %v7446_v10  ;;  %7730 = vmatmul.mubr.msk.bf16.gmra.mrb[80].mxu0 %vm5211_vm12, %v5080_v7  ;;  %v3221_v2 = vpop.permute.xlu1 %3220  ;;  %v4022_v62 = vsel %vm3838_vm5, %v3829_v33, %v16064_v51  ;;  %v4310_v15 = vsel %vm4224_vm7, %v4117_v21, %v16065_v56  ;;  %v4406_v42 = vsel %vm4224_vm7, %v4213_v3, %v16066_v50  ;;  %v16073_v10 = vld [vmem:[#allocation145_spill] sm:$0xff]  ;;  %v16077_v56 = vld [vmem:[#allocation271_spill] sm:$0xff] }
 0x653   : > { %6814 = vst.msk [vmem:[%s12781_s21 + $0x64] sm:$0xf] %vm6788_vm13, %v7444_v43  ;;  %6878 = vst.msk [vmem:[%s12781_s21 + $0x164] sm:$0xf] %vm6788_vm13, %v7508_v1  ;;  %v4215_v57 = vsel %vm4031_vm6, %v4022_v62, %v16067_v23  ;;  %v4503_v26 = vsel %vm4417_vm8, %v4310_v15, %v16068_v49  ;;  %v4599_v19 = vsel %vm4417_vm8, %v4406_v42, %v16069_v24  ;;  %v16074_v43 = vld [vmem:[#allocation624_spill] sm:$0xff]  ;;  %v16076_v33 = vld [vmem:[#allocation653_spill] sm:$0xff] }
 0x654   : > { %v3219_v55 = vpop.permute.xlu0 %3218  ;;  %v4119_v37 = vsel %vm4031_vm6, %v3926_v58, %v16070_v35  ;;  %v4408_v41 = vsel %vm4224_vm7, %v4215_v57, %v16071_v16  ;;  %v4696_v14 = vsel %vm4610_vm9, %v4503_v26, %v16072_v25  ;;  %v8241_v62 = vld [vmem:[%s8335_s22 + $0x2e0] sm:$0xff]   ;;  %v16078_v42 = vld [vmem:[#allocation261_spill] sm:$0xff]  ;;  %v8243_v26 = vld [vmem:[%s8335_s22 + $0x2e8] sm:$0xff]  }
 0x655   : > { %v4792_v63 = vsel %vm4610_vm9, %v4599_v19, %v3219_v55  ;;  %v4312_v28 = vsel %vm4224_vm7, %v4119_v37, %v16073_v10  ;;  %v4601_v1 = vsel %vm4417_vm8, %v4408_v41, %v16074_v43  ;;  %v3831_v15 = vsel %vm3645_vm4, %v8241_v62, %v16077_v56  ;;  %v8242_v23 = vld [vmem:[%s8335_s22 + $0x160] sm:$0xff]   ;;  %v16080_v24 = vld [vmem:[#allocation269_spill] sm:$0xff]  ;;  %v8244_v35 = vld [vmem:[%s8335_s22 + $0x168] sm:$0xff]  }
 0x656   : > { %v3435_v27 = vpop.permute.xlu1 %3434  ;;  %v4505_v46 = vsel %vm4417_vm8, %v4312_v28, %v16075_v61  ;;  %v16079_v57 = vld [vmem:[#allocation146_spill] sm:$0xff]  ;;  %v3833_v19 = vsel %vm3645_vm4, %v8243_v26, %v16080_v24  ;;  %v16082_v37 = vld [vmem:[#allocation144_spill] sm:$0xff]  ;;  %v16083_v41 = vld [vmem:[#allocation369_spill] sm:$0xff] }
 0x657   : > { %v4985_v47 = vsel %vm4803_vm10, %v4792_v63, %v3435_v27  ;;  %v4698_v53 = vsel %vm4610_vm9, %v4505_v46, %v16076_v33  ;;  %v3735_v49 = vsel %vm3645_vm4, %v8242_v23, %v16079_v57  ;;  %v3737_v16 = vsel %vm3645_vm4, %v8244_v35, %v16082_v37  ;;  %v16089_v28 = vld [vmem:[#allocation627_spill] sm:$0xff]  ;;  %v16097_v26 = vld [vmem:[#allocation586_spill] sm:$0xff] }
 0x658   : > { %v3339_v60 = vpop.permute.xlu0 %3338  ;;  %v3928_v25 = vsel %vm3838_vm5, %v3735_v49, %v16083_v41  ;;  %v16093_v46 = vld [vmem:[#allocation587_spill] sm:$0xff] }
 0x659   : > { %v4889_v7 = vsel %vm4803_vm10, %v4696_v14, %v3339_v60  ;;  %v4794_v60 = vsel %vm4610_vm9, %v4601_v1, %v3221_v2  ;;  %v16084_v14 = vld [vmem:[#allocation262_spill] sm:$0xff] }
 0x65a   : > { %v3437_v12 = vpop.permute.xlu1 %3436  ;;  %v4026_v63 = vsel %vm3838_vm5, %v3833_v19, %v16084_v14 }
 0x65b   : > { %v7787_v22 = vpop.f32.mrb[40].mxu1  ;;  %v4987_v34 = vsel %vm4803_vm10, %v4794_v60, %v3437_v12 }
 0x65c   : > { %v3341_v30 = vpop.permute.xlu0 %3340  ;;  %v5952_v52 = vadd.f32 %v13377_v39, %v7787_v22  ;;  %v5945_v38 = vpop.f32.mrb[41].mxu1  ;;  %v4024_v22 = vsel %vm3838_vm5, %v3831_v15, %v16078_v42 }
 0x65d   : > { %v7691_v54 = vpop.f32.mrb[40].mxu0  ;;  %v7788_v59 = vpop.f32.mrb[42].mxu1  ;;  %v4891_v2 = vsel %vm4803_vm10, %v4698_v53, %v3341_v30  ;;  %v16081_v30 = vld [vmem:[#allocation53_spill] sm:$0xff] }
 0x65e   : > { %v5600_v9 = vadd.f32 %v13377_v39, %v7691_v54  ;;  %v6240_v31 = vmax.f32 %v5952_v52, 0.0  ;;  %v5593_v0 = vpop.f32.mrb[41].mxu0  ;;  %v5955_v18 = vadd.f32 %v13377_v39, %v7788_v59  ;;  %v3634_v6 = vpop.permute.xlu1 %3633  ;;  %v4217_v52 = vsel %vm4031_vm6, %v4024_v22, %v16081_v30  ;;  %v16085_v54 = vld [vmem:[#allocation266_spill] sm:$0xff]  ;;  %v16098_v30 = vld [vmem:[#allocation71_spill] sm:$0xff] }
 0x65f   : > { %v7692_v55 = vpop.f32.mrb[42].mxu0  ;;  %v5178_v11 = vsel %vm4996_vm11, %v4985_v47, %v3634_v6  ;;  %v5947_v27 = vpop.f32.mrb[43].mxu1  ;;  %v4410_v59 = vsel %vm4224_vm7, %v4217_v52, %v16085_v54  ;;  %v16087_v0 = vld [vmem:[#allocation5_spill] sm:$0xff]  ;;  %v16088_v6 = vld [vmem:[#allocation56_spill] sm:$0xff] }
 0x660   : > { %v6176_v29 = vmax.f32 %v5600_v9, 0.0  ;;  %v7511_v20 = vpack.c.bf16 %v6240_v31, %v6240_v31  ;;  %v5603_v48 = vadd.f32 %v13377_v39, %v7692_v55  ;;  %v6241_v8 = vmax.f32 %v5955_v18, 0.0  ;;  %v5595_v32 = vpop.f32.mrb[43].mxu0  ;;  %v3538_v36 = vpop.permute.xlu0 %3537  ;;  %7829 = vmatprep.mubr.msk.bf16.mxu1 %vm5211_vm12, %v5178_v11  ;;  %v16086_v9 = vld [vmem:[#allocation368_spill] sm:$0xff]  ;;  %v16090_v55 = vld [vmem:[#allocation143_spill] sm:$0xff] }
 0x661   : > { %v5082_v17 = vsel %vm4996_vm11, %v4889_v7, %v3538_v36  ;;  %v3930_v31 = vsel %vm3838_vm5, %v3737_v16, %v16086_v9  ;;  %v4121_v18 = vsel %vm4031_vm6, %v3928_v25, %v16087_v0  ;;  %v4219_v10 = vsel %vm4031_vm6, %v4026_v63, %v16088_v6  ;;  %v16091_v27 = vld [vmem:[#allocation276_spill] sm:$0xff]  ;;  %v8245_v9 = vld [vmem:[%s8335_s22 + $0x178] sm:$0xff]   ;;  %v16100_v6 = vld [vmem:[#allocation150_spill] sm:$0xff] }
 0x662   : > { %v7447_v5 = vpack.c.bf16 %v6176_v29, %v6176_v29  ;;  %6881 = vst.msk [vmem:[%s12781_s21 + $0x170] sm:$0xf] %vm6788_vm13, %v7511_v20  ;;  %v6177_v13 = vmax.f32 %v5603_v48, 0.0  ;;  %v7512_v4 = vpack.c.bf16 %v6241_v8, %v6241_v8  ;;  %7733 = vmatprep.mubr.msk.bf16.mxu0 %vm5211_vm12, %v5082_v17  ;;  %v3636_v40 = vpop.permute.xlu1 %3635  ;;  %v4603_v43 = vsel %vm4417_vm8, %v4410_v59, %v16089_v28  ;;  %v16092_v36 = vld [vmem:[#allocation8_spill] sm:$0xff]  ;;  %v16094_v17 = vld [vmem:[#allocation626_spill] sm:$0xff] }
 0x663   : > { %v5180_v21 = vsel %vm4996_vm11, %v4987_v34, %v3636_v40  ;;  %v4314_v11 = vsel %vm4224_vm7, %v4121_v18, %v16090_v55  ;;  %v4412_v29 = vsel %vm4224_vm7, %v4219_v10, %v16091_v27  ;;  %v4123_v61 = vsel %vm4031_vm6, %v3930_v31, %v16092_v36  ;;  %v16095_v40 = vld [vmem:[#allocation16_spill] sm:$0xff]  ;;  %v16102_v55 = vld [vmem:[#allocation275_spill] sm:$0xff]  ;;  %v16103_v27 = vld [vmem:[#allocation370_spill] sm:$0xff] }
 0x664   : > { %6817 = vst.msk [vmem:[%s12781_s21 + $0x70] sm:$0xf] %vm6788_vm13, %v7447_v5  ;;  %v7448_v44 = vpack.c.bf16 %v6177_v13, %v6177_v13  ;;  %6882 = vst.msk [vmem:[%s12781_s21 + $0x174] sm:$0xf] %vm6788_vm13, %v7512_v4  ;;  %v3540_v3 = vpop.permute.xlu0 %3539  ;;  %7830 = vmatmul.mubr.msk.bf16.gmra.mrb[84].mxu1 %vm5211_vm12, %v5180_v21  ;;  %v4507_v60 = vsel %vm4417_vm8, %v4314_v11, %v16093_v46  ;;  %v4605_v34 = vsel %vm4417_vm8, %v4412_v29, %v16094_v17  ;;  %v16099_v31 = vld [vmem:[#allocation148_spill] sm:$0xff] }
 0x665   : > { %v5084_v12 = vsel %vm4996_vm11, %v4891_v2, %v3540_v3  ;;  %v4700_v33 = vsel %vm4610_vm9, %v4507_v60, %v16095_v40  ;;  %v3741_v0 = vsel %vm3645_vm4, %v8245_v9, %v16099_v31  ;;  %v8246_v18 = vld [vmem:[%s8335_s22 + $0x170] sm:$0xff]   ;;  %v16107_v60 = vld [vmem:[#allocation10_spill] sm:$0xff]  ;;  %v16110_v40 = vld [vmem:[#allocation59_spill] sm:$0xff] }
 0x666   : > { %6818 = vst.msk [vmem:[%s12781_s21 + $0x74] sm:$0xf] %vm6788_vm13, %v7448_v44  ;;  %7734 = vmatmul.mubr.msk.bf16.gmra.mrb[84].mxu0 %vm5211_vm12, %v5084_v12  ;;  %v3225_v45 = vpop.permute.xlu1 %3224  ;;  %v16096_v12 = vld [vmem:[#allocation149_spill] sm:$0xff]  ;;  %v3739_v10 = vsel %vm3645_vm4, %v8246_v18, %v16100_v6  ;;  %v8247_v28 = vld [vmem:[%s8335_s22 + $0x2f0] sm:$0xff]   ;;  %v3934_v29 = vsel %vm3838_vm5, %v3741_v0, %v16103_v27 }
 0x667   : > { %v4798_v62 = vsel %vm4610_vm9, %v4605_v34, %v3225_v45  ;;  %v4127_v17 = vsel %vm4031_vm6, %v3934_v29, %v16107_v60  ;;  %v16108_v34 = vld [vmem:[#allocation7_spill] sm:$0xff] }
 0x668   : > { %v3223_v58 = vpop.permute.xlu0 %3222 }
 0x669   : > { %v4796_v20 = vsel %vm4610_vm9, %v4603_v43, %v3223_v58  ;;  %v4316_v58 = vsel %vm4224_vm7, %v4123_v61, %v16096_v12  ;;  %v16101_v43 = vld [vmem:[#allocation277_spill] sm:$0xff]  ;;  %v16106_v61 = vld [vmem:[#allocation268_spill] sm:$0xff] }
 0x66a   : > { %v3439_v51 = vpop.permute.xlu1 %3438  ;;  %v4509_v24 = vsel %vm4417_vm8, %v4316_v58, %v16097_v26  ;;  %v16118_v26 = vld [vmem:[#allocation629_spill] sm:$0xff] }
 0x66b   : > { %v4989_v5 = vsel %vm4803_vm10, %v4796_v20, %v3439_v51  ;;  %v4702_v52 = vsel %vm4610_vm9, %v4509_v24, %v16098_v30  ;;  %v16104_v20 = vld [vmem:[#allocation371_spill] sm:$0xff] }
 0x66c   : > { %v3343_v50 = vpop.permute.xlu0 %3342 }
 0x66d   : > { %v4893_v56 = vsel %vm4803_vm10, %v4700_v33, %v3343_v50 }
 0x66e   : > { %v3441_v38 = vpop.permute.xlu1 %3440 }
 0x66f   : > { %v7791_v47 = vpop.f32.mrb[44].mxu1  ;;  %v4991_v45 = vsel %vm4803_vm10, %v4798_v62, %v3441_v38  ;;  %v16114_v62 = vld [vmem:[#allocation282_spill] sm:$0xff] }
 0x670   : > { %v3345_v1 = vpop.permute.xlu0 %3344  ;;  %v5959_v7 = vpop.f32.mrb[45].mxu1 }
 0x671   : > { %v7695_v48 = vpop.f32.mrb[44].mxu0  ;;  %v5960_v8 = vadd.f32 %v13377_v39, %v5959_v7  ;;  %v7792_v32 = vpop.f32.mrb[46].mxu1  ;;  %v4895_v41 = vsel %vm4803_vm10, %v4702_v52, %v3345_v1  ;;  %v3835_v1 = vsel %vm3645_vm4, %v8247_v28, %v16101_v43  ;;  %v8248_v7 = vld [vmem:[%s8335_s22 + $0x2f8] sm:$0xff]  }
 0x672   : > { %v5607_v13 = vpop.f32.mrb[45].mxu0  ;;  %v3638_v4 = vpop.permute.xlu1 %3637  ;;  %v3837_v11 = vsel %vm3645_vm4, %v8248_v7, %v16102_v55  ;;  %v3932_v48 = vsel %vm3838_vm5, %v3739_v10, %v16104_v20 }
 0x673   : > { %v5608_v53 = vadd.f32 %v13377_v39, %v5607_v13  ;;  %v6242_v21 = vmax.f32 %v5960_v8, 0.0  ;;  %v7696_v2 = vpop.f32.mrb[46].mxu0  ;;  %v5182_v44 = vsel %vm4996_vm11, %v4989_v5, %v3638_v4  ;;  %v5962_v3 = vpop.f32.mrb[47].mxu1  ;;  %v16105_v8 = vld [vmem:[#allocation267_spill] sm:$0xff]  ;;  %v4030_v46 = vsel %vm3838_vm5, %v3837_v11, %v16106_v61 }
 0x674   : > { %v5610_v51 = vpop.f32.mrb[47].mxu0  ;;  %v5963_v15 = vadd.f32 %v13377_v39, %v5962_v3  ;;  %v3542_v42 = vpop.permute.xlu0 %3541  ;;  %7833 = vmatprep.mubr.msk.bf16.mxu1 %vm5211_vm12, %v5182_v44  ;;  %v4028_v32 = vsel %vm3838_vm5, %v3835_v1, %v16105_v8  ;;  %v4125_v5 = vsel %vm4031_vm6, %v3932_v48, %v16108_v34  ;;  %v16109_v13 = vld [vmem:[#allocation55_spill] sm:$0xff]  ;;  %v4223_v33 = vsel %vm4031_vm6, %v4030_v46, %v16110_v40  ;;  %v16113_v3 = vld [vmem:[#allocation272_spill] sm:$0xff] }
 0x675   : > { %v6178_v22 = vmax.f32 %v5608_v53, 0.0  ;;  %v7513_v23 = vpack.c.bf16 %v6242_v21, %v6242_v21  ;;  %v5611_v57 = vadd.f32 %v13377_v39, %v5610_v51  ;;  %v5086_v49 = vsel %vm4996_vm11, %v4893_v56, %v3542_v42  ;;  %v16111_v53 = vld [vmem:[#allocation153_spill] sm:$0xff]  ;;  %v16112_v2 = vld [vmem:[#allocation147_spill] sm:$0xff]  ;;  %v16115_v51 = vld [vmem:[#allocation588_spill] sm:$0xff] }
 0x676   : > { %v6243_v50 = vmax.f32 %v5963_v15, 0.0  ;;  %7737 = vmatprep.mubr.msk.bf16.mxu0 %vm5211_vm12, %v5086_v49  ;;  %v3640_v19 = vpop.permute.xlu1 %3639  ;;  %v4221_v4 = vsel %vm4031_vm6, %v4028_v32, %v16109_v13  ;;  %v4320_v21 = vsel %vm4224_vm7, %v4127_v17, %v16111_v53  ;;  %v4318_v44 = vsel %vm4224_vm7, %v4125_v5, %v16112_v2  ;;  %v16116_v42 = vld [vmem:[#allocation589_spill] sm:$0xff] }
 0x677   : > { %v7449_v35 = vpack.c.bf16 %v6178_v22, %v6178_v22  ;;  %6883 = vst.msk [vmem:[%s12781_s21 + $0x178] sm:$0xf] %vm6788_vm13, %v7513_v23  ;;  %v6179_v37 = vmax.f32 %v5611_v57, 0.0  ;;  %v5184_v16 = vsel %vm4996_vm11, %v4991_v45, %v3640_v19  ;;  %v4414_v12 = vsel %vm4224_vm7, %v4221_v4, %v16113_v3  ;;  %v16117_v23 = vld [vmem:[#allocation630_spill] sm:$0xff]  ;;  %v16119_v45 = vld [vmem:[#allocation69_spill] sm:$0xff] }
 0x678   : > { %v7514_v38 = vpack.c.bf16 %v6243_v50, %v6243_v50  ;;  %v3544_v25 = vpop.permute.xlu0 %3543  ;;  %7834 = vmatmul.mubr.msk.bf16.gmra.mrb[88].mxu1 %vm5211_vm12, %v5184_v16  ;;  %v4416_v56 = vsel %vm4224_vm7, %v4223_v33, %v16114_v62  ;;  %v4513_v15 = vsel %vm4417_vm8, %v4320_v21, %v16115_v51  ;;  %v4511_v22 = vsel %vm4417_vm8, %v4318_v44, %v16116_v42 }
 0x679   : > { %6819 = vst.msk [vmem:[%s12781_s21 + $0x78] sm:$0xf] %vm6788_vm13, %v7449_v35  ;;  %v7450_v14 = vpack.c.bf16 %v6179_v37, %v6179_v37  ;;  %v5088_v63 = vsel %vm4996_vm11, %v4895_v41, %v3544_v25  ;;  %v4607_v57 = vsel %vm4417_vm8, %v4414_v12, %v16117_v23  ;;  %v4609_v24 = vsel %vm4417_vm8, %v4416_v56, %v16118_v26  ;;  %v16120_v37 = vld [vmem:[#allocation15_spill] sm:$0xff]  ;;  %v13910_v12 = vld [vmem:[%s14092_s3] ss:$0 sm:$0xff] }
 0x67a   : > { %6884 = vst.msk [vmem:[%s12781_s21 + $0x17c] sm:$0xf] %vm6788_vm13, %v7514_v38  ;;  %7738 = vmatmul.mubr.msk.bf16.gmra.mrb[88].mxu0 %vm5211_vm12, %v5088_v63  ;;  %v3229_v54 = vpop.permute.xlu1 %3228  ;;  %v4706_v50 = vsel %vm4610_vm9, %v4513_v15, %v16119_v45  ;;  %v4704_v16 = vsel %vm4610_vm9, %v4511_v22, %v16120_v37 }
 0x67b   : > { %6820 = vst.msk [vmem:[%s12781_s21 + $0x7c] sm:$0xf] %vm6788_vm13, %v7450_v14  ;;  %v4802_v41 = vsel %vm4610_vm9, %v4609_v24, %v3229_v54 }
 0x67c   : > { %v3227_v59 = vpop.permute.xlu0 %3226 }
 0x67d   : > { %v4800_v19 = vsel %vm4610_vm9, %v4607_v57, %v3227_v59 }
 0x67e   : > { %v3443_v47 = vpop.permute.xlu1 %3442 }
 0x67f   : > { %v4993_v38 = vsel %vm4803_vm10, %v4800_v19, %v3443_v47 }
 0x680   : > { %v3347_v36 = vpop.permute.xlu0 %3346 }
 0x681   : > { %v4897_v9 = vsel %vm4803_vm10, %v4704_v16, %v3347_v36 }
 0x682   : > { %v3445_v58 = vpop.permute.xlu1 %3444 }
 0x683   : > { %v7795_v49 = vpop.f32.mrb[48].mxu1  ;;  %v4995_v10 = vsel %vm4803_vm10, %v4802_v41, %v3445_v58 }
 0x684   : > { %v3349_v30 = vpop.permute.xlu0 %3348  ;;  %v5982_v52 = vadd.f32 %v13377_v39, %v7795_v49  ;;  %v5973_v35 = vpop.f32.mrb[49].mxu1 }
 0x685   : > { %v7699_v25 = vpop.f32.mrb[48].mxu0  ;;  %v5974_v14 = vadd.f32 %v13377_v39, %v5973_v35  ;;  %v7796_v63 = vpop.f32.mrb[50].mxu1  ;;  %v4899_v40 = vsel %vm4803_vm10, %v4706_v50, %v3349_v30 }
 0x686   : > { %v5630_v31 = vadd.f32 %v13377_v39, %v7699_v25  ;;  %v6246_v59 = vmax.f32 %v5982_v52, 0.0  ;;  %v5621_v0 = vpop.f32.mrb[49].mxu0  ;;  %v5985_v18 = vadd.f32 %v13377_v39, %v7796_v63  ;;  %v3642_v6 = vpop.permute.xlu1 %3641 }
 0x687   : > { %v5622_v28 = vadd.f32 %v13377_v39, %v5621_v0  ;;  %v6244_v54 = vmax.f32 %v5974_v14, 0.0  ;;  %v7700_v47 = vpop.f32.mrb[50].mxu0  ;;  %v5186_v43 = vsel %vm4996_vm11, %v4993_v38, %v3642_v6  ;;  %v5976_v1 = vpop.f32.mrb[51].mxu1 }
 0x688   : > { %v6182_v7 = vmax.f32 %v5630_v31, 0.0  ;;  %v7517_v55 = vpack.c.bf16 %v6246_v59, %v6246_v59  ;;  %v5633_v11 = vadd.f32 %v13377_v39, %v7700_v47  ;;  %v6247_v27 = vmax.f32 %v5985_v18, 0.0  ;;  %v5624_v29 = vpop.f32.mrb[51].mxu0  ;;  %v3546_v20 = vpop.permute.xlu0 %3545  ;;  %7837 = vmatprep.mubr.msk.bf16.mxu1 %vm5211_vm12, %v5186_v43 }
 0x689   : > { %v6180_v48 = vmax.f32 %v5622_v28, 0.0  ;;  %v7515_v8 = vpack.c.bf16 %v6244_v54, %v6244_v54  ;;  %v5625_v32 = vadd.f32 %v13377_v39, %v5624_v29  ;;  %v5977_v36 = vadd.f32 %v13377_v39, %v5976_v1 }
 0x68a   : > { %v7453_v61 = vpack.c.bf16 %v6182_v7, %v6182_v7  ;;  %6887 = vst.msk [vmem:[%s12781_s21 + $0x188] sm:$0xf] %vm6788_vm13, %v7517_v55  ;;  %v6183_v46 = vmax.f32 %v5633_v11, 0.0  ;;  %v7518_v60 = vpack.c.bf16 %v6247_v27, %v6247_v27  ;;  %v5090_v17 = vsel %vm4996_vm11, %v4897_v9, %v3546_v20  ;;  %v3644_v34 = vpop.permute.xlu1 %3643 }
 0x68b   : > { %v7451_v5 = vpack.c.bf16 %v6180_v48, %v6180_v48  ;;  %6885 = vst.msk [vmem:[%s12781_s21 + $0x180] sm:$0xf] %vm6788_vm13, %v7515_v8  ;;  %v6181_v13 = vmax.f32 %v5625_v32, 0.0  ;;  %v6245_v4 = vmax.f32 %v5977_v36, 0.0  ;;  %7741 = vmatprep.mubr.msk.bf16.mxu0 %vm5211_vm12, %v5090_v17  ;;  %v5188_v39 = vsel %vm4996_vm11, %v4995_v10, %v3644_v34 }
 0x68c   : > { %6823 = vst.msk [vmem:[%s12781_s21 + $0x88] sm:$0xf] %vm6788_vm13, %v7453_v61  ;;  %v7454_v33 = vpack.c.bf16 %v6183_v46, %v6183_v46  ;;  %6888 = vst.msk [vmem:[%s12781_s21 + $0x18c] sm:$0xf] %vm6788_vm13, %v7518_v60  ;;  %v3548_v53 = vpop.permute.xlu0 %3547  ;;  %7838 = vmatmul.mubr.msk.bf16.gmra.mrb[92].mxu1 %vm5211_vm12, %v5188_v39 }
 0x68d   : > { %6821 = vst.msk [vmem:[%s12781_s21 + $0x80] sm:$0xf] %vm6788_vm13, %v7451_v5  ;;  %v7452_v21 = vpack.c.bf16 %v6181_v13, %v6181_v13  ;;  %v7516_v2 = vpack.c.bf16 %v6245_v4, %v6245_v4  ;;  %v5092_v44 = vsel %vm4996_vm11, %v4899_v40, %v3548_v53 }
 0x68e   : > { %6824 = vst.msk [vmem:[%s12781_s21 + $0x8c] sm:$0xf] %vm6788_vm13, %v7454_v33  ;;  %7742 = vmatmul.mubr.msk.bf16.gmra.mrb[92].mxu0 %vm5211_vm12, %v5092_v44 }
 0x68f   : > { %6822 = vst.msk [vmem:[%s12781_s21 + $0x84] sm:$0xf] %vm6788_vm13, %v7452_v21  ;;  %6886 = vst.msk [vmem:[%s12781_s21 + $0x184] sm:$0xf] %vm6788_vm13, %v7516_v2 }
 0x697   : > { %v7799_v3 = vpop.f32.mrb[52].mxu1 }
 0x698   : > { %v5996_v58 = vadd.f32 %v13910_v12, %v7799_v3  ;;  %v5989_v62 = vpop.f32.mrb[53].mxu1  ;;  %v7703_v56 = vpop.f32.mrb[52].mxu0 }
 0x699   : > { %v7800_v51 = vpop.f32.mrb[54].mxu1  ;;  %v5644_v15 = vadd.f32 %v13910_v12, %v7703_v56  ;;  %v5637_v22 = vpop.f32.mrb[53].mxu0 }
 0x69a   : > { %v6248_v42 = vmax.f32 %v5996_v58, 0.0  ;;  %v5999_v23 = vadd.f32 %v13910_v12, %v7800_v51  ;;  %v5991_v57 = vpop.f32.mrb[55].mxu1  ;;  %v7704_v49 = vpop.f32.mrb[54].mxu0 }
 0x69b   : > { %v6184_v26 = vmax.f32 %v5644_v15, 0.0  ;;  %v5647_v45 = vadd.f32 %v13910_v12, %v7704_v49  ;;  %v5639_v19 = vpop.f32.mrb[55].mxu0 }
 0x69c   : > { %v7519_v24 = vpack.c.bf16 %v6248_v42, %v6248_v42  ;;  %v6249_v50 = vmax.f32 %v5999_v23, 0.0 }
 0x69d   : > { %v7455_v30 = vpack.c.bf16 %v6184_v26, %v6184_v26  ;;  %v6185_v52 = vmax.f32 %v5647_v45, 0.0 }
 0x69e   : > { %6889 = vst.msk [vmem:[%s12781_s21 + $0x190] sm:$0xf] %vm6788_vm13, %v7519_v24  ;;  %v7520_v35 = vpack.c.bf16 %v6249_v50, %v6249_v50 }
 0x69f   : > { %6825 = vst.msk [vmem:[%s12781_s21 + $0x90] sm:$0xf] %vm6788_vm13, %v7455_v30  ;;  %v7456_v37 = vpack.c.bf16 %v6185_v52, %v6185_v52 }
 0x6a0   : > { %6890 = vst.msk [vmem:[%s12781_s21 + $0x194] sm:$0xf] %vm6788_vm13, %v7520_v35 }
 0x6a1   : > { %6826 = vst.msk [vmem:[%s12781_s21 + $0x94] sm:$0xf] %vm6788_vm13, %v7456_v37 }
 0x6ab   : > { %v7803_v16 = vpop.f32.mrb[56].mxu1 }
 0x6ac   : > { %v6003_v41 = vpop.f32.mrb[57].mxu1 }
 0x6ad   : > { %v7707_v38 = vpop.f32.mrb[56].mxu0  ;;  %v6004_v25 = vadd.f32 %v13910_v12, %v6003_v41  ;;  %v7804_v14 = vpop.f32.mrb[58].mxu1 }
 0x6ae   : > { %v5651_v63 = vpop.f32.mrb[57].mxu0  ;;  %v6006_v9 = vpop.f32.mrb[59].mxu1 }
 0x6af   : > { %v5652_v31 = vadd.f32 %v13910_v12, %v5651_v63  ;;  %v6250_v59 = vmax.f32 %v6004_v25, 0.0  ;;  %v7708_v0 = vpop.f32.mrb[58].mxu0  ;;  %v6007_v18 = vadd.f32 %v13910_v12, %v6006_v9 }
 0x6b0   : > { %v5654_v6 = vpop.f32.mrb[59].mxu0 }
 0x6b1   : > { %v6186_v10 = vmax.f32 %v5652_v31, 0.0  ;;  %v7521_v28 = vpack.c.bf16 %v6250_v59, %v6250_v59  ;;  %v5655_v54 = vadd.f32 %v13910_v12, %v5654_v6  ;;  %v6251_v47 = vmax.f32 %v6007_v18, 0.0 }
 0x6b3   : > { %v7457_v43 = vpack.c.bf16 %v6186_v10, %v6186_v10  ;;  %6891 = vst.msk [vmem:[%s12781_s21 + $0x198] sm:$0xf] %vm6788_vm13, %v7521_v28  ;;  %v6187_v1 = vmax.f32 %v5655_v54, 0.0  ;;  %v7522_v7 = vpack.c.bf16 %v6251_v47, %v6251_v47 }
 0x6b5   : > { %6827 = vst.msk [vmem:[%s12781_s21 + $0x98] sm:$0xf] %vm6788_vm13, %v7457_v43  ;;  %v7458_v55 = vpack.c.bf16 %v6187_v1, %v6187_v1  ;;  %6892 = vst.msk [vmem:[%s12781_s21 + $0x19c] sm:$0xf] %vm6788_vm13, %v7522_v7 }
 0x6b7   : > { %6828 = vst.msk [vmem:[%s12781_s21 + $0x9c] sm:$0xf] %vm6788_vm13, %v7458_v55 }
 0x6bf   : > { %v7807_v11 = vpop.f32.mrb[60].mxu1 }
 0x6c0   : > { %v6026_v27 = vadd.f32 %v13910_v12, %v7807_v11  ;;  %v6017_v29 = vpop.f32.mrb[61].mxu1 }
 0x6c1   : > { %v7711_v20 = vpop.f32.mrb[60].mxu0  ;;  %v6018_v48 = vadd.f32 %v13910_v12, %v6017_v29  ;;  %v7808_v8 = vpop.f32.mrb[62].mxu1 }
 0x6c2   : > { %v5674_v32 = vadd.f32 %v13910_v12, %v7711_v20  ;;  %v6254_v36 = vmax.f32 %v6026_v27, 0.0  ;;  %v5665_v61 = vpop.f32.mrb[61].mxu0  ;;  %v6029_v46 = vadd.f32 %v13910_v12, %v7808_v8  ;;  %v6020_v60 = vpop.f32.mrb[63].mxu1 }
 0x6c3   : > { %v5666_v17 = vadd.f32 %v13910_v12, %v5665_v61  ;;  %v6252_v34 = vmax.f32 %v6018_v48, 0.0  ;;  %v7712_v5 = vpop.f32.mrb[62].mxu0  ;;  %v6021_v13 = vadd.f32 %v13910_v12, %v6020_v60 }
 0x6c4   : > { %v6190_v4 = vmax.f32 %v5674_v32, 0.0  ;;  %v7525_v39 = vpack.c.bf16 %v6254_v36, %v6254_v36  ;;  %v5677_v40 = vadd.f32 %v13910_v12, %v7712_v5  ;;  %v6255_v33 = vmax.f32 %v6029_v46, 0.0  ;;  %v5668_v53 = vpop.f32.mrb[63].mxu0 }
 0x6c5   : > { %v6188_v21 = vmax.f32 %v5666_v17, 0.0  ;;  %v7523_v2 = vpack.c.bf16 %v6252_v34, %v6252_v34  ;;  %v5669_v44 = vadd.f32 %v13910_v12, %v5668_v53  ;;  %v6253_v3 = vmax.f32 %v6021_v13, 0.0 }
 0x6c6   : > { %v7461_v58 = vpack.c.bf16 %v6190_v4, %v6190_v4  ;;  %6895 = vst.msk [vmem:[%s12781_s21 + $0x1a8] sm:$0xf] %vm6788_vm13, %v7525_v39  ;;  %v6191_v62 = vmax.f32 %v5677_v40, 0.0  ;;  %v7526_v56 = vpack.c.bf16 %v6255_v33, %v6255_v33 }
 0x6c7   : > { %v7459_v51 = vpack.c.bf16 %v6188_v21, %v6188_v21  ;;  %6893 = vst.msk [vmem:[%s12781_s21 + $0x1a0] sm:$0xf] %vm6788_vm13, %v7523_v2  ;;  %v6189_v15 = vmax.f32 %v5669_v44, 0.0  ;;  %v7524_v42 = vpack.c.bf16 %v6253_v3, %v6253_v3 }
 0x6c8   : > { %6831 = vst.msk [vmem:[%s12781_s21 + $0xa8] sm:$0xf] %vm6788_vm13, %v7461_v58  ;;  %v7462_v22 = vpack.c.bf16 %v6191_v62, %v6191_v62  ;;  %6896 = vst.msk [vmem:[%s12781_s21 + $0x1ac] sm:$0xf] %vm6788_vm13, %v7526_v56 }
 0x6c9   : > { %6829 = vst.msk [vmem:[%s12781_s21 + $0xa0] sm:$0xf] %vm6788_vm13, %v7459_v51  ;;  %v7460_v23 = vpack.c.bf16 %v6189_v15, %v6189_v15  ;;  %6894 = vst.msk [vmem:[%s12781_s21 + $0x1a4] sm:$0xf] %vm6788_vm13, %v7524_v42 }
 0x6ca   : > { %6832 = vst.msk [vmem:[%s12781_s21 + $0xac] sm:$0xf] %vm6788_vm13, %v7462_v22 }
 0x6cb   : > { %6830 = vst.msk [vmem:[%s12781_s21 + $0xa4] sm:$0xf] %vm6788_vm13, %v7460_v23 }
 0x6d3   : > { %v7811_v57 = vpop.f32.mrb[64].mxu1 }
 0x6d4   : > { %v6040_v49 = vadd.f32 %v13910_v12, %v7811_v57  ;;  %v6033_v26 = vpop.f32.mrb[65].mxu1 }
 0x6d5   : > { %v7715_v24 = vpop.f32.mrb[64].mxu0  ;;  %v7812_v45 = vpop.f32.mrb[66].mxu1 }
 0x6d6   : > { %v5688_v50 = vadd.f32 %v13910_v12, %v7715_v24  ;;  %v6256_v19 = vmax.f32 %v6040_v49, 0.0  ;;  %v5681_v30 = vpop.f32.mrb[65].mxu0  ;;  %v6043_v52 = vadd.f32 %v13910_v12, %v7812_v45  ;;  %v6035_v35 = vpop.f32.mrb[67].mxu1 }
 0x6d7   : > { %v7716_v37 = vpop.f32.mrb[66].mxu0 }
 0x6d8   : > { %v6192_v16 = vmax.f32 %v5688_v50, 0.0  ;;  %v7527_v41 = vpack.c.bf16 %v6256_v19, %v6256_v19  ;;  %v5691_v38 = vadd.f32 %v13910_v12, %v7716_v37  ;;  %v6257_v25 = vmax.f32 %v6043_v52, 0.0  ;;  %v5683_v14 = vpop.f32.mrb[67].mxu0 }
 0x6da   : > { %v7463_v63 = vpack.c.bf16 %v6192_v16, %v6192_v16  ;;  %6897 = vst.msk [vmem:[%s12781_s21 + $0x1b0] sm:$0xf] %vm6788_vm13, %v7527_v41  ;;  %v6193_v9 = vmax.f32 %v5691_v38, 0.0  ;;  %v7528_v31 = vpack.c.bf16 %v6257_v25, %v6257_v25 }
 0x6dc   : > { %6833 = vst.msk [vmem:[%s12781_s21 + $0xb0] sm:$0xf] %vm6788_vm13, %v7463_v63  ;;  %v7464_v59 = vpack.c.bf16 %v6193_v9, %v6193_v9  ;;  %6898 = vst.msk [vmem:[%s12781_s21 + $0x1b4] sm:$0xf] %vm6788_vm13, %v7528_v31 }
 0x6de   : > { %6834 = vst.msk [vmem:[%s12781_s21 + $0xb4] sm:$0xf] %vm6788_vm13, %v7464_v59 }
 0x6e7   : > { %v7815_v0 = vpop.f32.mrb[68].mxu1 }
 0x6e8   : > { %v6047_v18 = vpop.f32.mrb[69].mxu1 }
 0x6e9   : > { %v7719_v6 = vpop.f32.mrb[68].mxu0  ;;  %v6048_v10 = vadd.f32 %v13910_v12, %v6047_v18  ;;  %v7816_v28 = vpop.f32.mrb[70].mxu1 }
 0x6ea   : > { %v5695_v54 = vpop.f32.mrb[69].mxu0  ;;  %v6050_v47 = vpop.f32.mrb[71].mxu1 }
 0x6eb   : > { %v5696_v43 = vadd.f32 %v13910_v12, %v5695_v54  ;;  %v6258_v1 = vmax.f32 %v6048_v10, 0.0  ;;  %v7720_v7 = vpop.f32.mrb[70].mxu0  ;;  %v6051_v55 = vadd.f32 %v13910_v12, %v6050_v47 }
 0x6ec   : > { %v5698_v11 = vpop.f32.mrb[71].mxu0 }
 0x6ed   : > { %v6194_v27 = vmax.f32 %v5696_v43, 0.0  ;;  %v7529_v29 = vpack.c.bf16 %v6258_v1, %v6258_v1  ;;  %v5699_v20 = vadd.f32 %v13910_v12, %v5698_v11  ;;  %v6259_v48 = vmax.f32 %v6051_v55, 0.0 }
 0x6ef   : > { %v7465_v8 = vpack.c.bf16 %v6194_v27, %v6194_v27  ;;  %6899 = vst.msk [vmem:[%s12781_s21 + $0x1b8] sm:$0xf] %vm6788_vm13, %v7529_v29  ;;  %v6195_v32 = vmax.f32 %v5699_v20, 0.0  ;;  %v7530_v36 = vpack.c.bf16 %v6259_v48, %v6259_v48 }
 0x6f1   : > { %6835 = vst.msk [vmem:[%s12781_s21 + $0xb8] sm:$0xf] %vm6788_vm13, %v7465_v8  ;;  %v7466_v61 = vpack.c.bf16 %v6195_v32, %v6195_v32  ;;  %6900 = vst.msk [vmem:[%s12781_s21 + $0x1bc] sm:$0xf] %vm6788_vm13, %v7530_v36 }
 0x6f3   : > { %6836 = vst.msk [vmem:[%s12781_s21 + $0xbc] sm:$0xf] %vm6788_vm13, %v7466_v61 }
 0x6fb   : > { %v7819_v46 = vpop.f32.mrb[72].mxu1 }
 0x6fc   : > { %v6070_v60 = vadd.f32 %v13910_v12, %v7819_v46  ;;  %v6061_v17 = vpop.f32.mrb[73].mxu1 }
 0x6fd   : > { %v7723_v34 = vpop.f32.mrb[72].mxu0  ;;  %v6062_v5 = vadd.f32 %v13910_v12, %v6061_v17  ;;  %v7820_v13 = vpop.f32.mrb[74].mxu1 }
 0x6fe   : > { %v5718_v4 = vadd.f32 %v13910_v12, %v7723_v34  ;;  %v6262_v39 = vmax.f32 %v6070_v60, 0.0  ;;  %v5709_v40 = vpop.f32.mrb[73].mxu0  ;;  %v6073_v33 = vadd.f32 %v13910_v12, %v7820_v13  ;;  %v6064_v53 = vpop.f32.mrb[75].mxu1 }
 0x6ff   : > { %v5710_v21 = vadd.f32 %v13910_v12, %v5709_v40  ;;  %v6260_v2 = vmax.f32 %v6062_v5, 0.0  ;;  %v7724_v44 = vpop.f32.mrb[74].mxu0  ;;  %v6065_v3 = vadd.f32 %v13910_v12, %v6064_v53 }
 0x700   : > { %v6198_v58 = vmax.f32 %v5718_v4, 0.0  ;;  %v7533_v62 = vpack.c.bf16 %v6262_v39, %v6262_v39  ;;  %v5721_v56 = vadd.f32 %v13910_v12, %v7724_v44  ;;  %v6263_v51 = vmax.f32 %v6073_v33, 0.0  ;;  %v5712_v15 = vpop.f32.mrb[75].mxu0 }
 0x701   : > { %v6196_v42 = vmax.f32 %v5710_v21, 0.0  ;;  %v7531_v22 = vpack.c.bf16 %v6260_v2, %v6260_v2  ;;  %v5713_v23 = vadd.f32 %v13910_v12, %v5712_v15  ;;  %v6261_v57 = vmax.f32 %v6065_v3, 0.0 }
 0x702   : > { %v7469_v49 = vpack.c.bf16 %v6198_v58, %v6198_v58  ;;  %6903 = vst.msk [vmem:[%s12781_s21 + $0x1c8] sm:$0xf] %vm6788_vm13, %v7533_v62  ;;  %v6199_v26 = vmax.f32 %v5721_v56, 0.0  ;;  %v7534_v24 = vpack.c.bf16 %v6263_v51, %v6263_v51 }
 0x703   : > { %v7467_v45 = vpack.c.bf16 %v6196_v42, %v6196_v42  ;;  %6901 = vst.msk [vmem:[%s12781_s21 + $0x1c0] sm:$0xf] %vm6788_vm13, %v7531_v22  ;;  %v6197_v50 = vmax.f32 %v5713_v23, 0.0  ;;  %v7532_v19 = vpack.c.bf16 %v6261_v57, %v6261_v57 }
 0x704   : > { %6839 = vst.msk [vmem:[%s12781_s21 + $0xc8] sm:$0xf] %vm6788_vm13, %v7469_v49  ;;  %v7470_v30 = vpack.c.bf16 %v6199_v26, %v6199_v26  ;;  %6904 = vst.msk [vmem:[%s12781_s21 + $0x1cc] sm:$0xf] %vm6788_vm13, %v7534_v24 }
 0x705   : > { %6837 = vst.msk [vmem:[%s12781_s21 + $0xc0] sm:$0xf] %vm6788_vm13, %v7467_v45  ;;  %v7468_v52 = vpack.c.bf16 %v6197_v50, %v6197_v50  ;;  %6902 = vst.msk [vmem:[%s12781_s21 + $0x1c4] sm:$0xf] %vm6788_vm13, %v7532_v19 }
 0x706   : > { %6840 = vst.msk [vmem:[%s12781_s21 + $0xcc] sm:$0xf] %vm6788_vm13, %v7470_v30 }
 0x707   : > { %6838 = vst.msk [vmem:[%s12781_s21 + $0xc4] sm:$0xf] %vm6788_vm13, %v7468_v52 }
 0x70f   : > { %v7823_v35 = vpop.f32.mrb[76].mxu1 }
 0x710   : > { %v6084_v37 = vadd.f32 %v13910_v12, %v7823_v35  ;;  %v6077_v16 = vpop.f32.mrb[77].mxu1 }
 0x711   : > { %v7727_v41 = vpop.f32.mrb[76].mxu0  ;;  %v7824_v38 = vpop.f32.mrb[78].mxu1 }
 0x712   : > { %v5732_v25 = vadd.f32 %v13910_v12, %v7727_v41  ;;  %v6264_v14 = vmax.f32 %v6084_v37, 0.0  ;;  %v5725_v63 = vpop.f32.mrb[77].mxu0  ;;  %v6087_v9 = vadd.f32 %v13910_v12, %v7824_v38  ;;  %v6079_v31 = vpop.f32.mrb[79].mxu1 }
 0x713   : > { %v7728_v59 = vpop.f32.mrb[78].mxu0 }
 0x714   : > { %v6200_v0 = vmax.f32 %v5732_v25, 0.0  ;;  %v7535_v18 = vpack.c.bf16 %v6264_v14, %v6264_v14  ;;  %v5735_v6 = vadd.f32 %v13910_v12, %v7728_v59  ;;  %v6265_v10 = vmax.f32 %v6087_v9, 0.0  ;;  %v5727_v28 = vpop.f32.mrb[79].mxu0 }
 0x716   : > { %v7471_v54 = vpack.c.bf16 %v6200_v0, %v6200_v0  ;;  %6905 = vst.msk [vmem:[%s12781_s21 + $0x1d0] sm:$0xf] %vm6788_vm13, %v7535_v18  ;;  %v6201_v47 = vmax.f32 %v5735_v6, 0.0  ;;  %v7536_v43 = vpack.c.bf16 %v6265_v10, %v6265_v10 }
 0x718   : > { %6841 = vst.msk [vmem:[%s12781_s21 + $0xd0] sm:$0xf] %vm6788_vm13, %v7471_v54  ;;  %v7472_v1 = vpack.c.bf16 %v6201_v47, %v6201_v47  ;;  %6906 = vst.msk [vmem:[%s12781_s21 + $0x1d4] sm:$0xf] %vm6788_vm13, %v7536_v43 }
 0x71a   : > { %6842 = vst.msk [vmem:[%s12781_s21 + $0xd4] sm:$0xf] %vm6788_vm13, %v7472_v1 }
 0x723   : > { %v7827_v7 = vpop.f32.mrb[80].mxu1 }
 0x724   : > { %v6091_v55 = vpop.f32.mrb[81].mxu1 }
 0x725   : > { %v7731_v11 = vpop.f32.mrb[80].mxu0  ;;  %v6092_v27 = vadd.f32 %v13910_v12, %v6091_v55  ;;  %v7828_v29 = vpop.f32.mrb[82].mxu1 }
 0x726   : > { %v5739_v20 = vpop.f32.mrb[81].mxu0  ;;  %v6094_v48 = vpop.f32.mrb[83].mxu1 }
 0x727   : > { %v5740_v8 = vadd.f32 %v13910_v12, %v5739_v20  ;;  %v6266_v32 = vmax.f32 %v6092_v27, 0.0  ;;  %v7732_v36 = vpop.f32.mrb[82].mxu0  ;;  %v6095_v61 = vadd.f32 %v13910_v12, %v6094_v48 }
 0x728   : > { %v5742_v46 = vpop.f32.mrb[83].mxu0 }
 0x729   : > { %v6202_v60 = vmax.f32 %v5740_v8, 0.0  ;;  %v7537_v17 = vpack.c.bf16 %v6266_v32, %v6266_v32  ;;  %v5743_v34 = vadd.f32 %v13910_v12, %v5742_v46  ;;  %v6267_v5 = vmax.f32 %v6095_v61, 0.0 }
 0x72b   : > { %v7473_v13 = vpack.c.bf16 %v6202_v60, %v6202_v60  ;;  %6907 = vst.msk [vmem:[%s12781_s21 + $0x1d8] sm:$0xf] %vm6788_vm13, %v7537_v17  ;;  %v6203_v4 = vmax.f32 %v5743_v34, 0.0  ;;  %v7538_v39 = vpack.c.bf16 %v6267_v5, %v6267_v5 }
 0x72d   : > { %6843 = vst.msk [vmem:[%s12781_s21 + $0xd8] sm:$0xf] %vm6788_vm13, %v7473_v13  ;;  %v7474_v40 = vpack.c.bf16 %v6203_v4, %v6203_v4  ;;  %6908 = vst.msk [vmem:[%s12781_s21 + $0x1dc] sm:$0xf] %vm6788_vm13, %v7538_v39 }
 0x72f   : > { %6844 = vst.msk [vmem:[%s12781_s21 + $0xdc] sm:$0xf] %vm6788_vm13, %v7474_v40 }
 0x737   : > { %v7831_v33 = vpop.f32.mrb[84].mxu1 }
 0x738   : > { %v6114_v53 = vadd.f32 %v13910_v12, %v7831_v33  ;;  %v6105_v21 = vpop.f32.mrb[85].mxu1 }
 0x739   : > { %v7735_v2 = vpop.f32.mrb[84].mxu0  ;;  %v6106_v44 = vadd.f32 %v13910_v12, %v6105_v21  ;;  %v7832_v3 = vpop.f32.mrb[86].mxu1 }
 0x73a   : > { %v5762_v58 = vadd.f32 %v13910_v12, %v7735_v2  ;;  %v6270_v62 = vmax.f32 %v6114_v53, 0.0  ;;  %v5753_v56 = vpop.f32.mrb[85].mxu0  ;;  %v6117_v51 = vadd.f32 %v13910_v12, %v7832_v3  ;;  %v6108_v15 = vpop.f32.mrb[87].mxu1 }
 0x73b   : > { %v5754_v42 = vadd.f32 %v13910_v12, %v5753_v56  ;;  %v6268_v22 = vmax.f32 %v6106_v44, 0.0  ;;  %v7736_v23 = vpop.f32.mrb[86].mxu0  ;;  %v6109_v57 = vadd.f32 %v13910_v12, %v6108_v15 }
 0x73c   : > { %v6206_v49 = vmax.f32 %v5762_v58, 0.0  ;;  %v7541_v26 = vpack.c.bf16 %v6270_v62, %v6270_v62  ;;  %v5765_v24 = vadd.f32 %v13910_v12, %v7736_v23  ;;  %v6271_v45 = vmax.f32 %v6117_v51, 0.0  ;;  %v5756_v50 = vpop.f32.mrb[87].mxu0 }
 0x73d   : > { %v6204_v19 = vmax.f32 %v5754_v42, 0.0  ;;  %v7539_v30 = vpack.c.bf16 %v6268_v22, %v6268_v22  ;;  %v5757_v52 = vadd.f32 %v13910_v12, %v5756_v50  ;;  %v6269_v35 = vmax.f32 %v6109_v57, 0.0 }
 0x73e   : > { %v7477_v37 = vpack.c.bf16 %v6206_v49, %v6206_v49  ;;  %6911 = vst.msk [vmem:[%s12781_s21 + $0x1e8] sm:$0xf] %vm6788_vm13, %v7541_v26  ;;  %v6207_v16 = vmax.f32 %v5765_v24, 0.0  ;;  %v7542_v41 = vpack.c.bf16 %v6271_v45, %v6271_v45 }
 0x73f   : > { %v7475_v38 = vpack.c.bf16 %v6204_v19, %v6204_v19  ;;  %6909 = vst.msk [vmem:[%s12781_s21 + $0x1e0] sm:$0xf] %vm6788_vm13, %v7539_v30  ;;  %v6205_v25 = vmax.f32 %v5757_v52, 0.0  ;;  %v7540_v14 = vpack.c.bf16 %v6269_v35, %v6269_v35 }
 0x740   : > { %6847 = vst.msk [vmem:[%s12781_s21 + $0xe8] sm:$0xf] %vm6788_vm13, %v7477_v37  ;;  %v7478_v63 = vpack.c.bf16 %v6207_v16, %v6207_v16  ;;  %6912 = vst.msk [vmem:[%s12781_s21 + $0x1ec] sm:$0xf] %vm6788_vm13, %v7542_v41 }
 0x741   : > { %6845 = vst.msk [vmem:[%s12781_s21 + $0xe0] sm:$0xf] %vm6788_vm13, %v7475_v38  ;;  %v7476_v9 = vpack.c.bf16 %v6205_v25, %v6205_v25  ;;  %6910 = vst.msk [vmem:[%s12781_s21 + $0x1e4] sm:$0xf] %vm6788_vm13, %v7540_v14 }
 0x742   : > { %6848 = vst.msk [vmem:[%s12781_s21 + $0xec] sm:$0xf] %vm6788_vm13, %v7478_v63 }
 0x743   : > { %6846 = vst.msk [vmem:[%s12781_s21 + $0xe4] sm:$0xf] %vm6788_vm13, %v7476_v9 }
 0x74b   : > { %v7835_v31 = vpop.f32.mrb[88].mxu1 }
 0x74c   : > { %v6128_v59 = vadd.f32 %v13910_v12, %v7835_v31  ;;  %v6121_v0 = vpop.f32.mrb[89].mxu1 }
 0x74d   : > { %v7739_v18 = vpop.f32.mrb[88].mxu0  ;;  %v7836_v6 = vpop.f32.mrb[90].mxu1 }
 0x74e   : > { %v5776_v10 = vadd.f32 %v13910_v12, %v7739_v18  ;;  %v6272_v28 = vmax.f32 %v6128_v59, 0.0  ;;  %v5769_v54 = vpop.f32.mrb[89].mxu0  ;;  %v6131_v47 = vadd.f32 %v13910_v12, %v7836_v6  ;;  %v6123_v43 = vpop.f32.mrb[91].mxu1 }
 0x74f   : > { %v7740_v1 = vpop.f32.mrb[90].mxu0 }
 0x750   : > { %v6208_v7 = vmax.f32 %v5776_v10, 0.0  ;;  %v7543_v55 = vpack.c.bf16 %v6272_v28, %v6272_v28  ;;  %v5779_v11 = vadd.f32 %v13910_v12, %v7740_v1  ;;  %v6273_v27 = vmax.f32 %v6131_v47, 0.0  ;;  %v5771_v29 = vpop.f32.mrb[91].mxu0 }
 0x752   : > { %v7479_v20 = vpack.c.bf16 %v6208_v7, %v6208_v7  ;;  %6913 = vst.msk [vmem:[%s12781_s21 + $0x1f0] sm:$0xf] %vm6788_vm13, %v7543_v55  ;;  %v6209_v48 = vmax.f32 %v5779_v11, 0.0  ;;  %v7544_v8 = vpack.c.bf16 %v6273_v27, %v6273_v27 }
 0x754   : > { %6849 = vst.msk [vmem:[%s12781_s21 + $0xf0] sm:$0xf] %vm6788_vm13, %v7479_v20  ;;  %v7480_v32 = vpack.c.bf16 %v6209_v48, %v6209_v48  ;;  %6914 = vst.msk [vmem:[%s12781_s21 + $0x1f4] sm:$0xf] %vm6788_vm13, %v7544_v8 }
 0x756   : > { %6850 = vst.msk [vmem:[%s12781_s21 + $0xf4] sm:$0xf] %vm6788_vm13, %v7480_v32 }
 0x75f   : > { %v7839_v36 = vpop.f32.mrb[92].mxu1 }
 0x760   : > { %v6135_v61 = vpop.f32.mrb[93].mxu1 }
 0x761   : > { %v7743_v46 = vpop.f32.mrb[92].mxu0  ;;  %v6136_v60 = vadd.f32 %v13910_v12, %v6135_v61  ;;  %v7840_v17 = vpop.f32.mrb[94].mxu1 }
 0x762   : > { %v5783_v34 = vpop.f32.mrb[93].mxu0  ;;  %v6138_v5 = vpop.f32.mrb[95].mxu1 }
 0x763   : > { %v5784_v13 = vadd.f32 %v13910_v12, %v5783_v34  ;;  %v6274_v4 = vmax.f32 %v6136_v60, 0.0  ;;  %v7744_v39 = vpop.f32.mrb[94].mxu0  ;;  %v6139_v40 = vadd.f32 %v13910_v12, %v6138_v5 }
 0x764   : > { %v5786_v33 = vpop.f32.mrb[95].mxu0 }
 0x765   : > { %v6210_v53 = vmax.f32 %v5784_v13, 0.0  ;;  %v7545_v21 = vpack.c.bf16 %v6274_v4, %v6274_v4  ;;  %v5787_v2 = vadd.f32 %v13910_v12, %v5786_v33  ;;  %v6275_v44 = vmax.f32 %v6139_v40, 0.0 }
 0x767   : > { %v7481_v3 = vpack.c.bf16 %v6210_v53, %v6210_v53  ;;  %6915 = vst.msk [vmem:[%s12781_s21 + $0x1f8] sm:$0xf] %vm6788_vm13, %v7545_v21  ;;  %v6211_v58 = vmax.f32 %v5787_v2, 0.0  ;;  %v7546_v62 = vpack.c.bf16 %v6275_v44, %v6275_v44 }
 0x769   : > { %6851 = vst.msk [vmem:[%s12781_s21 + $0xf8] sm:$0xf] %vm6788_vm13, %v7481_v3  ;;  %v7482_v56 = vpack.c.bf16 %v6211_v58, %v6211_v58  ;;  %6916 = vst.msk [vmem:[%s12781_s21 + $0x1fc] sm:$0xf] %vm6788_vm13, %v7546_v62 }
 0x76b   : > { %6852 = vst.msk [vmem:[%s12781_s21 + $0xfc] sm:$0xf] %vm6788_vm13, %v7482_v56 }
 0x76c PF: > { %s14_s17 = sadd.s32 1, %s8272_s17   ;;  %s16121_s15 = smov %s8268_s16 }
 0x76d   : > { %p11_p5 = scmp.ge.s32.totalorder %s14_s17, 4   ;;  %s16122_s16 = smov %s16124_s18 }
 0x76f   :  { %13 = sbr.rel (!%p11_p5) target bundleno = 2 (0x2), region = 75 }

</bundles_post_ra>
